<compile_context>
chip_gen: v7x
topology: tpu7x:2x2x1
jax: 0.10.0
libtpu: 0.0.40
codegen_flags: <defaults>
</compile_context>

<pallas_src>
import math

import jax
import jax.numpy as jnp
from jax.experimental import pallas as pl
from jax.experimental.pallas import tpu as pltpu

# ---- model hyper-parameters (consistent with the module; H*W must equal C) ----
IN_CHANNELS = 2
FEATURE_DIM = 64
NUM_HEADS = 4
HEIGHT = 1
WIDTH = 2            # H * W must equal IN_CHANNELS
RES_LAYERS = 6
BATCH = 2

SEQ = IN_CHANNELS                  # sequence length seen by the MHA blocks
ROWS = BATCH * SEQ                 # rows of the in-kernel activation (=4)
HEAD_DIM = FEATURE_DIM // NUM_HEADS

_LN_EPS = 1e-5
_BN_EPS = 1e-5


# --------------------------- in-kernel helpers -------------------------------
def _erf(x):
    # Abramowitz & Stegun 7.1.26 rational approximation (|err| < 1.5e-7),
    # built only from exp/abs/where so it lowers cleanly in Mosaic.
    a1, a2, a3, a4, a5 = 0.254829592, -0.284496736, 1.421413741, -1.453152027, 1.061405429
    p = 0.3275911
    ax = jnp.abs(x)
    t = 1.0 / (1.0 + p * ax)
    poly = t * (a1 + t * (a2 + t * (a3 + t * (a4 + t * a5))))
    y = 1.0 - poly * jnp.exp(-ax * ax)
    return jnp.where(x >= 0, y, -y)


def _gelu_exact(x):
    return 0.5 * x * (1.0 + _erf(x * 0.7071067811865476))


def _layernorm(x, w, b):
    m = jnp.mean(x, axis=-1, keepdims=True)
    c = x - m
    v = jnp.mean(c * c, axis=-1, keepdims=True)
    return c * jax.lax.rsqrt(v + _LN_EPS) * w + b


# ------------------------------- fused kernel --------------------------------
def fused_forward_kernel(
        x_ref, wfT_ref, bf_ref,
        ln1w_ref, ln1b_ref, wqkvT_ref, bqkv_ref, woT_ref, bo_ref,
        ln2w_ref, ln2b_ref, w1T_ref, b1_ref, w2T_ref, b2_ref,
        resA0_ref, resA1_ref, resA2_ref, resb_ref, resg_ref, resbeta_ref,
        eprev_ref, enext_ref, pair_ref, swap_ref, hsel_ref, hselT_ref,
        wpT_ref, bp_ref, o_ref):
    D = FEATURE_DIM
    scale = 1.0 / math.sqrt(HEAD_DIM)
    inv_bn = 1.0 / float(BATCH * D)          # BatchNorm1d stats over (B, L=D)

    # constant matrices (hoisted loads, reused by every block)
    e_prev = eprev_ref[...]    # (D, D): y @ e_prev -> y[:, l-1], zero at l=0
    e_next = enext_ref[...]    # (D, D): y @ e_next -> y[:, l+1], zero at l=D-1
    pair = pair_ref[...]       # (ROWS, ROWS): sums rows of the same conv channel
    swap = swap_ref[...]       # (ROWS, ROWS): swaps the two tokens of a batch
    hsel = hsel_ref[...]       # (D, H): per-head lane-group sum
    hselT = hselT_ref[...]     # (H, D): broadcast per-head scalar over its lanes

    def mha(h, blk):
        # Pre-LN MHA block over all B*S rows at once:
        #   h += MHA(LN1(h));  h += FFN(LN2(h))
        z = _layernorm(h, ln1w_ref[blk], ln1b_ref[blk])
        qkv = jnp.dot(z, wqkvT_ref[blk],
                      preferred_element_type=jnp.float32) + bqkv_ref[blk]   # (ROWS, 3D)
        q = qkv[:, 0:D] * scale
        k = qkv[:, D:2 * D]
        v = qkv[:, 2 * D:3 * D]
        # S == 2: each query attends to its own token and the other token.
        k_sw = jnp.dot(swap, k, preferred_element_type=jnp.float32)
        v_sw = jnp.dot(swap, v, preferred_element_type=jnp.float32)
        s_self = jnp.dot(q * k, hsel, preferred_element_type=jnp.float32)     # (ROWS, H)
        s_cross = jnp.dot(q * k_sw, hsel, preferred_element_type=jnp.float32) # (ROWS, H)
        m = jnp.maximum(s_self, s_cross)
        e_self = jnp.exp(s_self - m)
        e_cross = jnp.exp(s_cross - m)
        inv = pl.reciprocal(e_self + e_cross, approx=True)
        p_self = jnp.dot(e_self * inv, hselT, preferred_element_type=jnp.float32)   # (ROWS, D)
        p_cross = jnp.dot(e_cross * inv, hselT, preferred_element_type=jnp.float32)
        attn = p_self * v + p_cross * v_sw
        h = h + jnp.dot(attn, woT_ref[blk],
                        preferred_element_type=jnp.float32) + bo_ref[blk]

        z2 = _layernorm(h, ln2w_ref[blk], ln2b_ref[blk])
        f = jnp.dot(z2, w1T_ref[blk], preferred_element_type=jnp.float32) + b1_ref[blk]
        f = _gelu_exact(f)
        f = jnp.dot(f, w2T_ref[blk], preferred_element_type=jnp.float32) + b2_ref[blk]
        return h + f

    def res(h, rb):
        # ResidualBlock1DConv(2, 3, 6): conv taps as matmuls on the MXU,
        # BatchNorm1d in training mode (biased per-batch statistics), ReLU
        # between layers, residual add at the end.
        y = h
        for i in range(RES_LAYERS):
            li = rb * RES_LAYERS + i
            t0 = jnp.dot(resA0_ref[li], y, preferred_element_type=jnp.float32)  # tap l-1
            t1 = jnp.dot(resA1_ref[li], y, preferred_element_type=jnp.float32)  # tap l
            t2 = jnp.dot(resA2_ref[li], y, preferred_element_type=jnp.float32)  # tap l+1
            conv = (jnp.dot(t0, e_prev, preferred_element_type=jnp.float32)
                    + t1
                    + jnp.dot(t2, e_next, preferred_element_type=jnp.float32)
                    + resb_ref[li])                                              # (ROWS, D)
            mean = jnp.sum(jnp.dot(pair, conv, preferred_element_type=jnp.float32),
                           axis=-1, keepdims=True) * inv_bn                     # (ROWS, 1)
            d = conv - mean
            var = jnp.sum(jnp.dot(pair, d * d, preferred_element_type=jnp.float32),
                          axis=-1, keepdims=True) * inv_bn
            y = d * jax.lax.rsqrt(var + _BN_EPS) * resg_ref[li] + resbeta_ref[li]
            if i < RES_LAYERS - 1:
                y = jnp.maximum(y, 0.0)
        return h + y

    # feature linear:  (ROWS, C) @ (C, D)
    h = jnp.dot(x_ref[...], wfT_ref[...],
                preferred_element_type=jnp.float32) + bf_ref[...]
    h = res(h, 0)          # res1
    h = mha(h, 0)          # attn1
    h = mha(h, 1)          # attn2
    h = res(h, 0)          # res1 again (shared weights)
    h = mha(h, 2)          # attn3
    h = res(h, 1)          # res2
    h = mha(h, 3)          # attn4
    o_ref[...] = jnp.dot(h, wpT_ref[...],
                         preferred_element_type=jnp.float32) + bp_ref[...]


# ------------------------------ host wrappers ---------------------------------
_VMEM = pl.BlockSpec(memory_space=pltpu.MemorySpace.VMEM)


def pack_params(params):
    """One-time host-side packing: transposes, stacking, conv->matmul matrices."""
    D, C, B = FEATURE_DIM, IN_CHANNELS, BATCH
    rows = B * C

    wf, bf = params['feature']
    wp, bp = params['project']

    blocks = [params['attn1'], params['attn2'], params['attn3'], params['attn4']]

    def stack(f):
        return jnp.stack([f(p) for p in blocks])

    ln1w = stack(lambda p: p['ln1_w'].reshape(1, D))
    ln1b = stack(lambda p: p['ln1_b'].reshape(1, D))
    wqkvT = stack(lambda p: p['wqkv'].T)
    bqkv = stack(lambda p: p['bqkv'].reshape(1, 3 * D))
    woT = stack(lambda p: p['wo'].T)
    bo = stack(lambda p: p['bo'].reshape(1, D))
    ln2w = stack(lambda p: p['ln2_w'].reshape(1, D))
    ln2b = stack(lambda p: p['ln2_b'].reshape(1, D))
    w1T = stack(lambda p: p['w1'].T)
    b1 = stack(lambda p: p['b1'].reshape(1, D))
    w2T = stack(lambda p: p['w2'].T)
    b2 = stack(lambda p: p['b2'].reshape(1, D))

    # conv taps as block-diagonal (per batch) channel-mix matrices
    eye_b = jnp.eye(B, dtype=jnp.float32)
    a0, a1, a2, rb_, rg_, rbeta_ = [], [], [], [], [], []
    for p in (params['res1'], params['res2']):
        for i in range(RES_LAYERS):
            a0.append(jnp.kron(eye_b, p['w'][i, :, :, 0]))
            a1.append(jnp.kron(eye_b, p['w'][i, :, :, 1]))
            a2.append(jnp.kron(eye_b, p['w'][i, :, :, 2]))
            rb_.append(jnp.tile(p['b'][i], B).reshape(rows, 1))
            rg_.append(jnp.tile(p['g'][i], B).reshape(rows, 1))
            rbeta_.append(jnp.tile(p['beta'][i], B).reshape(rows, 1))
    resA0 = jnp.stack(a0)
    resA1 = jnp.stack(a1)
    resA2 = jnp.stack(a2)
    resb = jnp.stack(rb_)
    resg = jnp.stack(rg_)
    resbeta = jnp.stack(rbeta_)

    # constant matrices used in-kernel
    e_prev = jnp.eye(D, k=1, dtype=jnp.float32)     # y @ e_prev -> y[:, l-1]
    e_next = jnp.eye(D, k=-1, dtype=jnp.float32)    # y @ e_next -> y[:, l+1]
    pair = jnp.kron(jnp.ones((B, B), jnp.float32), jnp.eye(C, dtype=jnp.float32))
    swap = jnp.kron(jnp.eye(B, dtype=jnp.float32),
                    jnp.array([[0.0, 1.0], [1.0, 0.0]], jnp.float32))
    hsel = jnp.repeat(jnp.eye(NUM_HEADS, dtype=jnp.float32), HEAD_DIM, axis=0)  # (D, H)
    hselT = hsel.T                                                               # (H, D)

    return (wf.T, bf.reshape(1, D),
            ln1w, ln1b, wqkvT, bqkv, woT, bo, ln2w, ln2b, w1T, b1, w2T, b2,
            resA0, resA1, resA2, resb, resg, resbeta,
            e_prev, e_next, pair, swap, hsel, hselT,
            wp.T, bp.reshape(1, C))


@jax.jit
def attention_ce_forward(x, packed):
    B, C, H, W = x.shape
    h = x.reshape(B * C, H * W)                 # FeatureNetwork: view(B, C, H*W), flattened rows
    out = pl.pallas_call(
        fused_forward_kernel,
        out_shape=jax.ShapeDtypeStruct((B * C, IN_CHANNELS), jnp.float32),
        in_specs=[_VMEM] * (1 + len(packed)),
        out_specs=_VMEM,
    )(h, *packed)
    return out.reshape(B, C, H, W)


# --------------------------- deterministic params -----------------------------
def init_params(key):
    D, C = FEATURE_DIM, IN_CHANNELS
    keys = iter(jax.random.split(key, 256))

    def dense(out_f, in_f):
        w = jax.random.normal(next(keys), (out_f, in_f), jnp.float32) / jnp.sqrt(in_f)
        b = 0.1 * jax.random.normal(next(keys), (out_f,), jnp.float32)
        return w, b

    def layer_norm():
        w = 1.0 + 0.1 * jax.random.normal(next(keys), (D,), jnp.float32)
        b = 0.1 * jax.random.normal(next(keys), (D,), jnp.float32)
        return w, b

    def mha():
        ln1w, ln1b = layer_norm()
        wqkv, bqkv = dense(3 * D, D)
        wo, bo = dense(D, D)
        ln2w, ln2b = layer_norm()
        w1, b1 = dense(D, D)
        w2, b2 = dense(D, D)
        return dict(ln1_w=ln1w, ln1_b=ln1b, wqkv=wqkv, bqkv=bqkv, wo=wo, bo=bo,
                    ln2_w=ln2w, ln2_b=ln2b, w1=w1, b1=b1, w2=w2, b2=b2)

    def res():
        nl = RES_LAYERS
        w = jax.random.normal(next(keys), (nl, C, C, 3), jnp.float32) / jnp.sqrt(3 * C)
        b = 0.1 * jax.random.normal(next(keys), (nl, C), jnp.float32)
        g = 1.0 + 0.1 * jax.random.normal(next(keys), (nl, C), jnp.float32)
        bt = 0.1 * jax.random.normal(next(keys), (nl, C), jnp.float32)
        return dict(w=w, b=b, g=g, beta=bt)

    return dict(feature=dense(D, C),
                attn1=mha(), attn2=mha(), attn3=mha(), attn4=mha(),
                res1=res(), res2=res(),
                project=dense(C, D))


# --------------------------- pure-JAX reference --------------------------------
def _ref_ln(z, w, b):
    m = jnp.mean(z, -1, keepdims=True)
    v = jnp.mean((z - m) ** 2, -1, keepdims=True)
    return (z - m) / jnp.sqrt(v + _LN_EPS) * w + b


def _ref_mha(x, p):
    B, S, D = x.shape
    nh, hd = NUM_HEADS, FEATURE_DIM // NUM_HEADS
    h = _ref_ln(x, p['ln1_w'], p['ln1_b'])
    qkv = h @ p['wqkv'].T + p['bqkv']
    q, k, v = jnp.split(qkv, 3, axis=-1)
    q = q.reshape(B, S, nh, hd).transpose(0, 2, 1, 3)
    k = k.reshape(B, S, nh, hd).transpose(0, 2, 1, 3)
    v = v.reshape(B, S, nh, hd).transpose(0, 2, 1, 3)
    s = jnp.einsum('bhqd,bhkd->bhqk', q, k) / jnp.sqrt(hd)
    a = jax.nn.softmax(s, axis=-1)
    o = jnp.einsum('bhqk,bhkd->bhqd', a, v).transpose(0, 2, 1, 3).reshape(B, S, D)
    x = x + o @ p['wo'].T + p['bo']
    h2 = _ref_ln(x, p['ln2_w'], p['ln2_b'])
    f = h2 @ p['w1'].T + p['b1']
    f = jax.nn.gelu(f, approximate=False)
    return x + f @ p['w2'].T + p['b2']


def _ref_res(x, p):
    y = x
    nl = p['w'].shape[0]
    for i in range(nl):
        y = jax.lax.conv_general_dilated(
            y, p['w'][i], window_strides=(1,), padding=((1, 1),),
            dimension_numbers=('NCH', 'OIH', 'NCH')) + p['b'][i][None, :, None]
        m = jnp.mean(y, axis=(0, 2), keepdims=True)
        v = jnp.mean((y - m) ** 2, axis=(0, 2), keepdims=True)
        y = (y - m) / jnp.sqrt(v + _BN_EPS)
        y = y * p['g'][i][None, :, None] + p['beta'][i][None, :, None]
        if i < nl - 1:
            y = jax.nn.relu(y)
    return x + y


def ref_forward(x, params):
    B, C, H, W = x.shape
    wf, bf = params['feature']
    h = x.reshape(B, C, H * W) @ wf.T + bf
    h = _ref_res(h, params['res1'])
    h = _ref_mha(h, params['attn1'])
    h = _ref_mha(h, params['attn2'])
    h = _ref_res(h, params['res1'])
    h = _ref_mha(h, params['attn3'])
    h = _ref_res(h, params['res2'])
    h = _ref_mha(h, params['attn4'])
    wp, bp = params['project']
    h = h @ wp.T + bp
    return h.reshape(B, C, H, W)


# ----------------------------------- main --------------------------------------
if __name__ == "__main__":
    key = jax.random.PRNGKey(0)
    pkey, xkey = jax.random.split(key)
    params = init_params(pkey)
    packed = pack_params(params)
    x = jax.random.normal(xkey, (BATCH, IN_CHANNELS, HEIGHT, WIDTH), jnp.float32)

    out = attention_ce_forward(x, packed)
    out = jax.block_until_ready(out)

    assert out.shape == x.shape
    assert bool(jnp.all(jnp.isfinite(out)))
    ref = ref_forward(x, params)
    assert bool(jnp.allclose(out, ref, atol=2e-2, rtol=2e-2)), "mismatch vs pure-JAX reference"

    print("KERNEL_OK")
</pallas_src>

<mosaic_0001>
module attributes {stable_mosaic.version = 11 : i64} {
  func.func @fused_forward_kernel(%arg0: memref<4x2xf32, #tpu.memory_space<vmem>>, %arg1: memref<2x64xf32, #tpu.memory_space<vmem>>, %arg2: memref<1x64xf32, #tpu.memory_space<vmem>>, %arg3: memref<4x1x64xf32, #tpu.memory_space<vmem>>, %arg4: memref<4x1x64xf32, #tpu.memory_space<vmem>>, %arg5: memref<4x64x192xf32, #tpu.memory_space<vmem>>, %arg6: memref<4x1x192xf32, #tpu.memory_space<vmem>>, %arg7: memref<4x64x64xf32, #tpu.memory_space<vmem>>, %arg8: memref<4x1x64xf32, #tpu.memory_space<vmem>>, %arg9: memref<4x1x64xf32, #tpu.memory_space<vmem>>, %arg10: memref<4x1x64xf32, #tpu.memory_space<vmem>>, %arg11: memref<4x64x64xf32, #tpu.memory_space<vmem>>, %arg12: memref<4x1x64xf32, #tpu.memory_space<vmem>>, %arg13: memref<4x64x64xf32, #tpu.memory_space<vmem>>, %arg14: memref<4x1x64xf32, #tpu.memory_space<vmem>>, %arg15: memref<12x4x4xf32, #tpu.memory_space<vmem>>, %arg16: memref<12x4x4xf32, #tpu.memory_space<vmem>>, %arg17: memref<12x4x4xf32, #tpu.memory_space<vmem>>, %arg18: memref<12x4x1xf32, #tpu.memory_space<vmem>>, %arg19: memref<12x4x1xf32, #tpu.memory_space<vmem>>, %arg20: memref<12x4x1xf32, #tpu.memory_space<vmem>>, %arg21: memref<64x64xf32, #tpu.memory_space<vmem>>, %arg22: memref<64x64xf32, #tpu.memory_space<vmem>>, %arg23: memref<4x4xf32, #tpu.memory_space<vmem>>, %arg24: memref<4x4xf32, #tpu.memory_space<vmem>>, %arg25: memref<64x4xf32, #tpu.memory_space<vmem>>, %arg26: memref<4x64xf32, #tpu.memory_space<vmem>>, %arg27: memref<64x2xf32, #tpu.memory_space<vmem>>, %arg28: memref<1x2xf32, #tpu.memory_space<vmem>>, %arg29: memref<4x2xf32, #tpu.memory_space<vmem>>) attributes {dimension_semantics = [], scalar_prefetch = 0 : i64, scratch_operands = 0 : i64, tpu.core_type = #tpu.core_type<tc>} {
    %c0 = arith.constant 0 : index
    %c0_0 = arith.constant 0 : index
    %0 = vector.load %arg21[%c0, %c0_0] : memref<64x64xf32, #tpu.memory_space<vmem>>, vector<64x64xf32>
    %c0_1 = arith.constant 0 : index
    %c0_2 = arith.constant 0 : index
    %1 = vector.load %arg22[%c0_1, %c0_2] : memref<64x64xf32, #tpu.memory_space<vmem>>, vector<64x64xf32>
    %c0_3 = arith.constant 0 : index
    %c0_4 = arith.constant 0 : index
    %2 = vector.load %arg23[%c0_3, %c0_4] : memref<4x4xf32, #tpu.memory_space<vmem>>, vector<4x4xf32>
    %c0_5 = arith.constant 0 : index
    %c0_6 = arith.constant 0 : index
    %3 = vector.load %arg24[%c0_5, %c0_6] : memref<4x4xf32, #tpu.memory_space<vmem>>, vector<4x4xf32>
    %c0_7 = arith.constant 0 : index
    %c0_8 = arith.constant 0 : index
    %4 = vector.load %arg25[%c0_7, %c0_8] : memref<64x4xf32, #tpu.memory_space<vmem>>, vector<64x4xf32>
    %c0_9 = arith.constant 0 : index
    %c0_10 = arith.constant 0 : index
    %5 = vector.load %arg26[%c0_9, %c0_10] : memref<4x64xf32, #tpu.memory_space<vmem>>, vector<4x64xf32>
    %c0_11 = arith.constant 0 : index
    %c0_12 = arith.constant 0 : index
    %6 = vector.load %arg0[%c0_11, %c0_12] : memref<4x2xf32, #tpu.memory_space<vmem>>, vector<4x2xf32>
    %c0_13 = arith.constant 0 : index
    %c0_14 = arith.constant 0 : index
    %7 = vector.load %arg1[%c0_13, %c0_14] : memref<2x64xf32, #tpu.memory_space<vmem>>, vector<2x64xf32>
    %cst = arith.constant dense<0.000000e+00> : vector<4x64xf32>
    %8 = tpu.matmul %6, %7, %cst {dimension_numbers = #tpu.dot_dimension_numbers<[1], [0], [0], [1], [0, 0, 1, 1], [], []>} : vector<4x2xf32>, vector<2x64xf32>, vector<4x64xf32> -> vector<4x64xf32>
    %c0_15 = arith.constant 0 : index
    %c0_16 = arith.constant 0 : index
    %9 = vector.load %arg2[%c0_15, %c0_16] : memref<1x64xf32, #tpu.memory_space<vmem>>, vector<1x64xf32>
    %10 = vector.broadcast %9 : vector<1x64xf32> to vector<4x64xf32>
    %11 = arith.addf %8, %10 : vector<4x64xf32>
    %c0_17 = arith.constant 0 : index
    %c0_18 = arith.constant 0 : index
    %c0_19 = arith.constant 0 : index
    %12 = vector.load %arg15[%c0_17, %c0_18, %c0_19] : memref<12x4x4xf32, #tpu.memory_space<vmem>>, vector<1x4x4xf32>
    %13 = vector.shape_cast %12 : vector<1x4x4xf32> to vector<4x4xf32>
    %cst_20 = arith.constant dense<0.000000e+00> : vector<4x64xf32>
    %14 = tpu.matmul %13, %11, %cst_20 {dimension_numbers = #tpu.dot_dimension_numbers<[1], [0], [0], [1], [0, 0, 1, 1], [], []>} : vector<4x4xf32>, vector<4x64xf32>, vector<4x64xf32> -> vector<4x64xf32>
    %c0_21 = arith.constant 0 : index
    %c0_22 = arith.constant 0 : index
    %c0_23 = arith.constant 0 : index
    %15 = vector.load %arg16[%c0_21, %c0_22, %c0_23] : memref<12x4x4xf32, #tpu.memory_space<vmem>>, vector<1x4x4xf32>
    %16 = vector.shape_cast %15 : vector<1x4x4xf32> to vector<4x4xf32>
    %cst_24 = arith.constant dense<0.000000e+00> : vector<4x64xf32>
    %17 = tpu.matmul %16, %11, %cst_24 {dimension_numbers = #tpu.dot_dimension_numbers<[1], [0], [0], [1], [0, 0, 1, 1], [], []>} : vector<4x4xf32>, vector<4x64xf32>, vector<4x64xf32> -> vector<4x64xf32>
    %c0_25 = arith.constant 0 : index
    %c0_26 = arith.constant 0 : index
    %c0_27 = arith.constant 0 : index
    %18 = vector.load %arg17[%c0_25, %c0_26, %c0_27] : memref<12x4x4xf32, #tpu.memory_space<vmem>>, vector<1x4x4xf32>
    %19 = vector.shape_cast %18 : vector<1x4x4xf32> to vector<4x4xf32>
    %cst_28 = arith.constant dense<0.000000e+00> : vector<4x64xf32>
    %20 = tpu.matmul %19, %11, %cst_28 {dimension_numbers = #tpu.dot_dimension_numbers<[1], [0], [0], [1], [0, 0, 1, 1], [], []>} : vector<4x4xf32>, vector<4x64xf32>, vector<4x64xf32> -> vector<4x64xf32>
    %cst_29 = arith.constant dense<0.000000e+00> : vector<4x64xf32>
    %21 = tpu.matmul %14, %0, %cst_29 {dimension_numbers = #tpu.dot_dimension_numbers<[1], [0], [0], [1], [0, 0, 1, 1], [], []>} : vector<4x64xf32>, vector<64x64xf32>, vector<4x64xf32> -> vector<4x64xf32>
    %22 = arith.addf %21, %17 : vector<4x64xf32>
    %cst_30 = arith.constant dense<0.000000e+00> : vector<4x64xf32>
    %23 = tpu.matmul %20, %1, %cst_30 {dimension_numbers = #tpu.dot_dimension_numbers<[1], [0], [0], [1], [0, 0, 1, 1], [], []>} : vector<4x64xf32>, vector<64x64xf32>, vector<4x64xf32> -> vector<4x64xf32>
    %24 = arith.addf %22, %23 : vector<4x64xf32>
    %c0_31 = arith.constant 0 : index
    %c0_32 = arith.constant 0 : index
    %c0_33 = arith.constant 0 : index
    %25 = vector.load %arg18[%c0_31, %c0_32, %c0_33] : memref<12x4x1xf32, #tpu.memory_space<vmem>>, vector<1x4x1xf32>
    %26 = vector.shape_cast %25 : vector<1x4x1xf32> to vector<4x1xf32>
    %27 = vector.broadcast %26 : vector<4x1xf32> to vector<4x64xf32>
    %28 = arith.addf %24, %27 : vector<4x64xf32>
    %cst_34 = arith.constant dense<0.000000e+00> : vector<4x64xf32>
    %29 = tpu.matmul %2, %28, %cst_34 {dimension_numbers = #tpu.dot_dimension_numbers<[1], [0], [0], [1], [0, 0, 1, 1], [], []>} : vector<4x4xf32>, vector<4x64xf32>, vector<4x64xf32> -> vector<4x64xf32>
    %cst_35 = arith.constant dense<0.000000e+00> : vector<4xf32>
    %30 = vector.multi_reduction <add>, %29, %cst_35 [1] : vector<4x64xf32> to vector<4xf32>
    %31 = vector.shape_cast %30 : vector<4xf32> to vector<4x1xf32>
    %cst_36 = arith.constant 7.812500e-03 : f32
    %32 = vector.broadcast %cst_36 : f32 to vector<4x1xf32>
    %33 = arith.mulf %31, %32 : vector<4x1xf32>
    %34 = vector.broadcast %33 : vector<4x1xf32> to vector<4x64xf32>
    %35 = arith.subf %28, %34 : vector<4x64xf32>
    %36 = arith.mulf %35, %35 : vector<4x64xf32>
    %cst_37 = arith.constant dense<0.000000e+00> : vector<4x64xf32>
    %37 = tpu.matmul %2, %36, %cst_37 {dimension_numbers = #tpu.dot_dimension_numbers<[1], [0], [0], [1], [0, 0, 1, 1], [], []>} : vector<4x4xf32>, vector<4x64xf32>, vector<4x64xf32> -> vector<4x64xf32>
    %cst_38 = arith.constant dense<0.000000e+00> : vector<4xf32>
    %38 = vector.multi_reduction <add>, %37, %cst_38 [1] : vector<4x64xf32> to vector<4xf32>
    %39 = vector.shape_cast %38 : vector<4xf32> to vector<4x1xf32>
    %cst_39 = arith.constant 7.812500e-03 : f32
    %40 = vector.broadcast %cst_39 : f32 to vector<4x1xf32>
    %41 = arith.mulf %39, %40 : vector<4x1xf32>
    %cst_40 = arith.constant 9.99999974E-6 : f32
    %42 = vector.broadcast %cst_40 : f32 to vector<4x1xf32>
    %43 = arith.addf %41, %42 : vector<4x1xf32>
    %44 = math.rsqrt %43 : vector<4x1xf32>
    %45 = vector.broadcast %44 : vector<4x1xf32> to vector<4x64xf32>
    %46 = arith.mulf %35, %45 : vector<4x64xf32>
    %c0_41 = arith.constant 0 : index
    %c0_42 = arith.constant 0 : index
    %c0_43 = arith.constant 0 : index
    %47 = vector.load %arg19[%c0_41, %c0_42, %c0_43] : memref<12x4x1xf32, #tpu.memory_space<vmem>>, vector<1x4x1xf32>
    %48 = vector.shape_cast %47 : vector<1x4x1xf32> to vector<4x1xf32>
    %49 = vector.broadcast %48 : vector<4x1xf32> to vector<4x64xf32>
    %50 = arith.mulf %46, %49 : vector<4x64xf32>
    %c0_44 = arith.constant 0 : index
    %c0_45 = arith.constant 0 : index
    %c0_46 = arith.constant 0 : index
    %51 = vector.load %arg20[%c0_44, %c0_45, %c0_46] : memref<12x4x1xf32, #tpu.memory_space<vmem>>, vector<1x4x1xf32>
    %52 = vector.shape_cast %51 : vector<1x4x1xf32> to vector<4x1xf32>
    %53 = vector.broadcast %52 : vector<4x1xf32> to vector<4x64xf32>
    %54 = arith.addf %50, %53 : vector<4x64xf32>
    %cst_47 = arith.constant 0.000000e+00 : f32
    %55 = vector.broadcast %cst_47 : f32 to vector<4x64xf32>
    %56 = arith.maximumf %54, %55 : vector<4x64xf32>
    %c1 = arith.constant 1 : index
    %c0_48 = arith.constant 0 : index
    %c0_49 = arith.constant 0 : index
    %57 = vector.load %arg15[%c1, %c0_48, %c0_49] : memref<12x4x4xf32, #tpu.memory_space<vmem>>, vector<1x4x4xf32>
    %58 = vector.shape_cast %57 : vector<1x4x4xf32> to vector<4x4xf32>
    %cst_50 = arith.constant dense<0.000000e+00> : vector<4x64xf32>
    %59 = tpu.matmul %58, %56, %cst_50 {dimension_numbers = #tpu.dot_dimension_numbers<[1], [0], [0], [1], [0, 0, 1, 1], [], []>} : vector<4x4xf32>, vector<4x64xf32>, vector<4x64xf32> -> vector<4x64xf32>
    %c1_51 = arith.constant 1 : index
    %c0_52 = arith.constant 0 : index
    %c0_53 = arith.constant 0 : index
    %60 = vector.load %arg16[%c1_51, %c0_52, %c0_53] : memref<12x4x4xf32, #tpu.memory_space<vmem>>, vector<1x4x4xf32>
    %61 = vector.shape_cast %60 : vector<1x4x4xf32> to vector<4x4xf32>
    %cst_54 = arith.constant dense<0.000000e+00> : vector<4x64xf32>
    %62 = tpu.matmul %61, %56, %cst_54 {dimension_numbers = #tpu.dot_dimension_numbers<[1], [0], [0], [1], [0, 0, 1, 1], [], []>} : vector<4x4xf32>, vector<4x64xf32>, vector<4x64xf32> -> vector<4x64xf32>
    %c1_55 = arith.constant 1 : index
    %c0_56 = arith.constant 0 : index
    %c0_57 = arith.constant 0 : index
    %63 = vector.load %arg17[%c1_55, %c0_56, %c0_57] : memref<12x4x4xf32, #tpu.memory_space<vmem>>, vector<1x4x4xf32>
    %64 = vector.shape_cast %63 : vector<1x4x4xf32> to vector<4x4xf32>
    %cst_58 = arith.constant dense<0.000000e+00> : vector<4x64xf32>
    %65 = tpu.matmul %64, %56, %cst_58 {dimension_numbers = #tpu.dot_dimension_numbers<[1], [0], [0], [1], [0, 0, 1, 1], [], []>} : vector<4x4xf32>, vector<4x64xf32>, vector<4x64xf32> -> vector<4x64xf32>
    %cst_59 = arith.constant dense<0.000000e+00> : vector<4x64xf32>
    %66 = tpu.matmul %59, %0, %cst_59 {dimension_numbers = #tpu.dot_dimension_numbers<[1], [0], [0], [1], [0, 0, 1, 1], [], []>} : vector<4x64xf32>, vector<64x64xf32>, vector<4x64xf32> -> vector<4x64xf32>
    %67 = arith.addf %66, %62 : vector<4x64xf32>
    %cst_60 = arith.constant dense<0.000000e+00> : vector<4x64xf32>
    %68 = tpu.matmul %65, %1, %cst_60 {dimension_numbers = #tpu.dot_dimension_numbers<[1], [0], [0], [1], [0, 0, 1, 1], [], []>} : vector<4x64xf32>, vector<64x64xf32>, vector<4x64xf32> -> vector<4x64xf32>
    %69 = arith.addf %67, %68 : vector<4x64xf32>
    %c1_61 = arith.constant 1 : index
    %c0_62 = arith.constant 0 : index
    %c0_63 = arith.constant 0 : index
    %70 = vector.load %arg18[%c1_61, %c0_62, %c0_63] : memref<12x4x1xf32, #tpu.memory_space<vmem>>, vector<1x4x1xf32>
    %71 = vector.shape_cast %70 : vector<1x4x1xf32> to vector<4x1xf32>
    %72 = vector.broadcast %71 : vector<4x1xf32> to vector<4x64xf32>
    %73 = arith.addf %69, %72 : vector<4x64xf32>
    %cst_64 = arith.constant dense<0.000000e+00> : vector<4x64xf32>
    %74 = tpu.matmul %2, %73, %cst_64 {dimension_numbers = #tpu.dot_dimension_numbers<[1], [0], [0], [1], [0, 0, 1, 1], [], []>} : vector<4x4xf32>, vector<4x64xf32>, vector<4x64xf32> -> vector<4x64xf32>
    %cst_65 = arith.constant dense<0.000000e+00> : vector<4xf32>
    %75 = vector.multi_reduction <add>, %74, %cst_65 [1] : vector<4x64xf32> to vector<4xf32>
    %76 = vector.shape_cast %75 : vector<4xf32> to vector<4x1xf32>
    %cst_66 = arith.constant 7.812500e-03 : f32
    %77 = vector.broadcast %cst_66 : f32 to vector<4x1xf32>
    %78 = arith.mulf %76, %77 : vector<4x1xf32>
    %79 = vector.broadcast %78 : vector<4x1xf32> to vector<4x64xf32>
    %80 = arith.subf %73, %79 : vector<4x64xf32>
    %81 = arith.mulf %80, %80 : vector<4x64xf32>
    %cst_67 = arith.constant dense<0.000000e+00> : vector<4x64xf32>
    %82 = tpu.matmul %2, %81, %cst_67 {dimension_numbers = #tpu.dot_dimension_numbers<[1], [0], [0], [1], [0, 0, 1, 1], [], []>} : vector<4x4xf32>, vector<4x64xf32>, vector<4x64xf32> -> vector<4x64xf32>
    %cst_68 = arith.constant dense<0.000000e+00> : vector<4xf32>
    %83 = vector.multi_reduction <add>, %82, %cst_68 [1] : vector<4x64xf32> to vector<4xf32>
    %84 = vector.shape_cast %83 : vector<4xf32> to vector<4x1xf32>
    %cst_69 = arith.constant 7.812500e-03 : f32
    %85 = vector.broadcast %cst_69 : f32 to vector<4x1xf32>
    %86 = arith.mulf %84, %85 : vector<4x1xf32>
    %cst_70 = arith.constant 9.99999974E-6 : f32
    %87 = vector.broadcast %cst_70 : f32 to vector<4x1xf32>
    %88 = arith.addf %86, %87 : vector<4x1xf32>
    %89 = math.rsqrt %88 : vector<4x1xf32>
    %90 = vector.broadcast %89 : vector<4x1xf32> to vector<4x64xf32>
    %91 = arith.mulf %80, %90 : vector<4x64xf32>
    %c1_71 = arith.constant 1 : index
    %c0_72 = arith.constant 0 : index
    %c0_73 = arith.constant 0 : index
    %92 = vector.load %arg19[%c1_71, %c0_72, %c0_73] : memref<12x4x1xf32, #tpu.memory_space<vmem>>, vector<1x4x1xf32>
    %93 = vector.shape_cast %92 : vector<1x4x1xf32> to vector<4x1xf32>
    %94 = vector.broadcast %93 : vector<4x1xf32> to vector<4x64xf32>
    %95 = arith.mulf %91, %94 : vector<4x64xf32>
    %c1_74 = arith.constant 1 : index
    %c0_75 = arith.constant 0 : index
    %c0_76 = arith.constant 0 : index
    %96 = vector.load %arg20[%c1_74, %c0_75, %c0_76] : memref<12x4x1xf32, #tpu.memory_space<vmem>>, vector<1x4x1xf32>
    %97 = vector.shape_cast %96 : vector<1x4x1xf32> to vector<4x1xf32>
    %98 = vector.broadcast %97 : vector<4x1xf32> to vector<4x64xf32>
    %99 = arith.addf %95, %98 : vector<4x64xf32>
    %cst_77 = arith.constant 0.000000e+00 : f32
    %100 = vector.broadcast %cst_77 : f32 to vector<4x64xf32>
    %101 = arith.maximumf %99, %100 : vector<4x64xf32>
    %c2 = arith.constant 2 : index
    %c0_78 = arith.constant 0 : index
    %c0_79 = arith.constant 0 : index
    %102 = vector.load %arg15[%c2, %c0_78, %c0_79] : memref<12x4x4xf32, #tpu.memory_space<vmem>>, vector<1x4x4xf32>
    %103 = vector.shape_cast %102 : vector<1x4x4xf32> to vector<4x4xf32>
    %cst_80 = arith.constant dense<0.000000e+00> : vector<4x64xf32>
    %104 = tpu.matmul %103, %101, %cst_80 {dimension_numbers = #tpu.dot_dimension_numbers<[1], [0], [0], [1], [0, 0, 1, 1], [], []>} : vector<4x4xf32>, vector<4x64xf32>, vector<4x64xf32> -> vector<4x64xf32>
    %c2_81 = arith.constant 2 : index
    %c0_82 = arith.constant 0 : index
    %c0_83 = arith.constant 0 : index
    %105 = vector.load %arg16[%c2_81, %c0_82, %c0_83] : memref<12x4x4xf32, #tpu.memory_space<vmem>>, vector<1x4x4xf32>
    %106 = vector.shape_cast %105 : vector<1x4x4xf32> to vector<4x4xf32>
    %cst_84 = arith.constant dense<0.000000e+00> : vector<4x64xf32>
    %107 = tpu.matmul %106, %101, %cst_84 {dimension_numbers = #tpu.dot_dimension_numbers<[1], [0], [0], [1], [0, 0, 1, 1], [], []>} : vector<4x4xf32>, vector<4x64xf32>, vector<4x64xf32> -> vector<4x64xf32>
    %c2_85 = arith.constant 2 : index
    %c0_86 = arith.constant 0 : index
    %c0_87 = arith.constant 0 : index
    %108 = vector.load %arg17[%c2_85, %c0_86, %c0_87] : memref<12x4x4xf32, #tpu.memory_space<vmem>>, vector<1x4x4xf32>
    %109 = vector.shape_cast %108 : vector<1x4x4xf32> to vector<4x4xf32>
    %cst_88 = arith.constant dense<0.000000e+00> : vector<4x64xf32>
    %110 = tpu.matmul %109, %101, %cst_88 {dimension_numbers = #tpu.dot_dimension_numbers<[1], [0], [0], [1], [0, 0, 1, 1], [], []>} : vector<4x4xf32>, vector<4x64xf32>, vector<4x64xf32> -> vector<4x64xf32>
    %cst_89 = arith.constant dense<0.000000e+00> : vector<4x64xf32>
    %111 = tpu.matmul %104, %0, %cst_89 {dimension_numbers = #tpu.dot_dimension_numbers<[1], [0], [0], [1], [0, 0, 1, 1], [], []>} : vector<4x64xf32>, vector<64x64xf32>, vector<4x64xf32> -> vector<4x64xf32>
    %112 = arith.addf %111, %107 : vector<4x64xf32>
    %cst_90 = arith.constant dense<0.000000e+00> : vector<4x64xf32>
    %113 = tpu.matmul %110, %1, %cst_90 {dimension_numbers = #tpu.dot_dimension_numbers<[1], [0], [0], [1], [0, 0, 1, 1], [], []>} : vector<4x64xf32>, vector<64x64xf32>, vector<4x64xf32> -> vector<4x64xf32>
    %114 = arith.addf %112, %113 : vector<4x64xf32>
    %c2_91 = arith.constant 2 : index
    %c0_92 = arith.constant 0 : index
    %c0_93 = arith.constant 0 : index
    %115 = vector.load %arg18[%c2_91, %c0_92, %c0_93] : memref<12x4x1xf32, #tpu.memory_space<vmem>>, vector<1x4x1xf32>
    %116 = vector.shape_cast %115 : vector<1x4x1xf32> to vector<4x1xf32>
    %117 = vector.broadcast %116 : vector<4x1xf32> to vector<4x64xf32>
    %118 = arith.addf %114, %117 : vector<4x64xf32>
    %cst_94 = arith.constant dense<0.000000e+00> : vector<4x64xf32>
    %119 = tpu.matmul %2, %118, %cst_94 {dimension_numbers = #tpu.dot_dimension_numbers<[1], [0], [0], [1], [0, 0, 1, 1], [], []>} : vector<4x4xf32>, vector<4x64xf32>, vector<4x64xf32> -> vector<4x64xf32>
    %cst_95 = arith.constant dense<0.000000e+00> : vector<4xf32>
    %120 = vector.multi_reduction <add>, %119, %cst_95 [1] : vector<4x64xf32> to vector<4xf32>
    %121 = vector.shape_cast %120 : vector<4xf32> to vector<4x1xf32>
    %cst_96 = arith.constant 7.812500e-03 : f32
    %122 = vector.broadcast %cst_96 : f32 to vector<4x1xf32>
    %123 = arith.mulf %121, %122 : vector<4x1xf32>
    %124 = vector.broadcast %123 : vector<4x1xf32> to vector<4x64xf32>
    %125 = arith.subf %118, %124 : vector<4x64xf32>
    %126 = arith.mulf %125, %125 : vector<4x64xf32>
    %cst_97 = arith.constant dense<0.000000e+00> : vector<4x64xf32>
    %127 = tpu.matmul %2, %126, %cst_97 {dimension_numbers = #tpu.dot_dimension_numbers<[1], [0], [0], [1], [0, 0, 1, 1], [], []>} : vector<4x4xf32>, vector<4x64xf32>, vector<4x64xf32> -> vector<4x64xf32>
    %cst_98 = arith.constant dense<0.000000e+00> : vector<4xf32>
    %128 = vector.multi_reduction <add>, %127, %cst_98 [1] : vector<4x64xf32> to vector<4xf32>
    %129 = vector.shape_cast %128 : vector<4xf32> to vector<4x1xf32>
    %cst_99 = arith.constant 7.812500e-03 : f32
    %130 = vector.broadcast %cst_99 : f32 to vector<4x1xf32>
    %131 = arith.mulf %129, %130 : vector<4x1xf32>
    %cst_100 = arith.constant 9.99999974E-6 : f32
    %132 = vector.broadcast %cst_100 : f32 to vector<4x1xf32>
    %133 = arith.addf %131, %132 : vector<4x1xf32>
    %134 = math.rsqrt %133 : vector<4x1xf32>
    %135 = vector.broadcast %134 : vector<4x1xf32> to vector<4x64xf32>
    %136 = arith.mulf %125, %135 : vector<4x64xf32>
    %c2_101 = arith.constant 2 : index
    %c0_102 = arith.constant 0 : index
    %c0_103 = arith.constant 0 : index
    %137 = vector.load %arg19[%c2_101, %c0_102, %c0_103] : memref<12x4x1xf32, #tpu.memory_space<vmem>>, vector<1x4x1xf32>
    %138 = vector.shape_cast %137 : vector<1x4x1xf32> to vector<4x1xf32>
    %139 = vector.broadcast %138 : vector<4x1xf32> to vector<4x64xf32>
    %140 = arith.mulf %136, %139 : vector<4x64xf32>
    %c2_104 = arith.constant 2 : index
    %c0_105 = arith.constant 0 : index
    %c0_106 = arith.constant 0 : index
    %141 = vector.load %arg20[%c2_104, %c0_105, %c0_106] : memref<12x4x1xf32, #tpu.memory_space<vmem>>, vector<1x4x1xf32>
    %142 = vector.shape_cast %141 : vector<1x4x1xf32> to vector<4x1xf32>
    %143 = vector.broadcast %142 : vector<4x1xf32> to vector<4x64xf32>
    %144 = arith.addf %140, %143 : vector<4x64xf32>
    %cst_107 = arith.constant 0.000000e+00 : f32
    %145 = vector.broadcast %cst_107 : f32 to vector<4x64xf32>
    %146 = arith.maximumf %144, %145 : vector<4x64xf32>
    %c3 = arith.constant 3 : index
    %c0_108 = arith.constant 0 : index
    %c0_109 = arith.constant 0 : index
    %147 = vector.load %arg15[%c3, %c0_108, %c0_109] : memref<12x4x4xf32, #tpu.memory_space<vmem>>, vector<1x4x4xf32>
    %148 = vector.shape_cast %147 : vector<1x4x4xf32> to vector<4x4xf32>
    %cst_110 = arith.constant dense<0.000000e+00> : vector<4x64xf32>
    %149 = tpu.matmul %148, %146, %cst_110 {dimension_numbers = #tpu.dot_dimension_numbers<[1], [0], [0], [1], [0, 0, 1, 1], [], []>} : vector<4x4xf32>, vector<4x64xf32>, vector<4x64xf32> -> vector<4x64xf32>
    %c3_111 = arith.constant 3 : index
    %c0_112 = arith.constant 0 : index
    %c0_113 = arith.constant 0 : index
    %150 = vector.load %arg16[%c3_111, %c0_112, %c0_113] : memref<12x4x4xf32, #tpu.memory_space<vmem>>, vector<1x4x4xf32>
    %151 = vector.shape_cast %150 : vector<1x4x4xf32> to vector<4x4xf32>
    %cst_114 = arith.constant dense<0.000000e+00> : vector<4x64xf32>
    %152 = tpu.matmul %151, %146, %cst_114 {dimension_numbers = #tpu.dot_dimension_numbers<[1], [0], [0], [1], [0, 0, 1, 1], [], []>} : vector<4x4xf32>, vector<4x64xf32>, vector<4x64xf32> -> vector<4x64xf32>
    %c3_115 = arith.constant 3 : index
    %c0_116 = arith.constant 0 : index
    %c0_117 = arith.constant 0 : index
    %153 = vector.load %arg17[%c3_115, %c0_116, %c0_117] : memref<12x4x4xf32, #tpu.memory_space<vmem>>, vector<1x4x4xf32>
    %154 = vector.shape_cast %153 : vector<1x4x4xf32> to vector<4x4xf32>
    %cst_118 = arith.constant dense<0.000000e+00> : vector<4x64xf32>
    %155 = tpu.matmul %154, %146, %cst_118 {dimension_numbers = #tpu.dot_dimension_numbers<[1], [0], [0], [1], [0, 0, 1, 1], [], []>} : vector<4x4xf32>, vector<4x64xf32>, vector<4x64xf32> -> vector<4x64xf32>
    %cst_119 = arith.constant dense<0.000000e+00> : vector<4x64xf32>
    %156 = tpu.matmul %149, %0, %cst_119 {dimension_numbers = #tpu.dot_dimension_numbers<[1], [0], [0], [1], [0, 0, 1, 1], [], []>} : vector<4x64xf32>, vector<64x64xf32>, vector<4x64xf32> -> vector<4x64xf32>
    %157 = arith.addf %156, %152 : vector<4x64xf32>
    %cst_120 = arith.constant dense<0.000000e+00> : vector<4x64xf32>
    %158 = tpu.matmul %155, %1, %cst_120 {dimension_numbers = #tpu.dot_dimension_numbers<[1], [0], [0], [1], [0, 0, 1, 1], [], []>} : vector<4x64xf32>, vector<64x64xf32>, vector<4x64xf32> -> vector<4x64xf32>
    %159 = arith.addf %157, %158 : vector<4x64xf32>
    %c3_121 = arith.constant 3 : index
    %c0_122 = arith.constant 0 : index
    %c0_123 = arith.constant 0 : index
    %160 = vector.load %arg18[%c3_121, %c0_122, %c0_123] : memref<12x4x1xf32, #tpu.memory_space<vmem>>, vector<1x4x1xf32>
    %161 = vector.shape_cast %160 : vector<1x4x1xf32> to vector<4x1xf32>
    %162 = vector.broadcast %161 : vector<4x1xf32> to vector<4x64xf32>
    %163 = arith.addf %159, %162 : vector<4x64xf32>
    %cst_124 = arith.constant dense<0.000000e+00> : vector<4x64xf32>
    %164 = tpu.matmul %2, %163, %cst_124 {dimension_numbers = #tpu.dot_dimension_numbers<[1], [0], [0], [1], [0, 0, 1, 1], [], []>} : vector<4x4xf32>, vector<4x64xf32>, vector<4x64xf32> -> vector<4x64xf32>
    %cst_125 = arith.constant dense<0.000000e+00> : vector<4xf32>
    %165 = vector.multi_reduction <add>, %164, %cst_125 [1] : vector<4x64xf32> to vector<4xf32>
    %166 = vector.shape_cast %165 : vector<4xf32> to vector<4x1xf32>
    %cst_126 = arith.constant 7.812500e-03 : f32
    %167 = vector.broadcast %cst_126 : f32 to vector<4x1xf32>
    %168 = arith.mulf %166, %167 : vector<4x1xf32>
    %169 = vector.broadcast %168 : vector<4x1xf32> to vector<4x64xf32>
    %170 = arith.subf %163, %169 : vector<4x64xf32>
    %171 = arith.mulf %170, %170 : vector<4x64xf32>
    %cst_127 = arith.constant dense<0.000000e+00> : vector<4x64xf32>
    %172 = tpu.matmul %2, %171, %cst_127 {dimension_numbers = #tpu.dot_dimension_numbers<[1], [0], [0], [1], [0, 0, 1, 1], [], []>} : vector<4x4xf32>, vector<4x64xf32>, vector<4x64xf32> -> vector<4x64xf32>
    %cst_128 = arith.constant dense<0.000000e+00> : vector<4xf32>
    %173 = vector.multi_reduction <add>, %172, %cst_128 [1] : vector<4x64xf32> to vector<4xf32>
    %174 = vector.shape_cast %173 : vector<4xf32> to vector<4x1xf32>
    %cst_129 = arith.constant 7.812500e-03 : f32
    %175 = vector.broadcast %cst_129 : f32 to vector<4x1xf32>
    %176 = arith.mulf %174, %175 : vector<4x1xf32>
    %cst_130 = arith.constant 9.99999974E-6 : f32
    %177 = vector.broadcast %cst_130 : f32 to vector<4x1xf32>
    %178 = arith.addf %176, %177 : vector<4x1xf32>
    %179 = math.rsqrt %178 : vector<4x1xf32>
    %180 = vector.broadcast %179 : vector<4x1xf32> to vector<4x64xf32>
    %181 = arith.mulf %170, %180 : vector<4x64xf32>
    %c3_131 = arith.constant 3 : index
    %c0_132 = arith.constant 0 : index
    %c0_133 = arith.constant 0 : index
    %182 = vector.load %arg19[%c3_131, %c0_132, %c0_133] : memref<12x4x1xf32, #tpu.memory_space<vmem>>, vector<1x4x1xf32>
    %183 = vector.shape_cast %182 : vector<1x4x1xf32> to vector<4x1xf32>
    %184 = vector.broadcast %183 : vector<4x1xf32> to vector<4x64xf32>
    %185 = arith.mulf %181, %184 : vector<4x64xf32>
    %c3_134 = arith.constant 3 : index
    %c0_135 = arith.constant 0 : index
    %c0_136 = arith.constant 0 : index
    %186 = vector.load %arg20[%c3_134, %c0_135, %c0_136] : memref<12x4x1xf32, #tpu.memory_space<vmem>>, vector<1x4x1xf32>
    %187 = vector.shape_cast %186 : vector<1x4x1xf32> to vector<4x1xf32>
    %188 = vector.broadcast %187 : vector<4x1xf32> to vector<4x64xf32>
    %189 = arith.addf %185, %188 : vector<4x64xf32>
    %cst_137 = arith.constant 0.000000e+00 : f32
    %190 = vector.broadcast %cst_137 : f32 to vector<4x64xf32>
    %191 = arith.maximumf %189, %190 : vector<4x64xf32>
    %c4 = arith.constant 4 : index
    %c0_138 = arith.constant 0 : index
    %c0_139 = arith.constant 0 : index
    %192 = vector.load %arg15[%c4, %c0_138, %c0_139] : memref<12x4x4xf32, #tpu.memory_space<vmem>>, vector<1x4x4xf32>
    %193 = vector.shape_cast %192 : vector<1x4x4xf32> to vector<4x4xf32>
    %cst_140 = arith.constant dense<0.000000e+00> : vector<4x64xf32>
    %194 = tpu.matmul %193, %191, %cst_140 {dimension_numbers = #tpu.dot_dimension_numbers<[1], [0], [0], [1], [0, 0, 1, 1], [], []>} : vector<4x4xf32>, vector<4x64xf32>, vector<4x64xf32> -> vector<4x64xf32>
    %c4_141 = arith.constant 4 : index
    %c0_142 = arith.constant 0 : index
    %c0_143 = arith.constant 0 : index
    %195 = vector.load %arg16[%c4_141, %c0_142, %c0_143] : memref<12x4x4xf32, #tpu.memory_space<vmem>>, vector<1x4x4xf32>
    %196 = vector.shape_cast %195 : vector<1x4x4xf32> to vector<4x4xf32>
    %cst_144 = arith.constant dense<0.000000e+00> : vector<4x64xf32>
    %197 = tpu.matmul %196, %191, %cst_144 {dimension_numbers = #tpu.dot_dimension_numbers<[1], [0], [0], [1], [0, 0, 1, 1], [], []>} : vector<4x4xf32>, vector<4x64xf32>, vector<4x64xf32> -> vector<4x64xf32>
    %c4_145 = arith.constant 4 : index
    %c0_146 = arith.constant 0 : index
    %c0_147 = arith.constant 0 : index
    %198 = vector.load %arg17[%c4_145, %c0_146, %c0_147] : memref<12x4x4xf32, #tpu.memory_space<vmem>>, vector<1x4x4xf32>
    %199 = vector.shape_cast %198 : vector<1x4x4xf32> to vector<4x4xf32>
    %cst_148 = arith.constant dense<0.000000e+00> : vector<4x64xf32>
    %200 = tpu.matmul %199, %191, %cst_148 {dimension_numbers = #tpu.dot_dimension_numbers<[1], [0], [0], [1], [0, 0, 1, 1], [], []>} : vector<4x4xf32>, vector<4x64xf32>, vector<4x64xf32> -> vector<4x64xf32>
    %cst_149 = arith.constant dense<0.000000e+00> : vector<4x64xf32>
    %201 = tpu.matmul %194, %0, %cst_149 {dimension_numbers = #tpu.dot_dimension_numbers<[1], [0], [0], [1], [0, 0, 1, 1], [], []>} : vector<4x64xf32>, vector<64x64xf32>, vector<4x64xf32> -> vector<4x64xf32>
    %202 = arith.addf %201, %197 : vector<4x64xf32>
    %cst_150 = arith.constant dense<0.000000e+00> : vector<4x64xf32>
    %203 = tpu.matmul %200, %1, %cst_150 {dimension_numbers = #tpu.dot_dimension_numbers<[1], [0], [0], [1], [0, 0, 1, 1], [], []>} : vector<4x64xf32>, vector<64x64xf32>, vector<4x64xf32> -> vector<4x64xf32>
    %204 = arith.addf %202, %203 : vector<4x64xf32>
    %c4_151 = arith.constant 4 : index
    %c0_152 = arith.constant 0 : index
    %c0_153 = arith.constant 0 : index
    %205 = vector.load %arg18[%c4_151, %c0_152, %c0_153] : memref<12x4x1xf32, #tpu.memory_space<vmem>>, vector<1x4x1xf32>
    %206 = vector.shape_cast %205 : vector<1x4x1xf32> to vector<4x1xf32>
    %207 = vector.broadcast %206 : vector<4x1xf32> to vector<4x64xf32>
    %208 = arith.addf %204, %207 : vector<4x64xf32>
    %cst_154 = arith.constant dense<0.000000e+00> : vector<4x64xf32>
    %209 = tpu.matmul %2, %208, %cst_154 {dimension_numbers = #tpu.dot_dimension_numbers<[1], [0], [0], [1], [0, 0, 1, 1], [], []>} : vector<4x4xf32>, vector<4x64xf32>, vector<4x64xf32> -> vector<4x64xf32>
    %cst_155 = arith.constant dense<0.000000e+00> : vector<4xf32>
    %210 = vector.multi_reduction <add>, %209, %cst_155 [1] : vector<4x64xf32> to vector<4xf32>
    %211 = vector.shape_cast %210 : vector<4xf32> to vector<4x1xf32>
    %cst_156 = arith.constant 7.812500e-03 : f32
    %212 = vector.broadcast %cst_156 : f32 to vector<4x1xf32>
    %213 = arith.mulf %211, %212 : vector<4x1xf32>
    %214 = vector.broadcast %213 : vector<4x1xf32> to vector<4x64xf32>
    %215 = arith.subf %208, %214 : vector<4x64xf32>
    %216 = arith.mulf %215, %215 : vector<4x64xf32>
    %cst_157 = arith.constant dense<0.000000e+00> : vector<4x64xf32>
    %217 = tpu.matmul %2, %216, %cst_157 {dimension_numbers = #tpu.dot_dimension_numbers<[1], [0], [0], [1], [0, 0, 1, 1], [], []>} : vector<4x4xf32>, vector<4x64xf32>, vector<4x64xf32> -> vector<4x64xf32>
    %cst_158 = arith.constant dense<0.000000e+00> : vector<4xf32>
    %218 = vector.multi_reduction <add>, %217, %cst_158 [1] : vector<4x64xf32> to vector<4xf32>
    %219 = vector.shape_cast %218 : vector<4xf32> to vector<4x1xf32>
    %cst_159 = arith.constant 7.812500e-03 : f32
    %220 = vector.broadcast %cst_159 : f32 to vector<4x1xf32>
    %221 = arith.mulf %219, %220 : vector<4x1xf32>
    %cst_160 = arith.constant 9.99999974E-6 : f32
    %222 = vector.broadcast %cst_160 : f32 to vector<4x1xf32>
    %223 = arith.addf %221, %222 : vector<4x1xf32>
    %224 = math.rsqrt %223 : vector<4x1xf32>
    %225 = vector.broadcast %224 : vector<4x1xf32> to vector<4x64xf32>
    %226 = arith.mulf %215, %225 : vector<4x64xf32>
    %c4_161 = arith.constant 4 : index
    %c0_162 = arith.constant 0 : index
    %c0_163 = arith.constant 0 : index
    %227 = vector.load %arg19[%c4_161, %c0_162, %c0_163] : memref<12x4x1xf32, #tpu.memory_space<vmem>>, vector<1x4x1xf32>
    %228 = vector.shape_cast %227 : vector<1x4x1xf32> to vector<4x1xf32>
    %229 = vector.broadcast %228 : vector<4x1xf32> to vector<4x64xf32>
    %230 = arith.mulf %226, %229 : vector<4x64xf32>
    %c4_164 = arith.constant 4 : index
    %c0_165 = arith.constant 0 : index
    %c0_166 = arith.constant 0 : index
    %231 = vector.load %arg20[%c4_164, %c0_165, %c0_166] : memref<12x4x1xf32, #tpu.memory_space<vmem>>, vector<1x4x1xf32>
    %232 = vector.shape_cast %231 : vector<1x4x1xf32> to vector<4x1xf32>
    %233 = vector.broadcast %232 : vector<4x1xf32> to vector<4x64xf32>
    %234 = arith.addf %230, %233 : vector<4x64xf32>
    %cst_167 = arith.constant 0.000000e+00 : f32
    %235 = vector.broadcast %cst_167 : f32 to vector<4x64xf32>
    %236 = arith.maximumf %234, %235 : vector<4x64xf32>
    %c5 = arith.constant 5 : index
    %c0_168 = arith.constant 0 : index
    %c0_169 = arith.constant 0 : index
    %237 = vector.load %arg15[%c5, %c0_168, %c0_169] : memref<12x4x4xf32, #tpu.memory_space<vmem>>, vector<1x4x4xf32>
    %238 = vector.shape_cast %237 : vector<1x4x4xf32> to vector<4x4xf32>
    %cst_170 = arith.constant dense<0.000000e+00> : vector<4x64xf32>
    %239 = tpu.matmul %238, %236, %cst_170 {dimension_numbers = #tpu.dot_dimension_numbers<[1], [0], [0], [1], [0, 0, 1, 1], [], []>} : vector<4x4xf32>, vector<4x64xf32>, vector<4x64xf32> -> vector<4x64xf32>
    %c5_171 = arith.constant 5 : index
    %c0_172 = arith.constant 0 : index
    %c0_173 = arith.constant 0 : index
    %240 = vector.load %arg16[%c5_171, %c0_172, %c0_173] : memref<12x4x4xf32, #tpu.memory_space<vmem>>, vector<1x4x4xf32>
    %241 = vector.shape_cast %240 : vector<1x4x4xf32> to vector<4x4xf32>
    %cst_174 = arith.constant dense<0.000000e+00> : vector<4x64xf32>
    %242 = tpu.matmul %241, %236, %cst_174 {dimension_numbers = #tpu.dot_dimension_numbers<[1], [0], [0], [1], [0, 0, 1, 1], [], []>} : vector<4x4xf32>, vector<4x64xf32>, vector<4x64xf32> -> vector<4x64xf32>
    %c5_175 = arith.constant 5 : index
    %c0_176 = arith.constant 0 : index
    %c0_177 = arith.constant 0 : index
    %243 = vector.load %arg17[%c5_175, %c0_176, %c0_177] : memref<12x4x4xf32, #tpu.memory_space<vmem>>, vector<1x4x4xf32>
    %244 = vector.shape_cast %243 : vector<1x4x4xf32> to vector<4x4xf32>
    %cst_178 = arith.constant dense<0.000000e+00> : vector<4x64xf32>
    %245 = tpu.matmul %244, %236, %cst_178 {dimension_numbers = #tpu.dot_dimension_numbers<[1], [0], [0], [1], [0, 0, 1, 1], [], []>} : vector<4x4xf32>, vector<4x64xf32>, vector<4x64xf32> -> vector<4x64xf32>
    %cst_179 = arith.constant dense<0.000000e+00> : vector<4x64xf32>
    %246 = tpu.matmul %239, %0, %cst_179 {dimension_numbers = #tpu.dot_dimension_numbers<[1], [0], [0], [1], [0, 0, 1, 1], [], []>} : vector<4x64xf32>, vector<64x64xf32>, vector<4x64xf32> -> vector<4x64xf32>
    %247 = arith.addf %246, %242 : vector<4x64xf32>
    %cst_180 = arith.constant dense<0.000000e+00> : vector<4x64xf32>
    %248 = tpu.matmul %245, %1, %cst_180 {dimension_numbers = #tpu.dot_dimension_numbers<[1], [0], [0], [1], [0, 0, 1, 1], [], []>} : vector<4x64xf32>, vector<64x64xf32>, vector<4x64xf32> -> vector<4x64xf32>
    %249 = arith.addf %247, %248 : vector<4x64xf32>
    %c5_181 = arith.constant 5 : index
    %c0_182 = arith.constant 0 : index
    %c0_183 = arith.constant 0 : index
    %250 = vector.load %arg18[%c5_181, %c0_182, %c0_183] : memref<12x4x1xf32, #tpu.memory_space<vmem>>, vector<1x4x1xf32>
    %251 = vector.shape_cast %250 : vector<1x4x1xf32> to vector<4x1xf32>
    %252 = vector.broadcast %251 : vector<4x1xf32> to vector<4x64xf32>
    %253 = arith.addf %249, %252 : vector<4x64xf32>
    %cst_184 = arith.constant dense<0.000000e+00> : vector<4x64xf32>
    %254 = tpu.matmul %2, %253, %cst_184 {dimension_numbers = #tpu.dot_dimension_numbers<[1], [0], [0], [1], [0, 0, 1, 1], [], []>} : vector<4x4xf32>, vector<4x64xf32>, vector<4x64xf32> -> vector<4x64xf32>
    %cst_185 = arith.constant dense<0.000000e+00> : vector<4xf32>
    %255 = vector.multi_reduction <add>, %254, %cst_185 [1] : vector<4x64xf32> to vector<4xf32>
    %256 = vector.shape_cast %255 : vector<4xf32> to vector<4x1xf32>
    %cst_186 = arith.constant 7.812500e-03 : f32
    %257 = vector.broadcast %cst_186 : f32 to vector<4x1xf32>
    %258 = arith.mulf %256, %257 : vector<4x1xf32>
    %259 = vector.broadcast %258 : vector<4x1xf32> to vector<4x64xf32>
    %260 = arith.subf %253, %259 : vector<4x64xf32>
    %261 = arith.mulf %260, %260 : vector<4x64xf32>
    %cst_187 = arith.constant dense<0.000000e+00> : vector<4x64xf32>
    %262 = tpu.matmul %2, %261, %cst_187 {dimension_numbers = #tpu.dot_dimension_numbers<[1], [0], [0], [1], [0, 0, 1, 1], [], []>} : vector<4x4xf32>, vector<4x64xf32>, vector<4x64xf32> -> vector<4x64xf32>
    %cst_188 = arith.constant dense<0.000000e+00> : vector<4xf32>
    %263 = vector.multi_reduction <add>, %262, %cst_188 [1] : vector<4x64xf32> to vector<4xf32>
    %264 = vector.shape_cast %263 : vector<4xf32> to vector<4x1xf32>
    %cst_189 = arith.constant 7.812500e-03 : f32
    %265 = vector.broadcast %cst_189 : f32 to vector<4x1xf32>
    %266 = arith.mulf %264, %265 : vector<4x1xf32>
    %cst_190 = arith.constant 9.99999974E-6 : f32
    %267 = vector.broadcast %cst_190 : f32 to vector<4x1xf32>
    %268 = arith.addf %266, %267 : vector<4x1xf32>
    %269 = math.rsqrt %268 : vector<4x1xf32>
    %270 = vector.broadcast %269 : vector<4x1xf32> to vector<4x64xf32>
    %271 = arith.mulf %260, %270 : vector<4x64xf32>
    %c5_191 = arith.constant 5 : index
    %c0_192 = arith.constant 0 : index
    %c0_193 = arith.constant 0 : index
    %272 = vector.load %arg19[%c5_191, %c0_192, %c0_193] : memref<12x4x1xf32, #tpu.memory_space<vmem>>, vector<1x4x1xf32>
    %273 = vector.shape_cast %272 : vector<1x4x1xf32> to vector<4x1xf32>
    %274 = vector.broadcast %273 : vector<4x1xf32> to vector<4x64xf32>
    %275 = arith.mulf %271, %274 : vector<4x64xf32>
    %c5_194 = arith.constant 5 : index
    %c0_195 = arith.constant 0 : index
    %c0_196 = arith.constant 0 : index
    %276 = vector.load %arg20[%c5_194, %c0_195, %c0_196] : memref<12x4x1xf32, #tpu.memory_space<vmem>>, vector<1x4x1xf32>
    %277 = vector.shape_cast %276 : vector<1x4x1xf32> to vector<4x1xf32>
    %278 = vector.broadcast %277 : vector<4x1xf32> to vector<4x64xf32>
    %279 = arith.addf %275, %278 : vector<4x64xf32>
    %280 = arith.addf %11, %279 : vector<4x64xf32>
    %c0_197 = arith.constant 0 : index
    %c0_198 = arith.constant 0 : index
    %c0_199 = arith.constant 0 : index
    %281 = vector.load %arg3[%c0_197, %c0_198, %c0_199] : memref<4x1x64xf32, #tpu.memory_space<vmem>>, vector<1x1x64xf32>
    %282 = vector.shape_cast %281 : vector<1x1x64xf32> to vector<1x64xf32>
    %c0_200 = arith.constant 0 : index
    %c0_201 = arith.constant 0 : index
    %c0_202 = arith.constant 0 : index
    %283 = vector.load %arg4[%c0_200, %c0_201, %c0_202] : memref<4x1x64xf32, #tpu.memory_space<vmem>>, vector<1x1x64xf32>
    %284 = vector.shape_cast %283 : vector<1x1x64xf32> to vector<1x64xf32>
    %cst_203 = arith.constant dense<0.000000e+00> : vector<4xf32>
    %285 = vector.multi_reduction <add>, %280, %cst_203 [1] : vector<4x64xf32> to vector<4xf32>
    %286 = vector.shape_cast %285 : vector<4xf32> to vector<4x1xf32>
    %cst_204 = arith.constant 6.400000e+01 : f32
    %287 = vector.broadcast %cst_204 : f32 to vector<4x1xf32>
    %288 = arith.divf %286, %287 : vector<4x1xf32>
    %289 = vector.broadcast %288 : vector<4x1xf32> to vector<4x64xf32>
    %290 = arith.subf %280, %289 : vector<4x64xf32>
    %291 = arith.mulf %290, %290 : vector<4x64xf32>
    %cst_205 = arith.constant dense<0.000000e+00> : vector<4xf32>
    %292 = vector.multi_reduction <add>, %291, %cst_205 [1] : vector<4x64xf32> to vector<4xf32>
    %293 = vector.shape_cast %292 : vector<4xf32> to vector<4x1xf32>
    %cst_206 = arith.constant 6.400000e+01 : f32
    %294 = vector.broadcast %cst_206 : f32 to vector<4x1xf32>
    %295 = arith.divf %293, %294 : vector<4x1xf32>
    %cst_207 = arith.constant 9.99999974E-6 : f32
    %296 = vector.broadcast %cst_207 : f32 to vector<4x1xf32>
    %297 = arith.addf %295, %296 : vector<4x1xf32>
    %298 = math.rsqrt %297 : vector<4x1xf32>
    %299 = vector.broadcast %298 : vector<4x1xf32> to vector<4x64xf32>
    %300 = arith.mulf %290, %299 : vector<4x64xf32>
    %301 = vector.broadcast %282 : vector<1x64xf32> to vector<4x64xf32>
    %302 = arith.mulf %300, %301 : vector<4x64xf32>
    %303 = vector.broadcast %284 : vector<1x64xf32> to vector<4x64xf32>
    %304 = arith.addf %302, %303 : vector<4x64xf32>
    %c0_208 = arith.constant 0 : index
    %c0_209 = arith.constant 0 : index
    %c0_210 = arith.constant 0 : index
    %305 = vector.load %arg5[%c0_208, %c0_209, %c0_210] : memref<4x64x192xf32, #tpu.memory_space<vmem>>, vector<1x64x192xf32>
    %306 = vector.shape_cast %305 : vector<1x64x192xf32> to vector<64x192xf32>
    %cst_211 = arith.constant dense<0.000000e+00> : vector<4x192xf32>
    %307 = tpu.matmul %304, %306, %cst_211 {dimension_numbers = #tpu.dot_dimension_numbers<[1], [0], [0], [1], [0, 0, 1, 1], [], []>} : vector<4x64xf32>, vector<64x192xf32>, vector<4x192xf32> -> vector<4x192xf32>
    %c0_212 = arith.constant 0 : index
    %c0_213 = arith.constant 0 : index
    %c0_214 = arith.constant 0 : index
    %308 = vector.load %arg6[%c0_212, %c0_213, %c0_214] : memref<4x1x192xf32, #tpu.memory_space<vmem>>, vector<1x1x192xf32>
    %309 = vector.shape_cast %308 : vector<1x1x192xf32> to vector<1x192xf32>
    %310 = vector.broadcast %309 : vector<1x192xf32> to vector<4x192xf32>
    %311 = arith.addf %307, %310 : vector<4x192xf32>
    %312 = vector.extract_strided_slice %311 {offsets = [0, 0], sizes = [4, 64], strides = [1, 1]} : vector<4x192xf32> to vector<4x64xf32>
    %cst_215 = arith.constant 2.500000e-01 : f32
    %313 = vector.broadcast %cst_215 : f32 to vector<4x64xf32>
    %314 = arith.mulf %312, %313 : vector<4x64xf32>
    %315 = vector.extract_strided_slice %311 {offsets = [0, 64], sizes = [4, 64], strides = [1, 1]} : vector<4x192xf32> to vector<4x64xf32>
    %316 = vector.extract_strided_slice %311 {offsets = [0, 128], sizes = [4, 64], strides = [1, 1]} : vector<4x192xf32> to vector<4x64xf32>
    %cst_216 = arith.constant dense<0.000000e+00> : vector<4x64xf32>
    %317 = tpu.matmul %3, %315, %cst_216 {dimension_numbers = #tpu.dot_dimension_numbers<[1], [0], [0], [1], [0, 0, 1, 1], [], []>} : vector<4x4xf32>, vector<4x64xf32>, vector<4x64xf32> -> vector<4x64xf32>
    %cst_217 = arith.constant dense<0.000000e+00> : vector<4x64xf32>
    %318 = tpu.matmul %3, %316, %cst_217 {dimension_numbers = #tpu.dot_dimension_numbers<[1], [0], [0], [1], [0, 0, 1, 1], [], []>} : vector<4x4xf32>, vector<4x64xf32>, vector<4x64xf32> -> vector<4x64xf32>
    %319 = arith.mulf %314, %315 : vector<4x64xf32>
    %cst_218 = arith.constant dense<0.000000e+00> : vector<4x4xf32>
    %320 = tpu.matmul %319, %4, %cst_218 {dimension_numbers = #tpu.dot_dimension_numbers<[1], [0], [0], [1], [0, 0, 1, 1], [], []>} : vector<4x64xf32>, vector<64x4xf32>, vector<4x4xf32> -> vector<4x4xf32>
    %321 = arith.mulf %314, %317 : vector<4x64xf32>
    %cst_219 = arith.constant dense<0.000000e+00> : vector<4x4xf32>
    %322 = tpu.matmul %321, %4, %cst_219 {dimension_numbers = #tpu.dot_dimension_numbers<[1], [0], [0], [1], [0, 0, 1, 1], [], []>} : vector<4x64xf32>, vector<64x4xf32>, vector<4x4xf32> -> vector<4x4xf32>
    %323 = arith.maximumf %320, %322 : vector<4x4xf32>
    %324 = arith.subf %320, %323 : vector<4x4xf32>
    %325 = math.exp %324 : vector<4x4xf32>
    %326 = arith.subf %322, %323 : vector<4x4xf32>
    %327 = math.exp %326 : vector<4x4xf32>
    %328 = arith.addf %325, %327 : vector<4x4xf32>
    %329 = tpu.reciprocal %328 {approx = true} : vector<4x4xf32> -> vector<4x4xf32>
    %330 = arith.mulf %325, %329 : vector<4x4xf32>
    %cst_220 = arith.constant dense<0.000000e+00> : vector<4x64xf32>
    %331 = tpu.matmul %330, %5, %cst_220 {dimension_numbers = #tpu.dot_dimension_numbers<[1], [0], [0], [1], [0, 0, 1, 1], [], []>} : vector<4x4xf32>, vector<4x64xf32>, vector<4x64xf32> -> vector<4x64xf32>
    %332 = arith.mulf %327, %329 : vector<4x4xf32>
    %cst_221 = arith.constant dense<0.000000e+00> : vector<4x64xf32>
    %333 = tpu.matmul %332, %5, %cst_221 {dimension_numbers = #tpu.dot_dimension_numbers<[1], [0], [0], [1], [0, 0, 1, 1], [], []>} : vector<4x4xf32>, vector<4x64xf32>, vector<4x64xf32> -> vector<4x64xf32>
    %334 = arith.mulf %331, %316 : vector<4x64xf32>
    %335 = arith.mulf %333, %318 : vector<4x64xf32>
    %336 = arith.addf %334, %335 : vector<4x64xf32>
    %c0_222 = arith.constant 0 : index
    %c0_223 = arith.constant 0 : index
    %c0_224 = arith.constant 0 : index
    %337 = vector.load %arg7[%c0_222, %c0_223, %c0_224] : memref<4x64x64xf32, #tpu.memory_space<vmem>>, vector<1x64x64xf32>
    %338 = vector.shape_cast %337 : vector<1x64x64xf32> to vector<64x64xf32>
    %cst_225 = arith.constant dense<0.000000e+00> : vector<4x64xf32>
    %339 = tpu.matmul %336, %338, %cst_225 {dimension_numbers = #tpu.dot_dimension_numbers<[1], [0], [0], [1], [0, 0, 1, 1], [], []>} : vector<4x64xf32>, vector<64x64xf32>, vector<4x64xf32> -> vector<4x64xf32>
    %340 = arith.addf %280, %339 : vector<4x64xf32>
    %c0_226 = arith.constant 0 : index
    %c0_227 = arith.constant 0 : index
    %c0_228 = arith.constant 0 : index
    %341 = vector.load %arg8[%c0_226, %c0_227, %c0_228] : memref<4x1x64xf32, #tpu.memory_space<vmem>>, vector<1x1x64xf32>
    %342 = vector.shape_cast %341 : vector<1x1x64xf32> to vector<1x64xf32>
    %343 = vector.broadcast %342 : vector<1x64xf32> to vector<4x64xf32>
    %344 = arith.addf %340, %343 : vector<4x64xf32>
    %c0_229 = arith.constant 0 : index
    %c0_230 = arith.constant 0 : index
    %c0_231 = arith.constant 0 : index
    %345 = vector.load %arg9[%c0_229, %c0_230, %c0_231] : memref<4x1x64xf32, #tpu.memory_space<vmem>>, vector<1x1x64xf32>
    %346 = vector.shape_cast %345 : vector<1x1x64xf32> to vector<1x64xf32>
    %c0_232 = arith.constant 0 : index
    %c0_233 = arith.constant 0 : index
    %c0_234 = arith.constant 0 : index
    %347 = vector.load %arg10[%c0_232, %c0_233, %c0_234] : memref<4x1x64xf32, #tpu.memory_space<vmem>>, vector<1x1x64xf32>
    %348 = vector.shape_cast %347 : vector<1x1x64xf32> to vector<1x64xf32>
    %cst_235 = arith.constant dense<0.000000e+00> : vector<4xf32>
    %349 = vector.multi_reduction <add>, %344, %cst_235 [1] : vector<4x64xf32> to vector<4xf32>
    %350 = vector.shape_cast %349 : vector<4xf32> to vector<4x1xf32>
    %cst_236 = arith.constant 6.400000e+01 : f32
    %351 = vector.broadcast %cst_236 : f32 to vector<4x1xf32>
    %352 = arith.divf %350, %351 : vector<4x1xf32>
    %353 = vector.broadcast %352 : vector<4x1xf32> to vector<4x64xf32>
    %354 = arith.subf %344, %353 : vector<4x64xf32>
    %355 = arith.mulf %354, %354 : vector<4x64xf32>
    %cst_237 = arith.constant dense<0.000000e+00> : vector<4xf32>
    %356 = vector.multi_reduction <add>, %355, %cst_237 [1] : vector<4x64xf32> to vector<4xf32>
    %357 = vector.shape_cast %356 : vector<4xf32> to vector<4x1xf32>
    %cst_238 = arith.constant 6.400000e+01 : f32
    %358 = vector.broadcast %cst_238 : f32 to vector<4x1xf32>
    %359 = arith.divf %357, %358 : vector<4x1xf32>
    %cst_239 = arith.constant 9.99999974E-6 : f32
    %360 = vector.broadcast %cst_239 : f32 to vector<4x1xf32>
    %361 = arith.addf %359, %360 : vector<4x1xf32>
    %362 = math.rsqrt %361 : vector<4x1xf32>
    %363 = vector.broadcast %362 : vector<4x1xf32> to vector<4x64xf32>
    %364 = arith.mulf %354, %363 : vector<4x64xf32>
    %365 = vector.broadcast %346 : vector<1x64xf32> to vector<4x64xf32>
    %366 = arith.mulf %364, %365 : vector<4x64xf32>
    %367 = vector.broadcast %348 : vector<1x64xf32> to vector<4x64xf32>
    %368 = arith.addf %366, %367 : vector<4x64xf32>
    %c0_240 = arith.constant 0 : index
    %c0_241 = arith.constant 0 : index
    %c0_242 = arith.constant 0 : index
    %369 = vector.load %arg11[%c0_240, %c0_241, %c0_242] : memref<4x64x64xf32, #tpu.memory_space<vmem>>, vector<1x64x64xf32>
    %370 = vector.shape_cast %369 : vector<1x64x64xf32> to vector<64x64xf32>
    %cst_243 = arith.constant dense<0.000000e+00> : vector<4x64xf32>
    %371 = tpu.matmul %368, %370, %cst_243 {dimension_numbers = #tpu.dot_dimension_numbers<[1], [0], [0], [1], [0, 0, 1, 1], [], []>} : vector<4x64xf32>, vector<64x64xf32>, vector<4x64xf32> -> vector<4x64xf32>
    %c0_244 = arith.constant 0 : index
    %c0_245 = arith.constant 0 : index
    %c0_246 = arith.constant 0 : index
    %372 = vector.load %arg12[%c0_244, %c0_245, %c0_246] : memref<4x1x64xf32, #tpu.memory_space<vmem>>, vector<1x1x64xf32>
    %373 = vector.shape_cast %372 : vector<1x1x64xf32> to vector<1x64xf32>
    %374 = vector.broadcast %373 : vector<1x64xf32> to vector<4x64xf32>
    %375 = arith.addf %371, %374 : vector<4x64xf32>
    %cst_247 = arith.constant 5.000000e-01 : f32
    %376 = vector.broadcast %cst_247 : f32 to vector<4x64xf32>
    %377 = arith.mulf %376, %375 : vector<4x64xf32>
    %cst_248 = arith.constant 0.707106769 : f32
    %378 = vector.broadcast %cst_248 : f32 to vector<4x64xf32>
    %379 = arith.mulf %375, %378 : vector<4x64xf32>
    %380 = math.absf %379 : vector<4x64xf32>
    %cst_249 = arith.constant 0.327591091 : f32
    %381 = vector.broadcast %cst_249 : f32 to vector<4x64xf32>
    %382 = arith.mulf %381, %380 : vector<4x64xf32>
    %cst_250 = arith.constant 1.000000e+00 : f32
    %383 = vector.broadcast %cst_250 : f32 to vector<4x64xf32>
    %384 = arith.addf %383, %382 : vector<4x64xf32>
    %cst_251 = arith.constant 1.000000e+00 : f32
    %385 = vector.broadcast %cst_251 : f32 to vector<4x64xf32>
    %386 = arith.divf %385, %384 : vector<4x64xf32>
    %cst_252 = arith.constant 1.06140542 : f32
    %387 = vector.broadcast %cst_252 : f32 to vector<4x64xf32>
    %388 = arith.mulf %386, %387 : vector<4x64xf32>
    %cst_253 = arith.constant -1.45315206 : f32
    %389 = vector.broadcast %cst_253 : f32 to vector<4x64xf32>
    %390 = arith.addf %389, %388 : vector<4x64xf32>
    %391 = arith.mulf %386, %390 : vector<4x64xf32>
    %cst_254 = arith.constant 1.42141378 : f32
    %392 = vector.broadcast %cst_254 : f32 to vector<4x64xf32>
    %393 = arith.addf %392, %391 : vector<4x64xf32>
    %394 = arith.mulf %386, %393 : vector<4x64xf32>
    %cst_255 = arith.constant -0.284496725 : f32
    %395 = vector.broadcast %cst_255 : f32 to vector<4x64xf32>
    %396 = arith.addf %395, %394 : vector<4x64xf32>
    %397 = arith.mulf %386, %396 : vector<4x64xf32>
    %cst_256 = arith.constant 0.254829586 : f32
    %398 = vector.broadcast %cst_256 : f32 to vector<4x64xf32>
    %399 = arith.addf %398, %397 : vector<4x64xf32>
    %400 = arith.mulf %386, %399 : vector<4x64xf32>
    %cst_257 = arith.constant 0.000000e+00 : f32
    %401 = vector.broadcast %cst_257 : f32 to vector<4x64xf32>
    %402 = arith.subf %401, %380 : vector<4x64xf32>
    %403 = arith.mulf %402, %380 : vector<4x64xf32>
    %404 = math.exp %403 : vector<4x64xf32>
    %405 = arith.mulf %400, %404 : vector<4x64xf32>
    %cst_258 = arith.constant 1.000000e+00 : f32
    %406 = vector.broadcast %cst_258 : f32 to vector<4x64xf32>
    %407 = arith.subf %406, %405 : vector<4x64xf32>
    %cst_259 = arith.constant 0.000000e+00 : f32
    %408 = vector.broadcast %cst_259 : f32 to vector<4x64xf32>
    %409 = arith.cmpf oge, %379, %408 : vector<4x64xf32>
    %cst_260 = arith.constant 0.000000e+00 : f32
    %410 = vector.broadcast %cst_260 : f32 to vector<4x64xf32>
    %411 = arith.subf %410, %407 : vector<4x64xf32>
    %412 = arith.select %409, %407, %411 : vector<4x64xi1>, vector<4x64xf32>
    %cst_261 = arith.constant 1.000000e+00 : f32
    %413 = vector.broadcast %cst_261 : f32 to vector<4x64xf32>
    %414 = arith.addf %413, %412 : vector<4x64xf32>
    %415 = arith.mulf %377, %414 : vector<4x64xf32>
    %c0_262 = arith.constant 0 : index
    %c0_263 = arith.constant 0 : index
    %c0_264 = arith.constant 0 : index
    %416 = vector.load %arg13[%c0_262, %c0_263, %c0_264] : memref<4x64x64xf32, #tpu.memory_space<vmem>>, vector<1x64x64xf32>
    %417 = vector.shape_cast %416 : vector<1x64x64xf32> to vector<64x64xf32>
    %cst_265 = arith.constant dense<0.000000e+00> : vector<4x64xf32>
    %418 = tpu.matmul %415, %417, %cst_265 {dimension_numbers = #tpu.dot_dimension_numbers<[1], [0], [0], [1], [0, 0, 1, 1], [], []>} : vector<4x64xf32>, vector<64x64xf32>, vector<4x64xf32> -> vector<4x64xf32>
    %c0_266 = arith.constant 0 : index
    %c0_267 = arith.constant 0 : index
    %c0_268 = arith.constant 0 : index
    %419 = vector.load %arg14[%c0_266, %c0_267, %c0_268] : memref<4x1x64xf32, #tpu.memory_space<vmem>>, vector<1x1x64xf32>
    %420 = vector.shape_cast %419 : vector<1x1x64xf32> to vector<1x64xf32>
    %421 = vector.broadcast %420 : vector<1x64xf32> to vector<4x64xf32>
    %422 = arith.addf %418, %421 : vector<4x64xf32>
    %423 = arith.addf %344, %422 : vector<4x64xf32>
    %c1_269 = arith.constant 1 : index
    %c0_270 = arith.constant 0 : index
    %c0_271 = arith.constant 0 : index
    %424 = vector.load %arg3[%c1_269, %c0_270, %c0_271] : memref<4x1x64xf32, #tpu.memory_space<vmem>>, vector<1x1x64xf32>
    %425 = vector.shape_cast %424 : vector<1x1x64xf32> to vector<1x64xf32>
    %c1_272 = arith.constant 1 : index
    %c0_273 = arith.constant 0 : index
    %c0_274 = arith.constant 0 : index
    %426 = vector.load %arg4[%c1_272, %c0_273, %c0_274] : memref<4x1x64xf32, #tpu.memory_space<vmem>>, vector<1x1x64xf32>
    %427 = vector.shape_cast %426 : vector<1x1x64xf32> to vector<1x64xf32>
    %cst_275 = arith.constant dense<0.000000e+00> : vector<4xf32>
    %428 = vector.multi_reduction <add>, %423, %cst_275 [1] : vector<4x64xf32> to vector<4xf32>
    %429 = vector.shape_cast %428 : vector<4xf32> to vector<4x1xf32>
    %cst_276 = arith.constant 6.400000e+01 : f32
    %430 = vector.broadcast %cst_276 : f32 to vector<4x1xf32>
    %431 = arith.divf %429, %430 : vector<4x1xf32>
    %432 = vector.broadcast %431 : vector<4x1xf32> to vector<4x64xf32>
    %433 = arith.subf %423, %432 : vector<4x64xf32>
    %434 = arith.mulf %433, %433 : vector<4x64xf32>
    %cst_277 = arith.constant dense<0.000000e+00> : vector<4xf32>
    %435 = vector.multi_reduction <add>, %434, %cst_277 [1] : vector<4x64xf32> to vector<4xf32>
    %436 = vector.shape_cast %435 : vector<4xf32> to vector<4x1xf32>
    %cst_278 = arith.constant 6.400000e+01 : f32
    %437 = vector.broadcast %cst_278 : f32 to vector<4x1xf32>
    %438 = arith.divf %436, %437 : vector<4x1xf32>
    %cst_279 = arith.constant 9.99999974E-6 : f32
    %439 = vector.broadcast %cst_279 : f32 to vector<4x1xf32>
    %440 = arith.addf %438, %439 : vector<4x1xf32>
    %441 = math.rsqrt %440 : vector<4x1xf32>
    %442 = vector.broadcast %441 : vector<4x1xf32> to vector<4x64xf32>
    %443 = arith.mulf %433, %442 : vector<4x64xf32>
    %444 = vector.broadcast %425 : vector<1x64xf32> to vector<4x64xf32>
    %445 = arith.mulf %443, %444 : vector<4x64xf32>
    %446 = vector.broadcast %427 : vector<1x64xf32> to vector<4x64xf32>
    %447 = arith.addf %445, %446 : vector<4x64xf32>
    %c1_280 = arith.constant 1 : index
    %c0_281 = arith.constant 0 : index
    %c0_282 = arith.constant 0 : index
    %448 = vector.load %arg5[%c1_280, %c0_281, %c0_282] : memref<4x64x192xf32, #tpu.memory_space<vmem>>, vector<1x64x192xf32>
    %449 = vector.shape_cast %448 : vector<1x64x192xf32> to vector<64x192xf32>
    %cst_283 = arith.constant dense<0.000000e+00> : vector<4x192xf32>
    %450 = tpu.matmul %447, %449, %cst_283 {dimension_numbers = #tpu.dot_dimension_numbers<[1], [0], [0], [1], [0, 0, 1, 1], [], []>} : vector<4x64xf32>, vector<64x192xf32>, vector<4x192xf32> -> vector<4x192xf32>
    %c1_284 = arith.constant 1 : index
    %c0_285 = arith.constant 0 : index
    %c0_286 = arith.constant 0 : index
    %451 = vector.load %arg6[%c1_284, %c0_285, %c0_286] : memref<4x1x192xf32, #tpu.memory_space<vmem>>, vector<1x1x192xf32>
    %452 = vector.shape_cast %451 : vector<1x1x192xf32> to vector<1x192xf32>
    %453 = vector.broadcast %452 : vector<1x192xf32> to vector<4x192xf32>
    %454 = arith.addf %450, %453 : vector<4x192xf32>
    %455 = vector.extract_strided_slice %454 {offsets = [0, 0], sizes = [4, 64], strides = [1, 1]} : vector<4x192xf32> to vector<4x64xf32>
    %cst_287 = arith.constant 2.500000e-01 : f32
    %456 = vector.broadcast %cst_287 : f32 to vector<4x64xf32>
    %457 = arith.mulf %455, %456 : vector<4x64xf32>
    %458 = vector.extract_strided_slice %454 {offsets = [0, 64], sizes = [4, 64], strides = [1, 1]} : vector<4x192xf32> to vector<4x64xf32>
    %459 = vector.extract_strided_slice %454 {offsets = [0, 128], sizes = [4, 64], strides = [1, 1]} : vector<4x192xf32> to vector<4x64xf32>
    %cst_288 = arith.constant dense<0.000000e+00> : vector<4x64xf32>
    %460 = tpu.matmul %3, %458, %cst_288 {dimension_numbers = #tpu.dot_dimension_numbers<[1], [0], [0], [1], [0, 0, 1, 1], [], []>} : vector<4x4xf32>, vector<4x64xf32>, vector<4x64xf32> -> vector<4x64xf32>
    %cst_289 = arith.constant dense<0.000000e+00> : vector<4x64xf32>
    %461 = tpu.matmul %3, %459, %cst_289 {dimension_numbers = #tpu.dot_dimension_numbers<[1], [0], [0], [1], [0, 0, 1, 1], [], []>} : vector<4x4xf32>, vector<4x64xf32>, vector<4x64xf32> -> vector<4x64xf32>
    %462 = arith.mulf %457, %458 : vector<4x64xf32>
    %cst_290 = arith.constant dense<0.000000e+00> : vector<4x4xf32>
    %463 = tpu.matmul %462, %4, %cst_290 {dimension_numbers = #tpu.dot_dimension_numbers<[1], [0], [0], [1], [0, 0, 1, 1], [], []>} : vector<4x64xf32>, vector<64x4xf32>, vector<4x4xf32> -> vector<4x4xf32>
    %464 = arith.mulf %457, %460 : vector<4x64xf32>
    %cst_291 = arith.constant dense<0.000000e+00> : vector<4x4xf32>
    %465 = tpu.matmul %464, %4, %cst_291 {dimension_numbers = #tpu.dot_dimension_numbers<[1], [0], [0], [1], [0, 0, 1, 1], [], []>} : vector<4x64xf32>, vector<64x4xf32>, vector<4x4xf32> -> vector<4x4xf32>
    %466 = arith.maximumf %463, %465 : vector<4x4xf32>
    %467 = arith.subf %463, %466 : vector<4x4xf32>
    %468 = math.exp %467 : vector<4x4xf32>
    %469 = arith.subf %465, %466 : vector<4x4xf32>
    %470 = math.exp %469 : vector<4x4xf32>
    %471 = arith.addf %468, %470 : vector<4x4xf32>
    %472 = tpu.reciprocal %471 {approx = true} : vector<4x4xf32> -> vector<4x4xf32>
    %473 = arith.mulf %468, %472 : vector<4x4xf32>
    %cst_292 = arith.constant dense<0.000000e+00> : vector<4x64xf32>
    %474 = tpu.matmul %473, %5, %cst_292 {dimension_numbers = #tpu.dot_dimension_numbers<[1], [0], [0], [1], [0, 0, 1, 1], [], []>} : vector<4x4xf32>, vector<4x64xf32>, vector<4x64xf32> -> vector<4x64xf32>
    %475 = arith.mulf %470, %472 : vector<4x4xf32>
    %cst_293 = arith.constant dense<0.000000e+00> : vector<4x64xf32>
    %476 = tpu.matmul %475, %5, %cst_293 {dimension_numbers = #tpu.dot_dimension_numbers<[1], [0], [0], [1], [0, 0, 1, 1], [], []>} : vector<4x4xf32>, vector<4x64xf32>, vector<4x64xf32> -> vector<4x64xf32>
    %477 = arith.mulf %474, %459 : vector<4x64xf32>
    %478 = arith.mulf %476, %461 : vector<4x64xf32>
    %479 = arith.addf %477, %478 : vector<4x64xf32>
    %c1_294 = arith.constant 1 : index
    %c0_295 = arith.constant 0 : index
    %c0_296 = arith.constant 0 : index
    %480 = vector.load %arg7[%c1_294, %c0_295, %c0_296] : memref<4x64x64xf32, #tpu.memory_space<vmem>>, vector<1x64x64xf32>
    %481 = vector.shape_cast %480 : vector<1x64x64xf32> to vector<64x64xf32>
    %cst_297 = arith.constant dense<0.000000e+00> : vector<4x64xf32>
    %482 = tpu.matmul %479, %481, %cst_297 {dimension_numbers = #tpu.dot_dimension_numbers<[1], [0], [0], [1], [0, 0, 1, 1], [], []>} : vector<4x64xf32>, vector<64x64xf32>, vector<4x64xf32> -> vector<4x64xf32>
    %483 = arith.addf %423, %482 : vector<4x64xf32>
    %c1_298 = arith.constant 1 : index
    %c0_299 = arith.constant 0 : index
    %c0_300 = arith.constant 0 : index
    %484 = vector.load %arg8[%c1_298, %c0_299, %c0_300] : memref<4x1x64xf32, #tpu.memory_space<vmem>>, vector<1x1x64xf32>
    %485 = vector.shape_cast %484 : vector<1x1x64xf32> to vector<1x64xf32>
    %486 = vector.broadcast %485 : vector<1x64xf32> to vector<4x64xf32>
    %487 = arith.addf %483, %486 : vector<4x64xf32>
    %c1_301 = arith.constant 1 : index
    %c0_302 = arith.constant 0 : index
    %c0_303 = arith.constant 0 : index
    %488 = vector.load %arg9[%c1_301, %c0_302, %c0_303] : memref<4x1x64xf32, #tpu.memory_space<vmem>>, vector<1x1x64xf32>
    %489 = vector.shape_cast %488 : vector<1x1x64xf32> to vector<1x64xf32>
    %c1_304 = arith.constant 1 : index
    %c0_305 = arith.constant 0 : index
    %c0_306 = arith.constant 0 : index
    %490 = vector.load %arg10[%c1_304, %c0_305, %c0_306] : memref<4x1x64xf32, #tpu.memory_space<vmem>>, vector<1x1x64xf32>
    %491 = vector.shape_cast %490 : vector<1x1x64xf32> to vector<1x64xf32>
    %cst_307 = arith.constant dense<0.000000e+00> : vector<4xf32>
    %492 = vector.multi_reduction <add>, %487, %cst_307 [1] : vector<4x64xf32> to vector<4xf32>
    %493 = vector.shape_cast %492 : vector<4xf32> to vector<4x1xf32>
    %cst_308 = arith.constant 6.400000e+01 : f32
    %494 = vector.broadcast %cst_308 : f32 to vector<4x1xf32>
    %495 = arith.divf %493, %494 : vector<4x1xf32>
    %496 = vector.broadcast %495 : vector<4x1xf32> to vector<4x64xf32>
    %497 = arith.subf %487, %496 : vector<4x64xf32>
    %498 = arith.mulf %497, %497 : vector<4x64xf32>
    %cst_309 = arith.constant dense<0.000000e+00> : vector<4xf32>
    %499 = vector.multi_reduction <add>, %498, %cst_309 [1] : vector<4x64xf32> to vector<4xf32>
    %500 = vector.shape_cast %499 : vector<4xf32> to vector<4x1xf32>
    %cst_310 = arith.constant 6.400000e+01 : f32
    %501 = vector.broadcast %cst_310 : f32 to vector<4x1xf32>
    %502 = arith.divf %500, %501 : vector<4x1xf32>
    %cst_311 = arith.constant 9.99999974E-6 : f32
    %503 = vector.broadcast %cst_311 : f32 to vector<4x1xf32>
    %504 = arith.addf %502, %503 : vector<4x1xf32>
    %505 = math.rsqrt %504 : vector<4x1xf32>
    %506 = vector.broadcast %505 : vector<4x1xf32> to vector<4x64xf32>
    %507 = arith.mulf %497, %506 : vector<4x64xf32>
    %508 = vector.broadcast %489 : vector<1x64xf32> to vector<4x64xf32>
    %509 = arith.mulf %507, %508 : vector<4x64xf32>
    %510 = vector.broadcast %491 : vector<1x64xf32> to vector<4x64xf32>
    %511 = arith.addf %509, %510 : vector<4x64xf32>
    %c1_312 = arith.constant 1 : index
    %c0_313 = arith.constant 0 : index
    %c0_314 = arith.constant 0 : index
    %512 = vector.load %arg11[%c1_312, %c0_313, %c0_314] : memref<4x64x64xf32, #tpu.memory_space<vmem>>, vector<1x64x64xf32>
    %513 = vector.shape_cast %512 : vector<1x64x64xf32> to vector<64x64xf32>
    %cst_315 = arith.constant dense<0.000000e+00> : vector<4x64xf32>
    %514 = tpu.matmul %511, %513, %cst_315 {dimension_numbers = #tpu.dot_dimension_numbers<[1], [0], [0], [1], [0, 0, 1, 1], [], []>} : vector<4x64xf32>, vector<64x64xf32>, vector<4x64xf32> -> vector<4x64xf32>
    %c1_316 = arith.constant 1 : index
    %c0_317 = arith.constant 0 : index
    %c0_318 = arith.constant 0 : index
    %515 = vector.load %arg12[%c1_316, %c0_317, %c0_318] : memref<4x1x64xf32, #tpu.memory_space<vmem>>, vector<1x1x64xf32>
    %516 = vector.shape_cast %515 : vector<1x1x64xf32> to vector<1x64xf32>
    %517 = vector.broadcast %516 : vector<1x64xf32> to vector<4x64xf32>
    %518 = arith.addf %514, %517 : vector<4x64xf32>
    %cst_319 = arith.constant 5.000000e-01 : f32
    %519 = vector.broadcast %cst_319 : f32 to vector<4x64xf32>
    %520 = arith.mulf %519, %518 : vector<4x64xf32>
    %cst_320 = arith.constant 0.707106769 : f32
    %521 = vector.broadcast %cst_320 : f32 to vector<4x64xf32>
    %522 = arith.mulf %518, %521 : vector<4x64xf32>
    %523 = math.absf %522 : vector<4x64xf32>
    %cst_321 = arith.constant 0.327591091 : f32
    %524 = vector.broadcast %cst_321 : f32 to vector<4x64xf32>
    %525 = arith.mulf %524, %523 : vector<4x64xf32>
    %cst_322 = arith.constant 1.000000e+00 : f32
    %526 = vector.broadcast %cst_322 : f32 to vector<4x64xf32>
    %527 = arith.addf %526, %525 : vector<4x64xf32>
    %cst_323 = arith.constant 1.000000e+00 : f32
    %528 = vector.broadcast %cst_323 : f32 to vector<4x64xf32>
    %529 = arith.divf %528, %527 : vector<4x64xf32>
    %cst_324 = arith.constant 1.06140542 : f32
    %530 = vector.broadcast %cst_324 : f32 to vector<4x64xf32>
    %531 = arith.mulf %529, %530 : vector<4x64xf32>
    %cst_325 = arith.constant -1.45315206 : f32
    %532 = vector.broadcast %cst_325 : f32 to vector<4x64xf32>
    %533 = arith.addf %532, %531 : vector<4x64xf32>
    %534 = arith.mulf %529, %533 : vector<4x64xf32>
    %cst_326 = arith.constant 1.42141378 : f32
    %535 = vector.broadcast %cst_326 : f32 to vector<4x64xf32>
    %536 = arith.addf %535, %534 : vector<4x64xf32>
    %537 = arith.mulf %529, %536 : vector<4x64xf32>
    %cst_327 = arith.constant -0.284496725 : f32
    %538 = vector.broadcast %cst_327 : f32 to vector<4x64xf32>
    %539 = arith.addf %538, %537 : vector<4x64xf32>
    %540 = arith.mulf %529, %539 : vector<4x64xf32>
    %cst_328 = arith.constant 0.254829586 : f32
    %541 = vector.broadcast %cst_328 : f32 to vector<4x64xf32>
    %542 = arith.addf %541, %540 : vector<4x64xf32>
    %543 = arith.mulf %529, %542 : vector<4x64xf32>
    %cst_329 = arith.constant 0.000000e+00 : f32
    %544 = vector.broadcast %cst_329 : f32 to vector<4x64xf32>
    %545 = arith.subf %544, %523 : vector<4x64xf32>
    %546 = arith.mulf %545, %523 : vector<4x64xf32>
    %547 = math.exp %546 : vector<4x64xf32>
    %548 = arith.mulf %543, %547 : vector<4x64xf32>
    %cst_330 = arith.constant 1.000000e+00 : f32
    %549 = vector.broadcast %cst_330 : f32 to vector<4x64xf32>
    %550 = arith.subf %549, %548 : vector<4x64xf32>
    %cst_331 = arith.constant 0.000000e+00 : f32
    %551 = vector.broadcast %cst_331 : f32 to vector<4x64xf32>
    %552 = arith.cmpf oge, %522, %551 : vector<4x64xf32>
    %cst_332 = arith.constant 0.000000e+00 : f32
    %553 = vector.broadcast %cst_332 : f32 to vector<4x64xf32>
    %554 = arith.subf %553, %550 : vector<4x64xf32>
    %555 = arith.select %552, %550, %554 : vector<4x64xi1>, vector<4x64xf32>
    %cst_333 = arith.constant 1.000000e+00 : f32
    %556 = vector.broadcast %cst_333 : f32 to vector<4x64xf32>
    %557 = arith.addf %556, %555 : vector<4x64xf32>
    %558 = arith.mulf %520, %557 : vector<4x64xf32>
    %c1_334 = arith.constant 1 : index
    %c0_335 = arith.constant 0 : index
    %c0_336 = arith.constant 0 : index
    %559 = vector.load %arg13[%c1_334, %c0_335, %c0_336] : memref<4x64x64xf32, #tpu.memory_space<vmem>>, vector<1x64x64xf32>
    %560 = vector.shape_cast %559 : vector<1x64x64xf32> to vector<64x64xf32>
    %cst_337 = arith.constant dense<0.000000e+00> : vector<4x64xf32>
    %561 = tpu.matmul %558, %560, %cst_337 {dimension_numbers = #tpu.dot_dimension_numbers<[1], [0], [0], [1], [0, 0, 1, 1], [], []>} : vector<4x64xf32>, vector<64x64xf32>, vector<4x64xf32> -> vector<4x64xf32>
    %c1_338 = arith.constant 1 : index
    %c0_339 = arith.constant 0 : index
    %c0_340 = arith.constant 0 : index
    %562 = vector.load %arg14[%c1_338, %c0_339, %c0_340] : memref<4x1x64xf32, #tpu.memory_space<vmem>>, vector<1x1x64xf32>
    %563 = vector.shape_cast %562 : vector<1x1x64xf32> to vector<1x64xf32>
    %564 = vector.broadcast %563 : vector<1x64xf32> to vector<4x64xf32>
    %565 = arith.addf %561, %564 : vector<4x64xf32>
    %566 = arith.addf %487, %565 : vector<4x64xf32>
    %c0_341 = arith.constant 0 : index
    %c0_342 = arith.constant 0 : index
    %c0_343 = arith.constant 0 : index
    %567 = vector.load %arg15[%c0_341, %c0_342, %c0_343] : memref<12x4x4xf32, #tpu.memory_space<vmem>>, vector<1x4x4xf32>
    %568 = vector.shape_cast %567 : vector<1x4x4xf32> to vector<4x4xf32>
    %cst_344 = arith.constant dense<0.000000e+00> : vector<4x64xf32>
    %569 = tpu.matmul %568, %566, %cst_344 {dimension_numbers = #tpu.dot_dimension_numbers<[1], [0], [0], [1], [0, 0, 1, 1], [], []>} : vector<4x4xf32>, vector<4x64xf32>, vector<4x64xf32> -> vector<4x64xf32>
    %c0_345 = arith.constant 0 : index
    %c0_346 = arith.constant 0 : index
    %c0_347 = arith.constant 0 : index
    %570 = vector.load %arg16[%c0_345, %c0_346, %c0_347] : memref<12x4x4xf32, #tpu.memory_space<vmem>>, vector<1x4x4xf32>
    %571 = vector.shape_cast %570 : vector<1x4x4xf32> to vector<4x4xf32>
    %cst_348 = arith.constant dense<0.000000e+00> : vector<4x64xf32>
    %572 = tpu.matmul %571, %566, %cst_348 {dimension_numbers = #tpu.dot_dimension_numbers<[1], [0], [0], [1], [0, 0, 1, 1], [], []>} : vector<4x4xf32>, vector<4x64xf32>, vector<4x64xf32> -> vector<4x64xf32>
    %c0_349 = arith.constant 0 : index
    %c0_350 = arith.constant 0 : index
    %c0_351 = arith.constant 0 : index
    %573 = vector.load %arg17[%c0_349, %c0_350, %c0_351] : memref<12x4x4xf32, #tpu.memory_space<vmem>>, vector<1x4x4xf32>
    %574 = vector.shape_cast %573 : vector<1x4x4xf32> to vector<4x4xf32>
    %cst_352 = arith.constant dense<0.000000e+00> : vector<4x64xf32>
    %575 = tpu.matmul %574, %566, %cst_352 {dimension_numbers = #tpu.dot_dimension_numbers<[1], [0], [0], [1], [0, 0, 1, 1], [], []>} : vector<4x4xf32>, vector<4x64xf32>, vector<4x64xf32> -> vector<4x64xf32>
    %cst_353 = arith.constant dense<0.000000e+00> : vector<4x64xf32>
    %576 = tpu.matmul %569, %0, %cst_353 {dimension_numbers = #tpu.dot_dimension_numbers<[1], [0], [0], [1], [0, 0, 1, 1], [], []>} : vector<4x64xf32>, vector<64x64xf32>, vector<4x64xf32> -> vector<4x64xf32>
    %577 = arith.addf %576, %572 : vector<4x64xf32>
    %cst_354 = arith.constant dense<0.000000e+00> : vector<4x64xf32>
    %578 = tpu.matmul %575, %1, %cst_354 {dimension_numbers = #tpu.dot_dimension_numbers<[1], [0], [0], [1], [0, 0, 1, 1], [], []>} : vector<4x64xf32>, vector<64x64xf32>, vector<4x64xf32> -> vector<4x64xf32>
    %579 = arith.addf %577, %578 : vector<4x64xf32>
    %c0_355 = arith.constant 0 : index
    %c0_356 = arith.constant 0 : index
    %c0_357 = arith.constant 0 : index
    %580 = vector.load %arg18[%c0_355, %c0_356, %c0_357] : memref<12x4x1xf32, #tpu.memory_space<vmem>>, vector<1x4x1xf32>
    %581 = vector.shape_cast %580 : vector<1x4x1xf32> to vector<4x1xf32>
    %582 = vector.broadcast %581 : vector<4x1xf32> to vector<4x64xf32>
    %583 = arith.addf %579, %582 : vector<4x64xf32>
    %cst_358 = arith.constant dense<0.000000e+00> : vector<4x64xf32>
    %584 = tpu.matmul %2, %583, %cst_358 {dimension_numbers = #tpu.dot_dimension_numbers<[1], [0], [0], [1], [0, 0, 1, 1], [], []>} : vector<4x4xf32>, vector<4x64xf32>, vector<4x64xf32> -> vector<4x64xf32>
    %cst_359 = arith.constant dense<0.000000e+00> : vector<4xf32>
    %585 = vector.multi_reduction <add>, %584, %cst_359 [1] : vector<4x64xf32> to vector<4xf32>
    %586 = vector.shape_cast %585 : vector<4xf32> to vector<4x1xf32>
    %cst_360 = arith.constant 7.812500e-03 : f32
    %587 = vector.broadcast %cst_360 : f32 to vector<4x1xf32>
    %588 = arith.mulf %586, %587 : vector<4x1xf32>
    %589 = vector.broadcast %588 : vector<4x1xf32> to vector<4x64xf32>
    %590 = arith.subf %583, %589 : vector<4x64xf32>
    %591 = arith.mulf %590, %590 : vector<4x64xf32>
    %cst_361 = arith.constant dense<0.000000e+00> : vector<4x64xf32>
    %592 = tpu.matmul %2, %591, %cst_361 {dimension_numbers = #tpu.dot_dimension_numbers<[1], [0], [0], [1], [0, 0, 1, 1], [], []>} : vector<4x4xf32>, vector<4x64xf32>, vector<4x64xf32> -> vector<4x64xf32>
    %cst_362 = arith.constant dense<0.000000e+00> : vector<4xf32>
    %593 = vector.multi_reduction <add>, %592, %cst_362 [1] : vector<4x64xf32> to vector<4xf32>
    %594 = vector.shape_cast %593 : vector<4xf32> to vector<4x1xf32>
    %cst_363 = arith.constant 7.812500e-03 : f32
    %595 = vector.broadcast %cst_363 : f32 to vector<4x1xf32>
    %596 = arith.mulf %594, %595 : vector<4x1xf32>
    %cst_364 = arith.constant 9.99999974E-6 : f32
    %597 = vector.broadcast %cst_364 : f32 to vector<4x1xf32>
    %598 = arith.addf %596, %597 : vector<4x1xf32>
    %599 = math.rsqrt %598 : vector<4x1xf32>
    %600 = vector.broadcast %599 : vector<4x1xf32> to vector<4x64xf32>
    %601 = arith.mulf %590, %600 : vector<4x64xf32>
    %c0_365 = arith.constant 0 : index
    %c0_366 = arith.constant 0 : index
    %c0_367 = arith.constant 0 : index
    %602 = vector.load %arg19[%c0_365, %c0_366, %c0_367] : memref<12x4x1xf32, #tpu.memory_space<vmem>>, vector<1x4x1xf32>
    %603 = vector.shape_cast %602 : vector<1x4x1xf32> to vector<4x1xf32>
    %604 = vector.broadcast %603 : vector<4x1xf32> to vector<4x64xf32>
    %605 = arith.mulf %601, %604 : vector<4x64xf32>
    %c0_368 = arith.constant 0 : index
    %c0_369 = arith.constant 0 : index
    %c0_370 = arith.constant 0 : index
    %606 = vector.load %arg20[%c0_368, %c0_369, %c0_370] : memref<12x4x1xf32, #tpu.memory_space<vmem>>, vector<1x4x1xf32>
    %607 = vector.shape_cast %606 : vector<1x4x1xf32> to vector<4x1xf32>
    %608 = vector.broadcast %607 : vector<4x1xf32> to vector<4x64xf32>
    %609 = arith.addf %605, %608 : vector<4x64xf32>
    %cst_371 = arith.constant 0.000000e+00 : f32
    %610 = vector.broadcast %cst_371 : f32 to vector<4x64xf32>
    %611 = arith.maximumf %609, %610 : vector<4x64xf32>
    %c1_372 = arith.constant 1 : index
    %c0_373 = arith.constant 0 : index
    %c0_374 = arith.constant 0 : index
    %612 = vector.load %arg15[%c1_372, %c0_373, %c0_374] : memref<12x4x4xf32, #tpu.memory_space<vmem>>, vector<1x4x4xf32>
    %613 = vector.shape_cast %612 : vector<1x4x4xf32> to vector<4x4xf32>
    %cst_375 = arith.constant dense<0.000000e+00> : vector<4x64xf32>
    %614 = tpu.matmul %613, %611, %cst_375 {dimension_numbers = #tpu.dot_dimension_numbers<[1], [0], [0], [1], [0, 0, 1, 1], [], []>} : vector<4x4xf32>, vector<4x64xf32>, vector<4x64xf32> -> vector<4x64xf32>
    %c1_376 = arith.constant 1 : index
    %c0_377 = arith.constant 0 : index
    %c0_378 = arith.constant 0 : index
    %615 = vector.load %arg16[%c1_376, %c0_377, %c0_378] : memref<12x4x4xf32, #tpu.memory_space<vmem>>, vector<1x4x4xf32>
    %616 = vector.shape_cast %615 : vector<1x4x4xf32> to vector<4x4xf32>
    %cst_379 = arith.constant dense<0.000000e+00> : vector<4x64xf32>
    %617 = tpu.matmul %616, %611, %cst_379 {dimension_numbers = #tpu.dot_dimension_numbers<[1], [0], [0], [1], [0, 0, 1, 1], [], []>} : vector<4x4xf32>, vector<4x64xf32>, vector<4x64xf32> -> vector<4x64xf32>
    %c1_380 = arith.constant 1 : index
    %c0_381 = arith.constant 0 : index
    %c0_382 = arith.constant 0 : index
    %618 = vector.load %arg17[%c1_380, %c0_381, %c0_382] : memref<12x4x4xf32, #tpu.memory_space<vmem>>, vector<1x4x4xf32>
    %619 = vector.shape_cast %618 : vector<1x4x4xf32> to vector<4x4xf32>
    %cst_383 = arith.constant dense<0.000000e+00> : vector<4x64xf32>
    %620 = tpu.matmul %619, %611, %cst_383 {dimension_numbers = #tpu.dot_dimension_numbers<[1], [0], [0], [1], [0, 0, 1, 1], [], []>} : vector<4x4xf32>, vector<4x64xf32>, vector<4x64xf32> -> vector<4x64xf32>
    %cst_384 = arith.constant dense<0.000000e+00> : vector<4x64xf32>
    %621 = tpu.matmul %614, %0, %cst_384 {dimension_numbers = #tpu.dot_dimension_numbers<[1], [0], [0], [1], [0, 0, 1, 1], [], []>} : vector<4x64xf32>, vector<64x64xf32>, vector<4x64xf32> -> vector<4x64xf32>
    %622 = arith.addf %621, %617 : vector<4x64xf32>
    %cst_385 = arith.constant dense<0.000000e+00> : vector<4x64xf32>
    %623 = tpu.matmul %620, %1, %cst_385 {dimension_numbers = #tpu.dot_dimension_numbers<[1], [0], [0], [1], [0, 0, 1, 1], [], []>} : vector<4x64xf32>, vector<64x64xf32>, vector<4x64xf32> -> vector<4x64xf32>
    %624 = arith.addf %622, %623 : vector<4x64xf32>
    %c1_386 = arith.constant 1 : index
    %c0_387 = arith.constant 0 : index
    %c0_388 = arith.constant 0 : index
    %625 = vector.load %arg18[%c1_386, %c0_387, %c0_388] : memref<12x4x1xf32, #tpu.memory_space<vmem>>, vector<1x4x1xf32>
    %626 = vector.shape_cast %625 : vector<1x4x1xf32> to vector<4x1xf32>
    %627 = vector.broadcast %626 : vector<4x1xf32> to vector<4x64xf32>
    %628 = arith.addf %624, %627 : vector<4x64xf32>
    %cst_389 = arith.constant dense<0.000000e+00> : vector<4x64xf32>
    %629 = tpu.matmul %2, %628, %cst_389 {dimension_numbers = #tpu.dot_dimension_numbers<[1], [0], [0], [1], [0, 0, 1, 1], [], []>} : vector<4x4xf32>, vector<4x64xf32>, vector<4x64xf32> -> vector<4x64xf32>
    %cst_390 = arith.constant dense<0.000000e+00> : vector<4xf32>
    %630 = vector.multi_reduction <add>, %629, %cst_390 [1] : vector<4x64xf32> to vector<4xf32>
    %631 = vector.shape_cast %630 : vector<4xf32> to vector<4x1xf32>
    %cst_391 = arith.constant 7.812500e-03 : f32
    %632 = vector.broadcast %cst_391 : f32 to vector<4x1xf32>
    %633 = arith.mulf %631, %632 : vector<4x1xf32>
    %634 = vector.broadcast %633 : vector<4x1xf32> to vector<4x64xf32>
    %635 = arith.subf %628, %634 : vector<4x64xf32>
    %636 = arith.mulf %635, %635 : vector<4x64xf32>
    %cst_392 = arith.constant dense<0.000000e+00> : vector<4x64xf32>
    %637 = tpu.matmul %2, %636, %cst_392 {dimension_numbers = #tpu.dot_dimension_numbers<[1], [0], [0], [1], [0, 0, 1, 1], [], []>} : vector<4x4xf32>, vector<4x64xf32>, vector<4x64xf32> -> vector<4x64xf32>
    %cst_393 = arith.constant dense<0.000000e+00> : vector<4xf32>
    %638 = vector.multi_reduction <add>, %637, %cst_393 [1] : vector<4x64xf32> to vector<4xf32>
    %639 = vector.shape_cast %638 : vector<4xf32> to vector<4x1xf32>
    %cst_394 = arith.constant 7.812500e-03 : f32
    %640 = vector.broadcast %cst_394 : f32 to vector<4x1xf32>
    %641 = arith.mulf %639, %640 : vector<4x1xf32>
    %cst_395 = arith.constant 9.99999974E-6 : f32
    %642 = vector.broadcast %cst_395 : f32 to vector<4x1xf32>
    %643 = arith.addf %641, %642 : vector<4x1xf32>
    %644 = math.rsqrt %643 : vector<4x1xf32>
    %645 = vector.broadcast %644 : vector<4x1xf32> to vector<4x64xf32>
    %646 = arith.mulf %635, %645 : vector<4x64xf32>
    %c1_396 = arith.constant 1 : index
    %c0_397 = arith.constant 0 : index
    %c0_398 = arith.constant 0 : index
    %647 = vector.load %arg19[%c1_396, %c0_397, %c0_398] : memref<12x4x1xf32, #tpu.memory_space<vmem>>, vector<1x4x1xf32>
    %648 = vector.shape_cast %647 : vector<1x4x1xf32> to vector<4x1xf32>
    %649 = vector.broadcast %648 : vector<4x1xf32> to vector<4x64xf32>
    %650 = arith.mulf %646, %649 : vector<4x64xf32>
    %c1_399 = arith.constant 1 : index
    %c0_400 = arith.constant 0 : index
    %c0_401 = arith.constant 0 : index
    %651 = vector.load %arg20[%c1_399, %c0_400, %c0_401] : memref<12x4x1xf32, #tpu.memory_space<vmem>>, vector<1x4x1xf32>
    %652 = vector.shape_cast %651 : vector<1x4x1xf32> to vector<4x1xf32>
    %653 = vector.broadcast %652 : vector<4x1xf32> to vector<4x64xf32>
    %654 = arith.addf %650, %653 : vector<4x64xf32>
    %cst_402 = arith.constant 0.000000e+00 : f32
    %655 = vector.broadcast %cst_402 : f32 to vector<4x64xf32>
    %656 = arith.maximumf %654, %655 : vector<4x64xf32>
    %c2_403 = arith.constant 2 : index
    %c0_404 = arith.constant 0 : index
    %c0_405 = arith.constant 0 : index
    %657 = vector.load %arg15[%c2_403, %c0_404, %c0_405] : memref<12x4x4xf32, #tpu.memory_space<vmem>>, vector<1x4x4xf32>
    %658 = vector.shape_cast %657 : vector<1x4x4xf32> to vector<4x4xf32>
    %cst_406 = arith.constant dense<0.000000e+00> : vector<4x64xf32>
    %659 = tpu.matmul %658, %656, %cst_406 {dimension_numbers = #tpu.dot_dimension_numbers<[1], [0], [0], [1], [0, 0, 1, 1], [], []>} : vector<4x4xf32>, vector<4x64xf32>, vector<4x64xf32> -> vector<4x64xf32>
    %c2_407 = arith.constant 2 : index
    %c0_408 = arith.constant 0 : index
    %c0_409 = arith.constant 0 : index
    %660 = vector.load %arg16[%c2_407, %c0_408, %c0_409] : memref<12x4x4xf32, #tpu.memory_space<vmem>>, vector<1x4x4xf32>
    %661 = vector.shape_cast %660 : vector<1x4x4xf32> to vector<4x4xf32>
    %cst_410 = arith.constant dense<0.000000e+00> : vector<4x64xf32>
    %662 = tpu.matmul %661, %656, %cst_410 {dimension_numbers = #tpu.dot_dimension_numbers<[1], [0], [0], [1], [0, 0, 1, 1], [], []>} : vector<4x4xf32>, vector<4x64xf32>, vector<4x64xf32> -> vector<4x64xf32>
    %c2_411 = arith.constant 2 : index
    %c0_412 = arith.constant 0 : index
    %c0_413 = arith.constant 0 : index
    %663 = vector.load %arg17[%c2_411, %c0_412, %c0_413] : memref<12x4x4xf32, #tpu.memory_space<vmem>>, vector<1x4x4xf32>
    %664 = vector.shape_cast %663 : vector<1x4x4xf32> to vector<4x4xf32>
    %cst_414 = arith.constant dense<0.000000e+00> : vector<4x64xf32>
    %665 = tpu.matmul %664, %656, %cst_414 {dimension_numbers = #tpu.dot_dimension_numbers<[1], [0], [0], [1], [0, 0, 1, 1], [], []>} : vector<4x4xf32>, vector<4x64xf32>, vector<4x64xf32> -> vector<4x64xf32>
    %cst_415 = arith.constant dense<0.000000e+00> : vector<4x64xf32>
    %666 = tpu.matmul %659, %0, %cst_415 {dimension_numbers = #tpu.dot_dimension_numbers<[1], [0], [0], [1], [0, 0, 1, 1], [], []>} : vector<4x64xf32>, vector<64x64xf32>, vector<4x64xf32> -> vector<4x64xf32>
    %667 = arith.addf %666, %662 : vector<4x64xf32>
    %cst_416 = arith.constant dense<0.000000e+00> : vector<4x64xf32>
    %668 = tpu.matmul %665, %1, %cst_416 {dimension_numbers = #tpu.dot_dimension_numbers<[1], [0], [0], [1], [0, 0, 1, 1], [], []>} : vector<4x64xf32>, vector<64x64xf32>, vector<4x64xf32> -> vector<4x64xf32>
    %669 = arith.addf %667, %668 : vector<4x64xf32>
    %c2_417 = arith.constant 2 : index
    %c0_418 = arith.constant 0 : index
    %c0_419 = arith.constant 0 : index
    %670 = vector.load %arg18[%c2_417, %c0_418, %c0_419] : memref<12x4x1xf32, #tpu.memory_space<vmem>>, vector<1x4x1xf32>
    %671 = vector.shape_cast %670 : vector<1x4x1xf32> to vector<4x1xf32>
    %672 = vector.broadcast %671 : vector<4x1xf32> to vector<4x64xf32>
    %673 = arith.addf %669, %672 : vector<4x64xf32>
    %cst_420 = arith.constant dense<0.000000e+00> : vector<4x64xf32>
    %674 = tpu.matmul %2, %673, %cst_420 {dimension_numbers = #tpu.dot_dimension_numbers<[1], [0], [0], [1], [0, 0, 1, 1], [], []>} : vector<4x4xf32>, vector<4x64xf32>, vector<4x64xf32> -> vector<4x64xf32>
    %cst_421 = arith.constant dense<0.000000e+00> : vector<4xf32>
    %675 = vector.multi_reduction <add>, %674, %cst_421 [1] : vector<4x64xf32> to vector<4xf32>
    %676 = vector.shape_cast %675 : vector<4xf32> to vector<4x1xf32>
    %cst_422 = arith.constant 7.812500e-03 : f32
    %677 = vector.broadcast %cst_422 : f32 to vector<4x1xf32>
    %678 = arith.mulf %676, %677 : vector<4x1xf32>
    %679 = vector.broadcast %678 : vector<4x1xf32> to vector<4x64xf32>
    %680 = arith.subf %673, %679 : vector<4x64xf32>
    %681 = arith.mulf %680, %680 : vector<4x64xf32>
    %cst_423 = arith.constant dense<0.000000e+00> : vector<4x64xf32>
    %682 = tpu.matmul %2, %681, %cst_423 {dimension_numbers = #tpu.dot_dimension_numbers<[1], [0], [0], [1], [0, 0, 1, 1], [], []>} : vector<4x4xf32>, vector<4x64xf32>, vector<4x64xf32> -> vector<4x64xf32>
    %cst_424 = arith.constant dense<0.000000e+00> : vector<4xf32>
    %683 = vector.multi_reduction <add>, %682, %cst_424 [1] : vector<4x64xf32> to vector<4xf32>
    %684 = vector.shape_cast %683 : vector<4xf32> to vector<4x1xf32>
    %cst_425 = arith.constant 7.812500e-03 : f32
    %685 = vector.broadcast %cst_425 : f32 to vector<4x1xf32>
    %686 = arith.mulf %684, %685 : vector<4x1xf32>
    %cst_426 = arith.constant 9.99999974E-6 : f32
    %687 = vector.broadcast %cst_426 : f32 to vector<4x1xf32>
    %688 = arith.addf %686, %687 : vector<4x1xf32>
    %689 = math.rsqrt %688 : vector<4x1xf32>
    %690 = vector.broadcast %689 : vector<4x1xf32> to vector<4x64xf32>
    %691 = arith.mulf %680, %690 : vector<4x64xf32>
    %c2_427 = arith.constant 2 : index
    %c0_428 = arith.constant 0 : index
    %c0_429 = arith.constant 0 : index
    %692 = vector.load %arg19[%c2_427, %c0_428, %c0_429] : memref<12x4x1xf32, #tpu.memory_space<vmem>>, vector<1x4x1xf32>
    %693 = vector.shape_cast %692 : vector<1x4x1xf32> to vector<4x1xf32>
    %694 = vector.broadcast %693 : vector<4x1xf32> to vector<4x64xf32>
    %695 = arith.mulf %691, %694 : vector<4x64xf32>
    %c2_430 = arith.constant 2 : index
    %c0_431 = arith.constant 0 : index
    %c0_432 = arith.constant 0 : index
    %696 = vector.load %arg20[%c2_430, %c0_431, %c0_432] : memref<12x4x1xf32, #tpu.memory_space<vmem>>, vector<1x4x1xf32>
    %697 = vector.shape_cast %696 : vector<1x4x1xf32> to vector<4x1xf32>
    %698 = vector.broadcast %697 : vector<4x1xf32> to vector<4x64xf32>
    %699 = arith.addf %695, %698 : vector<4x64xf32>
    %cst_433 = arith.constant 0.000000e+00 : f32
    %700 = vector.broadcast %cst_433 : f32 to vector<4x64xf32>
    %701 = arith.maximumf %699, %700 : vector<4x64xf32>
    %c3_434 = arith.constant 3 : index
    %c0_435 = arith.constant 0 : index
    %c0_436 = arith.constant 0 : index
    %702 = vector.load %arg15[%c3_434, %c0_435, %c0_436] : memref<12x4x4xf32, #tpu.memory_space<vmem>>, vector<1x4x4xf32>
    %703 = vector.shape_cast %702 : vector<1x4x4xf32> to vector<4x4xf32>
    %cst_437 = arith.constant dense<0.000000e+00> : vector<4x64xf32>
    %704 = tpu.matmul %703, %701, %cst_437 {dimension_numbers = #tpu.dot_dimension_numbers<[1], [0], [0], [1], [0, 0, 1, 1], [], []>} : vector<4x4xf32>, vector<4x64xf32>, vector<4x64xf32> -> vector<4x64xf32>
    %c3_438 = arith.constant 3 : index
    %c0_439 = arith.constant 0 : index
    %c0_440 = arith.constant 0 : index
    %705 = vector.load %arg16[%c3_438, %c0_439, %c0_440] : memref<12x4x4xf32, #tpu.memory_space<vmem>>, vector<1x4x4xf32>
    %706 = vector.shape_cast %705 : vector<1x4x4xf32> to vector<4x4xf32>
    %cst_441 = arith.constant dense<0.000000e+00> : vector<4x64xf32>
    %707 = tpu.matmul %706, %701, %cst_441 {dimension_numbers = #tpu.dot_dimension_numbers<[1], [0], [0], [1], [0, 0, 1, 1], [], []>} : vector<4x4xf32>, vector<4x64xf32>, vector<4x64xf32> -> vector<4x64xf32>
    %c3_442 = arith.constant 3 : index
    %c0_443 = arith.constant 0 : index
    %c0_444 = arith.constant 0 : index
    %708 = vector.load %arg17[%c3_442, %c0_443, %c0_444] : memref<12x4x4xf32, #tpu.memory_space<vmem>>, vector<1x4x4xf32>
    %709 = vector.shape_cast %708 : vector<1x4x4xf32> to vector<4x4xf32>
    %cst_445 = arith.constant dense<0.000000e+00> : vector<4x64xf32>
    %710 = tpu.matmul %709, %701, %cst_445 {dimension_numbers = #tpu.dot_dimension_numbers<[1], [0], [0], [1], [0, 0, 1, 1], [], []>} : vector<4x4xf32>, vector<4x64xf32>, vector<4x64xf32> -> vector<4x64xf32>
    %cst_446 = arith.constant dense<0.000000e+00> : vector<4x64xf32>
    %711 = tpu.matmul %704, %0, %cst_446 {dimension_numbers = #tpu.dot_dimension_numbers<[1], [0], [0], [1], [0, 0, 1, 1], [], []>} : vector<4x64xf32>, vector<64x64xf32>, vector<4x64xf32> -> vector<4x64xf32>
    %712 = arith.addf %711, %707 : vector<4x64xf32>
    %cst_447 = arith.constant dense<0.000000e+00> : vector<4x64xf32>
    %713 = tpu.matmul %710, %1, %cst_447 {dimension_numbers = #tpu.dot_dimension_numbers<[1], [0], [0], [1], [0, 0, 1, 1], [], []>} : vector<4x64xf32>, vector<64x64xf32>, vector<4x64xf32> -> vector<4x64xf32>
    %714 = arith.addf %712, %713 : vector<4x64xf32>
    %c3_448 = arith.constant 3 : index
    %c0_449 = arith.constant 0 : index
    %c0_450 = arith.constant 0 : index
    %715 = vector.load %arg18[%c3_448, %c0_449, %c0_450] : memref<12x4x1xf32, #tpu.memory_space<vmem>>, vector<1x4x1xf32>
    %716 = vector.shape_cast %715 : vector<1x4x1xf32> to vector<4x1xf32>
    %717 = vector.broadcast %716 : vector<4x1xf32> to vector<4x64xf32>
    %718 = arith.addf %714, %717 : vector<4x64xf32>
    %cst_451 = arith.constant dense<0.000000e+00> : vector<4x64xf32>
    %719 = tpu.matmul %2, %718, %cst_451 {dimension_numbers = #tpu.dot_dimension_numbers<[1], [0], [0], [1], [0, 0, 1, 1], [], []>} : vector<4x4xf32>, vector<4x64xf32>, vector<4x64xf32> -> vector<4x64xf32>
    %cst_452 = arith.constant dense<0.000000e+00> : vector<4xf32>
    %720 = vector.multi_reduction <add>, %719, %cst_452 [1] : vector<4x64xf32> to vector<4xf32>
    %721 = vector.shape_cast %720 : vector<4xf32> to vector<4x1xf32>
    %cst_453 = arith.constant 7.812500e-03 : f32
    %722 = vector.broadcast %cst_453 : f32 to vector<4x1xf32>
    %723 = arith.mulf %721, %722 : vector<4x1xf32>
    %724 = vector.broadcast %723 : vector<4x1xf32> to vector<4x64xf32>
    %725 = arith.subf %718, %724 : vector<4x64xf32>
    %726 = arith.mulf %725, %725 : vector<4x64xf32>
    %cst_454 = arith.constant dense<0.000000e+00> : vector<4x64xf32>
    %727 = tpu.matmul %2, %726, %cst_454 {dimension_numbers = #tpu.dot_dimension_numbers<[1], [0], [0], [1], [0, 0, 1, 1], [], []>} : vector<4x4xf32>, vector<4x64xf32>, vector<4x64xf32> -> vector<4x64xf32>
    %cst_455 = arith.constant dense<0.000000e+00> : vector<4xf32>
    %728 = vector.multi_reduction <add>, %727, %cst_455 [1] : vector<4x64xf32> to vector<4xf32>
    %729 = vector.shape_cast %728 : vector<4xf32> to vector<4x1xf32>
    %cst_456 = arith.constant 7.812500e-03 : f32
    %730 = vector.broadcast %cst_456 : f32 to vector<4x1xf32>
    %731 = arith.mulf %729, %730 : vector<4x1xf32>
    %cst_457 = arith.constant 9.99999974E-6 : f32
    %732 = vector.broadcast %cst_457 : f32 to vector<4x1xf32>
    %733 = arith.addf %731, %732 : vector<4x1xf32>
    %734 = math.rsqrt %733 : vector<4x1xf32>
    %735 = vector.broadcast %734 : vector<4x1xf32> to vector<4x64xf32>
    %736 = arith.mulf %725, %735 : vector<4x64xf32>
    %c3_458 = arith.constant 3 : index
    %c0_459 = arith.constant 0 : index
    %c0_460 = arith.constant 0 : index
    %737 = vector.load %arg19[%c3_458, %c0_459, %c0_460] : memref<12x4x1xf32, #tpu.memory_space<vmem>>, vector<1x4x1xf32>
    %738 = vector.shape_cast %737 : vector<1x4x1xf32> to vector<4x1xf32>
    %739 = vector.broadcast %738 : vector<4x1xf32> to vector<4x64xf32>
    %740 = arith.mulf %736, %739 : vector<4x64xf32>
    %c3_461 = arith.constant 3 : index
    %c0_462 = arith.constant 0 : index
    %c0_463 = arith.constant 0 : index
    %741 = vector.load %arg20[%c3_461, %c0_462, %c0_463] : memref<12x4x1xf32, #tpu.memory_space<vmem>>, vector<1x4x1xf32>
    %742 = vector.shape_cast %741 : vector<1x4x1xf32> to vector<4x1xf32>
    %743 = vector.broadcast %742 : vector<4x1xf32> to vector<4x64xf32>
    %744 = arith.addf %740, %743 : vector<4x64xf32>
    %cst_464 = arith.constant 0.000000e+00 : f32
    %745 = vector.broadcast %cst_464 : f32 to vector<4x64xf32>
    %746 = arith.maximumf %744, %745 : vector<4x64xf32>
    %c4_465 = arith.constant 4 : index
    %c0_466 = arith.constant 0 : index
    %c0_467 = arith.constant 0 : index
    %747 = vector.load %arg15[%c4_465, %c0_466, %c0_467] : memref<12x4x4xf32, #tpu.memory_space<vmem>>, vector<1x4x4xf32>
    %748 = vector.shape_cast %747 : vector<1x4x4xf32> to vector<4x4xf32>
    %cst_468 = arith.constant dense<0.000000e+00> : vector<4x64xf32>
    %749 = tpu.matmul %748, %746, %cst_468 {dimension_numbers = #tpu.dot_dimension_numbers<[1], [0], [0], [1], [0, 0, 1, 1], [], []>} : vector<4x4xf32>, vector<4x64xf32>, vector<4x64xf32> -> vector<4x64xf32>
    %c4_469 = arith.constant 4 : index
    %c0_470 = arith.constant 0 : index
    %c0_471 = arith.constant 0 : index
    %750 = vector.load %arg16[%c4_469, %c0_470, %c0_471] : memref<12x4x4xf32, #tpu.memory_space<vmem>>, vector<1x4x4xf32>
    %751 = vector.shape_cast %750 : vector<1x4x4xf32> to vector<4x4xf32>
    %cst_472 = arith.constant dense<0.000000e+00> : vector<4x64xf32>
    %752 = tpu.matmul %751, %746, %cst_472 {dimension_numbers = #tpu.dot_dimension_numbers<[1], [0], [0], [1], [0, 0, 1, 1], [], []>} : vector<4x4xf32>, vector<4x64xf32>, vector<4x64xf32> -> vector<4x64xf32>
    %c4_473 = arith.constant 4 : index
    %c0_474 = arith.constant 0 : index
    %c0_475 = arith.constant 0 : index
    %753 = vector.load %arg17[%c4_473, %c0_474, %c0_475] : memref<12x4x4xf32, #tpu.memory_space<vmem>>, vector<1x4x4xf32>
    %754 = vector.shape_cast %753 : vector<1x4x4xf32> to vector<4x4xf32>
    %cst_476 = arith.constant dense<0.000000e+00> : vector<4x64xf32>
    %755 = tpu.matmul %754, %746, %cst_476 {dimension_numbers = #tpu.dot_dimension_numbers<[1], [0], [0], [1], [0, 0, 1, 1], [], []>} : vector<4x4xf32>, vector<4x64xf32>, vector<4x64xf32> -> vector<4x64xf32>
    %cst_477 = arith.constant dense<0.000000e+00> : vector<4x64xf32>
    %756 = tpu.matmul %749, %0, %cst_477 {dimension_numbers = #tpu.dot_dimension_numbers<[1], [0], [0], [1], [0, 0, 1, 1], [], []>} : vector<4x64xf32>, vector<64x64xf32>, vector<4x64xf32> -> vector<4x64xf32>
    %757 = arith.addf %756, %752 : vector<4x64xf32>
    %cst_478 = arith.constant dense<0.000000e+00> : vector<4x64xf32>
    %758 = tpu.matmul %755, %1, %cst_478 {dimension_numbers = #tpu.dot_dimension_numbers<[1], [0], [0], [1], [0, 0, 1, 1], [], []>} : vector<4x64xf32>, vector<64x64xf32>, vector<4x64xf32> -> vector<4x64xf32>
    %759 = arith.addf %757, %758 : vector<4x64xf32>
    %c4_479 = arith.constant 4 : index
    %c0_480 = arith.constant 0 : index
    %c0_481 = arith.constant 0 : index
    %760 = vector.load %arg18[%c4_479, %c0_480, %c0_481] : memref<12x4x1xf32, #tpu.memory_space<vmem>>, vector<1x4x1xf32>
    %761 = vector.shape_cast %760 : vector<1x4x1xf32> to vector<4x1xf32>
    %762 = vector.broadcast %761 : vector<4x1xf32> to vector<4x64xf32>
    %763 = arith.addf %759, %762 : vector<4x64xf32>
    %cst_482 = arith.constant dense<0.000000e+00> : vector<4x64xf32>
    %764 = tpu.matmul %2, %763, %cst_482 {dimension_numbers = #tpu.dot_dimension_numbers<[1], [0], [0], [1], [0, 0, 1, 1], [], []>} : vector<4x4xf32>, vector<4x64xf32>, vector<4x64xf32> -> vector<4x64xf32>
    %cst_483 = arith.constant dense<0.000000e+00> : vector<4xf32>
    %765 = vector.multi_reduction <add>, %764, %cst_483 [1] : vector<4x64xf32> to vector<4xf32>
    %766 = vector.shape_cast %765 : vector<4xf32> to vector<4x1xf32>
    %cst_484 = arith.constant 7.812500e-03 : f32
    %767 = vector.broadcast %cst_484 : f32 to vector<4x1xf32>
    %768 = arith.mulf %766, %767 : vector<4x1xf32>
    %769 = vector.broadcast %768 : vector<4x1xf32> to vector<4x64xf32>
    %770 = arith.subf %763, %769 : vector<4x64xf32>
    %771 = arith.mulf %770, %770 : vector<4x64xf32>
    %cst_485 = arith.constant dense<0.000000e+00> : vector<4x64xf32>
    %772 = tpu.matmul %2, %771, %cst_485 {dimension_numbers = #tpu.dot_dimension_numbers<[1], [0], [0], [1], [0, 0, 1, 1], [], []>} : vector<4x4xf32>, vector<4x64xf32>, vector<4x64xf32> -> vector<4x64xf32>
    %cst_486 = arith.constant dense<0.000000e+00> : vector<4xf32>
    %773 = vector.multi_reduction <add>, %772, %cst_486 [1] : vector<4x64xf32> to vector<4xf32>
    %774 = vector.shape_cast %773 : vector<4xf32> to vector<4x1xf32>
    %cst_487 = arith.constant 7.812500e-03 : f32
    %775 = vector.broadcast %cst_487 : f32 to vector<4x1xf32>
    %776 = arith.mulf %774, %775 : vector<4x1xf32>
    %cst_488 = arith.constant 9.99999974E-6 : f32
    %777 = vector.broadcast %cst_488 : f32 to vector<4x1xf32>
    %778 = arith.addf %776, %777 : vector<4x1xf32>
    %779 = math.rsqrt %778 : vector<4x1xf32>
    %780 = vector.broadcast %779 : vector<4x1xf32> to vector<4x64xf32>
    %781 = arith.mulf %770, %780 : vector<4x64xf32>
    %c4_489 = arith.constant 4 : index
    %c0_490 = arith.constant 0 : index
    %c0_491 = arith.constant 0 : index
    %782 = vector.load %arg19[%c4_489, %c0_490, %c0_491] : memref<12x4x1xf32, #tpu.memory_space<vmem>>, vector<1x4x1xf32>
    %783 = vector.shape_cast %782 : vector<1x4x1xf32> to vector<4x1xf32>
    %784 = vector.broadcast %783 : vector<4x1xf32> to vector<4x64xf32>
    %785 = arith.mulf %781, %784 : vector<4x64xf32>
    %c4_492 = arith.constant 4 : index
    %c0_493 = arith.constant 0 : index
    %c0_494 = arith.constant 0 : index
    %786 = vector.load %arg20[%c4_492, %c0_493, %c0_494] : memref<12x4x1xf32, #tpu.memory_space<vmem>>, vector<1x4x1xf32>
    %787 = vector.shape_cast %786 : vector<1x4x1xf32> to vector<4x1xf32>
    %788 = vector.broadcast %787 : vector<4x1xf32> to vector<4x64xf32>
    %789 = arith.addf %785, %788 : vector<4x64xf32>
    %cst_495 = arith.constant 0.000000e+00 : f32
    %790 = vector.broadcast %cst_495 : f32 to vector<4x64xf32>
    %791 = arith.maximumf %789, %790 : vector<4x64xf32>
    %c5_496 = arith.constant 5 : index
    %c0_497 = arith.constant 0 : index
    %c0_498 = arith.constant 0 : index
    %792 = vector.load %arg15[%c5_496, %c0_497, %c0_498] : memref<12x4x4xf32, #tpu.memory_space<vmem>>, vector<1x4x4xf32>
    %793 = vector.shape_cast %792 : vector<1x4x4xf32> to vector<4x4xf32>
    %cst_499 = arith.constant dense<0.000000e+00> : vector<4x64xf32>
    %794 = tpu.matmul %793, %791, %cst_499 {dimension_numbers = #tpu.dot_dimension_numbers<[1], [0], [0], [1], [0, 0, 1, 1], [], []>} : vector<4x4xf32>, vector<4x64xf32>, vector<4x64xf32> -> vector<4x64xf32>
    %c5_500 = arith.constant 5 : index
    %c0_501 = arith.constant 0 : index
    %c0_502 = arith.constant 0 : index
    %795 = vector.load %arg16[%c5_500, %c0_501, %c0_502] : memref<12x4x4xf32, #tpu.memory_space<vmem>>, vector<1x4x4xf32>
    %796 = vector.shape_cast %795 : vector<1x4x4xf32> to vector<4x4xf32>
    %cst_503 = arith.constant dense<0.000000e+00> : vector<4x64xf32>
    %797 = tpu.matmul %796, %791, %cst_503 {dimension_numbers = #tpu.dot_dimension_numbers<[1], [0], [0], [1], [0, 0, 1, 1], [], []>} : vector<4x4xf32>, vector<4x64xf32>, vector<4x64xf32> -> vector<4x64xf32>
    %c5_504 = arith.constant 5 : index
    %c0_505 = arith.constant 0 : index
    %c0_506 = arith.constant 0 : index
    %798 = vector.load %arg17[%c5_504, %c0_505, %c0_506] : memref<12x4x4xf32, #tpu.memory_space<vmem>>, vector<1x4x4xf32>
    %799 = vector.shape_cast %798 : vector<1x4x4xf32> to vector<4x4xf32>
    %cst_507 = arith.constant dense<0.000000e+00> : vector<4x64xf32>
    %800 = tpu.matmul %799, %791, %cst_507 {dimension_numbers = #tpu.dot_dimension_numbers<[1], [0], [0], [1], [0, 0, 1, 1], [], []>} : vector<4x4xf32>, vector<4x64xf32>, vector<4x64xf32> -> vector<4x64xf32>
    %cst_508 = arith.constant dense<0.000000e+00> : vector<4x64xf32>
    %801 = tpu.matmul %794, %0, %cst_508 {dimension_numbers = #tpu.dot_dimension_numbers<[1], [0], [0], [1], [0, 0, 1, 1], [], []>} : vector<4x64xf32>, vector<64x64xf32>, vector<4x64xf32> -> vector<4x64xf32>
    %802 = arith.addf %801, %797 : vector<4x64xf32>
    %cst_509 = arith.constant dense<0.000000e+00> : vector<4x64xf32>
    %803 = tpu.matmul %800, %1, %cst_509 {dimension_numbers = #tpu.dot_dimension_numbers<[1], [0], [0], [1], [0, 0, 1, 1], [], []>} : vector<4x64xf32>, vector<64x64xf32>, vector<4x64xf32> -> vector<4x64xf32>
    %804 = arith.addf %802, %803 : vector<4x64xf32>
    %c5_510 = arith.constant 5 : index
    %c0_511 = arith.constant 0 : index
    %c0_512 = arith.constant 0 : index
    %805 = vector.load %arg18[%c5_510, %c0_511, %c0_512] : memref<12x4x1xf32, #tpu.memory_space<vmem>>, vector<1x4x1xf32>
    %806 = vector.shape_cast %805 : vector<1x4x1xf32> to vector<4x1xf32>
    %807 = vector.broadcast %806 : vector<4x1xf32> to vector<4x64xf32>
    %808 = arith.addf %804, %807 : vector<4x64xf32>
    %cst_513 = arith.constant dense<0.000000e+00> : vector<4x64xf32>
    %809 = tpu.matmul %2, %808, %cst_513 {dimension_numbers = #tpu.dot_dimension_numbers<[1], [0], [0], [1], [0, 0, 1, 1], [], []>} : vector<4x4xf32>, vector<4x64xf32>, vector<4x64xf32> -> vector<4x64xf32>
    %cst_514 = arith.constant dense<0.000000e+00> : vector<4xf32>
    %810 = vector.multi_reduction <add>, %809, %cst_514 [1] : vector<4x64xf32> to vector<4xf32>
    %811 = vector.shape_cast %810 : vector<4xf32> to vector<4x1xf32>
    %cst_515 = arith.constant 7.812500e-03 : f32
    %812 = vector.broadcast %cst_515 : f32 to vector<4x1xf32>
    %813 = arith.mulf %811, %812 : vector<4x1xf32>
    %814 = vector.broadcast %813 : vector<4x1xf32> to vector<4x64xf32>
    %815 = arith.subf %808, %814 : vector<4x64xf32>
    %816 = arith.mulf %815, %815 : vector<4x64xf32>
    %cst_516 = arith.constant dense<0.000000e+00> : vector<4x64xf32>
    %817 = tpu.matmul %2, %816, %cst_516 {dimension_numbers = #tpu.dot_dimension_numbers<[1], [0], [0], [1], [0, 0, 1, 1], [], []>} : vector<4x4xf32>, vector<4x64xf32>, vector<4x64xf32> -> vector<4x64xf32>
    %cst_517 = arith.constant dense<0.000000e+00> : vector<4xf32>
    %818 = vector.multi_reduction <add>, %817, %cst_517 [1] : vector<4x64xf32> to vector<4xf32>
    %819 = vector.shape_cast %818 : vector<4xf32> to vector<4x1xf32>
    %cst_518 = arith.constant 7.812500e-03 : f32
    %820 = vector.broadcast %cst_518 : f32 to vector<4x1xf32>
    %821 = arith.mulf %819, %820 : vector<4x1xf32>
    %cst_519 = arith.constant 9.99999974E-6 : f32
    %822 = vector.broadcast %cst_519 : f32 to vector<4x1xf32>
    %823 = arith.addf %821, %822 : vector<4x1xf32>
    %824 = math.rsqrt %823 : vector<4x1xf32>
    %825 = vector.broadcast %824 : vector<4x1xf32> to vector<4x64xf32>
    %826 = arith.mulf %815, %825 : vector<4x64xf32>
    %c5_520 = arith.constant 5 : index
    %c0_521 = arith.constant 0 : index
    %c0_522 = arith.constant 0 : index
    %827 = vector.load %arg19[%c5_520, %c0_521, %c0_522] : memref<12x4x1xf32, #tpu.memory_space<vmem>>, vector<1x4x1xf32>
    %828 = vector.shape_cast %827 : vector<1x4x1xf32> to vector<4x1xf32>
    %829 = vector.broadcast %828 : vector<4x1xf32> to vector<4x64xf32>
    %830 = arith.mulf %826, %829 : vector<4x64xf32>
    %c5_523 = arith.constant 5 : index
    %c0_524 = arith.constant 0 : index
    %c0_525 = arith.constant 0 : index
    %831 = vector.load %arg20[%c5_523, %c0_524, %c0_525] : memref<12x4x1xf32, #tpu.memory_space<vmem>>, vector<1x4x1xf32>
    %832 = vector.shape_cast %831 : vector<1x4x1xf32> to vector<4x1xf32>
    %833 = vector.broadcast %832 : vector<4x1xf32> to vector<4x64xf32>
    %834 = arith.addf %830, %833 : vector<4x64xf32>
    %835 = arith.addf %566, %834 : vector<4x64xf32>
    %c2_526 = arith.constant 2 : index
    %c0_527 = arith.constant 0 : index
    %c0_528 = arith.constant 0 : index
    %836 = vector.load %arg3[%c2_526, %c0_527, %c0_528] : memref<4x1x64xf32, #tpu.memory_space<vmem>>, vector<1x1x64xf32>
    %837 = vector.shape_cast %836 : vector<1x1x64xf32> to vector<1x64xf32>
    %c2_529 = arith.constant 2 : index
    %c0_530 = arith.constant 0 : index
    %c0_531 = arith.constant 0 : index
    %838 = vector.load %arg4[%c2_529, %c0_530, %c0_531] : memref<4x1x64xf32, #tpu.memory_space<vmem>>, vector<1x1x64xf32>
    %839 = vector.shape_cast %838 : vector<1x1x64xf32> to vector<1x64xf32>
    %cst_532 = arith.constant dense<0.000000e+00> : vector<4xf32>
    %840 = vector.multi_reduction <add>, %835, %cst_532 [1] : vector<4x64xf32> to vector<4xf32>
    %841 = vector.shape_cast %840 : vector<4xf32> to vector<4x1xf32>
    %cst_533 = arith.constant 6.400000e+01 : f32
    %842 = vector.broadcast %cst_533 : f32 to vector<4x1xf32>
    %843 = arith.divf %841, %842 : vector<4x1xf32>
    %844 = vector.broadcast %843 : vector<4x1xf32> to vector<4x64xf32>
    %845 = arith.subf %835, %844 : vector<4x64xf32>
    %846 = arith.mulf %845, %845 : vector<4x64xf32>
    %cst_534 = arith.constant dense<0.000000e+00> : vector<4xf32>
    %847 = vector.multi_reduction <add>, %846, %cst_534 [1] : vector<4x64xf32> to vector<4xf32>
    %848 = vector.shape_cast %847 : vector<4xf32> to vector<4x1xf32>
    %cst_535 = arith.constant 6.400000e+01 : f32
    %849 = vector.broadcast %cst_535 : f32 to vector<4x1xf32>
    %850 = arith.divf %848, %849 : vector<4x1xf32>
    %cst_536 = arith.constant 9.99999974E-6 : f32
    %851 = vector.broadcast %cst_536 : f32 to vector<4x1xf32>
    %852 = arith.addf %850, %851 : vector<4x1xf32>
    %853 = math.rsqrt %852 : vector<4x1xf32>
    %854 = vector.broadcast %853 : vector<4x1xf32> to vector<4x64xf32>
    %855 = arith.mulf %845, %854 : vector<4x64xf32>
    %856 = vector.broadcast %837 : vector<1x64xf32> to vector<4x64xf32>
    %857 = arith.mulf %855, %856 : vector<4x64xf32>
    %858 = vector.broadcast %839 : vector<1x64xf32> to vector<4x64xf32>
    %859 = arith.addf %857, %858 : vector<4x64xf32>
    %c2_537 = arith.constant 2 : index
    %c0_538 = arith.constant 0 : index
    %c0_539 = arith.constant 0 : index
    %860 = vector.load %arg5[%c2_537, %c0_538, %c0_539] : memref<4x64x192xf32, #tpu.memory_space<vmem>>, vector<1x64x192xf32>
    %861 = vector.shape_cast %860 : vector<1x64x192xf32> to vector<64x192xf32>
    %cst_540 = arith.constant dense<0.000000e+00> : vector<4x192xf32>
    %862 = tpu.matmul %859, %861, %cst_540 {dimension_numbers = #tpu.dot_dimension_numbers<[1], [0], [0], [1], [0, 0, 1, 1], [], []>} : vector<4x64xf32>, vector<64x192xf32>, vector<4x192xf32> -> vector<4x192xf32>
    %c2_541 = arith.constant 2 : index
    %c0_542 = arith.constant 0 : index
    %c0_543 = arith.constant 0 : index
    %863 = vector.load %arg6[%c2_541, %c0_542, %c0_543] : memref<4x1x192xf32, #tpu.memory_space<vmem>>, vector<1x1x192xf32>
    %864 = vector.shape_cast %863 : vector<1x1x192xf32> to vector<1x192xf32>
    %865 = vector.broadcast %864 : vector<1x192xf32> to vector<4x192xf32>
    %866 = arith.addf %862, %865 : vector<4x192xf32>
    %867 = vector.extract_strided_slice %866 {offsets = [0, 0], sizes = [4, 64], strides = [1, 1]} : vector<4x192xf32> to vector<4x64xf32>
    %cst_544 = arith.constant 2.500000e-01 : f32
    %868 = vector.broadcast %cst_544 : f32 to vector<4x64xf32>
    %869 = arith.mulf %867, %868 : vector<4x64xf32>
    %870 = vector.extract_strided_slice %866 {offsets = [0, 64], sizes = [4, 64], strides = [1, 1]} : vector<4x192xf32> to vector<4x64xf32>
    %871 = vector.extract_strided_slice %866 {offsets = [0, 128], sizes = [4, 64], strides = [1, 1]} : vector<4x192xf32> to vector<4x64xf32>
    %cst_545 = arith.constant dense<0.000000e+00> : vector<4x64xf32>
    %872 = tpu.matmul %3, %870, %cst_545 {dimension_numbers = #tpu.dot_dimension_numbers<[1], [0], [0], [1], [0, 0, 1, 1], [], []>} : vector<4x4xf32>, vector<4x64xf32>, vector<4x64xf32> -> vector<4x64xf32>
    %cst_546 = arith.constant dense<0.000000e+00> : vector<4x64xf32>
    %873 = tpu.matmul %3, %871, %cst_546 {dimension_numbers = #tpu.dot_dimension_numbers<[1], [0], [0], [1], [0, 0, 1, 1], [], []>} : vector<4x4xf32>, vector<4x64xf32>, vector<4x64xf32> -> vector<4x64xf32>
    %874 = arith.mulf %869, %870 : vector<4x64xf32>
    %cst_547 = arith.constant dense<0.000000e+00> : vector<4x4xf32>
    %875 = tpu.matmul %874, %4, %cst_547 {dimension_numbers = #tpu.dot_dimension_numbers<[1], [0], [0], [1], [0, 0, 1, 1], [], []>} : vector<4x64xf32>, vector<64x4xf32>, vector<4x4xf32> -> vector<4x4xf32>
    %876 = arith.mulf %869, %872 : vector<4x64xf32>
    %cst_548 = arith.constant dense<0.000000e+00> : vector<4x4xf32>
    %877 = tpu.matmul %876, %4, %cst_548 {dimension_numbers = #tpu.dot_dimension_numbers<[1], [0], [0], [1], [0, 0, 1, 1], [], []>} : vector<4x64xf32>, vector<64x4xf32>, vector<4x4xf32> -> vector<4x4xf32>
    %878 = arith.maximumf %875, %877 : vector<4x4xf32>
    %879 = arith.subf %875, %878 : vector<4x4xf32>
    %880 = math.exp %879 : vector<4x4xf32>
    %881 = arith.subf %877, %878 : vector<4x4xf32>
    %882 = math.exp %881 : vector<4x4xf32>
    %883 = arith.addf %880, %882 : vector<4x4xf32>
    %884 = tpu.reciprocal %883 {approx = true} : vector<4x4xf32> -> vector<4x4xf32>
    %885 = arith.mulf %880, %884 : vector<4x4xf32>
    %cst_549 = arith.constant dense<0.000000e+00> : vector<4x64xf32>
    %886 = tpu.matmul %885, %5, %cst_549 {dimension_numbers = #tpu.dot_dimension_numbers<[1], [0], [0], [1], [0, 0, 1, 1], [], []>} : vector<4x4xf32>, vector<4x64xf32>, vector<4x64xf32> -> vector<4x64xf32>
    %887 = arith.mulf %882, %884 : vector<4x4xf32>
    %cst_550 = arith.constant dense<0.000000e+00> : vector<4x64xf32>
    %888 = tpu.matmul %887, %5, %cst_550 {dimension_numbers = #tpu.dot_dimension_numbers<[1], [0], [0], [1], [0, 0, 1, 1], [], []>} : vector<4x4xf32>, vector<4x64xf32>, vector<4x64xf32> -> vector<4x64xf32>
    %889 = arith.mulf %886, %871 : vector<4x64xf32>
    %890 = arith.mulf %888, %873 : vector<4x64xf32>
    %891 = arith.addf %889, %890 : vector<4x64xf32>
    %c2_551 = arith.constant 2 : index
    %c0_552 = arith.constant 0 : index
    %c0_553 = arith.constant 0 : index
    %892 = vector.load %arg7[%c2_551, %c0_552, %c0_553] : memref<4x64x64xf32, #tpu.memory_space<vmem>>, vector<1x64x64xf32>
    %893 = vector.shape_cast %892 : vector<1x64x64xf32> to vector<64x64xf32>
    %cst_554 = arith.constant dense<0.000000e+00> : vector<4x64xf32>
    %894 = tpu.matmul %891, %893, %cst_554 {dimension_numbers = #tpu.dot_dimension_numbers<[1], [0], [0], [1], [0, 0, 1, 1], [], []>} : vector<4x64xf32>, vector<64x64xf32>, vector<4x64xf32> -> vector<4x64xf32>
    %895 = arith.addf %835, %894 : vector<4x64xf32>
    %c2_555 = arith.constant 2 : index
    %c0_556 = arith.constant 0 : index
    %c0_557 = arith.constant 0 : index
    %896 = vector.load %arg8[%c2_555, %c0_556, %c0_557] : memref<4x1x64xf32, #tpu.memory_space<vmem>>, vector<1x1x64xf32>
    %897 = vector.shape_cast %896 : vector<1x1x64xf32> to vector<1x64xf32>
    %898 = vector.broadcast %897 : vector<1x64xf32> to vector<4x64xf32>
    %899 = arith.addf %895, %898 : vector<4x64xf32>
    %c2_558 = arith.constant 2 : index
    %c0_559 = arith.constant 0 : index
    %c0_560 = arith.constant 0 : index
    %900 = vector.load %arg9[%c2_558, %c0_559, %c0_560] : memref<4x1x64xf32, #tpu.memory_space<vmem>>, vector<1x1x64xf32>
    %901 = vector.shape_cast %900 : vector<1x1x64xf32> to vector<1x64xf32>
    %c2_561 = arith.constant 2 : index
    %c0_562 = arith.constant 0 : index
    %c0_563 = arith.constant 0 : index
    %902 = vector.load %arg10[%c2_561, %c0_562, %c0_563] : memref<4x1x64xf32, #tpu.memory_space<vmem>>, vector<1x1x64xf32>
    %903 = vector.shape_cast %902 : vector<1x1x64xf32> to vector<1x64xf32>
    %cst_564 = arith.constant dense<0.000000e+00> : vector<4xf32>
    %904 = vector.multi_reduction <add>, %899, %cst_564 [1] : vector<4x64xf32> to vector<4xf32>
    %905 = vector.shape_cast %904 : vector<4xf32> to vector<4x1xf32>
    %cst_565 = arith.constant 6.400000e+01 : f32
    %906 = vector.broadcast %cst_565 : f32 to vector<4x1xf32>
    %907 = arith.divf %905, %906 : vector<4x1xf32>
    %908 = vector.broadcast %907 : vector<4x1xf32> to vector<4x64xf32>
    %909 = arith.subf %899, %908 : vector<4x64xf32>
    %910 = arith.mulf %909, %909 : vector<4x64xf32>
    %cst_566 = arith.constant dense<0.000000e+00> : vector<4xf32>
    %911 = vector.multi_reduction <add>, %910, %cst_566 [1] : vector<4x64xf32> to vector<4xf32>
    %912 = vector.shape_cast %911 : vector<4xf32> to vector<4x1xf32>
    %cst_567 = arith.constant 6.400000e+01 : f32
    %913 = vector.broadcast %cst_567 : f32 to vector<4x1xf32>
    %914 = arith.divf %912, %913 : vector<4x1xf32>
    %cst_568 = arith.constant 9.99999974E-6 : f32
    %915 = vector.broadcast %cst_568 : f32 to vector<4x1xf32>
    %916 = arith.addf %914, %915 : vector<4x1xf32>
    %917 = math.rsqrt %916 : vector<4x1xf32>
    %918 = vector.broadcast %917 : vector<4x1xf32> to vector<4x64xf32>
    %919 = arith.mulf %909, %918 : vector<4x64xf32>
    %920 = vector.broadcast %901 : vector<1x64xf32> to vector<4x64xf32>
    %921 = arith.mulf %919, %920 : vector<4x64xf32>
    %922 = vector.broadcast %903 : vector<1x64xf32> to vector<4x64xf32>
    %923 = arith.addf %921, %922 : vector<4x64xf32>
    %c2_569 = arith.constant 2 : index
    %c0_570 = arith.constant 0 : index
    %c0_571 = arith.constant 0 : index
    %924 = vector.load %arg11[%c2_569, %c0_570, %c0_571] : memref<4x64x64xf32, #tpu.memory_space<vmem>>, vector<1x64x64xf32>
    %925 = vector.shape_cast %924 : vector<1x64x64xf32> to vector<64x64xf32>
    %cst_572 = arith.constant dense<0.000000e+00> : vector<4x64xf32>
    %926 = tpu.matmul %923, %925, %cst_572 {dimension_numbers = #tpu.dot_dimension_numbers<[1], [0], [0], [1], [0, 0, 1, 1], [], []>} : vector<4x64xf32>, vector<64x64xf32>, vector<4x64xf32> -> vector<4x64xf32>
    %c2_573 = arith.constant 2 : index
    %c0_574 = arith.constant 0 : index
    %c0_575 = arith.constant 0 : index
    %927 = vector.load %arg12[%c2_573, %c0_574, %c0_575] : memref<4x1x64xf32, #tpu.memory_space<vmem>>, vector<1x1x64xf32>
    %928 = vector.shape_cast %927 : vector<1x1x64xf32> to vector<1x64xf32>
    %929 = vector.broadcast %928 : vector<1x64xf32> to vector<4x64xf32>
    %930 = arith.addf %926, %929 : vector<4x64xf32>
    %cst_576 = arith.constant 5.000000e-01 : f32
    %931 = vector.broadcast %cst_576 : f32 to vector<4x64xf32>
    %932 = arith.mulf %931, %930 : vector<4x64xf32>
    %cst_577 = arith.constant 0.707106769 : f32
    %933 = vector.broadcast %cst_577 : f32 to vector<4x64xf32>
    %934 = arith.mulf %930, %933 : vector<4x64xf32>
    %935 = math.absf %934 : vector<4x64xf32>
    %cst_578 = arith.constant 0.327591091 : f32
    %936 = vector.broadcast %cst_578 : f32 to vector<4x64xf32>
    %937 = arith.mulf %936, %935 : vector<4x64xf32>
    %cst_579 = arith.constant 1.000000e+00 : f32
    %938 = vector.broadcast %cst_579 : f32 to vector<4x64xf32>
    %939 = arith.addf %938, %937 : vector<4x64xf32>
    %cst_580 = arith.constant 1.000000e+00 : f32
    %940 = vector.broadcast %cst_580 : f32 to vector<4x64xf32>
    %941 = arith.divf %940, %939 : vector<4x64xf32>
    %cst_581 = arith.constant 1.06140542 : f32
    %942 = vector.broadcast %cst_581 : f32 to vector<4x64xf32>
    %943 = arith.mulf %941, %942 : vector<4x64xf32>
    %cst_582 = arith.constant -1.45315206 : f32
    %944 = vector.broadcast %cst_582 : f32 to vector<4x64xf32>
    %945 = arith.addf %944, %943 : vector<4x64xf32>
    %946 = arith.mulf %941, %945 : vector<4x64xf32>
    %cst_583 = arith.constant 1.42141378 : f32
    %947 = vector.broadcast %cst_583 : f32 to vector<4x64xf32>
    %948 = arith.addf %947, %946 : vector<4x64xf32>
    %949 = arith.mulf %941, %948 : vector<4x64xf32>
    %cst_584 = arith.constant -0.284496725 : f32
    %950 = vector.broadcast %cst_584 : f32 to vector<4x64xf32>
    %951 = arith.addf %950, %949 : vector<4x64xf32>
    %952 = arith.mulf %941, %951 : vector<4x64xf32>
    %cst_585 = arith.constant 0.254829586 : f32
    %953 = vector.broadcast %cst_585 : f32 to vector<4x64xf32>
    %954 = arith.addf %953, %952 : vector<4x64xf32>
    %955 = arith.mulf %941, %954 : vector<4x64xf32>
    %cst_586 = arith.constant 0.000000e+00 : f32
    %956 = vector.broadcast %cst_586 : f32 to vector<4x64xf32>
    %957 = arith.subf %956, %935 : vector<4x64xf32>
    %958 = arith.mulf %957, %935 : vector<4x64xf32>
    %959 = math.exp %958 : vector<4x64xf32>
    %960 = arith.mulf %955, %959 : vector<4x64xf32>
    %cst_587 = arith.constant 1.000000e+00 : f32
    %961 = vector.broadcast %cst_587 : f32 to vector<4x64xf32>
    %962 = arith.subf %961, %960 : vector<4x64xf32>
    %cst_588 = arith.constant 0.000000e+00 : f32
    %963 = vector.broadcast %cst_588 : f32 to vector<4x64xf32>
    %964 = arith.cmpf oge, %934, %963 : vector<4x64xf32>
    %cst_589 = arith.constant 0.000000e+00 : f32
    %965 = vector.broadcast %cst_589 : f32 to vector<4x64xf32>
    %966 = arith.subf %965, %962 : vector<4x64xf32>
    %967 = arith.select %964, %962, %966 : vector<4x64xi1>, vector<4x64xf32>
    %cst_590 = arith.constant 1.000000e+00 : f32
    %968 = vector.broadcast %cst_590 : f32 to vector<4x64xf32>
    %969 = arith.addf %968, %967 : vector<4x64xf32>
    %970 = arith.mulf %932, %969 : vector<4x64xf32>
    %c2_591 = arith.constant 2 : index
    %c0_592 = arith.constant 0 : index
    %c0_593 = arith.constant 0 : index
    %971 = vector.load %arg13[%c2_591, %c0_592, %c0_593] : memref<4x64x64xf32, #tpu.memory_space<vmem>>, vector<1x64x64xf32>
    %972 = vector.shape_cast %971 : vector<1x64x64xf32> to vector<64x64xf32>
    %cst_594 = arith.constant dense<0.000000e+00> : vector<4x64xf32>
    %973 = tpu.matmul %970, %972, %cst_594 {dimension_numbers = #tpu.dot_dimension_numbers<[1], [0], [0], [1], [0, 0, 1, 1], [], []>} : vector<4x64xf32>, vector<64x64xf32>, vector<4x64xf32> -> vector<4x64xf32>
    %c2_595 = arith.constant 2 : index
    %c0_596 = arith.constant 0 : index
    %c0_597 = arith.constant 0 : index
    %974 = vector.load %arg14[%c2_595, %c0_596, %c0_597] : memref<4x1x64xf32, #tpu.memory_space<vmem>>, vector<1x1x64xf32>
    %975 = vector.shape_cast %974 : vector<1x1x64xf32> to vector<1x64xf32>
    %976 = vector.broadcast %975 : vector<1x64xf32> to vector<4x64xf32>
    %977 = arith.addf %973, %976 : vector<4x64xf32>
    %978 = arith.addf %899, %977 : vector<4x64xf32>
    %c6 = arith.constant 6 : index
    %c0_598 = arith.constant 0 : index
    %c0_599 = arith.constant 0 : index
    %979 = vector.load %arg15[%c6, %c0_598, %c0_599] : memref<12x4x4xf32, #tpu.memory_space<vmem>>, vector<1x4x4xf32>
    %980 = vector.shape_cast %979 : vector<1x4x4xf32> to vector<4x4xf32>
    %cst_600 = arith.constant dense<0.000000e+00> : vector<4x64xf32>
    %981 = tpu.matmul %980, %978, %cst_600 {dimension_numbers = #tpu.dot_dimension_numbers<[1], [0], [0], [1], [0, 0, 1, 1], [], []>} : vector<4x4xf32>, vector<4x64xf32>, vector<4x64xf32> -> vector<4x64xf32>
    %c6_601 = arith.constant 6 : index
    %c0_602 = arith.constant 0 : index
    %c0_603 = arith.constant 0 : index
    %982 = vector.load %arg16[%c6_601, %c0_602, %c0_603] : memref<12x4x4xf32, #tpu.memory_space<vmem>>, vector<1x4x4xf32>
    %983 = vector.shape_cast %982 : vector<1x4x4xf32> to vector<4x4xf32>
    %cst_604 = arith.constant dense<0.000000e+00> : vector<4x64xf32>
    %984 = tpu.matmul %983, %978, %cst_604 {dimension_numbers = #tpu.dot_dimension_numbers<[1], [0], [0], [1], [0, 0, 1, 1], [], []>} : vector<4x4xf32>, vector<4x64xf32>, vector<4x64xf32> -> vector<4x64xf32>
    %c6_605 = arith.constant 6 : index
    %c0_606 = arith.constant 0 : index
    %c0_607 = arith.constant 0 : index
    %985 = vector.load %arg17[%c6_605, %c0_606, %c0_607] : memref<12x4x4xf32, #tpu.memory_space<vmem>>, vector<1x4x4xf32>
    %986 = vector.shape_cast %985 : vector<1x4x4xf32> to vector<4x4xf32>
    %cst_608 = arith.constant dense<0.000000e+00> : vector<4x64xf32>
    %987 = tpu.matmul %986, %978, %cst_608 {dimension_numbers = #tpu.dot_dimension_numbers<[1], [0], [0], [1], [0, 0, 1, 1], [], []>} : vector<4x4xf32>, vector<4x64xf32>, vector<4x64xf32> -> vector<4x64xf32>
    %cst_609 = arith.constant dense<0.000000e+00> : vector<4x64xf32>
    %988 = tpu.matmul %981, %0, %cst_609 {dimension_numbers = #tpu.dot_dimension_numbers<[1], [0], [0], [1], [0, 0, 1, 1], [], []>} : vector<4x64xf32>, vector<64x64xf32>, vector<4x64xf32> -> vector<4x64xf32>
    %989 = arith.addf %988, %984 : vector<4x64xf32>
    %cst_610 = arith.constant dense<0.000000e+00> : vector<4x64xf32>
    %990 = tpu.matmul %987, %1, %cst_610 {dimension_numbers = #tpu.dot_dimension_numbers<[1], [0], [0], [1], [0, 0, 1, 1], [], []>} : vector<4x64xf32>, vector<64x64xf32>, vector<4x64xf32> -> vector<4x64xf32>
    %991 = arith.addf %989, %990 : vector<4x64xf32>
    %c6_611 = arith.constant 6 : index
    %c0_612 = arith.constant 0 : index
    %c0_613 = arith.constant 0 : index
    %992 = vector.load %arg18[%c6_611, %c0_612, %c0_613] : memref<12x4x1xf32, #tpu.memory_space<vmem>>, vector<1x4x1xf32>
    %993 = vector.shape_cast %992 : vector<1x4x1xf32> to vector<4x1xf32>
    %994 = vector.broadcast %993 : vector<4x1xf32> to vector<4x64xf32>
    %995 = arith.addf %991, %994 : vector<4x64xf32>
    %cst_614 = arith.constant dense<0.000000e+00> : vector<4x64xf32>
    %996 = tpu.matmul %2, %995, %cst_614 {dimension_numbers = #tpu.dot_dimension_numbers<[1], [0], [0], [1], [0, 0, 1, 1], [], []>} : vector<4x4xf32>, vector<4x64xf32>, vector<4x64xf32> -> vector<4x64xf32>
    %cst_615 = arith.constant dense<0.000000e+00> : vector<4xf32>
    %997 = vector.multi_reduction <add>, %996, %cst_615 [1] : vector<4x64xf32> to vector<4xf32>
    %998 = vector.shape_cast %997 : vector<4xf32> to vector<4x1xf32>
    %cst_616 = arith.constant 7.812500e-03 : f32
    %999 = vector.broadcast %cst_616 : f32 to vector<4x1xf32>
    %1000 = arith.mulf %998, %999 : vector<4x1xf32>
    %1001 = vector.broadcast %1000 : vector<4x1xf32> to vector<4x64xf32>
    %1002 = arith.subf %995, %1001 : vector<4x64xf32>
    %1003 = arith.mulf %1002, %1002 : vector<4x64xf32>
    %cst_617 = arith.constant dense<0.000000e+00> : vector<4x64xf32>
    %1004 = tpu.matmul %2, %1003, %cst_617 {dimension_numbers = #tpu.dot_dimension_numbers<[1], [0], [0], [1], [0, 0, 1, 1], [], []>} : vector<4x4xf32>, vector<4x64xf32>, vector<4x64xf32> -> vector<4x64xf32>
    %cst_618 = arith.constant dense<0.000000e+00> : vector<4xf32>
    %1005 = vector.multi_reduction <add>, %1004, %cst_618 [1] : vector<4x64xf32> to vector<4xf32>
    %1006 = vector.shape_cast %1005 : vector<4xf32> to vector<4x1xf32>
    %cst_619 = arith.constant 7.812500e-03 : f32
    %1007 = vector.broadcast %cst_619 : f32 to vector<4x1xf32>
    %1008 = arith.mulf %1006, %1007 : vector<4x1xf32>
    %cst_620 = arith.constant 9.99999974E-6 : f32
    %1009 = vector.broadcast %cst_620 : f32 to vector<4x1xf32>
    %1010 = arith.addf %1008, %1009 : vector<4x1xf32>
    %1011 = math.rsqrt %1010 : vector<4x1xf32>
    %1012 = vector.broadcast %1011 : vector<4x1xf32> to vector<4x64xf32>
    %1013 = arith.mulf %1002, %1012 : vector<4x64xf32>
    %c6_621 = arith.constant 6 : index
    %c0_622 = arith.constant 0 : index
    %c0_623 = arith.constant 0 : index
    %1014 = vector.load %arg19[%c6_621, %c0_622, %c0_623] : memref<12x4x1xf32, #tpu.memory_space<vmem>>, vector<1x4x1xf32>
    %1015 = vector.shape_cast %1014 : vector<1x4x1xf32> to vector<4x1xf32>
    %1016 = vector.broadcast %1015 : vector<4x1xf32> to vector<4x64xf32>
    %1017 = arith.mulf %1013, %1016 : vector<4x64xf32>
    %c6_624 = arith.constant 6 : index
    %c0_625 = arith.constant 0 : index
    %c0_626 = arith.constant 0 : index
    %1018 = vector.load %arg20[%c6_624, %c0_625, %c0_626] : memref<12x4x1xf32, #tpu.memory_space<vmem>>, vector<1x4x1xf32>
    %1019 = vector.shape_cast %1018 : vector<1x4x1xf32> to vector<4x1xf32>
    %1020 = vector.broadcast %1019 : vector<4x1xf32> to vector<4x64xf32>
    %1021 = arith.addf %1017, %1020 : vector<4x64xf32>
    %cst_627 = arith.constant 0.000000e+00 : f32
    %1022 = vector.broadcast %cst_627 : f32 to vector<4x64xf32>
    %1023 = arith.maximumf %1021, %1022 : vector<4x64xf32>
    %c7 = arith.constant 7 : index
    %c0_628 = arith.constant 0 : index
    %c0_629 = arith.constant 0 : index
    %1024 = vector.load %arg15[%c7, %c0_628, %c0_629] : memref<12x4x4xf32, #tpu.memory_space<vmem>>, vector<1x4x4xf32>
    %1025 = vector.shape_cast %1024 : vector<1x4x4xf32> to vector<4x4xf32>
    %cst_630 = arith.constant dense<0.000000e+00> : vector<4x64xf32>
    %1026 = tpu.matmul %1025, %1023, %cst_630 {dimension_numbers = #tpu.dot_dimension_numbers<[1], [0], [0], [1], [0, 0, 1, 1], [], []>} : vector<4x4xf32>, vector<4x64xf32>, vector<4x64xf32> -> vector<4x64xf32>
    %c7_631 = arith.constant 7 : index
    %c0_632 = arith.constant 0 : index
    %c0_633 = arith.constant 0 : index
    %1027 = vector.load %arg16[%c7_631, %c0_632, %c0_633] : memref<12x4x4xf32, #tpu.memory_space<vmem>>, vector<1x4x4xf32>
    %1028 = vector.shape_cast %1027 : vector<1x4x4xf32> to vector<4x4xf32>
    %cst_634 = arith.constant dense<0.000000e+00> : vector<4x64xf32>
    %1029 = tpu.matmul %1028, %1023, %cst_634 {dimension_numbers = #tpu.dot_dimension_numbers<[1], [0], [0], [1], [0, 0, 1, 1], [], []>} : vector<4x4xf32>, vector<4x64xf32>, vector<4x64xf32> -> vector<4x64xf32>
    %c7_635 = arith.constant 7 : index
    %c0_636 = arith.constant 0 : index
    %c0_637 = arith.constant 0 : index
    %1030 = vector.load %arg17[%c7_635, %c0_636, %c0_637] : memref<12x4x4xf32, #tpu.memory_space<vmem>>, vector<1x4x4xf32>
    %1031 = vector.shape_cast %1030 : vector<1x4x4xf32> to vector<4x4xf32>
    %cst_638 = arith.constant dense<0.000000e+00> : vector<4x64xf32>
    %1032 = tpu.matmul %1031, %1023, %cst_638 {dimension_numbers = #tpu.dot_dimension_numbers<[1], [0], [0], [1], [0, 0, 1, 1], [], []>} : vector<4x4xf32>, vector<4x64xf32>, vector<4x64xf32> -> vector<4x64xf32>
    %cst_639 = arith.constant dense<0.000000e+00> : vector<4x64xf32>
    %1033 = tpu.matmul %1026, %0, %cst_639 {dimension_numbers = #tpu.dot_dimension_numbers<[1], [0], [0], [1], [0, 0, 1, 1], [], []>} : vector<4x64xf32>, vector<64x64xf32>, vector<4x64xf32> -> vector<4x64xf32>
    %1034 = arith.addf %1033, %1029 : vector<4x64xf32>
    %cst_640 = arith.constant dense<0.000000e+00> : vector<4x64xf32>
    %1035 = tpu.matmul %1032, %1, %cst_640 {dimension_numbers = #tpu.dot_dimension_numbers<[1], [0], [0], [1], [0, 0, 1, 1], [], []>} : vector<4x64xf32>, vector<64x64xf32>, vector<4x64xf32> -> vector<4x64xf32>
    %1036 = arith.addf %1034, %1035 : vector<4x64xf32>
    %c7_641 = arith.constant 7 : index
    %c0_642 = arith.constant 0 : index
    %c0_643 = arith.constant 0 : index
    %1037 = vector.load %arg18[%c7_641, %c0_642, %c0_643] : memref<12x4x1xf32, #tpu.memory_space<vmem>>, vector<1x4x1xf32>
    %1038 = vector.shape_cast %1037 : vector<1x4x1xf32> to vector<4x1xf32>
    %1039 = vector.broadcast %1038 : vector<4x1xf32> to vector<4x64xf32>
    %1040 = arith.addf %1036, %1039 : vector<4x64xf32>
    %cst_644 = arith.constant dense<0.000000e+00> : vector<4x64xf32>
    %1041 = tpu.matmul %2, %1040, %cst_644 {dimension_numbers = #tpu.dot_dimension_numbers<[1], [0], [0], [1], [0, 0, 1, 1], [], []>} : vector<4x4xf32>, vector<4x64xf32>, vector<4x64xf32> -> vector<4x64xf32>
    %cst_645 = arith.constant dense<0.000000e+00> : vector<4xf32>
    %1042 = vector.multi_reduction <add>, %1041, %cst_645 [1] : vector<4x64xf32> to vector<4xf32>
    %1043 = vector.shape_cast %1042 : vector<4xf32> to vector<4x1xf32>
    %cst_646 = arith.constant 7.812500e-03 : f32
    %1044 = vector.broadcast %cst_646 : f32 to vector<4x1xf32>
    %1045 = arith.mulf %1043, %1044 : vector<4x1xf32>
    %1046 = vector.broadcast %1045 : vector<4x1xf32> to vector<4x64xf32>
    %1047 = arith.subf %1040, %1046 : vector<4x64xf32>
    %1048 = arith.mulf %1047, %1047 : vector<4x64xf32>
    %cst_647 = arith.constant dense<0.000000e+00> : vector<4x64xf32>
    %1049 = tpu.matmul %2, %1048, %cst_647 {dimension_numbers = #tpu.dot_dimension_numbers<[1], [0], [0], [1], [0, 0, 1, 1], [], []>} : vector<4x4xf32>, vector<4x64xf32>, vector<4x64xf32> -> vector<4x64xf32>
    %cst_648 = arith.constant dense<0.000000e+00> : vector<4xf32>
    %1050 = vector.multi_reduction <add>, %1049, %cst_648 [1] : vector<4x64xf32> to vector<4xf32>
    %1051 = vector.shape_cast %1050 : vector<4xf32> to vector<4x1xf32>
    %cst_649 = arith.constant 7.812500e-03 : f32
    %1052 = vector.broadcast %cst_649 : f32 to vector<4x1xf32>
    %1053 = arith.mulf %1051, %1052 : vector<4x1xf32>
    %cst_650 = arith.constant 9.99999974E-6 : f32
    %1054 = vector.broadcast %cst_650 : f32 to vector<4x1xf32>
    %1055 = arith.addf %1053, %1054 : vector<4x1xf32>
    %1056 = math.rsqrt %1055 : vector<4x1xf32>
    %1057 = vector.broadcast %1056 : vector<4x1xf32> to vector<4x64xf32>
    %1058 = arith.mulf %1047, %1057 : vector<4x64xf32>
    %c7_651 = arith.constant 7 : index
    %c0_652 = arith.constant 0 : index
    %c0_653 = arith.constant 0 : index
    %1059 = vector.load %arg19[%c7_651, %c0_652, %c0_653] : memref<12x4x1xf32, #tpu.memory_space<vmem>>, vector<1x4x1xf32>
    %1060 = vector.shape_cast %1059 : vector<1x4x1xf32> to vector<4x1xf32>
    %1061 = vector.broadcast %1060 : vector<4x1xf32> to vector<4x64xf32>
    %1062 = arith.mulf %1058, %1061 : vector<4x64xf32>
    %c7_654 = arith.constant 7 : index
    %c0_655 = arith.constant 0 : index
    %c0_656 = arith.constant 0 : index
    %1063 = vector.load %arg20[%c7_654, %c0_655, %c0_656] : memref<12x4x1xf32, #tpu.memory_space<vmem>>, vector<1x4x1xf32>
    %1064 = vector.shape_cast %1063 : vector<1x4x1xf32> to vector<4x1xf32>
    %1065 = vector.broadcast %1064 : vector<4x1xf32> to vector<4x64xf32>
    %1066 = arith.addf %1062, %1065 : vector<4x64xf32>
    %cst_657 = arith.constant 0.000000e+00 : f32
    %1067 = vector.broadcast %cst_657 : f32 to vector<4x64xf32>
    %1068 = arith.maximumf %1066, %1067 : vector<4x64xf32>
    %c8 = arith.constant 8 : index
    %c0_658 = arith.constant 0 : index
    %c0_659 = arith.constant 0 : index
    %1069 = vector.load %arg15[%c8, %c0_658, %c0_659] : memref<12x4x4xf32, #tpu.memory_space<vmem>>, vector<1x4x4xf32>
    %1070 = vector.shape_cast %1069 : vector<1x4x4xf32> to vector<4x4xf32>
    %cst_660 = arith.constant dense<0.000000e+00> : vector<4x64xf32>
    %1071 = tpu.matmul %1070, %1068, %cst_660 {dimension_numbers = #tpu.dot_dimension_numbers<[1], [0], [0], [1], [0, 0, 1, 1], [], []>} : vector<4x4xf32>, vector<4x64xf32>, vector<4x64xf32> -> vector<4x64xf32>
    %c8_661 = arith.constant 8 : index
    %c0_662 = arith.constant 0 : index
    %c0_663 = arith.constant 0 : index
    %1072 = vector.load %arg16[%c8_661, %c0_662, %c0_663] : memref<12x4x4xf32, #tpu.memory_space<vmem>>, vector<1x4x4xf32>
    %1073 = vector.shape_cast %1072 : vector<1x4x4xf32> to vector<4x4xf32>
    %cst_664 = arith.constant dense<0.000000e+00> : vector<4x64xf32>
    %1074 = tpu.matmul %1073, %1068, %cst_664 {dimension_numbers = #tpu.dot_dimension_numbers<[1], [0], [0], [1], [0, 0, 1, 1], [], []>} : vector<4x4xf32>, vector<4x64xf32>, vector<4x64xf32> -> vector<4x64xf32>
    %c8_665 = arith.constant 8 : index
    %c0_666 = arith.constant 0 : index
    %c0_667 = arith.constant 0 : index
    %1075 = vector.load %arg17[%c8_665, %c0_666, %c0_667] : memref<12x4x4xf32, #tpu.memory_space<vmem>>, vector<1x4x4xf32>
    %1076 = vector.shape_cast %1075 : vector<1x4x4xf32> to vector<4x4xf32>
    %cst_668 = arith.constant dense<0.000000e+00> : vector<4x64xf32>
    %1077 = tpu.matmul %1076, %1068, %cst_668 {dimension_numbers = #tpu.dot_dimension_numbers<[1], [0], [0], [1], [0, 0, 1, 1], [], []>} : vector<4x4xf32>, vector<4x64xf32>, vector<4x64xf32> -> vector<4x64xf32>
    %cst_669 = arith.constant dense<0.000000e+00> : vector<4x64xf32>
    %1078 = tpu.matmul %1071, %0, %cst_669 {dimension_numbers = #tpu.dot_dimension_numbers<[1], [0], [0], [1], [0, 0, 1, 1], [], []>} : vector<4x64xf32>, vector<64x64xf32>, vector<4x64xf32> -> vector<4x64xf32>
    %1079 = arith.addf %1078, %1074 : vector<4x64xf32>
    %cst_670 = arith.constant dense<0.000000e+00> : vector<4x64xf32>
    %1080 = tpu.matmul %1077, %1, %cst_670 {dimension_numbers = #tpu.dot_dimension_numbers<[1], [0], [0], [1], [0, 0, 1, 1], [], []>} : vector<4x64xf32>, vector<64x64xf32>, vector<4x64xf32> -> vector<4x64xf32>
    %1081 = arith.addf %1079, %1080 : vector<4x64xf32>
    %c8_671 = arith.constant 8 : index
    %c0_672 = arith.constant 0 : index
    %c0_673 = arith.constant 0 : index
    %1082 = vector.load %arg18[%c8_671, %c0_672, %c0_673] : memref<12x4x1xf32, #tpu.memory_space<vmem>>, vector<1x4x1xf32>
    %1083 = vector.shape_cast %1082 : vector<1x4x1xf32> to vector<4x1xf32>
    %1084 = vector.broadcast %1083 : vector<4x1xf32> to vector<4x64xf32>
    %1085 = arith.addf %1081, %1084 : vector<4x64xf32>
    %cst_674 = arith.constant dense<0.000000e+00> : vector<4x64xf32>
    %1086 = tpu.matmul %2, %1085, %cst_674 {dimension_numbers = #tpu.dot_dimension_numbers<[1], [0], [0], [1], [0, 0, 1, 1], [], []>} : vector<4x4xf32>, vector<4x64xf32>, vector<4x64xf32> -> vector<4x64xf32>
    %cst_675 = arith.constant dense<0.000000e+00> : vector<4xf32>
    %1087 = vector.multi_reduction <add>, %1086, %cst_675 [1] : vector<4x64xf32> to vector<4xf32>
    %1088 = vector.shape_cast %1087 : vector<4xf32> to vector<4x1xf32>
    %cst_676 = arith.constant 7.812500e-03 : f32
    %1089 = vector.broadcast %cst_676 : f32 to vector<4x1xf32>
    %1090 = arith.mulf %1088, %1089 : vector<4x1xf32>
    %1091 = vector.broadcast %1090 : vector<4x1xf32> to vector<4x64xf32>
    %1092 = arith.subf %1085, %1091 : vector<4x64xf32>
    %1093 = arith.mulf %1092, %1092 : vector<4x64xf32>
    %cst_677 = arith.constant dense<0.000000e+00> : vector<4x64xf32>
    %1094 = tpu.matmul %2, %1093, %cst_677 {dimension_numbers = #tpu.dot_dimension_numbers<[1], [0], [0], [1], [0, 0, 1, 1], [], []>} : vector<4x4xf32>, vector<4x64xf32>, vector<4x64xf32> -> vector<4x64xf32>
    %cst_678 = arith.constant dense<0.000000e+00> : vector<4xf32>
    %1095 = vector.multi_reduction <add>, %1094, %cst_678 [1] : vector<4x64xf32> to vector<4xf32>
    %1096 = vector.shape_cast %1095 : vector<4xf32> to vector<4x1xf32>
    %cst_679 = arith.constant 7.812500e-03 : f32
    %1097 = vector.broadcast %cst_679 : f32 to vector<4x1xf32>
    %1098 = arith.mulf %1096, %1097 : vector<4x1xf32>
    %cst_680 = arith.constant 9.99999974E-6 : f32
    %1099 = vector.broadcast %cst_680 : f32 to vector<4x1xf32>
    %1100 = arith.addf %1098, %1099 : vector<4x1xf32>
    %1101 = math.rsqrt %1100 : vector<4x1xf32>
    %1102 = vector.broadcast %1101 : vector<4x1xf32> to vector<4x64xf32>
    %1103 = arith.mulf %1092, %1102 : vector<4x64xf32>
    %c8_681 = arith.constant 8 : index
    %c0_682 = arith.constant 0 : index
    %c0_683 = arith.constant 0 : index
    %1104 = vector.load %arg19[%c8_681, %c0_682, %c0_683] : memref<12x4x1xf32, #tpu.memory_space<vmem>>, vector<1x4x1xf32>
    %1105 = vector.shape_cast %1104 : vector<1x4x1xf32> to vector<4x1xf32>
    %1106 = vector.broadcast %1105 : vector<4x1xf32> to vector<4x64xf32>
    %1107 = arith.mulf %1103, %1106 : vector<4x64xf32>
    %c8_684 = arith.constant 8 : index
    %c0_685 = arith.constant 0 : index
    %c0_686 = arith.constant 0 : index
    %1108 = vector.load %arg20[%c8_684, %c0_685, %c0_686] : memref<12x4x1xf32, #tpu.memory_space<vmem>>, vector<1x4x1xf32>
    %1109 = vector.shape_cast %1108 : vector<1x4x1xf32> to vector<4x1xf32>
    %1110 = vector.broadcast %1109 : vector<4x1xf32> to vector<4x64xf32>
    %1111 = arith.addf %1107, %1110 : vector<4x64xf32>
    %cst_687 = arith.constant 0.000000e+00 : f32
    %1112 = vector.broadcast %cst_687 : f32 to vector<4x64xf32>
    %1113 = arith.maximumf %1111, %1112 : vector<4x64xf32>
    %c9 = arith.constant 9 : index
    %c0_688 = arith.constant 0 : index
    %c0_689 = arith.constant 0 : index
    %1114 = vector.load %arg15[%c9, %c0_688, %c0_689] : memref<12x4x4xf32, #tpu.memory_space<vmem>>, vector<1x4x4xf32>
    %1115 = vector.shape_cast %1114 : vector<1x4x4xf32> to vector<4x4xf32>
    %cst_690 = arith.constant dense<0.000000e+00> : vector<4x64xf32>
    %1116 = tpu.matmul %1115, %1113, %cst_690 {dimension_numbers = #tpu.dot_dimension_numbers<[1], [0], [0], [1], [0, 0, 1, 1], [], []>} : vector<4x4xf32>, vector<4x64xf32>, vector<4x64xf32> -> vector<4x64xf32>
    %c9_691 = arith.constant 9 : index
    %c0_692 = arith.constant 0 : index
    %c0_693 = arith.constant 0 : index
    %1117 = vector.load %arg16[%c9_691, %c0_692, %c0_693] : memref<12x4x4xf32, #tpu.memory_space<vmem>>, vector<1x4x4xf32>
    %1118 = vector.shape_cast %1117 : vector<1x4x4xf32> to vector<4x4xf32>
    %cst_694 = arith.constant dense<0.000000e+00> : vector<4x64xf32>
    %1119 = tpu.matmul %1118, %1113, %cst_694 {dimension_numbers = #tpu.dot_dimension_numbers<[1], [0], [0], [1], [0, 0, 1, 1], [], []>} : vector<4x4xf32>, vector<4x64xf32>, vector<4x64xf32> -> vector<4x64xf32>
    %c9_695 = arith.constant 9 : index
    %c0_696 = arith.constant 0 : index
    %c0_697 = arith.constant 0 : index
    %1120 = vector.load %arg17[%c9_695, %c0_696, %c0_697] : memref<12x4x4xf32, #tpu.memory_space<vmem>>, vector<1x4x4xf32>
    %1121 = vector.shape_cast %1120 : vector<1x4x4xf32> to vector<4x4xf32>
    %cst_698 = arith.constant dense<0.000000e+00> : vector<4x64xf32>
    %1122 = tpu.matmul %1121, %1113, %cst_698 {dimension_numbers = #tpu.dot_dimension_numbers<[1], [0], [0], [1], [0, 0, 1, 1], [], []>} : vector<4x4xf32>, vector<4x64xf32>, vector<4x64xf32> -> vector<4x64xf32>
    %cst_699 = arith.constant dense<0.000000e+00> : vector<4x64xf32>
    %1123 = tpu.matmul %1116, %0, %cst_699 {dimension_numbers = #tpu.dot_dimension_numbers<[1], [0], [0], [1], [0, 0, 1, 1], [], []>} : vector<4x64xf32>, vector<64x64xf32>, vector<4x64xf32> -> vector<4x64xf32>
    %1124 = arith.addf %1123, %1119 : vector<4x64xf32>
    %cst_700 = arith.constant dense<0.000000e+00> : vector<4x64xf32>
    %1125 = tpu.matmul %1122, %1, %cst_700 {dimension_numbers = #tpu.dot_dimension_numbers<[1], [0], [0], [1], [0, 0, 1, 1], [], []>} : vector<4x64xf32>, vector<64x64xf32>, vector<4x64xf32> -> vector<4x64xf32>
    %1126 = arith.addf %1124, %1125 : vector<4x64xf32>
    %c9_701 = arith.constant 9 : index
    %c0_702 = arith.constant 0 : index
    %c0_703 = arith.constant 0 : index
    %1127 = vector.load %arg18[%c9_701, %c0_702, %c0_703] : memref<12x4x1xf32, #tpu.memory_space<vmem>>, vector<1x4x1xf32>
    %1128 = vector.shape_cast %1127 : vector<1x4x1xf32> to vector<4x1xf32>
    %1129 = vector.broadcast %1128 : vector<4x1xf32> to vector<4x64xf32>
    %1130 = arith.addf %1126, %1129 : vector<4x64xf32>
    %cst_704 = arith.constant dense<0.000000e+00> : vector<4x64xf32>
    %1131 = tpu.matmul %2, %1130, %cst_704 {dimension_numbers = #tpu.dot_dimension_numbers<[1], [0], [0], [1], [0, 0, 1, 1], [], []>} : vector<4x4xf32>, vector<4x64xf32>, vector<4x64xf32> -> vector<4x64xf32>
    %cst_705 = arith.constant dense<0.000000e+00> : vector<4xf32>
    %1132 = vector.multi_reduction <add>, %1131, %cst_705 [1] : vector<4x64xf32> to vector<4xf32>
    %1133 = vector.shape_cast %1132 : vector<4xf32> to vector<4x1xf32>
    %cst_706 = arith.constant 7.812500e-03 : f32
    %1134 = vector.broadcast %cst_706 : f32 to vector<4x1xf32>
    %1135 = arith.mulf %1133, %1134 : vector<4x1xf32>
    %1136 = vector.broadcast %1135 : vector<4x1xf32> to vector<4x64xf32>
    %1137 = arith.subf %1130, %1136 : vector<4x64xf32>
    %1138 = arith.mulf %1137, %1137 : vector<4x64xf32>
    %cst_707 = arith.constant dense<0.000000e+00> : vector<4x64xf32>
    %1139 = tpu.matmul %2, %1138, %cst_707 {dimension_numbers = #tpu.dot_dimension_numbers<[1], [0], [0], [1], [0, 0, 1, 1], [], []>} : vector<4x4xf32>, vector<4x64xf32>, vector<4x64xf32> -> vector<4x64xf32>
    %cst_708 = arith.constant dense<0.000000e+00> : vector<4xf32>
    %1140 = vector.multi_reduction <add>, %1139, %cst_708 [1] : vector<4x64xf32> to vector<4xf32>
    %1141 = vector.shape_cast %1140 : vector<4xf32> to vector<4x1xf32>
    %cst_709 = arith.constant 7.812500e-03 : f32
    %1142 = vector.broadcast %cst_709 : f32 to vector<4x1xf32>
    %1143 = arith.mulf %1141, %1142 : vector<4x1xf32>
    %cst_710 = arith.constant 9.99999974E-6 : f32
    %1144 = vector.broadcast %cst_710 : f32 to vector<4x1xf32>
    %1145 = arith.addf %1143, %1144 : vector<4x1xf32>
    %1146 = math.rsqrt %1145 : vector<4x1xf32>
    %1147 = vector.broadcast %1146 : vector<4x1xf32> to vector<4x64xf32>
    %1148 = arith.mulf %1137, %1147 : vector<4x64xf32>
    %c9_711 = arith.constant 9 : index
    %c0_712 = arith.constant 0 : index
    %c0_713 = arith.constant 0 : index
    %1149 = vector.load %arg19[%c9_711, %c0_712, %c0_713] : memref<12x4x1xf32, #tpu.memory_space<vmem>>, vector<1x4x1xf32>
    %1150 = vector.shape_cast %1149 : vector<1x4x1xf32> to vector<4x1xf32>
    %1151 = vector.broadcast %1150 : vector<4x1xf32> to vector<4x64xf32>
    %1152 = arith.mulf %1148, %1151 : vector<4x64xf32>
    %c9_714 = arith.constant 9 : index
    %c0_715 = arith.constant 0 : index
    %c0_716 = arith.constant 0 : index
    %1153 = vector.load %arg20[%c9_714, %c0_715, %c0_716] : memref<12x4x1xf32, #tpu.memory_space<vmem>>, vector<1x4x1xf32>
    %1154 = vector.shape_cast %1153 : vector<1x4x1xf32> to vector<4x1xf32>
    %1155 = vector.broadcast %1154 : vector<4x1xf32> to vector<4x64xf32>
    %1156 = arith.addf %1152, %1155 : vector<4x64xf32>
    %cst_717 = arith.constant 0.000000e+00 : f32
    %1157 = vector.broadcast %cst_717 : f32 to vector<4x64xf32>
    %1158 = arith.maximumf %1156, %1157 : vector<4x64xf32>
    %c10 = arith.constant 10 : index
    %c0_718 = arith.constant 0 : index
    %c0_719 = arith.constant 0 : index
    %1159 = vector.load %arg15[%c10, %c0_718, %c0_719] : memref<12x4x4xf32, #tpu.memory_space<vmem>>, vector<1x4x4xf32>
    %1160 = vector.shape_cast %1159 : vector<1x4x4xf32> to vector<4x4xf32>
    %cst_720 = arith.constant dense<0.000000e+00> : vector<4x64xf32>
    %1161 = tpu.matmul %1160, %1158, %cst_720 {dimension_numbers = #tpu.dot_dimension_numbers<[1], [0], [0], [1], [0, 0, 1, 1], [], []>} : vector<4x4xf32>, vector<4x64xf32>, vector<4x64xf32> -> vector<4x64xf32>
    %c10_721 = arith.constant 10 : index
    %c0_722 = arith.constant 0 : index
    %c0_723 = arith.constant 0 : index
    %1162 = vector.load %arg16[%c10_721, %c0_722, %c0_723] : memref<12x4x4xf32, #tpu.memory_space<vmem>>, vector<1x4x4xf32>
    %1163 = vector.shape_cast %1162 : vector<1x4x4xf32> to vector<4x4xf32>
    %cst_724 = arith.constant dense<0.000000e+00> : vector<4x64xf32>
    %1164 = tpu.matmul %1163, %1158, %cst_724 {dimension_numbers = #tpu.dot_dimension_numbers<[1], [0], [0], [1], [0, 0, 1, 1], [], []>} : vector<4x4xf32>, vector<4x64xf32>, vector<4x64xf32> -> vector<4x64xf32>
    %c10_725 = arith.constant 10 : index
    %c0_726 = arith.constant 0 : index
    %c0_727 = arith.constant 0 : index
    %1165 = vector.load %arg17[%c10_725, %c0_726, %c0_727] : memref<12x4x4xf32, #tpu.memory_space<vmem>>, vector<1x4x4xf32>
    %1166 = vector.shape_cast %1165 : vector<1x4x4xf32> to vector<4x4xf32>
    %cst_728 = arith.constant dense<0.000000e+00> : vector<4x64xf32>
    %1167 = tpu.matmul %1166, %1158, %cst_728 {dimension_numbers = #tpu.dot_dimension_numbers<[1], [0], [0], [1], [0, 0, 1, 1], [], []>} : vector<4x4xf32>, vector<4x64xf32>, vector<4x64xf32> -> vector<4x64xf32>
    %cst_729 = arith.constant dense<0.000000e+00> : vector<4x64xf32>
    %1168 = tpu.matmul %1161, %0, %cst_729 {dimension_numbers = #tpu.dot_dimension_numbers<[1], [0], [0], [1], [0, 0, 1, 1], [], []>} : vector<4x64xf32>, vector<64x64xf32>, vector<4x64xf32> -> vector<4x64xf32>
    %1169 = arith.addf %1168, %1164 : vector<4x64xf32>
    %cst_730 = arith.constant dense<0.000000e+00> : vector<4x64xf32>
    %1170 = tpu.matmul %1167, %1, %cst_730 {dimension_numbers = #tpu.dot_dimension_numbers<[1], [0], [0], [1], [0, 0, 1, 1], [], []>} : vector<4x64xf32>, vector<64x64xf32>, vector<4x64xf32> -> vector<4x64xf32>
    %1171 = arith.addf %1169, %1170 : vector<4x64xf32>
    %c10_731 = arith.constant 10 : index
    %c0_732 = arith.constant 0 : index
    %c0_733 = arith.constant 0 : index
    %1172 = vector.load %arg18[%c10_731, %c0_732, %c0_733] : memref<12x4x1xf32, #tpu.memory_space<vmem>>, vector<1x4x1xf32>
    %1173 = vector.shape_cast %1172 : vector<1x4x1xf32> to vector<4x1xf32>
    %1174 = vector.broadcast %1173 : vector<4x1xf32> to vector<4x64xf32>
    %1175 = arith.addf %1171, %1174 : vector<4x64xf32>
    %cst_734 = arith.constant dense<0.000000e+00> : vector<4x64xf32>
    %1176 = tpu.matmul %2, %1175, %cst_734 {dimension_numbers = #tpu.dot_dimension_numbers<[1], [0], [0], [1], [0, 0, 1, 1], [], []>} : vector<4x4xf32>, vector<4x64xf32>, vector<4x64xf32> -> vector<4x64xf32>
    %cst_735 = arith.constant dense<0.000000e+00> : vector<4xf32>
    %1177 = vector.multi_reduction <add>, %1176, %cst_735 [1] : vector<4x64xf32> to vector<4xf32>
    %1178 = vector.shape_cast %1177 : vector<4xf32> to vector<4x1xf32>
    %cst_736 = arith.constant 7.812500e-03 : f32
    %1179 = vector.broadcast %cst_736 : f32 to vector<4x1xf32>
    %1180 = arith.mulf %1178, %1179 : vector<4x1xf32>
    %1181 = vector.broadcast %1180 : vector<4x1xf32> to vector<4x64xf32>
    %1182 = arith.subf %1175, %1181 : vector<4x64xf32>
    %1183 = arith.mulf %1182, %1182 : vector<4x64xf32>
    %cst_737 = arith.constant dense<0.000000e+00> : vector<4x64xf32>
    %1184 = tpu.matmul %2, %1183, %cst_737 {dimension_numbers = #tpu.dot_dimension_numbers<[1], [0], [0], [1], [0, 0, 1, 1], [], []>} : vector<4x4xf32>, vector<4x64xf32>, vector<4x64xf32> -> vector<4x64xf32>
    %cst_738 = arith.constant dense<0.000000e+00> : vector<4xf32>
    %1185 = vector.multi_reduction <add>, %1184, %cst_738 [1] : vector<4x64xf32> to vector<4xf32>
    %1186 = vector.shape_cast %1185 : vector<4xf32> to vector<4x1xf32>
    %cst_739 = arith.constant 7.812500e-03 : f32
    %1187 = vector.broadcast %cst_739 : f32 to vector<4x1xf32>
    %1188 = arith.mulf %1186, %1187 : vector<4x1xf32>
    %cst_740 = arith.constant 9.99999974E-6 : f32
    %1189 = vector.broadcast %cst_740 : f32 to vector<4x1xf32>
    %1190 = arith.addf %1188, %1189 : vector<4x1xf32>
    %1191 = math.rsqrt %1190 : vector<4x1xf32>
    %1192 = vector.broadcast %1191 : vector<4x1xf32> to vector<4x64xf32>
    %1193 = arith.mulf %1182, %1192 : vector<4x64xf32>
    %c10_741 = arith.constant 10 : index
    %c0_742 = arith.constant 0 : index
    %c0_743 = arith.constant 0 : index
    %1194 = vector.load %arg19[%c10_741, %c0_742, %c0_743] : memref<12x4x1xf32, #tpu.memory_space<vmem>>, vector<1x4x1xf32>
    %1195 = vector.shape_cast %1194 : vector<1x4x1xf32> to vector<4x1xf32>
    %1196 = vector.broadcast %1195 : vector<4x1xf32> to vector<4x64xf32>
    %1197 = arith.mulf %1193, %1196 : vector<4x64xf32>
    %c10_744 = arith.constant 10 : index
    %c0_745 = arith.constant 0 : index
    %c0_746 = arith.constant 0 : index
    %1198 = vector.load %arg20[%c10_744, %c0_745, %c0_746] : memref<12x4x1xf32, #tpu.memory_space<vmem>>, vector<1x4x1xf32>
    %1199 = vector.shape_cast %1198 : vector<1x4x1xf32> to vector<4x1xf32>
    %1200 = vector.broadcast %1199 : vector<4x1xf32> to vector<4x64xf32>
    %1201 = arith.addf %1197, %1200 : vector<4x64xf32>
    %cst_747 = arith.constant 0.000000e+00 : f32
    %1202 = vector.broadcast %cst_747 : f32 to vector<4x64xf32>
    %1203 = arith.maximumf %1201, %1202 : vector<4x64xf32>
    %c11 = arith.constant 11 : index
    %c0_748 = arith.constant 0 : index
    %c0_749 = arith.constant 0 : index
    %1204 = vector.load %arg15[%c11, %c0_748, %c0_749] : memref<12x4x4xf32, #tpu.memory_space<vmem>>, vector<1x4x4xf32>
    %1205 = vector.shape_cast %1204 : vector<1x4x4xf32> to vector<4x4xf32>
    %cst_750 = arith.constant dense<0.000000e+00> : vector<4x64xf32>
    %1206 = tpu.matmul %1205, %1203, %cst_750 {dimension_numbers = #tpu.dot_dimension_numbers<[1], [0], [0], [1], [0, 0, 1, 1], [], []>} : vector<4x4xf32>, vector<4x64xf32>, vector<4x64xf32> -> vector<4x64xf32>
    %c11_751 = arith.constant 11 : index
    %c0_752 = arith.constant 0 : index
    %c0_753 = arith.constant 0 : index
    %1207 = vector.load %arg16[%c11_751, %c0_752, %c0_753] : memref<12x4x4xf32, #tpu.memory_space<vmem>>, vector<1x4x4xf32>
    %1208 = vector.shape_cast %1207 : vector<1x4x4xf32> to vector<4x4xf32>
    %cst_754 = arith.constant dense<0.000000e+00> : vector<4x64xf32>
    %1209 = tpu.matmul %1208, %1203, %cst_754 {dimension_numbers = #tpu.dot_dimension_numbers<[1], [0], [0], [1], [0, 0, 1, 1], [], []>} : vector<4x4xf32>, vector<4x64xf32>, vector<4x64xf32> -> vector<4x64xf32>
    %c11_755 = arith.constant 11 : index
    %c0_756 = arith.constant 0 : index
    %c0_757 = arith.constant 0 : index
    %1210 = vector.load %arg17[%c11_755, %c0_756, %c0_757] : memref<12x4x4xf32, #tpu.memory_space<vmem>>, vector<1x4x4xf32>
    %1211 = vector.shape_cast %1210 : vector<1x4x4xf32> to vector<4x4xf32>
    %cst_758 = arith.constant dense<0.000000e+00> : vector<4x64xf32>
    %1212 = tpu.matmul %1211, %1203, %cst_758 {dimension_numbers = #tpu.dot_dimension_numbers<[1], [0], [0], [1], [0, 0, 1, 1], [], []>} : vector<4x4xf32>, vector<4x64xf32>, vector<4x64xf32> -> vector<4x64xf32>
    %cst_759 = arith.constant dense<0.000000e+00> : vector<4x64xf32>
    %1213 = tpu.matmul %1206, %0, %cst_759 {dimension_numbers = #tpu.dot_dimension_numbers<[1], [0], [0], [1], [0, 0, 1, 1], [], []>} : vector<4x64xf32>, vector<64x64xf32>, vector<4x64xf32> -> vector<4x64xf32>
    %1214 = arith.addf %1213, %1209 : vector<4x64xf32>
    %cst_760 = arith.constant dense<0.000000e+00> : vector<4x64xf32>
    %1215 = tpu.matmul %1212, %1, %cst_760 {dimension_numbers = #tpu.dot_dimension_numbers<[1], [0], [0], [1], [0, 0, 1, 1], [], []>} : vector<4x64xf32>, vector<64x64xf32>, vector<4x64xf32> -> vector<4x64xf32>
    %1216 = arith.addf %1214, %1215 : vector<4x64xf32>
    %c11_761 = arith.constant 11 : index
    %c0_762 = arith.constant 0 : index
    %c0_763 = arith.constant 0 : index
    %1217 = vector.load %arg18[%c11_761, %c0_762, %c0_763] : memref<12x4x1xf32, #tpu.memory_space<vmem>>, vector<1x4x1xf32>
    %1218 = vector.shape_cast %1217 : vector<1x4x1xf32> to vector<4x1xf32>
    %1219 = vector.broadcast %1218 : vector<4x1xf32> to vector<4x64xf32>
    %1220 = arith.addf %1216, %1219 : vector<4x64xf32>
    %cst_764 = arith.constant dense<0.000000e+00> : vector<4x64xf32>
    %1221 = tpu.matmul %2, %1220, %cst_764 {dimension_numbers = #tpu.dot_dimension_numbers<[1], [0], [0], [1], [0, 0, 1, 1], [], []>} : vector<4x4xf32>, vector<4x64xf32>, vector<4x64xf32> -> vector<4x64xf32>
    %cst_765 = arith.constant dense<0.000000e+00> : vector<4xf32>
    %1222 = vector.multi_reduction <add>, %1221, %cst_765 [1] : vector<4x64xf32> to vector<4xf32>
    %1223 = vector.shape_cast %1222 : vector<4xf32> to vector<4x1xf32>
    %cst_766 = arith.constant 7.812500e-03 : f32
    %1224 = vector.broadcast %cst_766 : f32 to vector<4x1xf32>
    %1225 = arith.mulf %1223, %1224 : vector<4x1xf32>
    %1226 = vector.broadcast %1225 : vector<4x1xf32> to vector<4x64xf32>
    %1227 = arith.subf %1220, %1226 : vector<4x64xf32>
    %1228 = arith.mulf %1227, %1227 : vector<4x64xf32>
    %cst_767 = arith.constant dense<0.000000e+00> : vector<4x64xf32>
    %1229 = tpu.matmul %2, %1228, %cst_767 {dimension_numbers = #tpu.dot_dimension_numbers<[1], [0], [0], [1], [0, 0, 1, 1], [], []>} : vector<4x4xf32>, vector<4x64xf32>, vector<4x64xf32> -> vector<4x64xf32>
    %cst_768 = arith.constant dense<0.000000e+00> : vector<4xf32>
    %1230 = vector.multi_reduction <add>, %1229, %cst_768 [1] : vector<4x64xf32> to vector<4xf32>
    %1231 = vector.shape_cast %1230 : vector<4xf32> to vector<4x1xf32>
    %cst_769 = arith.constant 7.812500e-03 : f32
    %1232 = vector.broadcast %cst_769 : f32 to vector<4x1xf32>
    %1233 = arith.mulf %1231, %1232 : vector<4x1xf32>
    %cst_770 = arith.constant 9.99999974E-6 : f32
    %1234 = vector.broadcast %cst_770 : f32 to vector<4x1xf32>
    %1235 = arith.addf %1233, %1234 : vector<4x1xf32>
    %1236 = math.rsqrt %1235 : vector<4x1xf32>
    %1237 = vector.broadcast %1236 : vector<4x1xf32> to vector<4x64xf32>
    %1238 = arith.mulf %1227, %1237 : vector<4x64xf32>
    %c11_771 = arith.constant 11 : index
    %c0_772 = arith.constant 0 : index
    %c0_773 = arith.constant 0 : index
    %1239 = vector.load %arg19[%c11_771, %c0_772, %c0_773] : memref<12x4x1xf32, #tpu.memory_space<vmem>>, vector<1x4x1xf32>
    %1240 = vector.shape_cast %1239 : vector<1x4x1xf32> to vector<4x1xf32>
    %1241 = vector.broadcast %1240 : vector<4x1xf32> to vector<4x64xf32>
    %1242 = arith.mulf %1238, %1241 : vector<4x64xf32>
    %c11_774 = arith.constant 11 : index
    %c0_775 = arith.constant 0 : index
    %c0_776 = arith.constant 0 : index
    %1243 = vector.load %arg20[%c11_774, %c0_775, %c0_776] : memref<12x4x1xf32, #tpu.memory_space<vmem>>, vector<1x4x1xf32>
    %1244 = vector.shape_cast %1243 : vector<1x4x1xf32> to vector<4x1xf32>
    %1245 = vector.broadcast %1244 : vector<4x1xf32> to vector<4x64xf32>
    %1246 = arith.addf %1242, %1245 : vector<4x64xf32>
    %1247 = arith.addf %978, %1246 : vector<4x64xf32>
    %c3_777 = arith.constant 3 : index
    %c0_778 = arith.constant 0 : index
    %c0_779 = arith.constant 0 : index
    %1248 = vector.load %arg3[%c3_777, %c0_778, %c0_779] : memref<4x1x64xf32, #tpu.memory_space<vmem>>, vector<1x1x64xf32>
    %1249 = vector.shape_cast %1248 : vector<1x1x64xf32> to vector<1x64xf32>
    %c3_780 = arith.constant 3 : index
    %c0_781 = arith.constant 0 : index
    %c0_782 = arith.constant 0 : index
    %1250 = vector.load %arg4[%c3_780, %c0_781, %c0_782] : memref<4x1x64xf32, #tpu.memory_space<vmem>>, vector<1x1x64xf32>
    %1251 = vector.shape_cast %1250 : vector<1x1x64xf32> to vector<1x64xf32>
    %cst_783 = arith.constant dense<0.000000e+00> : vector<4xf32>
    %1252 = vector.multi_reduction <add>, %1247, %cst_783 [1] : vector<4x64xf32> to vector<4xf32>
    %1253 = vector.shape_cast %1252 : vector<4xf32> to vector<4x1xf32>
    %cst_784 = arith.constant 6.400000e+01 : f32
    %1254 = vector.broadcast %cst_784 : f32 to vector<4x1xf32>
    %1255 = arith.divf %1253, %1254 : vector<4x1xf32>
    %1256 = vector.broadcast %1255 : vector<4x1xf32> to vector<4x64xf32>
    %1257 = arith.subf %1247, %1256 : vector<4x64xf32>
    %1258 = arith.mulf %1257, %1257 : vector<4x64xf32>
    %cst_785 = arith.constant dense<0.000000e+00> : vector<4xf32>
    %1259 = vector.multi_reduction <add>, %1258, %cst_785 [1] : vector<4x64xf32> to vector<4xf32>
    %1260 = vector.shape_cast %1259 : vector<4xf32> to vector<4x1xf32>
    %cst_786 = arith.constant 6.400000e+01 : f32
    %1261 = vector.broadcast %cst_786 : f32 to vector<4x1xf32>
    %1262 = arith.divf %1260, %1261 : vector<4x1xf32>
    %cst_787 = arith.constant 9.99999974E-6 : f32
    %1263 = vector.broadcast %cst_787 : f32 to vector<4x1xf32>
    %1264 = arith.addf %1262, %1263 : vector<4x1xf32>
    %1265 = math.rsqrt %1264 : vector<4x1xf32>
    %1266 = vector.broadcast %1265 : vector<4x1xf32> to vector<4x64xf32>
    %1267 = arith.mulf %1257, %1266 : vector<4x64xf32>
    %1268 = vector.broadcast %1249 : vector<1x64xf32> to vector<4x64xf32>
    %1269 = arith.mulf %1267, %1268 : vector<4x64xf32>
    %1270 = vector.broadcast %1251 : vector<1x64xf32> to vector<4x64xf32>
    %1271 = arith.addf %1269, %1270 : vector<4x64xf32>
    %c3_788 = arith.constant 3 : index
    %c0_789 = arith.constant 0 : index
    %c0_790 = arith.constant 0 : index
    %1272 = vector.load %arg5[%c3_788, %c0_789, %c0_790] : memref<4x64x192xf32, #tpu.memory_space<vmem>>, vector<1x64x192xf32>
    %1273 = vector.shape_cast %1272 : vector<1x64x192xf32> to vector<64x192xf32>
    %cst_791 = arith.constant dense<0.000000e+00> : vector<4x192xf32>
    %1274 = tpu.matmul %1271, %1273, %cst_791 {dimension_numbers = #tpu.dot_dimension_numbers<[1], [0], [0], [1], [0, 0, 1, 1], [], []>} : vector<4x64xf32>, vector<64x192xf32>, vector<4x192xf32> -> vector<4x192xf32>
    %c3_792 = arith.constant 3 : index
    %c0_793 = arith.constant 0 : index
    %c0_794 = arith.constant 0 : index
    %1275 = vector.load %arg6[%c3_792, %c0_793, %c0_794] : memref<4x1x192xf32, #tpu.memory_space<vmem>>, vector<1x1x192xf32>
    %1276 = vector.shape_cast %1275 : vector<1x1x192xf32> to vector<1x192xf32>
    %1277 = vector.broadcast %1276 : vector<1x192xf32> to vector<4x192xf32>
    %1278 = arith.addf %1274, %1277 : vector<4x192xf32>
    %1279 = vector.extract_strided_slice %1278 {offsets = [0, 0], sizes = [4, 64], strides = [1, 1]} : vector<4x192xf32> to vector<4x64xf32>
    %cst_795 = arith.constant 2.500000e-01 : f32
    %1280 = vector.broadcast %cst_795 : f32 to vector<4x64xf32>
    %1281 = arith.mulf %1279, %1280 : vector<4x64xf32>
    %1282 = vector.extract_strided_slice %1278 {offsets = [0, 64], sizes = [4, 64], strides = [1, 1]} : vector<4x192xf32> to vector<4x64xf32>
    %1283 = vector.extract_strided_slice %1278 {offsets = [0, 128], sizes = [4, 64], strides = [1, 1]} : vector<4x192xf32> to vector<4x64xf32>
    %cst_796 = arith.constant dense<0.000000e+00> : vector<4x64xf32>
    %1284 = tpu.matmul %3, %1282, %cst_796 {dimension_numbers = #tpu.dot_dimension_numbers<[1], [0], [0], [1], [0, 0, 1, 1], [], []>} : vector<4x4xf32>, vector<4x64xf32>, vector<4x64xf32> -> vector<4x64xf32>
    %cst_797 = arith.constant dense<0.000000e+00> : vector<4x64xf32>
    %1285 = tpu.matmul %3, %1283, %cst_797 {dimension_numbers = #tpu.dot_dimension_numbers<[1], [0], [0], [1], [0, 0, 1, 1], [], []>} : vector<4x4xf32>, vector<4x64xf32>, vector<4x64xf32> -> vector<4x64xf32>
    %1286 = arith.mulf %1281, %1282 : vector<4x64xf32>
    %cst_798 = arith.constant dense<0.000000e+00> : vector<4x4xf32>
    %1287 = tpu.matmul %1286, %4, %cst_798 {dimension_numbers = #tpu.dot_dimension_numbers<[1], [0], [0], [1], [0, 0, 1, 1], [], []>} : vector<4x64xf32>, vector<64x4xf32>, vector<4x4xf32> -> vector<4x4xf32>
    %1288 = arith.mulf %1281, %1284 : vector<4x64xf32>
    %cst_799 = arith.constant dense<0.000000e+00> : vector<4x4xf32>
    %1289 = tpu.matmul %1288, %4, %cst_799 {dimension_numbers = #tpu.dot_dimension_numbers<[1], [0], [0], [1], [0, 0, 1, 1], [], []>} : vector<4x64xf32>, vector<64x4xf32>, vector<4x4xf32> -> vector<4x4xf32>
    %1290 = arith.maximumf %1287, %1289 : vector<4x4xf32>
    %1291 = arith.subf %1287, %1290 : vector<4x4xf32>
    %1292 = math.exp %1291 : vector<4x4xf32>
    %1293 = arith.subf %1289, %1290 : vector<4x4xf32>
    %1294 = math.exp %1293 : vector<4x4xf32>
    %1295 = arith.addf %1292, %1294 : vector<4x4xf32>
    %1296 = tpu.reciprocal %1295 {approx = true} : vector<4x4xf32> -> vector<4x4xf32>
    %1297 = arith.mulf %1292, %1296 : vector<4x4xf32>
    %cst_800 = arith.constant dense<0.000000e+00> : vector<4x64xf32>
    %1298 = tpu.matmul %1297, %5, %cst_800 {dimension_numbers = #tpu.dot_dimension_numbers<[1], [0], [0], [1], [0, 0, 1, 1], [], []>} : vector<4x4xf32>, vector<4x64xf32>, vector<4x64xf32> -> vector<4x64xf32>
    %1299 = arith.mulf %1294, %1296 : vector<4x4xf32>
    %cst_801 = arith.constant dense<0.000000e+00> : vector<4x64xf32>
    %1300 = tpu.matmul %1299, %5, %cst_801 {dimension_numbers = #tpu.dot_dimension_numbers<[1], [0], [0], [1], [0, 0, 1, 1], [], []>} : vector<4x4xf32>, vector<4x64xf32>, vector<4x64xf32> -> vector<4x64xf32>
    %1301 = arith.mulf %1298, %1283 : vector<4x64xf32>
    %1302 = arith.mulf %1300, %1285 : vector<4x64xf32>
    %1303 = arith.addf %1301, %1302 : vector<4x64xf32>
    %c3_802 = arith.constant 3 : index
    %c0_803 = arith.constant 0 : index
    %c0_804 = arith.constant 0 : index
    %1304 = vector.load %arg7[%c3_802, %c0_803, %c0_804] : memref<4x64x64xf32, #tpu.memory_space<vmem>>, vector<1x64x64xf32>
    %1305 = vector.shape_cast %1304 : vector<1x64x64xf32> to vector<64x64xf32>
    %cst_805 = arith.constant dense<0.000000e+00> : vector<4x64xf32>
    %1306 = tpu.matmul %1303, %1305, %cst_805 {dimension_numbers = #tpu.dot_dimension_numbers<[1], [0], [0], [1], [0, 0, 1, 1], [], []>} : vector<4x64xf32>, vector<64x64xf32>, vector<4x64xf32> -> vector<4x64xf32>
    %1307 = arith.addf %1247, %1306 : vector<4x64xf32>
    %c3_806 = arith.constant 3 : index
    %c0_807 = arith.constant 0 : index
    %c0_808 = arith.constant 0 : index
    %1308 = vector.load %arg8[%c3_806, %c0_807, %c0_808] : memref<4x1x64xf32, #tpu.memory_space<vmem>>, vector<1x1x64xf32>
    %1309 = vector.shape_cast %1308 : vector<1x1x64xf32> to vector<1x64xf32>
    %1310 = vector.broadcast %1309 : vector<1x64xf32> to vector<4x64xf32>
    %1311 = arith.addf %1307, %1310 : vector<4x64xf32>
    %c3_809 = arith.constant 3 : index
    %c0_810 = arith.constant 0 : index
    %c0_811 = arith.constant 0 : index
    %1312 = vector.load %arg9[%c3_809, %c0_810, %c0_811] : memref<4x1x64xf32, #tpu.memory_space<vmem>>, vector<1x1x64xf32>
    %1313 = vector.shape_cast %1312 : vector<1x1x64xf32> to vector<1x64xf32>
    %c3_812 = arith.constant 3 : index
    %c0_813 = arith.constant 0 : index
    %c0_814 = arith.constant 0 : index
    %1314 = vector.load %arg10[%c3_812, %c0_813, %c0_814] : memref<4x1x64xf32, #tpu.memory_space<vmem>>, vector<1x1x64xf32>
    %1315 = vector.shape_cast %1314 : vector<1x1x64xf32> to vector<1x64xf32>
    %cst_815 = arith.constant dense<0.000000e+00> : vector<4xf32>
    %1316 = vector.multi_reduction <add>, %1311, %cst_815 [1] : vector<4x64xf32> to vector<4xf32>
    %1317 = vector.shape_cast %1316 : vector<4xf32> to vector<4x1xf32>
    %cst_816 = arith.constant 6.400000e+01 : f32
    %1318 = vector.broadcast %cst_816 : f32 to vector<4x1xf32>
    %1319 = arith.divf %1317, %1318 : vector<4x1xf32>
    %1320 = vector.broadcast %1319 : vector<4x1xf32> to vector<4x64xf32>
    %1321 = arith.subf %1311, %1320 : vector<4x64xf32>
    %1322 = arith.mulf %1321, %1321 : vector<4x64xf32>
    %cst_817 = arith.constant dense<0.000000e+00> : vector<4xf32>
    %1323 = vector.multi_reduction <add>, %1322, %cst_817 [1] : vector<4x64xf32> to vector<4xf32>
    %1324 = vector.shape_cast %1323 : vector<4xf32> to vector<4x1xf32>
    %cst_818 = arith.constant 6.400000e+01 : f32
    %1325 = vector.broadcast %cst_818 : f32 to vector<4x1xf32>
    %1326 = arith.divf %1324, %1325 : vector<4x1xf32>
    %cst_819 = arith.constant 9.99999974E-6 : f32
    %1327 = vector.broadcast %cst_819 : f32 to vector<4x1xf32>
    %1328 = arith.addf %1326, %1327 : vector<4x1xf32>
    %1329 = math.rsqrt %1328 : vector<4x1xf32>
    %1330 = vector.broadcast %1329 : vector<4x1xf32> to vector<4x64xf32>
    %1331 = arith.mulf %1321, %1330 : vector<4x64xf32>
    %1332 = vector.broadcast %1313 : vector<1x64xf32> to vector<4x64xf32>
    %1333 = arith.mulf %1331, %1332 : vector<4x64xf32>
    %1334 = vector.broadcast %1315 : vector<1x64xf32> to vector<4x64xf32>
    %1335 = arith.addf %1333, %1334 : vector<4x64xf32>
    %c3_820 = arith.constant 3 : index
    %c0_821 = arith.constant 0 : index
    %c0_822 = arith.constant 0 : index
    %1336 = vector.load %arg11[%c3_820, %c0_821, %c0_822] : memref<4x64x64xf32, #tpu.memory_space<vmem>>, vector<1x64x64xf32>
    %1337 = vector.shape_cast %1336 : vector<1x64x64xf32> to vector<64x64xf32>
    %cst_823 = arith.constant dense<0.000000e+00> : vector<4x64xf32>
    %1338 = tpu.matmul %1335, %1337, %cst_823 {dimension_numbers = #tpu.dot_dimension_numbers<[1], [0], [0], [1], [0, 0, 1, 1], [], []>} : vector<4x64xf32>, vector<64x64xf32>, vector<4x64xf32> -> vector<4x64xf32>
    %c3_824 = arith.constant 3 : index
    %c0_825 = arith.constant 0 : index
    %c0_826 = arith.constant 0 : index
    %1339 = vector.load %arg12[%c3_824, %c0_825, %c0_826] : memref<4x1x64xf32, #tpu.memory_space<vmem>>, vector<1x1x64xf32>
    %1340 = vector.shape_cast %1339 : vector<1x1x64xf32> to vector<1x64xf32>
    %1341 = vector.broadcast %1340 : vector<1x64xf32> to vector<4x64xf32>
    %1342 = arith.addf %1338, %1341 : vector<4x64xf32>
    %cst_827 = arith.constant 5.000000e-01 : f32
    %1343 = vector.broadcast %cst_827 : f32 to vector<4x64xf32>
    %1344 = arith.mulf %1343, %1342 : vector<4x64xf32>
    %cst_828 = arith.constant 0.707106769 : f32
    %1345 = vector.broadcast %cst_828 : f32 to vector<4x64xf32>
    %1346 = arith.mulf %1342, %1345 : vector<4x64xf32>
    %1347 = math.absf %1346 : vector<4x64xf32>
    %cst_829 = arith.constant 0.327591091 : f32
    %1348 = vector.broadcast %cst_829 : f32 to vector<4x64xf32>
    %1349 = arith.mulf %1348, %1347 : vector<4x64xf32>
    %cst_830 = arith.constant 1.000000e+00 : f32
    %1350 = vector.broadcast %cst_830 : f32 to vector<4x64xf32>
    %1351 = arith.addf %1350, %1349 : vector<4x64xf32>
    %cst_831 = arith.constant 1.000000e+00 : f32
    %1352 = vector.broadcast %cst_831 : f32 to vector<4x64xf32>
    %1353 = arith.divf %1352, %1351 : vector<4x64xf32>
    %cst_832 = arith.constant 1.06140542 : f32
    %1354 = vector.broadcast %cst_832 : f32 to vector<4x64xf32>
    %1355 = arith.mulf %1353, %1354 : vector<4x64xf32>
    %cst_833 = arith.constant -1.45315206 : f32
    %1356 = vector.broadcast %cst_833 : f32 to vector<4x64xf32>
    %1357 = arith.addf %1356, %1355 : vector<4x64xf32>
    %1358 = arith.mulf %1353, %1357 : vector<4x64xf32>
    %cst_834 = arith.constant 1.42141378 : f32
    %1359 = vector.broadcast %cst_834 : f32 to vector<4x64xf32>
    %1360 = arith.addf %1359, %1358 : vector<4x64xf32>
    %1361 = arith.mulf %1353, %1360 : vector<4x64xf32>
    %cst_835 = arith.constant -0.284496725 : f32
    %1362 = vector.broadcast %cst_835 : f32 to vector<4x64xf32>
    %1363 = arith.addf %1362, %1361 : vector<4x64xf32>
    %1364 = arith.mulf %1353, %1363 : vector<4x64xf32>
    %cst_836 = arith.constant 0.254829586 : f32
    %1365 = vector.broadcast %cst_836 : f32 to vector<4x64xf32>
    %1366 = arith.addf %1365, %1364 : vector<4x64xf32>
    %1367 = arith.mulf %1353, %1366 : vector<4x64xf32>
    %cst_837 = arith.constant 0.000000e+00 : f32
    %1368 = vector.broadcast %cst_837 : f32 to vector<4x64xf32>
    %1369 = arith.subf %1368, %1347 : vector<4x64xf32>
    %1370 = arith.mulf %1369, %1347 : vector<4x64xf32>
    %1371 = math.exp %1370 : vector<4x64xf32>
    %1372 = arith.mulf %1367, %1371 : vector<4x64xf32>
    %cst_838 = arith.constant 1.000000e+00 : f32
    %1373 = vector.broadcast %cst_838 : f32 to vector<4x64xf32>
    %1374 = arith.subf %1373, %1372 : vector<4x64xf32>
    %cst_839 = arith.constant 0.000000e+00 : f32
    %1375 = vector.broadcast %cst_839 : f32 to vector<4x64xf32>
    %1376 = arith.cmpf oge, %1346, %1375 : vector<4x64xf32>
    %cst_840 = arith.constant 0.000000e+00 : f32
    %1377 = vector.broadcast %cst_840 : f32 to vector<4x64xf32>
    %1378 = arith.subf %1377, %1374 : vector<4x64xf32>
    %1379 = arith.select %1376, %1374, %1378 : vector<4x64xi1>, vector<4x64xf32>
    %cst_841 = arith.constant 1.000000e+00 : f32
    %1380 = vector.broadcast %cst_841 : f32 to vector<4x64xf32>
    %1381 = arith.addf %1380, %1379 : vector<4x64xf32>
    %1382 = arith.mulf %1344, %1381 : vector<4x64xf32>
    %c3_842 = arith.constant 3 : index
    %c0_843 = arith.constant 0 : index
    %c0_844 = arith.constant 0 : index
    %1383 = vector.load %arg13[%c3_842, %c0_843, %c0_844] : memref<4x64x64xf32, #tpu.memory_space<vmem>>, vector<1x64x64xf32>
    %1384 = vector.shape_cast %1383 : vector<1x64x64xf32> to vector<64x64xf32>
    %cst_845 = arith.constant dense<0.000000e+00> : vector<4x64xf32>
    %1385 = tpu.matmul %1382, %1384, %cst_845 {dimension_numbers = #tpu.dot_dimension_numbers<[1], [0], [0], [1], [0, 0, 1, 1], [], []>} : vector<4x64xf32>, vector<64x64xf32>, vector<4x64xf32> -> vector<4x64xf32>
    %c3_846 = arith.constant 3 : index
    %c0_847 = arith.constant 0 : index
    %c0_848 = arith.constant 0 : index
    %1386 = vector.load %arg14[%c3_846, %c0_847, %c0_848] : memref<4x1x64xf32, #tpu.memory_space<vmem>>, vector<1x1x64xf32>
    %1387 = vector.shape_cast %1386 : vector<1x1x64xf32> to vector<1x64xf32>
    %1388 = vector.broadcast %1387 : vector<1x64xf32> to vector<4x64xf32>
    %1389 = arith.addf %1385, %1388 : vector<4x64xf32>
    %1390 = arith.addf %1311, %1389 : vector<4x64xf32>
    %c0_849 = arith.constant 0 : index
    %c0_850 = arith.constant 0 : index
    %1391 = vector.load %arg27[%c0_849, %c0_850] : memref<64x2xf32, #tpu.memory_space<vmem>>, vector<64x2xf32>
    %cst_851 = arith.constant dense<0.000000e+00> : vector<4x2xf32>
    %1392 = tpu.matmul %1390, %1391, %cst_851 {dimension_numbers = #tpu.dot_dimension_numbers<[1], [0], [0], [1], [0, 0, 1, 1], [], []>} : vector<4x64xf32>, vector<64x2xf32>, vector<4x2xf32> -> vector<4x2xf32>
    %c0_852 = arith.constant 0 : index
    %c0_853 = arith.constant 0 : index
    %1393 = vector.load %arg28[%c0_852, %c0_853] : memref<1x2xf32, #tpu.memory_space<vmem>>, vector<1x2xf32>
    %1394 = vector.broadcast %1393 : vector<1x2xf32> to vector<4x2xf32>
    %1395 = arith.addf %1392, %1394 : vector<4x2xf32>
    %c0_854 = arith.constant 0 : index
    %c0_855 = arith.constant 0 : index
    %1396 = vector.load %arg29[%c0_854, %c0_855] : memref<4x2xf32, #tpu.memory_space<vmem>>, vector<4x2xf32>
    tpu.vector_store %arg29[%c0_854, %c0_855], %1395 {strides = array<i32>} : memref<4x2xf32, #tpu.memory_space<vmem>>, vector<4x2xf32>,
    return
  }
}

</mosaic_0001>

<bundles_post_ra>
// kernel: attention_ce_forward.1
= control target key start
LH: loop header
LB: loop body
LE: loop exit
PB: predicated region body
PF: predicated region fallthrough
CT: control target
= control target key end

     0   :  { %s18170_s6 = smov 1   ;;  %s18171_s10 = smov 2   ;;  %s20086_s0 = inlined_call_operand.smem [shape: u32[30], index: -1, kind: input, shape index: {}] }
   0x1   :  { %s18235_s5 = sld [smem:[%s20086_s0]]   ;;  %s18172_s14 = smov 3  }
   0x2   :  { %s18240_s9 = sld [smem:[%s20086_s0 + %s18170_s6]]   ;;  %s18173_s18 = smov 4  }
   0x3   :  { %s18245_s13 = sld [smem:[%s20086_s0 + %s18171_s10]]   ;;  %s18174_s22 = smov 5  }
   0x4   :  { %s18250_s17 = sld [smem:[%s20086_s0 + %s18172_s14]]   ;;  %s18175_s26 = smov 6  }
   0x5   :  { %s18255_s21 = sld [smem:[%s20086_s0 + %s18173_s18]]   ;;  %s18176_s30 = smov 7  }
   0x6   :  { %s18260_s25 = sld [smem:[%s20086_s0 + %s18174_s22]]   ;;  %s18177_s4 = smov 8  }
   0x7   :  { %s18265_s29 = sld [smem:[%s20086_s0 + %s18175_s26]]   ;;  %s18178_s10 = smov 9  }
   0x8   :  { %s18270_s3 = sld [smem:[%s20086_s0 + %s18176_s30]]   ;;  %s18179_s15 = smov 10  }
   0x9   :  { %s18275_s8 = sld [smem:[%s20086_s0 + %s18177_s4]]   ;;  %s18180_s20 = smov 11  }
   0xa   :  { %s18280_s14 = sld [smem:[%s20086_s0 + %s18178_s10]]   ;;  %s18181_s26 = smov 12  }
   0xb   :  { %s18285_s19 = sld [smem:[%s20086_s0 + %s18179_s15]]   ;;  %s18182_s1 = smov 13  }
   0xc   :  { %s18290_s24 = sld [smem:[%s20086_s0 + %s18180_s20]]   ;;  %s18183_s7 = smov 14  }
   0xd   :  { %s18295_s30 = sld [smem:[%s20086_s0 + %s18181_s26]]   ;;  %s18184_s15 = smov 15  }
   0xe   :  { %20099 = sst [smem:[#allocation36_spill]] %s18270_s3  ;;  %s18185_s22 = smov 16  }
   0xf   :  { %s18300_s6 = sld [smem:[%s20086_s0 + %s18182_s1]]   ;;  %s18186_s28 = smov 17  }
  0x10   :  { %s18305_s12 = sld [smem:[%s20086_s0 + %s18183_s7]]   ;;  %s18187_s7 = smov 18  }
  0x11   :  { %s18310_s20 = sld [smem:[%s20086_s0 + %s18184_s15]]   ;;  %s18188_s15 = smov 19  }
  0x12   :  { %20100 = sst [smem:[#allocation37_spill]] %s18290_s24 }
  0x13   :  { %s18315_s27 = sld [smem:[%s20086_s0 + %s18185_s22]]   ;;  %s18189_s22 = smov 20  }
  0x14   :  { %s18320_s4 = sld [smem:[%s20086_s0 + %s18186_s28]]   ;;  %s18190_s28 = smov 21  }
  0x15   :  { %s18325_s24 = sld [smem:[%s20086_s0 + %s18187_s7]]   ;;  %s18191_s7 = smov 22  }
  0x16   :  { %s18330_s3 = sld [smem:[%s20086_s0 + %s18188_s15]]   ;;  %s18192_s15 = smov 23  }
  0x17   :  { %20101 = sst [smem:[#allocation38_spill]] %s18310_s20 }
  0x19   :  { %20102 = sst [smem:[#allocation39_spill]] %s18315_s27 }
  0x1a   :  { %20103 = sst [smem:[#allocation40_spill]] %s18320_s4 }
  0x1b   :  { %20104 = sst [smem:[#allocation41_spill]] %s18325_s24 }
  0x1c   :  { %20105 = sst [smem:[#allocation42_spill]] %s18330_s3 }
  0x1d   :  { %s18335_s27 = sld [smem:[%s20086_s0 + %s18189_s22]]   ;;  %s18193_s22 = smov 24  }
  0x1e   :  { %s18340_s4 = sld [smem:[%s20086_s0 + %s18190_s28]]   ;;  %s18194_s28 = smov 25  }
  0x1f   :  { %s18345_s24 = sld [smem:[%s20086_s0 + %s18191_s7]]   ;;  %s18195_s7 = smov 26  }
  0x20   :  { %s18350_s3 = sld [smem:[%s20086_s0 + %s18192_s15]]   ;;  %s18196_s15 = smov 27  }
  0x21   :  { %s18360_s20 = sld [smem:[%s20086_s0 + %s18194_s28]]   ;;  %s18198_s28 = smov 29  }
  0x23   :  { %20106 = sst [smem:[#allocation43_spill]] %s18335_s27 }
  0x24   :  { %s18355_s27 = sld [smem:[%s20086_s0 + %s18193_s22]]   ;;  %s18197_s22 = smov 28  }
  0x25   :  { %20107 = sst [smem:[#allocation44_spill]] %s18345_s24 }
  0x26   :  { %20108 = sst [smem:[#allocation45_spill]] %s18350_s3 }
  0x27   :  { %20110 = sst [smem:[#allocation47_spill]] %s18360_s20 }
  0x28   :  { %s18365_s24 = sld [smem:[%s20086_s0 + %s18195_s7]]  }
  0x29   :  { %s18370_s3 = sld [smem:[%s20086_s0 + %s18196_s15]]  }
  0x2a   :  { %20109 = sst [smem:[#allocation46_spill]] %s18355_s27 }
  0x2b   :  { %s18375_s27 = sld [smem:[%s20086_s0 + %s18197_s22]]  }
  0x2c   :  { %s18380_s20 = sld [smem:[%s20086_s0 + %s18198_s28]]  }
  0x2d   :  { %64 = vsyncpa [#allocation3], 0 }
  0x2e   :  { %65 = vsyncpa [#allocation6], 0 }
  0x2f   :  { %66 = vsyncpa [#allocation9], 0 }
  0x30   :  { %67 = vsyncpa [#allocation12], 0 }
  0x31   :  { %68 = vsyncpa [#allocation15], 0 }
  0x32   :  { %69 = vsyncpa [#allocation18], 0 }
  0x33   :  { %70 = vsyncpa [#allocation21], 0 }
  0x34   :  { %71 = vsyncpa [#allocation24], 0 }
  0x35   :  { %72 = vsyncpa [#allocation4], 0  ;;  %s18199_s7 = smov [#allocation5]   ;;  %s18200_s11 = smov [#allocation8]  }
  0x36   :  { %s89_s10 = sshll.u32 %s18199_s7, 4  ;;  %s108_s15 = sshll.u32 %s18200_s11, 4  ;;  %s90_s10 = int_to_ptr.vmem [resolvable:$true] %s89_s10  ;;  %s18382_s15 = int_to_ptr.vmem [resolvable:$true] %s108_s15 }
  0x37   :  { %s17800_s0 = scalar_lea.hbm %s18240_s9, 32 }
  0x38   :  { %p17801_p0 = scmp.ne.s32.totalorder %s18240_s9, %s17800_s0  ;;  %p17804_p1 = scmp.lt.u32.totalorder %s17800_s0, %s18240_s9 }
  0x3a   :  { %p17806_p2 = pnand %p17804_p1, %p17801_p0 }
  0x3c   :  { %17809 = shalt.err (!%p17806_p2)
}
  0x3d   :  { %s17810_s16 = scalar_lea.vmem %s90_s10, 32  ;;  %p17815_p4 = scmp.lt.s32.totalorder %s90_s10, %s90_s10 }
  0x3e   :  { %p17811_p3 = scmp.ne.s32.totalorder %s90_s10, %s17810_s16  ;;  %p17816_p5 = scmp.lt.s32.totalorder %s17810_s16, %s17810_s16 }
  0x40   :  { %p17817_p6 = por %p17816_p5, %p17815_p4 }
  0x42   :  { %p17818_p7 = pnand %p17817_p6, %p17811_p3 }
  0x44   :  { %17821 = shalt.err (!%p17818_p7)
}
  0x45   :  { %92 = dma.hbm_to_vmem [thread:$0]  %s18240_s9, 32, %s90_s10, [#allocation6]  }
  0x46   :  { %s17822_s18 = scalar_lea.hbm %s18250_s17, 64 }
  0x47   :  { %p17823_p8 = scmp.ne.s32.totalorder %s18250_s17, %s17822_s18  ;;  %p17826_p9 = scmp.lt.u32.totalorder %s17822_s18, %s18250_s17 }
  0x49   :  { %p17828_p10 = pnand %p17826_p9, %p17823_p8 }
  0x4b   :  { %17831 = shalt.err (!%p17828_p10)
}
  0x4c   :  { %s17832_s22 = scalar_lea.vmem %s18382_s15, 64  ;;  %p17837_p12 = scmp.lt.s32.totalorder %s18382_s15, %s18382_s15 }
  0x4d   :  { %p17833_p11 = scmp.ne.s32.totalorder %s18382_s15, %s17832_s22  ;;  %p17838_p13 = scmp.lt.s32.totalorder %s17832_s22, %s17832_s22 }
  0x4f   :  { %p17839_p0 = por %p17838_p13, %p17837_p12 }
  0x51   :  { %p17840_p1 = pnand %p17839_p0, %p17833_p11 }
  0x53   :  { %17843 = shalt.err (!%p17840_p1)
}
  0x54   :  { %s18201_s23 = smov 16   ;;  %s18202_s9 = smov 1  }
  0x55   :  { %114 = dma.hbm_to_vmem [thread:$0]  %s18250_s17, 64, %s18382_s15, [#allocation9], %s18201_s23, %s18201_s23, %s18202_s9  }
  0x56   :  { %s18203_s26 = smov [#allocation11]   ;;  %s18204_s1 = smov [#allocation14]  }
  0x57   :  { %s132_s28 = sshll.u32 %s18203_s26, 4  ;;  %s158_s2 = sshll.u32 %s18204_s1, 4  ;;  %s133_s28 = int_to_ptr.vmem [resolvable:$true] %s132_s28  ;;  %s159_s2 = int_to_ptr.vmem [resolvable:$true] %s158_s2 }
  0x58   :  { %s17844_s7 = scalar_lea.hbm %s18260_s25, 8192 }
  0x59   :  { %p17845_p2 = scmp.ne.s32.totalorder %s18260_s25, %s17844_s7  ;;  %p17848_p3 = scmp.lt.u32.totalorder %s17844_s7, %s18260_s25 }
  0x5b   :  { %p17850_p4 = pnand %p17848_p3, %p17845_p2 }
  0x5d   :  { %17853 = shalt.err (!%p17850_p4)
}
  0x5e   :  { %s17854_s10 = scalar_lea.vmem %s133_s28, 8192  ;;  %p17859_p6 = scmp.lt.s32.totalorder %s133_s28, %s133_s28 }
  0x5f   :  { %p17855_p5 = scmp.ne.s32.totalorder %s133_s28, %s17854_s10  ;;  %p17860_p7 = scmp.lt.s32.totalorder %s17854_s10, %s17854_s10 }
  0x61   :  { %p17861_p8 = por %p17860_p7, %p17859_p6 }
  0x63   :  { %p17862_p9 = pnand %p17861_p8, %p17855_p5 }
  0x65   :  { %17865 = shalt.err (!%p17862_p9)
}
  0x66   :  { %s18205_s11 = smov 256   ;;  %s17866_s17 = scalar_lea.hbm %s18275_s8, 64 }
  0x67   :  { %138 = dma.hbm_to_vmem [thread:$0]  %s18260_s25, 8192, %s133_s28, [#allocation12], %s18205_s11, %s18205_s11, %s18201_s23  }
  0x68   :  { %p17867_p10 = scmp.ne.s32.totalorder %s18275_s8, %s17866_s17  ;;  %p17870_p11 = scmp.lt.u32.totalorder %s17866_s17, %s18275_s8 }
  0x6a   :  { %p17872_p12 = pnand %p17870_p11, %p17867_p10 }
  0x6c   :  { %17875 = shalt.err (!%p17872_p12)
}
  0x6d   :  { %s17876_s15 = scalar_lea.vmem %s159_s2, 64  ;;  %p17881_p0 = scmp.lt.s32.totalorder %s159_s2, %s159_s2 }
  0x6e   :  { %p17877_p13 = scmp.ne.s32.totalorder %s159_s2, %s17876_s15  ;;  %p17882_p1 = scmp.lt.s32.totalorder %s17876_s15, %s17876_s15 }
  0x70   :  { %p17883_p2 = por %p17882_p1, %p17881_p0 }
  0x72   :  { %p17884_p3 = pnand %p17883_p2, %p17877_p13 }
  0x74   :  { %17887 = shalt.err (!%p17884_p3)
}
  0x75   :  { %164 = dma.hbm_to_vmem [thread:$0]  %s18275_s8, 64, %s159_s2, [#allocation15], %s18201_s23, %s18201_s23, %s18202_s9  }
  0x76   :  { %s18206_s25 = smov [#allocation17]   ;;  %s18207_s16 = smov [#allocation20]  }
  0x77   :  { %s182_s0 = sshll.u32 %s18206_s25, 4  ;;  %s208_s18 = sshll.u32 %s18207_s16, 4  ;;  %s183_s0 = int_to_ptr.vmem [resolvable:$true] %s182_s0  ;;  %s209_s18 = int_to_ptr.vmem [resolvable:$true] %s208_s18 }
  0x78   :  { %s17888_s22 = scalar_lea.hbm %s18285_s19, 64 }
  0x79   :  { %p17889_p4 = scmp.ne.s32.totalorder %s18285_s19, %s17888_s22  ;;  %p17892_p5 = scmp.lt.u32.totalorder %s17888_s22, %s18285_s19 }
  0x7b   :  { %p17894_p6 = pnand %p17892_p5, %p17889_p4 }
  0x7d   :  { %17897 = shalt.err (!%p17894_p6)
}
  0x7e   :  { %s17898_s26 = scalar_lea.vmem %s183_s0, 64  ;;  %p17903_p8 = scmp.lt.s32.totalorder %s183_s0, %s183_s0 }
  0x7f   :  { %p17899_p7 = scmp.ne.s32.totalorder %s183_s0, %s17898_s26  ;;  %p17904_p9 = scmp.lt.s32.totalorder %s17898_s26, %s17898_s26 }
  0x81   :  { %p17905_p10 = por %p17904_p9, %p17903_p8 }
  0x83   :  { %p17906_p11 = pnand %p17905_p10, %p17899_p7 }
  0x85   :  { %17909 = shalt.err (!%p17906_p11)
}
  0x86   :  { %188 = dma.hbm_to_vmem [thread:$0]  %s18285_s19, 64, %s183_s0, [#allocation18], %s18201_s23, %s18201_s23, %s18202_s9  }
  0x87   :  { %s17910_s8 = scalar_lea.hbm %s18300_s6, 4096 }
  0x88   :  { %p17911_p12 = scmp.ne.s32.totalorder %s18300_s6, %s17910_s8  ;;  %p17914_p13 = scmp.lt.u32.totalorder %s17910_s8, %s18300_s6 }
  0x8a   :  { %p17916_p0 = pnand %p17914_p13, %p17911_p12 }
  0x8c   :  { %17919 = shalt.err (!%p17916_p0)
}
  0x8d   :  { %s17920_s28 = scalar_lea.vmem %s209_s18, 4096  ;;  %p17925_p2 = scmp.lt.s32.totalorder %s209_s18, %s209_s18 }
  0x8e   :  { %p17921_p1 = scmp.ne.s32.totalorder %s209_s18, %s17920_s28  ;;  %p17926_p3 = scmp.lt.s32.totalorder %s17920_s28, %s17920_s28 }
  0x90   :  { %p17927_p4 = por %p17926_p3, %p17925_p2 }
  0x92   :  { %p17928_p5 = pnand %p17927_p4, %p17921_p1 }
  0x94   :  { %17931 = shalt.err (!%p17928_p5)
}
  0x95   :  { %s18208_s1 = smov 128   ;;  %s18209_s2 = smov 8  }
  0x96   :  { %214 = dma.hbm_to_vmem [thread:$0]  %s18300_s6, 4096, %s209_s18, [#allocation21], %s18208_s1, %s18208_s1, %s18209_s2  }
  0x97   :  { %s18210_s19 = smov [#allocation23]   ;;  %s18211_s10 = smov [#allocation2]  }
  0x98   :  { %s244_s7 = sshll.u32 %s18210_s19, 4  ;;  %s79_s11 = sshll.u32 %s18211_s10, 4  ;;  %s245_s7 = int_to_ptr.vmem [resolvable:$true] %s244_s7  ;;  %s80_s11 = int_to_ptr.vmem [resolvable:$true] %s79_s11 }
  0x99   :  { %s17932_s17 = scalar_lea.hbm %s18340_s4, 1024 }
  0x9a   :  { %p17933_p6 = scmp.ne.s32.totalorder %s18340_s4, %s17932_s17  ;;  %p17936_p7 = scmp.lt.u32.totalorder %s17932_s17, %s18340_s4 }
  0x9c   :  { %p17938_p8 = pnand %p17936_p7, %p17933_p6 }
  0x9e   :  { %17941 = shalt.err (!%p17938_p8)
}
  0x9f   :  { %s17942_s15 = scalar_lea.vmem %s245_s7, 1024  ;;  %p17947_p10 = scmp.lt.s32.totalorder %s245_s7, %s245_s7 }
  0xa0   :  { %p17943_p9 = scmp.ne.s32.totalorder %s245_s7, %s17942_s15  ;;  %p17948_p11 = scmp.lt.s32.totalorder %s17942_s15, %s17942_s15 }
  0xa2   :  { %p17949_p12 = por %p17948_p11, %p17947_p10 }
  0xa4   :  { %p17950_p13 = pnand %p17949_p12, %p17943_p9 }
  0xa6   :  { %17953 = shalt.err (!%p17950_p13)
}
  0xa7   :  { %250 = dma.hbm_to_vmem [thread:$0]  %s18340_s4, 1024, %s245_s7, [#allocation24], %s18208_s1, %s18208_s1, %s18209_s2  }
  0xa8   :  { %s17954_s6 = scalar_lea.hbm %s18235_s5, 64 }
  0xa9   :  { %p17955_p0 = scmp.ne.s32.totalorder %s18235_s5, %s17954_s6  ;;  %p17958_p1 = scmp.lt.u32.totalorder %s17954_s6, %s18235_s5 }
  0xab   :  { %p17960_p2 = pnand %p17958_p1, %p17955_p0 }
  0xad   :  { %17963 = shalt.err (!%p17960_p2)
}
  0xae   :  { %s17964_s25 = scalar_lea.vmem %s80_s11, 64  ;;  %p17969_p4 = scmp.lt.s32.totalorder %s80_s11, %s80_s11 }
  0xaf   :  { %p17965_p3 = scmp.ne.s32.totalorder %s80_s11, %s17964_s25  ;;  %p17970_p5 = scmp.lt.s32.totalorder %s17964_s25, %s17964_s25 }
  0xb1   :  { %p17971_p6 = por %p17970_p5, %p17969_p4 }
  0xb3   :  { %p17972_p7 = pnand %p17971_p6, %p17965_p3 }
  0xb5   :  { %17975 = shalt.err (!%p17972_p7)
}
  0xb6   :  { %82 = dma.hbm_to_vmem [thread:$0]  %s18235_s5, 64, %s80_s11, [#allocation3]  }
  0xb7   :  { %s18212_s0 = smov [#allocation7]   ;;  %s18213_s16 = smov [#allocation10]  }
  0xb8   :  { %s99_s4 = sshll.u32 %s18212_s0, 4  ;;  %s120_s18 = sshll.u32 %s18213_s16, 4  ;;  %s100_s4 = int_to_ptr.vmem [resolvable:$true] %s99_s4  ;;  %s121_s18 = int_to_ptr.vmem [resolvable:$true] %s120_s18 }
  0xb9   :  { %s17976_s22 = scalar_lea.hbm %s18245_s13, 16 }
  0xba   :  { %p17977_p8 = scmp.ne.s32.totalorder %s18245_s13, %s17976_s22  ;;  %p17980_p9 = scmp.lt.u32.totalorder %s17976_s22, %s18245_s13 }
  0xbc   :  { %p17982_p10 = pnand %p17980_p9, %p17977_p8 }
  0xbe   :  { %17985 = shalt.err (!%p17982_p10)
}
  0xbf   :  { %s17986_s26 = scalar_lea.vmem %s100_s4, 16  ;;  %s17990_s8 = scalar_lea.vmem %s100_s4, 32 }
  0xc0   :  { %p17987_p11 = scmp.ne.s32.totalorder %s100_s4, %s17986_s26  ;;  %p17991_p12 = scmp.lt.s32.totalorder %s100_s4, %s100_s4 }
  0xc1   :  { %p17992_p13 = scmp.lt.s32.totalorder %s17990_s8, %s17986_s26 }
  0xc3   :  { %p17993_p0 = por %p17992_p13, %p17991_p12 }
  0xc5   :  { %p17994_p1 = pnand %p17993_p0, %p17987_p11 }
  0xc7   :  { %17997 = shalt.err (!%p17994_p1)
}
  0xc8   :  { %102 = dma.hbm_to_vmem [thread:$0]  %s18245_s13, 16, %s100_s4, [#allocation6]  }
  0xc9   :  { %s17998_s5 = scalar_lea.hbm %s18255_s21, 64 }
  0xca   :  { %p17999_p2 = scmp.ne.s32.totalorder %s18255_s21, %s17998_s5  ;;  %p18002_p3 = scmp.lt.u32.totalorder %s17998_s5, %s18255_s21 }
  0xcc   :  { %p18004_p4 = pnand %p18002_p3, %p17999_p2 }
  0xce   :  { %18007 = shalt.err (!%p18004_p4)
}
  0xcf   :  { %s18008_s28 = scalar_lea.vmem %s121_s18, 64  ;;  %p18013_p6 = scmp.lt.s32.totalorder %s121_s18, %s121_s18 }
  0xd0   :  { %p18009_p5 = scmp.ne.s32.totalorder %s121_s18, %s18008_s28  ;;  %p18014_p7 = scmp.lt.s32.totalorder %s18008_s28, %s18008_s28 }
  0xd2   :  { %p18015_p8 = por %p18014_p7, %p18013_p6 }
  0xd4   :  { %p18016_p9 = pnand %p18015_p8, %p18009_p5 }
  0xd6   :  { %18019 = shalt.err (!%p18016_p9)
}
  0xd7   :  { %126 = dma.hbm_to_vmem [thread:$0]  %s18255_s21, 64, %s121_s18, [#allocation9], %s18201_s23, %s18201_s23, %s18202_s9  }
  0xd8   :  { %s18214_s13 = smov [#allocation13]   ;;  %s18020_s7 = scalar_lea.hbm %s18265_s29, 128 }
  0xd9   :  { %s144_s19 = sshll.u32 %s18214_s13, 4  ;;  %p18021_p10 = scmp.ne.s32.totalorder %s18265_s29, %s18020_s7  ;;  %s145_s19 = int_to_ptr.vmem [resolvable:$true] %s144_s19 }
  0xda   :  { %p18024_p11 = scmp.lt.u32.totalorder %s18020_s7, %s18265_s29 }
  0xdc   :  { %p18026_p12 = pnand %p18024_p11, %p18021_p10 }
  0xde   :  { %18029 = shalt.err (!%p18026_p12)
}
  0xdf   :  { %s18030_s10 = scalar_lea.vmem %s145_s19, 128  ;;  %p18035_p0 = scmp.lt.s32.totalorder %s145_s19, %s145_s19 }
  0xe0   :  { %p18031_p13 = scmp.ne.s32.totalorder %s145_s19, %s18030_s10  ;;  %p18036_p1 = scmp.lt.s32.totalorder %s18030_s10, %s18030_s10 }
  0xe2   :  { %p18037_p2 = por %p18036_p1, %p18035_p0 }
  0xe4   :  { %p18038_p3 = pnand %p18037_p2, %p18031_p13 }
  0xe6   :  { %18041 = shalt.err (!%p18038_p3)
}
  0xe7   :  { %s18215_s11 = smov 32   ;;  %s18216_s21 = smov 2  }
  0xe8   :  { %150 = dma.hbm_to_vmem [thread:$0]  %s18265_s29, 128, %s145_s19, [#allocation12], %s18215_s11, %s18215_s11, %s18216_s21  }
  0xe9   :  { %s18217_s17 = smov [#allocation16]   ;;  %s18218_s6 = smov [#allocation19]  }
  0xea   :  { %s170_s15 = sshll.u32 %s18217_s17, 4  ;;  %s196_s25 = sshll.u32 %s18218_s6, 4  ;;  %s171_s15 = int_to_ptr.vmem [resolvable:$true] %s170_s15  ;;  %s18452_s25 = int_to_ptr.vmem [resolvable:$true] %s196_s25 }
  0xeb   :  { %s18042_s0 = scalar_lea.hbm %s18280_s14, 64 }
  0xec   :  { %p18043_p4 = scmp.ne.s32.totalorder %s18280_s14, %s18042_s0  ;;  %p18046_p5 = scmp.lt.u32.totalorder %s18042_s0, %s18280_s14 }
  0xee   :  { %p18048_p6 = pnand %p18046_p5, %p18043_p4 }
  0xf0   :  { %18051 = shalt.err (!%p18048_p6)
}
  0xf1   :  { %s18052_s4 = scalar_lea.vmem %s171_s15, 64  ;;  %p18057_p8 = scmp.lt.s32.totalorder %s171_s15, %s171_s15 }
  0xf2   :  { %p18053_p7 = scmp.ne.s32.totalorder %s171_s15, %s18052_s4  ;;  %p18058_p9 = scmp.lt.s32.totalorder %s18052_s4, %s18052_s4 }
  0xf4   :  { %p18059_p10 = por %p18058_p9, %p18057_p8 }
  0xf6   :  { %p18060_p11 = pnand %p18059_p10, %p18053_p7 }
  0xf8   :  { %18063 = shalt.err (!%p18060_p11)
}
  0xf9   :  { %176 = dma.hbm_to_vmem [thread:$0]  %s18280_s14, 64, %s171_s15, [#allocation15], %s18201_s23, %s18201_s23, %s18202_s9  }
  0xfa   :  { %s18064_s29 = scalar_lea.hbm %s18295_s30, 64 }
  0xfb   :  { %p18065_p12 = scmp.ne.s32.totalorder %s18295_s30, %s18064_s29  ;;  %p18068_p13 = scmp.lt.u32.totalorder %s18064_s29, %s18295_s30 }
  0xfd   :  { %p18070_p0 = pnand %p18068_p13, %p18065_p12 }
  0xff   :  { %18073 = shalt.err (!%p18070_p0)
}
 0x100   :  { %s18074_s16 = scalar_lea.vmem %s18452_s25, 64  ;;  %p18079_p2 = scmp.lt.s32.totalorder %s18452_s25, %s18452_s25 }
 0x101   :  { %p18075_p1 = scmp.ne.s32.totalorder %s18452_s25, %s18074_s16  ;;  %p18080_p3 = scmp.lt.s32.totalorder %s18074_s16, %s18074_s16 }
 0x103   :  { %p18081_p4 = por %p18080_p3, %p18079_p2 }
 0x105   :  { %p18082_p5 = pnand %p18081_p4, %p18075_p1 }
 0x107   :  { %18085 = shalt.err (!%p18082_p5)
}
 0x108   :  { %202 = dma.hbm_to_vmem [thread:$0]  %s18295_s30, 64, %s18452_s25, [#allocation18], %s18201_s23, %s18201_s23, %s18202_s9  }
 0x109   :  { %s18219_s14 = smov [#allocation22]   ;;  %s18220_s22 = smov [#allocation25]  }
 0x10a   :  { %s220_s18 = sshll.u32 %s18219_s14, 4  ;;  %s256_s26 = sshll.u32 %s18220_s22, 4  ;;  %s221_s18 = int_to_ptr.vmem [resolvable:$true] %s220_s18  ;;  %s18473_s26 = int_to_ptr.vmem [resolvable:$true] %s256_s26 }
 0x10b   :  { %s18086_s8 = scalar_lea.hbm %s18305_s12, 64 }
 0x10c   :  { %p18087_p6 = scmp.ne.s32.totalorder %s18305_s12, %s18086_s8  ;;  %p18090_p7 = scmp.lt.u32.totalorder %s18086_s8, %s18305_s12 }
 0x10e   :  { %p18092_p8 = pnand %p18090_p7, %p18087_p6 }
 0x110   :  { %18095 = shalt.err (!%p18092_p8)
}
 0x111   :  { %s18096_s5 = scalar_lea.vmem %s221_s18, 64  ;;  %p18101_p10 = scmp.lt.s32.totalorder %s221_s18, %s221_s18 }
 0x112   :  { %p18097_p9 = scmp.ne.s32.totalorder %s221_s18, %s18096_s5  ;;  %p18102_p11 = scmp.lt.s32.totalorder %s18096_s5, %s18096_s5 }
 0x114   :  { %p18103_p12 = por %p18102_p11, %p18101_p10 }
 0x116   :  { %p18104_p13 = pnand %p18103_p12, %p18097_p9 }
 0x118   :  { %18107 = shalt.err (!%p18104_p13)
}
 0x119   :  { %s20111_s30 = sld [smem:[#allocation44_spill]] }
 0x11a   :  { %226 = dma.hbm_to_vmem [thread:$0]  %s18305_s12, 64, %s221_s18, [#allocation21], %s18201_s23, %s18201_s23, %s18202_s9  }
 0x11f   :  { %s18108_s28 = scalar_lea.hbm %s20111_s30, 1024 }
 0x120   :  { %p18109_p0 = scmp.ne.s32.totalorder %s20111_s30, %s18108_s28  ;;  %p18112_p1 = scmp.lt.u32.totalorder %s18108_s28, %s20111_s30 }
 0x122   :  { %p18114_p2 = pnand %p18112_p1, %p18109_p0 }
 0x124   :  { %18117 = shalt.err (!%p18114_p2)
}
 0x125   :  { %s18118_s13 = scalar_lea.vmem %s18473_s26, 1024  ;;  %p18123_p4 = scmp.lt.s32.totalorder %s18473_s26, %s18473_s26 }
 0x126   :  { %p18119_p3 = scmp.ne.s32.totalorder %s18473_s26, %s18118_s13  ;;  %p18124_p5 = scmp.lt.s32.totalorder %s18118_s13, %s18118_s13 }
 0x128   :  { %p18125_p6 = por %p18124_p5, %p18123_p4 }
 0x12a   :  { %p18126_p7 = pnand %p18125_p6, %p18119_p3 }
 0x12c   :  { %18129 = shalt.err (!%p18126_p7)
}
 0x12d   :  { %262 = dma.hbm_to_vmem [thread:$0]  %s20111_s30, 1024, %s18473_s26, [#allocation24], %s18208_s1, %s18208_s1, %s18209_s2  }
 0x12e   :  { %18152 = dma.done.wait [#allocation3], 64  }
 0x12f   :  { %18153 = vsyncadd [#allocation3], 4294967232 }
 0x130   :  { %18154 = dma.done.wait [#allocation6], 48  }
 0x131   :  { %18155 = vsyncadd [#allocation6], 4294967248 }
 0x132   :  { %18156 = dma.done.wait [#allocation9], 128  }
 0x133   :  { %18157 = vsyncadd [#allocation9], 4294967168 }
 0x134   :  { %18158 = dma.done.wait [#allocation12], 8320  }
 0x135   :  { %18159 = vsyncadd [#allocation12], 4294958976 }
 0x136   :  { %18160 = dma.done.wait [#allocation15], 128  }
 0x137   :  { %18161 = vsyncadd [#allocation15], 4294967168 }
 0x138   :  { %18162 = dma.done.wait [#allocation18], 128  }
 0x139   :  { %18163 = vsyncadd [#allocation18], 4294967168 }
 0x13a   :  { %18164 = dma.done.wait [#allocation21], 4160  }
 0x13b   :  { %18165 = vsyncadd [#allocation21], 4294963136 }
 0x13c   :  { %18166 = dma.done.wait [#allocation24], 2048  }
 0x13d   :  { %18167 = vsyncadd [#allocation24], 4294965248  ;;  %v18221_v0 = vmov 0.0   ;;  %vm18222_vm0 = vmmov 0   ;;  %s20112_s12 = sld [smem:[#allocation38_spill]]  ;;  %vm360_vm1 = vcmask 1041408  }
 0x13e   :  { %15259 = vmatprep.subr.mxu0 %v18221_v0  ;;  %15261 = vmatprep.mubr.msk.f32.mxu0 %vm18222_vm0, %v18221_v0  ;;  %vm356_vm2 = vcmask 15360   ;;  %v348_v1 = vld [vmem:[#allocation5] sm:$0x3]  ;;  %v347_v2 = vld [vmem:[#allocation2] sm:$0xf]  ;;  %s20113_s23 = sld [smem:[#allocation39_spill]] }
 0x13f   :  { %15264 = vmatprep.subr.mxu1 %v18221_v0  ;;  %15266 = vmatprep.mubr.msk.f32.mxu1 %vm18222_vm0, %v18221_v0  ;;  %v14113_v3 = vld [vmem:[#allocation7] ss:$0 sm:$0xff]  ;;  %vm439_vm3 = vcmask 1043456   ;;  %v320_v5 = vld [vmem:[#allocation23] sm:$0xff]  ;;  %v321_v6 = vld [vmem:[#allocation23 + $0x8] sm:$0xff]  ;;  %s20114_s9 = sld [smem:[#allocation40_spill]] }
 0x140   :  { %15260 = vmatpush3.msk.msra.mxu0 %vm360_vm1, %v348_v1  ;;  %vm435_vm4 = vcmask 31744   ;;  %v328_v10 = vld [vmem:[#allocation25] sm:$0xff]  ;;  %v329_v11 = vld [vmem:[#allocation25 + $0x8] sm:$0xff]  ;;  %v18511_v13 = vpack.c.bf16 %v321_v6, %v320_v5  ;;  %v322_v14 = vld [vmem:[#allocation23 + $0x10] sm:$0xff]  ;;  %v18223_v18 = vmov 0.0|0.0   ;;  %s20115_s1 = sld [smem:[#allocation41_spill]] }
 0x141   :  { %15262 = vmatmul.mubr.msk.f32.vlgmr.msra.gmra.mrb[0].mxu0 %vm356_vm2, %v347_v2  ;;  %15269 = vmatprep.subr.mxu0 %v18221_v0  ;;  %v323_v15 = vld [vmem:[#allocation23 + $0x18] sm:$0xff]  ;;  %v18520_v17 = vpack.c.bf16 %v329_v11, %v328_v10  ;;  %v330_v19 = vld [vmem:[#allocation25 + $0x10] sm:$0xff]  ;;  %v324_v22 = vld [vmem:[#allocation23 + $0x20] sm:$0xff]  ;;  %v18224_v36 = vmov 0   ;;  %vm661_vm5 = vcmask 523264   ;;  %s20116_s2 = sld [smem:[#allocation45_spill]] }
 0x142   :  { %15271 = vmatprep.mubr.msk.f32.mxu0 %vm18222_vm0, %v18221_v0  ;;  %v331_v20 = vld [vmem:[#allocation25 + $0x18] sm:$0xff]  ;;  %v18526_v21 = vpack.c.bf16 %v323_v15, %v322_v14  ;;  %v325_v23 = vld [vmem:[#allocation23 + $0x28] sm:$0xff]  ;;  %v332_v25 = vld [vmem:[#allocation25 + $0x20] sm:$0xff]  ;;  %17682 = vset.pattern.permute.xlu0 %v18224_v36  ;;  %s20117_s19 = sld [smem:[#allocation42_spill]]  ;;  %vm892_vm6 = vcmask 519168   ;;  %s20118_s7 = sld [smem:[#allocation43_spill]] }
 0x143   :  { %v434_v9 = vld [vmem:[%s20112_s12] sm:$0xf]  ;;  %v18531_v24 = vpack.c.bf16 %v331_v20, %v330_v19  ;;  %v333_v26 = vld [vmem:[#allocation25 + $0x28] sm:$0xff]  ;;  %v18539_v27 = vpack.c.bf16 %v325_v23, %v324_v22  ;;  %v327_v29 = vld [vmem:[#allocation23 + $0x38] sm:$0xff]  ;;  %17683 = vset.pattern.permute.xlu1 %v18224_v36  ;;  %s20119_s10 = sld [smem:[#allocation47_spill]]  ;;  %s20120_s11 = sld [smem:[#allocation46_spill]] }
 0x144   :  { %v513_v12 = vld [vmem:[%s20113_s23] sm:$0xf]  ;;  %v18543_v30 = vpack.c.bf16 %v333_v26, %v332_v25  ;;  %v335_v33 = vld [vmem:[#allocation25 + $0x38] sm:$0xff]  ;;  %s18225_s21 = smov 64   ;;  %s20121_s17 = sld [smem:[#allocation36_spill]]  ;;  %vm14060_vm11 = vcmask 11264  }
 0x145   :  { %v587_v16 = vld [vmem:[%s20114_s9] sm:$0xf]  ;;  %v14128_v15 = vld [vmem:[%s20112_s12 + $0x4] sm:$0xf]  ;;  %s20122_s15 = sld [smem:[#allocation37_spill]] }
 0x146   :  { %v326_v28 = vld [vmem:[#allocation23 + $0x30] sm:$0xff]  ;;  %v14139_v2 = vld [vmem:[%s20115_s1 + $0x4] sm:$0xf] }
 0x147   :  { %v18547_v31 = vpack.c.bf16 %v327_v29, %v326_v28  ;;  %v334_v32 = vld [vmem:[#allocation25 + $0x30] sm:$0xff]  ;;  %v14134_v19 = vld [vmem:[%s20114_s9 + $0x4] sm:$0xf] }
 0x148   :  { %v18554_v34 = vpack.c.bf16 %v335_v33, %v334_v32  ;;  %v809_v35 = vld [vmem:[%s20115_s1] sm:$0xf]  ;;  %v14144_v55 = vld [vmem:[%s20117_s19 + $0x4] sm:$0xf] }
 0x149   :  { %812 = vperm.xlu0 %17682, %v809_v35   ;;  %v18569_v51 = vld [vmem:[%s20116_s2] sm:$0xf] }
 0x14a   :  { %v979_v56 = vld [vmem:[%s20117_s19] sm:$0xf] }
 0x14b   :  { %982 = vperm.xlu1 %17683, %v979_v56   ;;  %v986_v1 = vld [vmem:[%s20118_s7] sm:$0xf] }
 0x1c8   :  { %v18565_v47 = vpop.permute.xlu0 %812 }
 0x214   :  { %v430_v4 = vpop.f32.mrb[0].mxu0 }
 0x215   :  { %v18503_v7 = vadd.f32 %v14113_v3, %v430_v4  ;;  %v15263_v8 = vpop.f32.mrb[1].mxu0  ;;  %v18589_v3 = vpop.permute.xlu1 %982 }
 0x217   :  { %15265 = vmatpush3.msk.msra.mxu1 %vm439_vm3, %v18503_v7  ;;  %15270 = vmatpush3.msk.msra.mxu0 %vm439_vm3, %v18503_v7 }
 0x218   :  { %15267 = vmatmul.mubr.msk.f32.vlgmr.msra.gmra.mrb[0].mxu1 %vm435_vm4, %v434_v9  ;;  %15274 = vmatprep.subr.mxu1 %v18221_v0 }
 0x219   :  { %15275 = vmatpush3.msk.msra.mxu1 %vm439_vm3, %v18503_v7  ;;  %15276 = vmatprep.mubr.msk.f32.mxu1 %vm18222_vm0, %v18221_v0 }
 0x21a   :  { %16877 = vmatprep.subr.bf16.mxu0 %v18223_v18  ;;  %15272 = vmatmul.mubr.msk.f32.vlgmr.msra.gmra.mrb[2].mxu0 %vm435_vm4, %v513_v12 }
 0x21b   :  { %16879 = vmatpush3.bf16.msra.mxu0 %v18511_v13  ;;  %16889 = vmatprep.subr.bf16.mxu1 %v18223_v18 }
 0x21c   :  { %15277 = vmatmul.mubr.msk.f32.vlgmr.msra.gmra.mrb[2].mxu1 %vm435_vm4, %v587_v16  ;;  %16880 = vmatprep.subr.bf16.mxu0 %v18223_v18  ;;  %v14131_v16 = vld [vmem:[%s20113_s23 + $0x4] sm:$0xf] }
 0x21d   :  { %16891 = vmatpush3.bf16.msra.mxu1 %v18520_v17  ;;  %15295 = vmatprep.mubr.msk.f32.mxu0 %vm18222_vm0, %v18221_v0 }
 0x21e   :  { %16892 = vmatprep.subr.bf16.mxu1 %v18223_v18  ;;  %15314 = vmatprep.mubr.msk.f32.mxu1 %vm18222_vm0, %v18221_v0 }
 0x21f   :  { %16882 = vmatpush3.bf16.msra.mxu0 %v18526_v21 }
 0x220   :  { %16883 = vmatprep.subr.bf16.mxu0 %v18223_v18 }
 0x221   :  { %16894 = vmatpush3.bf16.msra.mxu1 %v18531_v24 }
 0x222   :  { %16895 = vmatprep.subr.bf16.mxu1 %v18223_v18 }
 0x223   :  { %16885 = vmatpush3.bf16.msra.mxu0 %v18539_v27 }
 0x224   :  { %16886 = vmatprep.subr.bf16.mxu0 %v18223_v18 }
 0x225   :  { %16897 = vmatpush3.bf16.msra.mxu1 %v18543_v30 }
 0x226   :  { %16898 = vmatprep.subr.bf16.mxu1 %v18223_v18 }
 0x227   :  { %16888 = vmatpush3.bf16.msra.mxu0 %v18547_v31 }
 0x228   :  { %15317 = vmatprep.subr.mxu0 %v18221_v0 }
 0x229   :  { %16900 = vmatpush3.bf16.msra.mxu1 %v18554_v34 }
 0x22a   :  { %15322 = vmatprep.subr.mxu1 %v18221_v0 }
 0x2eb   :  { %v509_v37 = vpop.f32.mrb[0].mxu1 }
 0x2ec   :  { %v15268_v38 = vpop.f32.mrb[1].mxu1  ;;  %15296 = vmatmul.mubr.msk.f32.vlgmr.msra.gmra.mrb[4].mxu0 %vm661_vm5, %v509_v37 }
 0x2ed   :  { %v583_v39 = vpop.f32.mrb[2].mxu0  ;;  %15319 = vmatprep.mubr.msk.f32.mxu0 %vm18222_vm0, %v18221_v0 }
 0x2ee   :  { %v15273_v40 = vpop.f32.mrb[3].mxu0 }
 0x2ef   :  { %v657_v41 = vpop.f32.mrb[2].mxu1 }
 0x2f0   :  { %v15278_v42 = vpop.f32.mrb[3].mxu1  ;;  %15315 = vmatmul.mubr.msk.f32.vlgmr.msra.gmra.mrb[4].mxu1 %vm661_vm5, %v657_v41 }
 0x2f1   :  { %15324 = vmatprep.mubr.msk.f32.mxu1 %vm18222_vm0, %v18221_v0 }
 0x3bf   :  { %v731_v43 = vpop.f32.mrb[4].mxu0 }
 0x3c0   :  { %v732_v44 = vadd.f32 %v731_v43, %v583_v39  ;;  %v15297_v45 = vpop.f32.mrb[5].mxu0 }
 0x3c3   :  { %v804_v46 = vpop.f32.mrb[4].mxu1 }
 0x3c4   :  { %v808_v48 = vadd.f32 %v804_v46, %v732_v44  ;;  %v15316_v49 = vpop.f32.mrb[5].mxu1 }
 0x3c6   :  { %v815_v50 = vadd.f32 %v18565_v47, %v808_v48 }
 0x3c8   :  { %15318 = vmatpush3.msk.msra.mxu0 %vm439_vm3, %v815_v50 }
 0x3c9   :  { %15320 = vmatmul.mubr.msk.f32.vlgmr.msra.gmra.mrb[6].mxu0 %vm435_vm4, %v18569_v51  ;;  %15327 = vmatprep.subr.mxu0 %v18221_v0 }
 0x3ca   :  { %15329 = vmatprep.mubr.msk.f32.mxu0 %vm18222_vm0, %v18221_v0 }
 0x49c   :  { %v888_v52 = vpop.f32.mrb[6].mxu0 }
 0x49d   :  { %v15321_v53 = vpop.f32.mrb[7].mxu0  ;;  %v893_v54 = vsel %vm892_vm6, %v888_v52, 0.0  ;;  %v14145_v52 = vld [vmem:[%s20118_s7 + $0x4] sm:$0xf] }
 0x49e   :  { %894 = vadd.xlane.f32.xlu0 %v893_v54  ;;  %v14157_v53 = vld [vmem:[%s20115_s1 + $0x8] sm:$0xf] }
 0x4b4   :  { %1540 = vperm.xlu0 %17682, %v14144_v55  }
 0x52b   :  { %v895_v57 = vpop.xlane.xlu0 %894 }
 0x52c   :  { %v896_v58 = vmul.f32 0.0078125, %v895_v57 }
 0x52e   :  { %v897_v59 = vsub.f32 %v815_v50, %v896_v58 }
 0x530   :  { %v898_v60 = vmul.f32 %v897_v59, %v897_v59 }
 0x532   :  { %15323 = vmatpush3.msk.msra.mxu1 %vm439_vm3, %v898_v60 }
 0x533   :  { %15325 = vmatmul.mubr.msk.f32.vlgmr.msra.gmra.mrb[6].mxu1 %vm435_vm4, %v18569_v51  ;;  %15332 = vmatprep.subr.mxu1 %v18221_v0  ;;  %v18654_v54 = vpop.permute.xlu0 %1540 }
 0x534   :  { %15334 = vmatprep.mubr.msk.f32.mxu1 %vm18222_vm0, %v18221_v0 }
 0x606   :  { %v968_v61 = vpop.f32.mrb[6].mxu1 }
 0x607   :  { %v15326_v62 = vpop.f32.mrb[7].mxu1  ;;  %v972_v63 = vsel %vm892_vm6, %v968_v61, 0.0 }
 0x608   :  { %973 = vadd.xlane.f32.xlu1 %v972_v63 }
 0x619   :  { %989 = vperm.xlu1 %17683, %v986_v1   ;;  %v14146_v1 = vld [vmem:[%s20112_s12 + $0x8] sm:$0xf] }
 0x61d   :  { %1373 = vperm.xlu1 %17683, %v14139_v2   ;;  %v14149_v2 = vld [vmem:[%s20113_s23 + $0x8] sm:$0xf] }
 0x695   :  { %v974_v4 = vpop.xlane.xlu1 %973 }
 0x696   :  { %v975_v5 = vmul.f32 0.0078125, %v974_v4  ;;  %v14152_v4 = vld [vmem:[%s20114_s9 + $0x8] sm:$0xf] }
 0x698   :  { %v976_v6 = vadd.f32 1e-05, %v975_v5 }
 0x699   :  { %v18592_v11 = vpop.permute.xlu1 %989 }
 0x69a   :  { %17684 = vrsqrt.f32 %v976_v6 }
 0x69d   :  { %v18635_v38 = vpop.permute.xlu1 %1373 }
 0x6a4   :  { %v17685_v8 = vpop.eup %17684 }
 0x6a5   :  { %v978_v9 = vmul.f32 %v17685_v8, %v897_v59 }
 0x6a7   :  { %v985_v10 = vmul.f32 %v18589_v3, %v978_v9 }
 0x6a9   :  { %v992_v12 = vadd.f32 %v18592_v11, %v985_v10 }
 0x6ab   :  { %v993_v14 = vmax.f32 %v992_v12, 0.0 }
 0x6ad   :  { %15328 = vmatpush3.msk.msra.mxu0 %vm439_vm3, %v993_v14  ;;  %15333 = vmatpush3.msk.msra.mxu1 %vm439_vm3, %v993_v14 }
 0x6ae   :  { %15330 = vmatmul.mubr.msk.f32.vlgmr.msra.gmra.mrb[8].mxu0 %vm435_vm4, %v14128_v15  ;;  %15337 = vmatprep.subr.mxu0 %v18221_v0 }
 0x6af   :  { %15338 = vmatpush3.msk.msra.mxu0 %vm439_vm3, %v993_v14  ;;  %15339 = vmatprep.mubr.msk.f32.mxu0 %vm18222_vm0, %v18221_v0 }
 0x6b0   :  { %16901 = vmatprep.subr.bf16.mxu1 %v18223_v18  ;;  %15335 = vmatmul.mubr.msk.f32.vlgmr.msra.gmra.mrb[8].mxu1 %vm435_vm4, %v14131_v16 }
 0x6b1   :  { %16903 = vmatpush3.bf16.msra.mxu1 %v18511_v13  ;;  %16913 = vmatprep.subr.bf16.mxu0 %v18223_v18 }
 0x6b2   :  { %15340 = vmatmul.mubr.msk.f32.vlgmr.msra.gmra.mrb[10].mxu0 %vm435_vm4, %v14134_v19  ;;  %16904 = vmatprep.subr.bf16.mxu1 %v18223_v18 }
 0x6b3   :  { %16915 = vmatpush3.bf16.msra.mxu0 %v18520_v17  ;;  %15358 = vmatprep.mubr.msk.f32.mxu1 %vm18222_vm0, %v18221_v0 }
 0x6b4   :  { %16916 = vmatprep.subr.bf16.mxu0 %v18223_v18  ;;  %15377 = vmatprep.mubr.msk.f32.mxu0 %vm18222_vm0, %v18221_v0 }
 0x6b5   :  { %16906 = vmatpush3.bf16.msra.mxu1 %v18526_v21 }
 0x6b6   :  { %16907 = vmatprep.subr.bf16.mxu1 %v18223_v18 }
 0x6b7   :  { %16918 = vmatpush3.bf16.msra.mxu0 %v18531_v24 }
 0x6b8   :  { %16919 = vmatprep.subr.bf16.mxu0 %v18223_v18 }
 0x6b9   :  { %16909 = vmatpush3.bf16.msra.mxu1 %v18539_v27 }
 0x6ba   :  { %16910 = vmatprep.subr.bf16.mxu1 %v18223_v18 }
 0x6bb   :  { %16921 = vmatpush3.bf16.msra.mxu0 %v18543_v30 }
 0x6bc   :  { %16922 = vmatprep.subr.bf16.mxu0 %v18223_v18 }
 0x6bd   :  { %16912 = vmatpush3.bf16.msra.mxu1 %v18547_v31 }
 0x6be   :  { %15380 = vmatprep.subr.mxu1 %v18221_v0 }
 0x6bf   :  { %16924 = vmatpush3.bf16.msra.mxu0 %v18554_v34 }
 0x6c0   :  { %15385 = vmatprep.subr.mxu0 %v18221_v0 }
 0x781   :  { %v1068_v20 = vpop.f32.mrb[8].mxu0 }
 0x782   :  { %v15331_v22 = vpop.f32.mrb[9].mxu0  ;;  %15359 = vmatmul.mubr.msk.f32.vlgmr.msra.gmra.mrb[10].mxu1 %vm661_vm5, %v1068_v20 }
 0x783   :  { %v1143_v23 = vpop.f32.mrb[8].mxu1  ;;  %15382 = vmatprep.mubr.msk.f32.mxu1 %vm18222_vm0, %v18221_v0 }
 0x784   :  { %v15336_v25 = vpop.f32.mrb[9].mxu1 }
 0x785   :  { %v1218_v26 = vpop.f32.mrb[10].mxu0 }
 0x786   :  { %v15341_v28 = vpop.f32.mrb[11].mxu0  ;;  %15378 = vmatmul.mubr.msk.f32.vlgmr.msra.gmra.mrb[12].mxu0 %vm661_vm5, %v1218_v26 }
 0x787   :  { %15387 = vmatprep.mubr.msk.f32.mxu0 %vm18222_vm0, %v18221_v0 }
 0x855   :  { %v1291_v29 = vpop.f32.mrb[10].mxu1 }
 0x856   :  { %v1292_v32 = vadd.f32 %v1291_v29, %v1143_v23  ;;  %v15360_v33 = vpop.f32.mrb[11].mxu1 }
 0x857   :  { %v14163_v33 = vld [vmem:[%s20118_s7 + $0x8] sm:$0xf] }
 0x859   :  { %v1364_v35 = vpop.f32.mrb[12].mxu0 }
 0x85a   :  { %v1368_v36 = vadd.f32 %v1364_v35, %v1292_v32  ;;  %v15379_v37 = vpop.f32.mrb[13].mxu0  ;;  %v14162_v32 = vld [vmem:[%s20117_s19 + $0x8] sm:$0xf]  ;;  %v14175_v35 = vld [vmem:[%s20115_s1 + $0xc] sm:$0xf] }
 0x85c   :  { %v1376_v39 = vadd.f32 %v18635_v38, %v1368_v36 }
 0x85e   :  { %15381 = vmatpush3.msk.msra.mxu1 %vm439_vm3, %v1376_v39 }
 0x85f   :  { %15383 = vmatmul.mubr.msk.f32.vlgmr.msra.gmra.mrb[12].mxu1 %vm435_vm4, %v18569_v51  ;;  %15390 = vmatprep.subr.mxu1 %v18221_v0 }
 0x860   :  { %15392 = vmatprep.mubr.msk.f32.mxu1 %vm18222_vm0, %v18221_v0 }
 0x932   :  { %v1446_v40 = vpop.f32.mrb[12].mxu1 }
 0x933   :  { %v15384_v41 = vpop.f32.mrb[13].mxu1  ;;  %v1450_v42 = vsel %vm892_vm6, %v1446_v40, 0.0 }
 0x934   :  { %1451 = vadd.xlane.f32.xlu1 %v1450_v42 }
 0x9c1   :  { %v1452_v43 = vpop.xlane.xlu1 %1451 }
 0x9c2   :  { %v1453_v44 = vmul.f32 0.0078125, %v1452_v43 }
 0x9c4   :  { %v1454_v45 = vsub.f32 %v1376_v39, %v1453_v44  ;;  %v14180_v44 = vld [vmem:[%s20117_s19 + $0xc] sm:$0xf] }
 0x9c6   :  { %v1455_v46 = vmul.f32 %v1454_v45, %v1454_v45 }
 0x9c8   :  { %15386 = vmatpush3.msk.msra.mxu0 %vm439_vm3, %v1455_v46 }
 0x9c9   :  { %15388 = vmatmul.mubr.msk.f32.vlgmr.msra.gmra.mrb[14].mxu0 %vm435_vm4, %v18569_v51  ;;  %15395 = vmatprep.subr.mxu0 %v18221_v0 }
 0x9ca   :  { %15397 = vmatprep.mubr.msk.f32.mxu0 %vm18222_vm0, %v18221_v0 }
 0xa9c   :  { %v1525_v48 = vpop.f32.mrb[14].mxu0 }
 0xa9d   :  { %v15389_v49 = vpop.f32.mrb[15].mxu0  ;;  %v1529_v50 = vsel %vm892_vm6, %v1525_v48, 0.0 }
 0xa9e   :  { %1530 = vadd.xlane.f32.xlu0 %v1529_v50 }
 0xab4   :  { %1548 = vperm.xlu0 %17682, %v14145_v52  }
 0xab8   :  { %1932 = vperm.xlu0 %17682, %v14157_v53  }
 0xb2b   :  { %v1531_v55 = vpop.xlane.xlu0 %1530 }
 0xb2c   :  { %v1532_v56 = vmul.f32 0.0078125, %v1531_v55 }
 0xb2e   :  { %v1533_v57 = vadd.f32 1e-05, %v1532_v56 }
 0xb30   :  { %17686 = vrsqrt.f32 %v1533_v57 }
 0xb33   :  { %v18657_v61 = vpop.permute.xlu0 %1548 }
 0xb37   :  { %v18700_v23 = vpop.permute.xlu0 %1932 }
 0xb3a   :  { %v17687_v58 = vpop.eup %17686 }
 0xb3b   :  { %v1535_v59 = vmul.f32 %v17687_v58, %v1454_v45  ;;  %v14164_v58 = vld [vmem:[%s20112_s12 + $0xc] sm:$0xf] }
 0xb3d   :  { %v1543_v60 = vmul.f32 %v18654_v54, %v1535_v59  ;;  %v14167_v59 = vld [vmem:[%s20113_s23 + $0xc] sm:$0xf] }
 0xb3f   :  { %v1551_v62 = vadd.f32 %v18657_v61, %v1543_v60  ;;  %v14170_v60 = vld [vmem:[%s20114_s9 + $0xc] sm:$0xf] }
 0xb41   :  { %v1552_v63 = vmax.f32 %v1551_v62, 0.0 }
 0xb43   :  { %15391 = vmatpush3.msk.msra.mxu1 %vm439_vm3, %v1552_v63  ;;  %15396 = vmatpush3.msk.msra.mxu0 %vm439_vm3, %v1552_v63 }
 0xb44   :  { %15393 = vmatmul.mubr.msk.f32.vlgmr.msra.gmra.mrb[14].mxu1 %vm435_vm4, %v14146_v1  ;;  %15400 = vmatprep.subr.mxu1 %v18221_v0 }
 0xb45   :  { %15401 = vmatpush3.msk.msra.mxu1 %vm439_vm3, %v1552_v63  ;;  %15402 = vmatprep.mubr.msk.f32.mxu1 %vm18222_vm0, %v18221_v0 }
 0xb46   :  { %16925 = vmatprep.subr.bf16.mxu0 %v18223_v18  ;;  %15398 = vmatmul.mubr.msk.f32.vlgmr.msra.gmra.mrb[16].mxu0 %vm435_vm4, %v14149_v2 }
 0xb47   :  { %16927 = vmatpush3.bf16.msra.mxu0 %v18511_v13  ;;  %16937 = vmatprep.subr.bf16.mxu1 %v18223_v18 }
 0xb48   :  { %15403 = vmatmul.mubr.msk.f32.vlgmr.msra.gmra.mrb[16].mxu1 %vm435_vm4, %v14152_v4  ;;  %16928 = vmatprep.subr.bf16.mxu0 %v18223_v18 }
 0xb49   :  { %16939 = vmatpush3.bf16.msra.mxu1 %v18520_v17  ;;  %15421 = vmatprep.mubr.msk.f32.mxu0 %vm18222_vm0, %v18221_v0 }
 0xb4a   :  { %16940 = vmatprep.subr.bf16.mxu1 %v18223_v18  ;;  %15440 = vmatprep.mubr.msk.f32.mxu1 %vm18222_vm0, %v18221_v0 }
 0xb4b   :  { %16930 = vmatpush3.bf16.msra.mxu0 %v18526_v21 }
 0xb4c   :  { %16931 = vmatprep.subr.bf16.mxu0 %v18223_v18 }
 0xb4d   :  { %16942 = vmatpush3.bf16.msra.mxu1 %v18531_v24 }
 0xb4e   :  { %16943 = vmatprep.subr.bf16.mxu1 %v18223_v18 }
 0xb4f   :  { %16933 = vmatpush3.bf16.msra.mxu0 %v18539_v27 }
 0xb50   :  { %16934 = vmatprep.subr.bf16.mxu0 %v18223_v18 }
 0xb51   :  { %16945 = vmatpush3.bf16.msra.mxu1 %v18543_v30 }
 0xb52   :  { %16946 = vmatprep.subr.bf16.mxu1 %v18223_v18 }
 0xb53   :  { %16936 = vmatpush3.bf16.msra.mxu0 %v18547_v31 }
 0xb54   :  { %15443 = vmatprep.subr.mxu0 %v18221_v0 }
 0xb55   :  { %16948 = vmatpush3.bf16.msra.mxu1 %v18554_v34 }
 0xb56   :  { %15448 = vmatprep.subr.mxu1 %v18221_v0 }
 0xc17   :  { %v1627_v5 = vpop.f32.mrb[14].mxu1 }
 0xc18   :  { %v15394_v6 = vpop.f32.mrb[15].mxu1  ;;  %15422 = vmatmul.mubr.msk.f32.vlgmr.msra.gmra.mrb[18].mxu0 %vm661_vm5, %v1627_v5 }
 0xc19   :  { %v1702_v8 = vpop.f32.mrb[16].mxu0  ;;  %15445 = vmatprep.mubr.msk.f32.mxu0 %vm18222_vm0, %v18221_v0 }
 0xc1a   :  { %v15399_v9 = vpop.f32.mrb[17].mxu0 }
 0xc1b   :  { %v1777_v10 = vpop.f32.mrb[16].mxu1 }
 0xc1c   :  { %v15404_v12 = vpop.f32.mrb[17].mxu1  ;;  %15441 = vmatmul.mubr.msk.f32.vlgmr.msra.gmra.mrb[18].mxu1 %vm661_vm5, %v1777_v10 }
 0xc1d   :  { %15450 = vmatprep.mubr.msk.f32.mxu1 %vm18222_vm0, %v18221_v0 }
 0xceb   :  { %v1850_v14 = vpop.f32.mrb[18].mxu0 }
 0xcec   :  { %v1851_v15 = vadd.f32 %v1850_v14, %v1702_v8  ;;  %v15423_v16 = vpop.f32.mrb[19].mxu0 }
 0xcef   :  { %v1923_v19 = vpop.f32.mrb[18].mxu1 }
 0xcf0   :  { %v1927_v20 = vadd.f32 %v1923_v19, %v1851_v15  ;;  %v15442_v22 = vpop.f32.mrb[19].mxu1 }
 0xcf2   :  { %v1935_v25 = vadd.f32 %v18700_v23, %v1927_v20 }
 0xcf4   :  { %15444 = vmatpush3.msk.msra.mxu0 %vm439_vm3, %v1935_v25 }
 0xcf5   :  { %15446 = vmatmul.mubr.msk.f32.vlgmr.msra.gmra.mrb[20].mxu0 %vm435_vm4, %v18569_v51  ;;  %15453 = vmatprep.subr.mxu0 %v18221_v0 }
 0xcf6   :  { %15455 = vmatprep.mubr.msk.f32.mxu0 %vm18222_vm0, %v18221_v0 }
 0xdc8   :  { %v2005_v26 = vpop.f32.mrb[20].mxu0 }
 0xdc9   :  { %v15447_v28 = vpop.f32.mrb[21].mxu0  ;;  %v2009_v29 = vsel %vm892_vm6, %v2005_v26, 0.0 }
 0xdca   :  { %2010 = vadd.xlane.f32.xlu1 %v2009_v29 }
 0xddb   :  { %2099 = vperm.xlu1 %17683, %v14162_v32  }
 0xddf   :  { %2107 = vperm.xlu1 %17683, %v14163_v33  }
 0xde3   :  { %2491 = vperm.xlu1 %17683, %v14175_v35  }
 0xe57   :  { %v2011_v36 = vpop.xlane.xlu1 %2010 }
 0xe58   :  { %v2012_v37 = vmul.f32 0.0078125, %v2011_v36  ;;  %v14181_v36 = vld [vmem:[%s20118_s7 + $0xc] sm:$0xf] }
 0xe5a   :  { %v2013_v39 = vsub.f32 %v1935_v25, %v2012_v37  ;;  %v14193_v37 = vld [vmem:[%s20115_s1 + $0x10] sm:$0xf] }
 0xe5b   :  { %v18721_v49 = vpop.permute.xlu1 %2099 }
 0xe5c   :  { %v2014_v40 = vmul.f32 %v2013_v39, %v2013_v39 }
 0xe5e   :  { %15449 = vmatpush3.msk.msra.mxu1 %vm439_vm3, %v2014_v40 }
 0xe5f   :  { %15451 = vmatmul.mubr.msk.f32.vlgmr.msra.gmra.mrb[20].mxu1 %vm435_vm4, %v18569_v51  ;;  %15458 = vmatprep.subr.mxu1 %v18221_v0  ;;  %v18724_v55 = vpop.permute.xlu1 %2107 }
 0xe60   :  { %15460 = vmatprep.mubr.msk.f32.mxu1 %vm18222_vm0, %v18221_v0 }
 0xe63   :  { %v18767_v15 = vpop.permute.xlu1 %2491 }
 0xf32   :  { %v2084_v41 = vpop.f32.mrb[20].mxu1 }
 0xf33   :  { %v15452_v42 = vpop.f32.mrb[21].mxu1  ;;  %v2088_v43 = vsel %vm892_vm6, %v2084_v41, 0.0 }
 0xf34   :  { %2089 = vadd.xlane.f32.xlu0 %v2088_v43 }
 0xf4a   :  { %2658 = vperm.xlu0 %17682, %v14180_v44  }
 0xfc1   :  { %v2090_v45 = vpop.xlane.xlu0 %2089 }
 0xfc2   :  { %v2091_v46 = vmul.f32 0.0078125, %v2090_v45 }
 0xfc4   :  { %v2092_v48 = vadd.f32 1e-05, %v2091_v46 }
 0xfc6   :  { %17688 = vrsqrt.f32 %v2092_v48 }
 0xfd0   :  { %v17689_v50 = vpop.eup %17688 }
 0xfd1   :  { %v2094_v52 = vmul.f32 %v17689_v50, %v2013_v39  ;;  %v18786_v39 = vpop.permute.xlu0 %2658 }
 0xfd3   :  { %v2102_v53 = vmul.f32 %v18721_v49, %v2094_v52  ;;  %v14182_v52 = vld [vmem:[%s20112_s12 + $0x10] sm:$0xf] }
 0xfd5   :  { %v2110_v56 = vadd.f32 %v18724_v55, %v2102_v53  ;;  %v14185_v53 = vld [vmem:[%s20113_s23 + $0x10] sm:$0xf] }
 0xfd7   :  { %v2111_v57 = vmax.f32 %v2110_v56, 0.0  ;;  %v14188_v56 = vld [vmem:[%s20114_s9 + $0x10] sm:$0xf] }
 0xfd9   :  { %15454 = vmatpush3.msk.msra.mxu0 %vm439_vm3, %v2111_v57  ;;  %15459 = vmatpush3.msk.msra.mxu1 %vm439_vm3, %v2111_v57 }
 0xfda   :  { %15456 = vmatmul.mubr.msk.f32.vlgmr.msra.gmra.mrb[22].mxu0 %vm435_vm4, %v14164_v58  ;;  %15463 = vmatprep.subr.mxu0 %v18221_v0 }
 0xfdb   :  { %15464 = vmatpush3.msk.msra.mxu0 %vm439_vm3, %v2111_v57  ;;  %15465 = vmatprep.mubr.msk.f32.mxu0 %vm18222_vm0, %v18221_v0 }
 0xfdc   :  { %16949 = vmatprep.subr.bf16.mxu1 %v18223_v18  ;;  %15461 = vmatmul.mubr.msk.f32.vlgmr.msra.gmra.mrb[22].mxu1 %vm435_vm4, %v14167_v59 }
 0xfdd   :  { %16951 = vmatpush3.bf16.msra.mxu1 %v18511_v13  ;;  %16961 = vmatprep.subr.bf16.mxu0 %v18223_v18 }
 0xfde   :  { %15466 = vmatmul.mubr.msk.f32.vlgmr.msra.gmra.mrb[24].mxu0 %vm435_vm4, %v14170_v60  ;;  %16952 = vmatprep.subr.bf16.mxu1 %v18223_v18 }
 0xfdf   :  { %16963 = vmatpush3.bf16.msra.mxu0 %v18520_v17  ;;  %15484 = vmatprep.mubr.msk.f32.mxu1 %vm18222_vm0, %v18221_v0 }
 0xfe0   :  { %16964 = vmatprep.subr.bf16.mxu0 %v18223_v18  ;;  %15503 = vmatprep.mubr.msk.f32.mxu0 %vm18222_vm0, %v18221_v0 }
 0xfe1   :  { %16954 = vmatpush3.bf16.msra.mxu1 %v18526_v21 }
 0xfe2   :  { %16955 = vmatprep.subr.bf16.mxu1 %v18223_v18 }
 0xfe3   :  { %16966 = vmatpush3.bf16.msra.mxu0 %v18531_v24 }
 0xfe4   :  { %16967 = vmatprep.subr.bf16.mxu0 %v18223_v18 }
 0xfe5   :  { %16957 = vmatpush3.bf16.msra.mxu1 %v18539_v27 }
 0xfe6   :  { %16958 = vmatprep.subr.bf16.mxu1 %v18223_v18 }
 0xfe7   :  { %16969 = vmatpush3.bf16.msra.mxu0 %v18543_v30 }
 0xfe8   :  { %16970 = vmatprep.subr.bf16.mxu0 %v18223_v18 }
 0xfe9   :  { %16960 = vmatpush3.bf16.msra.mxu1 %v18547_v31 }
 0xfea   :  { %15506 = vmatprep.subr.mxu1 %v18221_v0 }
 0xfeb   :  { %16972 = vmatpush3.bf16.msra.mxu0 %v18554_v34 }
 0xfec   :  { %15511 = vmatprep.subr.mxu0 %v18221_v0 }
0x10ad   :  { %v2186_v62 = vpop.f32.mrb[22].mxu0 }
0x10ae   :  { %v15457_v63 = vpop.f32.mrb[23].mxu0  ;;  %15485 = vmatmul.mubr.msk.f32.vlgmr.msra.gmra.mrb[24].mxu1 %vm661_vm5, %v2186_v62 }
0x10af   :  { %v2261_v1 = vpop.f32.mrb[22].mxu1  ;;  %15508 = vmatprep.mubr.msk.f32.mxu1 %vm18222_vm0, %v18221_v0 }
0x10b0   :  { %v15462_v2 = vpop.f32.mrb[23].mxu1 }
0x10b1   :  { %v2336_v4 = vpop.f32.mrb[24].mxu0 }
0x10b2   :  { %v15467_v5 = vpop.f32.mrb[25].mxu0  ;;  %15504 = vmatmul.mubr.msk.f32.vlgmr.msra.gmra.mrb[26].mxu0 %vm661_vm5, %v2336_v4 }
0x10b3   :  { %15513 = vmatprep.mubr.msk.f32.mxu0 %vm18222_vm0, %v18221_v0 }
0x1181   :  { %v2409_v6 = vpop.f32.mrb[24].mxu1 }
0x1182   :  { %v2410_v8 = vadd.f32 %v2409_v6, %v2261_v1  ;;  %v15486_v9 = vpop.f32.mrb[25].mxu1 }
0x1185   :  { %v2482_v10 = vpop.f32.mrb[26].mxu0 }
0x1186   :  { %v2486_v12 = vadd.f32 %v2482_v10, %v2410_v8  ;;  %v15505_v14 = vpop.f32.mrb[27].mxu0 }
0x1188   :  { %v2494_v16 = vadd.f32 %v18767_v15, %v2486_v12 }
0x118a   :  { %15507 = vmatpush3.msk.msra.mxu1 %vm439_vm3, %v2494_v16 }
0x118b   :  { %15509 = vmatmul.mubr.msk.f32.vlgmr.msra.gmra.mrb[26].mxu1 %vm435_vm4, %v18569_v51  ;;  %15516 = vmatprep.subr.mxu1 %v18221_v0 }
0x118c   :  { %15518 = vmatprep.mubr.msk.f32.mxu1 %vm18222_vm0, %v18221_v0 }
0x125e   :  { %v2564_v19 = vpop.f32.mrb[26].mxu1 }
0x125f   :  { %v15510_v20 = vpop.f32.mrb[27].mxu1  ;;  %v2568_v22 = vsel %vm892_vm6, %v2564_v19, 0.0  ;;  %v14198_v19 = vld [vmem:[%s20117_s19 + $0x10] sm:$0xf] }
0x1260   :  { %2569 = vadd.xlane.f32.xlu1 %v2568_v22  ;;  %v14199_v20 = vld [vmem:[%s20118_s7 + $0x10] sm:$0xf]  ;;  %v14211_v22 = vld [vmem:[%s20115_s1 + $0x14] sm:$0xf] }
0x12ed   :  { %v2570_v25 = vpop.xlane.xlu1 %2569 }
0x12ee   :  { %v2571_v26 = vmul.f32 0.0078125, %v2570_v25 }
0x12f0   :  { %v2572_v28 = vsub.f32 %v2494_v16, %v2571_v26 }
0x12f2   :  { %v2573_v29 = vmul.f32 %v2572_v28, %v2572_v28 }
0x12f4   :  { %15512 = vmatpush3.msk.msra.mxu0 %vm439_vm3, %v2573_v29 }
0x12f5   :  { %15514 = vmatmul.mubr.msk.f32.vlgmr.msra.gmra.mrb[28].mxu0 %vm435_vm4, %v18569_v51  ;;  %15521 = vmatprep.subr.mxu0 %v18221_v0 }
0x12f6   :  { %15523 = vmatprep.mubr.msk.f32.mxu0 %vm18222_vm0, %v18221_v0 }
0x13c8   :  { %v2643_v32 = vpop.f32.mrb[28].mxu0 }
0x13c9   :  { %v15515_v33 = vpop.f32.mrb[29].mxu0  ;;  %v2647_v35 = vsel %vm892_vm6, %v2643_v32, 0.0 }
0x13ca   :  { %2648 = vadd.xlane.f32.xlu0 %v2647_v35 }
0x13e0   :  { %2666 = vperm.xlu0 %17682, %v14181_v36   ;;  %v14216_v36 = vld [vmem:[%s20117_s19 + $0x14] sm:$0xf] }
0x13e4   :  { %3050 = vperm.xlu0 %17682, %v14193_v37  }
0x1457   :  { %v2649_v40 = vpop.xlane.xlu0 %2648 }
0x1458   :  { %v2650_v41 = vmul.f32 0.0078125, %v2649_v40 }
0x145a   :  { %v2651_v42 = vadd.f32 1e-05, %v2650_v41 }
0x145c   :  { %17690 = vrsqrt.f32 %v2651_v42 }
0x145f   :  { %v18789_v46 = vpop.permute.xlu0 %2666 }
0x1463   :  { %v18832_v9 = vpop.permute.xlu0 %3050 }
0x1466   :  { %v17691_v43 = vpop.eup %17690 }
0x1467   :  { %v2653_v44 = vmul.f32 %v17691_v43, %v2572_v28 }
0x1469   :  { %v2661_v45 = vmul.f32 %v18786_v39, %v2653_v44 }
0x146b   :  { %v2669_v48 = vadd.f32 %v18789_v46, %v2661_v45 }
0x146d   :  { %v2670_v50 = vmax.f32 %v2669_v48, 0.0 }
0x146f   :  { %15517 = vmatpush3.msk.msra.mxu1 %vm439_vm3, %v2670_v50  ;;  %15522 = vmatpush3.msk.msra.mxu0 %vm439_vm3, %v2670_v50 }
0x1470   :  { %15519 = vmatmul.mubr.msk.f32.vlgmr.msra.gmra.mrb[28].mxu1 %vm435_vm4, %v14182_v52  ;;  %15526 = vmatprep.subr.mxu1 %v18221_v0 }
0x1471   :  { %15527 = vmatpush3.msk.msra.mxu1 %vm439_vm3, %v2670_v50  ;;  %15528 = vmatprep.mubr.msk.f32.mxu1 %vm18222_vm0, %v18221_v0 }
0x1472   :  { %16973 = vmatprep.subr.bf16.mxu0 %v18223_v18  ;;  %15524 = vmatmul.mubr.msk.f32.vlgmr.msra.gmra.mrb[30].mxu0 %vm435_vm4, %v14185_v53  ;;  %v14200_v53 = vld [vmem:[%s20112_s12 + $0x14] sm:$0xf] }
0x1473   :  { %16975 = vmatpush3.bf16.msra.mxu0 %v18511_v13  ;;  %16985 = vmatprep.subr.bf16.mxu1 %v18223_v18 }
0x1474   :  { %15529 = vmatmul.mubr.msk.f32.vlgmr.msra.gmra.mrb[30].mxu1 %vm435_vm4, %v14188_v56  ;;  %16976 = vmatprep.subr.bf16.mxu0 %v18223_v18  ;;  %v14203_v56 = vld [vmem:[%s20113_s23 + $0x14] sm:$0xf] }
0x1475   :  { %16987 = vmatpush3.bf16.msra.mxu1 %v18520_v17  ;;  %15547 = vmatprep.mubr.msk.f32.mxu0 %vm18222_vm0, %v18221_v0 }
0x1476   :  { %16988 = vmatprep.subr.bf16.mxu1 %v18223_v18  ;;  %15566 = vmatprep.mubr.msk.f32.mxu1 %vm18222_vm0, %v18221_v0 }
0x1477   :  { %16978 = vmatpush3.bf16.msra.mxu0 %v18526_v21 }
0x1478   :  { %16979 = vmatprep.subr.bf16.mxu0 %v18223_v18 }
0x1479   :  { %16990 = vmatpush3.bf16.msra.mxu1 %v18531_v24 }
0x147a   :  { %16991 = vmatprep.subr.bf16.mxu1 %v18223_v18 }
0x147b   :  { %16981 = vmatpush3.bf16.msra.mxu0 %v18539_v27 }
0x147c   :  { %16982 = vmatprep.subr.bf16.mxu0 %v18223_v18 }
0x147d   :  { %16993 = vmatpush3.bf16.msra.mxu1 %v18543_v30 }
0x147e   :  { %16994 = vmatprep.subr.bf16.mxu1 %v18223_v18 }
0x147f   :  { %16984 = vmatpush3.bf16.msra.mxu0 %v18547_v31 }
0x1480   :  { %15569 = vmatprep.subr.mxu0 %v18221_v0 }
0x1481   :  { %16996 = vmatpush3.bf16.msra.mxu1 %v18554_v34 }
0x1482   :  { %15574 = vmatprep.subr.mxu1 %v18221_v0 }
0x1543   :  { %v2745_v57 = vpop.f32.mrb[28].mxu1 }
0x1544   :  { %v15520_v58 = vpop.f32.mrb[29].mxu1  ;;  %15548 = vmatmul.mubr.msk.f32.vlgmr.msra.gmra.mrb[32].mxu0 %vm661_vm5, %v2745_v57  ;;  %v14206_v57 = vld [vmem:[%s20114_s9 + $0x14] sm:$0xf] }
0x1545   :  { %v2820_v59 = vpop.f32.mrb[30].mxu0  ;;  %15571 = vmatprep.mubr.msk.f32.mxu0 %vm18222_vm0, %v18221_v0 }
0x1546   :  { %v15525_v60 = vpop.f32.mrb[31].mxu0 }
0x1547   :  { %v2895_v62 = vpop.f32.mrb[30].mxu1 }
0x1548   :  { %v15530_v63 = vpop.f32.mrb[31].mxu1  ;;  %15567 = vmatmul.mubr.msk.f32.vlgmr.msra.gmra.mrb[32].mxu1 %vm661_vm5, %v2895_v62 }
0x1549   :  { %15576 = vmatprep.mubr.msk.f32.mxu1 %vm18222_vm0, %v18221_v0 }
0x1617   :  { %v2968_v1 = vpop.f32.mrb[32].mxu0 }
0x1618   :  { %v2969_v2 = vadd.f32 %v2968_v1, %v2820_v59  ;;  %v15549_v4 = vpop.f32.mrb[33].mxu0 }
0x161b   :  { %v3041_v5 = vpop.f32.mrb[32].mxu1 }
0x161c   :  { %v3045_v6 = vadd.f32 %v3041_v5, %v2969_v2  ;;  %v15568_v8 = vpop.f32.mrb[33].mxu1 }
0x161e   :  { %v3053_v10 = vadd.f32 %v18832_v9, %v3045_v6 }
0x1620   :  { %15570 = vmatpush3.msk.msra.mxu0 %vm439_vm3, %v3053_v10 }
0x1621   :  { %15572 = vmatmul.mubr.msk.f32.vlgmr.msra.gmra.mrb[34].mxu0 %vm435_vm4, %v18569_v51  ;;  %15579 = vmatprep.subr.mxu0 %v18221_v0 }
0x1622   :  { %15581 = vmatprep.mubr.msk.f32.mxu0 %vm18222_vm0, %v18221_v0 }
0x16f4   :  { %v3123_v12 = vpop.f32.mrb[34].mxu0 }
0x16f5   :  { %v15573_v14 = vpop.f32.mrb[35].mxu0  ;;  %v3127_v16 = vsel %vm892_vm6, %v3123_v12, 0.0 }
0x16f6   :  { %3128 = vadd.xlane.f32.xlu1 %v3127_v16 }
0x1707   :  { %3217 = vperm.xlu1 %17683, %v14198_v19  }
0x170b   :  { %3225 = vperm.xlu1 %17683, %v14199_v20  }
0x170f   :  { %3609 = vperm.xlu1 %17683, %v14211_v22  }
0x1783   :  { %v3129_v25 = vpop.xlane.xlu1 %3128 }
0x1784   :  { %v3130_v26 = vmul.f32 0.0078125, %v3129_v25 }
0x1786   :  { %v3131_v28 = vsub.f32 %v3053_v10, %v3130_v26 }
0x1787   :  { %v18853_v42 = vpop.permute.xlu1 %3217 }
0x1788   :  { %v3132_v29 = vmul.f32 %v3131_v28, %v3131_v28 }
0x178a   :  { %15575 = vmatpush3.msk.msra.mxu1 %vm439_vm3, %v3132_v29 }
0x178b   :  { %15577 = vmatmul.mubr.msk.f32.vlgmr.msra.gmra.mrb[34].mxu1 %vm435_vm4, %v18569_v51  ;;  %15584 = vmatprep.subr.mxu1 %v18221_v0  ;;  %v18856_v48 = vpop.permute.xlu1 %3225 }
0x178c   :  { %15586 = vmatprep.mubr.msk.f32.mxu1 %vm18222_vm0, %v18221_v0 }
0x178f   :  { %v18899_v12 = vpop.permute.xlu1 %3609 }
0x185e   :  { %v3202_v32 = vpop.f32.mrb[34].mxu1 }
0x185f   :  { %v15578_v33 = vpop.f32.mrb[35].mxu1  ;;  %v3206_v35 = vsel %vm892_vm6, %v3202_v32, 0.0 }
0x1860   :  { %3207 = vadd.xlane.f32.xlu0 %v3206_v35  ;;  %v14217_v35 = vld [vmem:[%s20118_s7 + $0x14] sm:$0xf] }
0x1876   :  { %3776 = vperm.xlu0 %17682, %v14216_v36  }
0x18ed   :  { %v3208_v37 = vpop.xlane.xlu0 %3207 }
0x18ee   :  { %v3209_v40 = vmul.f32 0.0078125, %v3208_v37 }
0x18f0   :  { %v3210_v41 = vadd.f32 1e-05, %v3209_v40 }
0x18f2   :  { %17692 = vrsqrt.f32 %v3210_v41 }
0x18f5   :  { %v18915_v36 = vpop.permute.xlu0 %3776 }
0x18fc   :  { %v17693_v43 = vpop.eup %17692 }
0x18fd   :  { %v3212_v44 = vmul.f32 %v17693_v43, %v3131_v28 }
0x18ff   :  { %v3220_v45 = vmul.f32 %v18853_v42, %v3212_v44 }
0x1901   :  { %v3228_v50 = vadd.f32 %v18856_v48, %v3220_v45 }
0x1903   :  { %v3229_v52 = vmax.f32 %v3228_v50, 0.0 }
0x1905   :  { %15580 = vmatpush3.msk.msra.mxu0 %vm439_vm3, %v3229_v52  ;;  %15585 = vmatpush3.msk.msra.mxu1 %vm439_vm3, %v3229_v52 }
0x1906   :  { %15582 = vmatmul.mubr.msk.f32.vlgmr.msra.gmra.mrb[36].mxu0 %vm435_vm4, %v14200_v53  ;;  %15589 = vmatprep.subr.mxu0 %v18221_v0 }
0x1907   :  { %15590 = vmatpush3.msk.msra.mxu0 %vm439_vm3, %v3229_v52  ;;  %15591 = vmatprep.mubr.msk.f32.mxu0 %vm18222_vm0, %v18221_v0 }
0x1908   :  { %16997 = vmatprep.subr.bf16.mxu1 %v18223_v18  ;;  %15587 = vmatmul.mubr.msk.f32.vlgmr.msra.gmra.mrb[36].mxu1 %vm435_vm4, %v14203_v56 }
0x1909   :  { %16999 = vmatpush3.bf16.msra.mxu1 %v18511_v13  ;;  %17009 = vmatprep.subr.bf16.mxu0 %v18223_v18 }
0x190a   :  { %15592 = vmatmul.mubr.msk.f32.vlgmr.msra.gmra.mrb[38].mxu0 %vm435_vm4, %v14206_v57  ;;  %17000 = vmatprep.subr.bf16.mxu1 %v18223_v18 }
0x190b   :  { %17011 = vmatpush3.bf16.msra.mxu0 %v18520_v17  ;;  %15610 = vmatprep.mubr.msk.f32.mxu1 %vm18222_vm0, %v18221_v0 }
0x190c   :  { %17012 = vmatprep.subr.bf16.mxu0 %v18223_v18  ;;  %15629 = vmatprep.mubr.msk.f32.mxu0 %vm18222_vm0, %v18221_v0 }
0x190d   :  { %17002 = vmatpush3.bf16.msra.mxu1 %v18526_v21 }
0x190e   :  { %17003 = vmatprep.subr.bf16.mxu1 %v18223_v18 }
0x190f   :  { %17014 = vmatpush3.bf16.msra.mxu0 %v18531_v24 }
0x1910   :  { %17015 = vmatprep.subr.bf16.mxu0 %v18223_v18 }
0x1911   :  { %17005 = vmatpush3.bf16.msra.mxu1 %v18539_v27 }
0x1912   :  { %17006 = vmatprep.subr.bf16.mxu1 %v18223_v18 }
0x1913   :  { %17017 = vmatpush3.bf16.msra.mxu0 %v18543_v30 }
0x1914   :  { %17018 = vmatprep.subr.bf16.mxu0 %v18223_v18 }
0x1915   :  { %17008 = vmatpush3.bf16.msra.mxu1 %v18547_v31 }
0x1916   :  { %15632 = vmatprep.subr.mxu1 %v18221_v0 }
0x1917   :  { %17020 = vmatpush3.bf16.msra.mxu0 %v18554_v34 }
0x1918   :  { %15637 = vmatprep.subr.mxu0 %v18221_v0 }
0x19d9   :  { %v3304_v58 = vpop.f32.mrb[36].mxu0 }
0x19da   :  { %v15583_v59 = vpop.f32.mrb[37].mxu0  ;;  %15611 = vmatmul.mubr.msk.f32.vlgmr.msra.gmra.mrb[38].mxu1 %vm661_vm5, %v3304_v58 }
0x19db   :  { %v3379_v60 = vpop.f32.mrb[36].mxu1  ;;  %15634 = vmatprep.mubr.msk.f32.mxu1 %vm18222_vm0, %v18221_v0 }
0x19dc   :  { %v15588_v62 = vpop.f32.mrb[37].mxu1 }
0x19dd   :  { %v3454_v63 = vpop.f32.mrb[38].mxu0  ;;  %v3820_v62 = vld [vmem:[#allocation11 + $0x8] sm:$0xff] }
0x19de   :  { %v15593_v1 = vpop.f32.mrb[39].mxu0  ;;  %15630 = vmatmul.mubr.msk.f32.vlgmr.msra.gmra.mrb[40].mxu0 %vm661_vm5, %v3454_v63  ;;  %v3822_v63 = vld [vmem:[#allocation11 + $0x18] sm:$0xff] }
0x19df   :  { %15639 = vmatprep.mubr.msk.f32.mxu0 %vm18222_vm0, %v18221_v0  ;;  %v17021_v1 = vpack.c.bf16 %v3822_v63, %v3820_v62  ;;  %v338_v63 = vld [vmem:[%s20119_s10] sm:$0xff] }
0x1aad   :  { %v3527_v2 = vpop.f32.mrb[38].mxu1 }
0x1aae   :  { %v3528_v4 = vadd.f32 %v3527_v2, %v3379_v60  ;;  %v15612_v5 = vpop.f32.mrb[39].mxu1  ;;  %v3819_v2 = vld [vmem:[#allocation11] sm:$0xff] }
0x1ab1   :  { %v3600_v6 = vpop.f32.mrb[40].mxu0 }
0x1ab2   :  { %v3604_v8 = vadd.f32 %v3600_v6, %v3528_v4  ;;  %v15631_v10 = vpop.f32.mrb[41].mxu0  ;;  %v3821_v4 = vld [vmem:[#allocation11 + $0x10] sm:$0xff]  ;;  %v3826_v6 = vld [vmem:[#allocation11 + $0x38] sm:$0xff] }
0x1ab3   :  { %v17023_v5 = vpack.c.bf16 %v3821_v4, %v3819_v2  ;;  %v3823_v10 = vld [vmem:[#allocation11 + $0x20] sm:$0xff] }
0x1ab4   :  { %v3612_v14 = vadd.f32 %v18899_v12, %v3604_v8 }
0x1ab6   :  { %15633 = vmatpush3.msk.msra.mxu1 %vm439_vm3, %v3612_v14 }
0x1ab7   :  { %15635 = vmatmul.mubr.msk.f32.vlgmr.msra.gmra.mrb[40].mxu1 %vm435_vm4, %v18569_v51  ;;  %17022 = vmatprep.subr.bf16.mxu1 %v17021_v1  ;;  %v339_v1 = vld [vmem:[%s20119_s10 + $0x8] sm:$0xff] }
0x1ab8   :  { %3914 = vmatprep.mubr.f32.mxu1 %v18221_v0  ;;  %17024 = vmatpush1.bf16.msra.mxu1 %v17023_v5  ;;  %v18936_v4 = vpack.c.bf16 %v339_v1, %v338_v63  ;;  %v4387_v63 = vld [vmem:[%s20121_s17 + $0x10] sm:$0xff] }
0x1b8a   :  { %v3682_v16 = vpop.f32.mrb[40].mxu1 }
0x1b8b   :  { %v15636_v19 = vpop.f32.mrb[41].mxu1  ;;  %v3686_v20 = vsel %vm892_vm6, %v3682_v16, 0.0 }
0x1b8c   :  { %3687 = vadd.xlane.f32.xlu1 %v3686_v20  ;;  %v3828_v19 = vld [vmem:[#allocation11 + $0x48] sm:$0xff]  ;;  %v3830_v20 = vld [vmem:[#allocation11 + $0x58] sm:$0xff] }
0x1c19   :  { %v3688_v22 = vpop.xlane.xlu1 %3687 }
0x1c1a   :  { %v3689_v25 = vmul.f32 0.0078125, %v3688_v22  ;;  %v17029_v22 = vpack.c.bf16 %v3830_v20, %v3828_v19  ;;  %v342_v19 = vld [vmem:[%s20119_s10 + $0x20] sm:$0xff]  ;;  %v343_v20 = vld [vmem:[%s20119_s10 + $0x28] sm:$0xff] }
0x1c1c   :  { %v3690_v26 = vsub.f32 %v3612_v14, %v3689_v25  ;;  %v3825_v14 = vld [vmem:[#allocation11 + $0x30] sm:$0xff]  ;;  %v3827_v25 = vld [vmem:[#allocation11 + $0x40] sm:$0xff] }
0x1c1d   :  { %v17027_v16 = vpack.c.bf16 %v3825_v14, %v3823_v10 }
0x1c1e   :  { %v3691_v28 = vmul.f32 %v3690_v26, %v3690_v26 }
0x1c20   :  { %15638 = vmatpush3.msk.msra.mxu0 %vm439_vm3, %v3691_v28 }
0x1c21   :  { %15640 = vmatmul.mubr.msk.f32.vlgmr.msra.gmra.mrb[42].mxu0 %vm435_vm4, %v18569_v51  ;;  %15642 = vmatprep.subr.mxu0 %v18221_v0 }
0x1c22   :  { %15644 = vmatprep.mubr.msk.f32.mxu0 %vm18222_vm0, %v18221_v0 }
0x1cf4   :  { %v3761_v29 = vpop.f32.mrb[42].mxu0 }
0x1cf5   :  { %v15641_v32 = vpop.f32.mrb[43].mxu0  ;;  %v3765_v33 = vsel %vm892_vm6, %v3761_v29, 0.0  ;;  %v3832_v29 = vld [vmem:[#allocation11 + $0x68] sm:$0xff] }
0x1cf6   :  { %3766 = vadd.xlane.f32.xlu0 %v3765_v33  ;;  %v3834_v32 = vld [vmem:[#allocation11 + $0x78] sm:$0xff] }
0x1cf7   :  { %v17033_v33 = vpack.c.bf16 %v3834_v32, %v3832_v29 }
0x1d0c   :  { %3784 = vperm.xlu0 %17682, %v14217_v35   ;;  %v3831_v35 = vld [vmem:[#allocation11 + $0x60] sm:$0xff] }
0x1d83   :  { %v3767_v37 = vpop.xlane.xlu0 %3766 }
0x1d84   :  { %v3768_v40 = vmul.f32 0.0078125, %v3767_v37  ;;  %v3833_v37 = vld [vmem:[#allocation11 + $0x70] sm:$0xff] }
0x1d86   :  { %v3769_v41 = vadd.f32 1e-05, %v3768_v40  ;;  %v17035_v40 = vpack.c.bf16 %v3833_v37, %v3831_v35 }
0x1d88   :  { %17694 = vrsqrt.f32 %v3769_v41 }
0x1d8b   :  { %v18918_v45 = vpop.permute.xlu0 %3784 }
0x1d92   :  { %v17695_v43 = vpop.eup %17694 }
0x1d93   :  { %v3771_v51 = vmul.f32 %v17695_v43, %v3690_v26  ;;  %v3829_v26 = vld [vmem:[#allocation11 + $0x50] sm:$0xff] }
0x1d94   :  { %v17031_v28 = vpack.c.bf16 %v3829_v26, %v3827_v25  ;;  %v344_v25 = vld [vmem:[%s20119_s10 + $0x30] sm:$0xff]  ;;  %v345_v26 = vld [vmem:[%s20119_s10 + $0x38] sm:$0xff] }
0x1d95   :  { %v3779_v44 = vmul.f32 %v18915_v36, %v3771_v51 }
0x1d97   :  { %v3787_v50 = vadd.f32 %v18918_v45, %v3779_v44 }
0x1d99   :  { %v18922_v52 = vadd.f32 %v3787_v50, %v18503_v7  ;;  %v3824_v7 = vld [vmem:[#allocation11 + $0x28] sm:$0xff]  ;;  %v14218_v50 = vld [vmem:[#allocation8] ss:$0 sm:$0xff] }
0x1d9a   :  { %v17025_v8 = vpack.c.bf16 %v3826_v6, %v3824_v7  ;;  %v340_v7 = vld [vmem:[%s20119_s10 + $0x10] sm:$0xff]  ;;  %v341_v6 = vld [vmem:[%s20119_s10 + $0x18] sm:$0xff] }
0x1d9b   :  { %v3791_v53 = vsel %vm892_vm6, %v18922_v52, 0.0 }
0x1d9c   :  { %3792 = vadd.xlane.f32.xlu0 %v3791_v53  ;;  %17026 = vmatprep.subr.bf16.mxu1 %v17025_v8  ;;  %v18943_v8 = vpack.c.bf16 %v341_v6, %v340_v7 }
0x1d9d   :  { %17028 = vmatpush1.bf16.msra.mxu1 %v17027_v16 }
0x1d9e   :  { %17030 = vmatprep.subr.bf16.mxu1 %v17029_v22  ;;  %v18949_v22 = vpack.c.bf16 %v343_v20, %v342_v19 }
0x1da1   :  { %17032 = vmatpush1.bf16.msra.mxu1 %v17031_v28  ;;  %v18956_v28 = vpack.c.bf16 %v345_v26, %v344_v25 }
0x1da2   :  { %17034 = vmatprep.subr.bf16.mxu1 %v17033_v33  ;;  %v18964_v33 = vld [vmem:[%s20120_s11] sm:$0xf] }
0x1da5   :  { %17036 = vmatpush1.bf16.msra.mxu1 %v17035_v40 }
0x1da6   :  { %17049 = vmatprep.subr.bf16.mxu1 %v18223_v18 }
0x1e29   :  { %v3793_v56 = vpop.xlane.xlu0 %3792 }
0x1e2a   :  { %v3795_v57 = vmul.f32 0.015625, %v3793_v56  ;;  %v14219_v56 = vld [vmem:[#allocation10] ss:$0 sm:$0xff] }
0x1e2c   :  { %v3796_v58 = vsub.f32 %v18922_v52, %v3795_v57 }
0x1e2e   :  { %v3797_v59 = vmul.f32 %v3796_v58, %v3796_v58 }
0x1e30   :  { %v3798_v60 = vsel %vm892_vm6, %v3797_v59, 0.0 }
0x1e31   :  { %3799 = vadd.xlane.f32.xlu1 %v3798_v60  ;;  %v3837_v60 = vlaneseq }
0x1e33   :  { %v3838_v62 = vshrl.u32 %v3837_v60, 7  ;;  %v4385_v60 = vld [vmem:[%s20121_s17] sm:$0xff] }
0x1e35   :  { %v18934_v2 = vsub.s32 0, %v3838_v62  ;;  %v18960_v29 = vsub.s32 1, %v3838_v62  ;;  %v4386_v62 = vld [vmem:[%s20121_s17 + $0x8] sm:$0xff] }
0x1e36   :  { %v17062_v1 = vpack.c.bf16 %v4386_v62, %v4385_v60 }
0x1ebe   :  { %v3800_v41 = vpop.xlane.xlu1 %3799 }
0x1ebf   :  { %v3801_v43 = vmul.f32 0.015625, %v3800_v41 }
0x1ec1   :  { %v3802_v51 = vadd.f32 1e-05, %v3801_v43 }
0x1ec3   :  { %17696 = vrsqrt.f32 %v3802_v51 }
0x1ecd   :  { %v17697_v44 = vpop.eup %17696 }
0x1ece   :  { %v3804_v53 = vmul.f32 %v17697_v44, %v3796_v58  ;;  %v3835_v58 = vld [vmem:[#allocation13] sm:$0x3] }
0x1ecf   :  { %v3840_v5 = vrot.slane %v3835_v58, %v18934_v2  ;;  %v3844_v32 = vrot.slane %v3835_v58, %v18960_v29  ;;  %v4388_v58 = vld [vmem:[%s20121_s17 + $0x18] sm:$0xff] }
0x1ed0   :  { %v3811_v57 = vmul.f32 %v14218_v50, %v3804_v53 }
0x1ed2   :  { %v3818_v59 = vadd.f32 %v14219_v56, %v3811_v57 }
0x1ed4   :  { %14220 = vmatmul.mubr.msk.f32.vlgmr.msra.gmra.mrb[42].mxu1 %vm661_vm5, %v3818_v59  ;;  %v18996_v59 = vld [vmem:[%s18365_s24] sm:$0xf] }
0x1ed5   :  { %15687 = vmatprep.mubr.msk.f32.mxu1 %vm18222_vm0, %v18221_v0  ;;  %17051 = vmatpush3.bf16.msra.mxu1 %v18936_v4 }
0x1ed6   :  { %17052 = vmatprep.subr.bf16.mxu1 %v18223_v18 }
0x1ed9   :  { %17054 = vmatpush3.bf16.msra.mxu1 %v18943_v8 }
0x1eda   :  { %17055 = vmatprep.subr.bf16.mxu1 %v18223_v18 }
0x1edd   :  { %17057 = vmatpush3.bf16.msra.mxu1 %v18949_v22 }
0x1ede   :  { %17058 = vmatprep.subr.bf16.mxu1 %v18223_v18 }
0x1ee1   :  { %17060 = vmatpush3.bf16.msra.mxu1 %v18956_v28 }
0x1ee2   :  { %17061 = vmatprep.subr.bf16.mxu1 %v18223_v18 }
0x1fa7   :  { %v3916_v10 = vpop.f32.mrb[42].mxu1 }
0x1fa8   :  { %v3917_v14 = vadd.f32 %v3916_v10, %v3840_v5  ;;  %v3918_v16 = vpop.f32.mrb[43].mxu1  ;;  %v17065_v5 = vpack.c.bf16 %v4388_v58, %v4387_v63 }
0x1fa9   :  { %v18966_v37 = vadd.f32 %v3918_v16, %v3844_v32 }
0x1faa   :  { %3923 = vrot.lane.b32.xlu1 %v3917_v14, %s18225_s21  ;;  %v3921_v40 = vmul.f32 0.25, %v3917_v14 }
0x201c   :  { %v3924_v35 = vpop.permute.xlu1 %3923 }
0x201d   :  { %15643 = vmatpush3.msk.msra.mxu0 %vm439_vm3, %v3924_v35  ;;  %v4074_v41 = vmul.f32 %v3924_v35, %v3921_v40 }
0x201e   :  { %15645 = vmatmul.mubr.msk.f32.vlgmr.msra.gmra.mrb[44].mxu0 %vm435_vm4, %v18964_v33  ;;  %15647 = vmatprep.subr.mxu0 %v18221_v0 }
0x201f   :  { %15648 = vmatpush3.msk.msra.mxu0 %vm439_vm3, %v18966_v37  ;;  %15649 = vmatprep.mubr.msk.f32.mxu0 %vm18222_vm0, %v18221_v0 }
0x2020   :  { %17037 = vmatprep.subr.bf16.mxu0 %v18223_v18 }
0x2022   :  { %15650 = vmatmul.mubr.msk.f32.vlgmr.msra.gmra.mrb[46].mxu0 %vm435_vm4, %v18964_v33 }
0x2023   :  { %17039 = vmatpush3.bf16.msra.mxu0 %v18936_v4  ;;  %15668 = vmatprep.mubr.msk.f32.mxu0 %vm18222_vm0, %v18221_v0 }
0x2024   :  { %17040 = vmatprep.subr.bf16.mxu0 %v18223_v18 }
0x2027   :  { %17042 = vmatpush3.bf16.msra.mxu0 %v18943_v8 }
0x2028   :  { %17043 = vmatprep.subr.bf16.mxu0 %v18223_v18 }
0x202b   :  { %17045 = vmatpush3.bf16.msra.mxu0 %v18949_v22 }
0x202c   :  { %17046 = vmatprep.subr.bf16.mxu0 %v18223_v18 }
0x202f   :  { %17048 = vmatpush3.bf16.msra.mxu0 %v18956_v28 }
0x2030   :  { %15690 = vmatprep.subr.mxu0 %v18221_v0 }
0x2032   :  { %15669 = vmatmul.mubr.msk.f32.vlgmr.msra.gmra.mrb[48].mxu0 %vm661_vm5, %v4074_v41 }
0x2033   :  { %15692 = vmatprep.mubr.msk.f32.mxu0 %vm18222_vm0, %v18221_v0  ;;  %15691 = vmatpush3.msk.msra.mxu0 %vm439_vm3, %v18996_v59 }
0x2034   :  { %15695 = vmatprep.subr.mxu0 %v18221_v0 }
0x20f1   :  { %v3996_v43 = vpop.f32.mrb[44].mxu0 }
0x20f2   :  { %v4148_v51 = vmul.f32 %v3996_v43, %v3921_v40  ;;  %v15646_v44 = vpop.f32.mrb[45].mxu0  ;;  %v4389_v43 = vld [vmem:[%s20121_s17 + $0x20] sm:$0xff] }
0x20f4   :  { %15688 = vmatmul.mubr.msk.f32.vlgmr.msra.gmra.mrb[44].mxu1 %vm661_vm5, %v4148_v51  ;;  %v4390_v51 = vld [vmem:[%s20121_s17 + $0x28] sm:$0xff] }
0x20f5   :  { %v4069_v50 = vpop.f32.mrb[46].mxu0  ;;  %15716 = vmatprep.mubr.msk.f32.mxu1 %vm18222_vm0, %v18221_v0  ;;  %17063 = vmatpush3.bf16.msra.mxu1 %v17062_v1  ;;  %v17068_v44 = vpack.c.bf16 %v4390_v51, %v4389_v43  ;;  %v4507_v43 = vld [vmem:[%s20122_s15 + $0x18] sm:$0xff] }
0x20f6   :  { %v15651_v53 = vpop.f32.mrb[47].mxu0  ;;  %17064 = vmatprep.subr.bf16.mxu1 %v18223_v18 }
0x20f7   :  { %v4391_v53 = vld [vmem:[%s20121_s17 + $0x30] sm:$0xff] }
0x20f9   :  { %17066 = vmatpush3.bf16.msra.mxu1 %v17065_v5 }
0x20fa   :  { %17067 = vmatprep.subr.bf16.mxu1 %v18223_v18 }
0x20fd   :  { %17069 = vmatpush3.bf16.msra.mxu1 %v17068_v44  ;;  %v4508_v44 = vld [vmem:[%s20122_s15 + $0x20] sm:$0xff] }
0x20fe   :  { %17070 = vmatprep.subr.bf16.mxu1 %v18223_v18 }
0x2105   :  { %v4144_v56 = vpop.f32.mrb[48].mxu0 }
0x2106   :  { %v15670_v57 = vpop.f32.mrb[49].mxu0 }
0x21c7   :  { %v4218_v7 = vpop.f32.mrb[44].mxu1 }
0x21c8   :  { %v4222_v6 = vmax.f32 %v4144_v56, %v4218_v7  ;;  %v15689_v10 = vpop.f32.mrb[45].mxu1 }
0x21c9   :  { %v14232_v10 = vld [vmem:[#allocation14] ss:$0 sm:$0xff] }
0x21ca   :  { %v4223_v14 = vsub.f32 %v4144_v56, %v4222_v6  ;;  %v4226_v16 = vsub.f32 %v4218_v7, %v4222_v6  ;;  %v4392_v56 = vld [vmem:[%s20121_s17 + $0x38] sm:$0xff] }
0x21cb   :  { %v17071_v57 = vpack.c.bf16 %v4392_v56, %v4391_v53  ;;  %v4509_v53 = vld [vmem:[%s20122_s15 + $0x28] sm:$0xff] }
0x21cc   :  { %v4224_v19 = vmul.f32 1.442695, %v4223_v14  ;;  %v4227_v20 = vmul.f32 1.442695, %v4226_v16  ;;  %v17080_v56 = vpack.c.bf16 %v4509_v53, %v4508_v44  ;;  %v14235_v44 = vld [vmem:[#allocation19] ss:$0 sm:$0xff] }
0x21cd   :  { %17072 = vmatpush3.bf16.msra.mxu1 %v17071_v57  ;;  %v4510_v57 = vld [vmem:[%s20122_s15 + $0x30] sm:$0xff] }
0x21ce   :  { %17698 = vpow2.f32 %v4224_v19  ;;  %17085 = vmatprep.subr.bf16.mxu1 %v18223_v18 }
0x21cf   :  { %17700 = vpow2.f32 %v4227_v20 }
0x21d8   :  { %v17699_v25 = vpop.eup %17698 }
0x21d9   :  { %v17701_v26 = vpop.eup %17700 }
0x21da   :  { %v4229_v32 = vadd.f32 %v17701_v26, %v17699_v25 }
0x21dc   :  { %17702 = vrcp.f32 %v4229_v32 }
0x21e6   :  { %v17703_v35 = vpop.eup %17702 }
0x21e7   :  { %v4231_v40 = vmul.f32 %v17703_v35, %v17699_v25  ;;  %v4308_v41 = vmul.f32 %v17703_v35, %v17701_v26  ;;  %v4505_v35 = vld [vmem:[%s20122_s15 + $0x8] sm:$0xff] }
0x21e9   :  { %15693 = vmatmul.mubr.msk.f32.vlgmr.msra.gmra.mrb[50].mxu0 %vm435_vm4, %v4231_v40 }
0x21ea   :  { %15696 = vmatpush3.msk.msra.mxu0 %vm439_vm3, %v18996_v59  ;;  %15697 = vmatprep.mubr.msk.f32.mxu0 %vm18222_vm0, %v18221_v0 }
0x21eb   :  { %17073 = vmatprep.subr.bf16.mxu0 %v18223_v18 }
0x21ed   :  { %15698 = vmatmul.mubr.msk.f32.vlgmr.msra.gmra.mrb[52].mxu0 %vm435_vm4, %v4308_v41  ;;  %v4506_v41 = vld [vmem:[%s20122_s15 + $0x10] sm:$0xff] }
0x21ee   :  { %15735 = vmatprep.mubr.msk.f32.mxu0 %vm18222_vm0, %v18221_v0  ;;  %v17077_v51 = vpack.c.bf16 %v4507_v43, %v4506_v41  ;;  %v4625_v41 = vld [vmem:[#allocation20 + $0x30] sm:$0xff]  ;;  %v4626_v43 = vld [vmem:[#allocation20 + $0x38] sm:$0xff] }
0x22bc   :  { %v4304_v60 = vpop.f32.mrb[50].mxu0 }
0x22bd   :  { %v15694_v62 = vpop.f32.mrb[51].mxu0  ;;  %v4382_v1 = vmul.f32 %v4304_v60, %v18966_v37  ;;  %v4511_v60 = vld [vmem:[%s20122_s15 + $0x38] sm:$0xff] }
0x22be   :  { %v17083_v62 = vpack.c.bf16 %v4511_v60, %v4510_v57 }
0x22c0   :  { %v4378_v63 = vpop.f32.mrb[52].mxu0 }
0x22c1   :  { %v4383_v58 = vmul.f32 %v4378_v63, %v4069_v50  ;;  %v15699_v5 = vpop.f32.mrb[53].mxu0 }
0x22c3   :  { %v4384_v7 = vadd.f32 %v4383_v58, %v4382_v1 }
0x22c5   :  { %15717 = vmatmul.mubr.msk.f32.vlgmr.msra.gmra.mrb[46].mxu1 %vm661_vm5, %v4384_v7  ;;  %v14233_v7 = vld [vmem:[#allocation16] ss:$0 sm:$0xff] }
0x22c6   :  { %15754 = vmatprep.mubr.msk.f32.mxu1 %vm18222_vm0, %v18221_v0 }
0x2398   :  { %v4462_v6 = vpop.f32.mrb[46].mxu1 }
0x2399   :  { %v4466_v14 = vadd.f32 %v4462_v6, %v18922_v52  ;;  %v15718_v16 = vpop.f32.mrb[47].mxu1  ;;  %v4504_v52 = vld [vmem:[%s20122_s15] sm:$0xff] }
0x239a   :  { %v17074_v40 = vpack.c.bf16 %v4505_v35, %v4504_v52  ;;  %v4624_v35 = vld [vmem:[#allocation20 + $0x28] sm:$0xff] }
0x239b   :  { %v19027_v19 = vadd.f32 %v14232_v10, %v4466_v14  ;;  %v14234_v10 = vld [vmem:[#allocation17] ss:$0 sm:$0xff] }
0x239c   :  { %17075 = vmatpush3.bf16.msra.mxu0 %v17074_v40 }
0x239d   :  { %v4477_v37 = vsel %vm892_vm6, %v19027_v19, 0.0  ;;  %17076 = vmatprep.subr.bf16.mxu0 %v18223_v18 }
0x239e   :  { %4478 = vadd.xlane.f32.xlu1 %v4477_v37  ;;  %v4619_v37 = vld [vmem:[#allocation20] sm:$0xff] }
0x23a0   :  { %17078 = vmatpush3.bf16.msra.mxu0 %v17077_v51  ;;  %v17095_v51 = vpack.c.bf16 %v4626_v43, %v4625_v41 }
0x23a1   :  { %17079 = vmatprep.subr.bf16.mxu0 %v18223_v18 }
0x23a4   :  { %17081 = vmatpush3.bf16.msra.mxu0 %v17080_v56 }
0x23a5   :  { %17082 = vmatprep.subr.bf16.mxu0 %v18223_v18 }
0x23a8   :  { %17084 = vmatpush3.bf16.msra.mxu0 %v17083_v62 }
0x242b   :  { %v4479_v50 = vpop.xlane.xlu1 %4478 }
0x242c   :  { %v4480_v20 = vmul.f32 0.015625, %v4479_v50  ;;  %v4620_v50 = vld [vmem:[#allocation20 + $0x8] sm:$0xff] }
0x242e   :  { %v4481_v25 = vsub.f32 %v19027_v19, %v4480_v20  ;;  %v17086_v20 = vpack.c.bf16 %v4620_v50, %v4619_v37 }
0x2430   :  { %v4482_v26 = vmul.f32 %v4481_v25, %v4481_v25  ;;  %17087 = vmatpush3.bf16.msra.mxu1 %v17086_v20 }
0x2431   :  { %17088 = vmatprep.subr.bf16.mxu1 %v18223_v18 }
0x2432   :  { %v4483_v32 = vsel %vm892_vm6, %v4482_v26, 0.0  ;;  %v4621_v26 = vld [vmem:[#allocation20 + $0x10] sm:$0xff] }
0x2433   :  { %4484 = vadd.xlane.f32.xlu0 %v4483_v32  ;;  %v4622_v32 = vld [vmem:[#allocation20 + $0x18] sm:$0xff] }
0x2434   :  { %v17089_v52 = vpack.c.bf16 %v4622_v32, %v4621_v26 }
0x2436   :  { %17090 = vmatpush3.bf16.msra.mxu1 %v17089_v52 }
0x2437   :  { %17091 = vmatprep.subr.bf16.mxu1 %v18223_v18 }
0x24c0   :  { %v4485_v63 = vpop.xlane.xlu0 %4484 }
0x24c1   :  { %v4486_v1 = vmul.f32 0.015625, %v4485_v63 }
0x24c3   :  { %v4487_v58 = vadd.f32 1e-05, %v4486_v1 }
0x24c5   :  { %17704 = vrsqrt.f32 %v4487_v58 }
0x24cf   :  { %v17705_v5 = vpop.eup %17704 }
0x24d0   :  { %v4489_v6 = vmul.f32 %v17705_v5, %v4481_v25  ;;  %v4623_v25 = vld [vmem:[#allocation20 + $0x20] sm:$0xff] }
0x24d1   :  { %v17092_v40 = vpack.c.bf16 %v4624_v35, %v4623_v25 }
0x24d2   :  { %v4496_v14 = vmul.f32 %v14233_v7, %v4489_v6 }
0x24d3   :  { %17093 = vmatpush3.bf16.msra.mxu1 %v17092_v40 }
0x24d4   :  { %v4503_v16 = vadd.f32 %v14234_v10, %v4496_v14  ;;  %17094 = vmatprep.subr.bf16.mxu1 %v18223_v18 }
0x24d6   :  { %15736 = vmatmul.mubr.msk.f32.vlgmr.msra.gmra.mrb[54].mxu0 %vm661_vm5, %v4503_v16 }
0x24d7   :  { %4836 = vmatprep.mubr.f32.mxu0 %v18221_v0  ;;  %17096 = vmatpush3.bf16.msra.mxu1 %v17095_v51 }
0x24d8   :  { %15757 = vmatprep.subr.mxu1 %v18221_v0 }
0x25a9   :  { %v4588_v53 = vpop.f32.mrb[54].mxu0 }
0x25aa   :  { %v4589_v56 = vadd.f32 %v14235_v44, %v4588_v53  ;;  %v15737_v57 = vpop.f32.mrb[55].mxu0 }
0x25ab   :  { %v14237_v57 = vld [vmem:[#allocation22] ss:$0 sm:$0xff] }
0x25ac   :  { %v4593_v60 = vmul.f32 0.70710677, %v4589_v56  ;;  %v4592_v51 = vmul.f32 0.5, %v4589_v56 }
0x25ae   :  { %v4594_v62 = vand.u32 2147483647, %v4593_v60  ;;  %vm4614_vm7 = vcmp.ge.f32.partialorder %v4593_v60, 0.0 }
0x25b0   :  { %v4595_v63 = vmul.f32 0.3275911, %v4594_v62  ;;  %v4608_v58 = vsub.f32 0.0, %v4594_v62 }
0x25b2   :  { %v4596_v1 = vadd.f32 1.0, %v4595_v63  ;;  %v4609_v7 = vmul.f32 %v4608_v58, %v4594_v62 }
0x25b4   :  { %17706 = vrcp.f32 %v4596_v1  ;;  %v4610_v14 = vmul.f32 1.442695, %v4609_v7 }
0x25b6   :  { %17708 = vpow2.f32 %v4610_v14  ;;  %v4741_v14 = vld [vmem:[#allocation11 + $0x88] sm:$0xff] }
0x25be   :  { %v17707_v5 = vpop.eup %17706 }
0x25bf   :  { %v4599_v6 = vmul.f32 1.0614054, %v17707_v5 }
0x25c0   :  { %v17709_v25 = vpop.eup %17708 }
0x25c1   :  { %v4600_v10 = vadd.f32 -1.4531521, %v4599_v6 }
0x25c3   :  { %v4601_v16 = vmul.f32 %v17707_v5, %v4600_v10 }
0x25c5   :  { %v4602_v37 = vadd.f32 1.4214138, %v4601_v16  ;;  %v4743_v16 = vld [vmem:[#allocation11 + $0x98] sm:$0xff] }
0x25c7   :  { %v4603_v50 = vmul.f32 %v17707_v5, %v4602_v37  ;;  %v17097_v37 = vpack.c.bf16 %v4743_v16, %v4741_v14 }
0x25c9   :  { %v4604_v20 = vadd.f32 -0.28449672, %v4603_v50  ;;  %v4740_v50 = vld [vmem:[#allocation11 + $0x80] sm:$0xff]  ;;  %17098 = vmatprep.subr.bf16.mxu0 %v17097_v37  ;;  %v14239_v37 = vld [vmem:[#allocation8 + $0x1] ss:$0 sm:$0xff] }
0x25cb   :  { %v4605_v26 = vmul.f32 %v17707_v5, %v4604_v20  ;;  %v4742_v20 = vld [vmem:[#allocation11 + $0x90] sm:$0xff] }
0x25cd   :  { %v4606_v32 = vadd.f32 0.2548296, %v4605_v26  ;;  %v17099_v26 = vpack.c.bf16 %v4742_v20, %v4740_v50  ;;  %v14240_v20 = vld [vmem:[#allocation10 + $0x1] ss:$0 sm:$0xff] }
0x25cf   :  { %v4607_v52 = vmul.f32 %v17707_v5, %v4606_v32  ;;  %17100 = vmatpush1.bf16.msra.mxu0 %v17099_v26  ;;  %v4747_v32 = vld [vmem:[#allocation11 + $0xb8] sm:$0xff] }
0x25d1   :  { %v4612_v35 = vmul.f32 %v17709_v25, %v4607_v52  ;;  %v4744_v25 = vld [vmem:[#allocation11 + $0xa0] sm:$0xff] }
0x25d3   :  { %v4613_v40 = vsub.f32 1.0, %v4612_v35  ;;  %v4746_v35 = vld [vmem:[#allocation11 + $0xb0] sm:$0xff] }
0x25d5   :  { %v4615_v41 = vsub.f32 0.0, %v4613_v40 }
0x25d7   :  { %v4616_v43 = vsel %vm4614_vm7, %v4613_v40, %v4615_v41  ;;  %v17103_v40 = vpack.c.bf16 %v4746_v35, %v4744_v25  ;;  %v4749_v41 = vld [vmem:[#allocation11 + $0xc8] sm:$0xff] }
0x25d8   :  { %v4617_v44 = vadd.f32 1.0, %v4616_v43  ;;  %v4751_v43 = vld [vmem:[#allocation11 + $0xd8] sm:$0xff] }
0x25da   :  { %v4618_v53 = vmul.f32 %v4617_v44, %v4592_v51  ;;  %v17105_v51 = vpack.c.bf16 %v4751_v43, %v4749_v41  ;;  %v4748_v44 = vld [vmem:[#allocation11 + $0xc0] sm:$0xff] }
0x25dc   :  { %15755 = vmatmul.mubr.msk.f32.vlgmr.msra.gmra.mrb[48].mxu1 %vm661_vm5, %v4618_v53  ;;  %v4750_v53 = vld [vmem:[#allocation11 + $0xd0] sm:$0xff] }
0x25dd   :  { %15759 = vmatprep.mubr.msk.f32.mxu1 %vm18222_vm0, %v18221_v0 }
0x26af   :  { %v4703_v62 = vpop.f32.mrb[48].mxu1 }
0x26b0   :  { %v4704_v63 = vadd.f32 %v14237_v57, %v4703_v62  ;;  %v15756_v1 = vpop.f32.mrb[49].mxu1  ;;  %v17107_v57 = vpack.c.bf16 %v4750_v53, %v4748_v44  ;;  %v4753_v62 = vld [vmem:[#allocation11 + $0xe8] sm:$0xff] }
0x26b2   :  { %v19054_v58 = vadd.f32 %v4704_v63, %v19027_v19  ;;  %v4745_v19 = vld [vmem:[#allocation11 + $0xa8] sm:$0xff]  ;;  %v4755_v63 = vld [vmem:[#allocation11 + $0xf8] sm:$0xff] }
0x26b3   :  { %v17101_v52 = vpack.c.bf16 %v4747_v32, %v4745_v19  ;;  %v17109_v1 = vpack.c.bf16 %v4755_v63, %v4753_v62  ;;  %v4757_v32 = vld [vmem:[#allocation13 + $0x2] sm:$0x3] }
0x26b4   :  { %v4712_v5 = vsel %vm892_vm6, %v19054_v58, 0.0  ;;  %v4766_v25 = vrot.slane %v4757_v32, %v18960_v29 }
0x26b5   :  { %4713 = vadd.xlane.f32.xlu0 %v4712_v5  ;;  %17102 = vmatprep.subr.bf16.mxu0 %v17101_v52  ;;  %v4752_v5 = vld [vmem:[#allocation11 + $0xe0] sm:$0xff]  ;;  %v4762_v52 = vrot.slane %v4757_v32, %v18934_v2 }
0x26b6   :  { %17104 = vmatpush1.bf16.msra.mxu0 %v17103_v40 }
0x26b7   :  { %17106 = vmatprep.subr.bf16.mxu0 %v17105_v51 }
0x26ba   :  { %17108 = vmatpush1.bf16.msra.mxu0 %v17107_v57 }
0x26bb   :  { %17110 = vmatprep.subr.bf16.mxu0 %v17109_v1 }
0x2742   :  { %v4714_v60 = vpop.xlane.xlu0 %4713 }
0x2743   :  { %v4715_v56 = vmul.f32 0.015625, %v4714_v60  ;;  %v4754_v60 = vld [vmem:[#allocation11 + $0xf0] sm:$0xff] }
0x2745   :  { %v4716_v7 = vsub.f32 %v19054_v58, %v4715_v56  ;;  %v17111_v56 = vpack.c.bf16 %v4754_v60, %v4752_v5 }
0x2747   :  { %v4717_v6 = vmul.f32 %v4716_v7, %v4716_v7  ;;  %17112 = vmatpush1.bf16.msra.mxu0 %v17111_v56 }
0x2748   :  { %15762 = vmatprep.subr.mxu0 %v18221_v0 }
0x2749   :  { %v4718_v10 = vsel %vm892_vm6, %v4717_v6, 0.0 }
0x274a   :  { %4719 = vadd.xlane.f32.xlu0 %v4718_v10 }
0x27d7   :  { %v4720_v6 = vpop.xlane.xlu0 %4719 }
0x27d8   :  { %v4721_v10 = vmul.f32 0.015625, %v4720_v6 }
0x27da   :  { %v4722_v14 = vadd.f32 1e-05, %v4721_v10 }
0x27dc   :  { %17710 = vrsqrt.f32 %v4722_v14 }
0x27e6   :  { %v17711_v16 = vpop.eup %17710 }
0x27e7   :  { %v4724_v50 = vmul.f32 %v17711_v16, %v4716_v7 }
0x27e9   :  { %v4731_v26 = vmul.f32 %v14239_v37, %v4724_v50 }
0x27eb   :  { %v4738_v19 = vadd.f32 %v14240_v20, %v4731_v26  ;;  %v14252_v26 = vld [vmem:[%s20121_s17 + $0x40] sm:$0xff] }
0x27ed   :  { %14241 = vmatmul.mubr.msk.f32.vlgmr.msra.gmra.mrb[56].mxu0 %vm661_vm5, %v4738_v19  ;;  %v14253_v19 = vld [vmem:[%s20121_s17 + $0x48] sm:$0xff] }
0x27ee   :  { %15764 = vmatprep.mubr.msk.f32.mxu0 %vm18222_vm0, %v18221_v0 }
0x28c0   :  { %v4838_v35 = vpop.f32.mrb[56].mxu0 }
0x28c1   :  { %v4839_v40 = vadd.f32 %v4838_v35, %v4762_v52  ;;  %v4840_v41 = vpop.f32.mrb[57].mxu0  ;;  %v17138_v52 = vpack.c.bf16 %v14253_v19, %v14252_v26 }
0x28c2   :  { %v19066_v43 = vadd.f32 %v4840_v41, %v4766_v25  ;;  %v14255_v41 = vld [vmem:[%s20121_s17 + $0x58] sm:$0xff] }
0x28c3   :  { %4845 = vrot.lane.b32.xlu0 %v4839_v40, %s18225_s21  ;;  %v4843_v51 = vmul.f32 0.25, %v4839_v40  ;;  %v14254_v40 = vld [vmem:[%s20121_s17 + $0x50] sm:$0xff] }
0x28c4   :  { %15763 = vmatpush3.msk.msra.mxu0 %vm439_vm3, %v19066_v43 }
0x28c5   :  { %15765 = vmatmul.mubr.msk.f32.vlgmr.msra.gmra.mrb[58].mxu0 %vm435_vm4, %v18964_v33  ;;  %17125 = vmatprep.subr.bf16.mxu0 %v18223_v18 }
0x28c6   :  { %17127 = vmatpush3.bf16.msra.mxu0 %v18936_v4  ;;  %15802 = vmatprep.mubr.msk.f32.mxu0 %vm18222_vm0, %v18221_v0 }
0x28c7   :  { %17128 = vmatprep.subr.bf16.mxu0 %v18223_v18 }
0x28ca   :  { %17130 = vmatpush3.bf16.msra.mxu0 %v18943_v8 }
0x28cb   :  { %17131 = vmatprep.subr.bf16.mxu0 %v18223_v18 }
0x28ce   :  { %17133 = vmatpush3.bf16.msra.mxu0 %v18949_v22 }
0x28cf   :  { %17134 = vmatprep.subr.bf16.mxu0 %v18223_v18 }
0x28d2   :  { %17136 = vmatpush3.bf16.msra.mxu0 %v18956_v28 }
0x28d3   :  { %15810 = vmatprep.subr.mxu0 %v18221_v0 }
0x2935   :  { %v4846_v7 = vpop.permute.xlu0 %4845 }
0x2936   :  { %15758 = vmatpush3.msk.msra.mxu1 %vm439_vm3, %v4846_v7 }
0x2937   :  { %15760 = vmatmul.mubr.msk.f32.vlgmr.msra.gmra.mrb[50].mxu1 %vm435_vm4, %v18964_v33  ;;  %17113 = vmatprep.subr.bf16.mxu1 %v18223_v18  ;;  %v4993_v33 = vmul.f32 %v4846_v7, %v4843_v51  ;;  %v17141_v7 = vpack.c.bf16 %v14255_v41, %v14254_v40  ;;  %v14266_v40 = vld [vmem:[%s20122_s15 + $0x50] sm:$0xff]  ;;  %v14267_v41 = vld [vmem:[%s20122_s15 + $0x58] sm:$0xff] }
0x2938   :  { %17115 = vmatpush3.bf16.msra.mxu1 %v18936_v4  ;;  %15783 = vmatprep.mubr.msk.f32.mxu1 %vm18222_vm0, %v18221_v0 }
0x2939   :  { %17116 = vmatprep.subr.bf16.mxu1 %v18223_v18 }
0x293c   :  { %17118 = vmatpush3.bf16.msra.mxu1 %v18943_v8 }
0x293d   :  { %17119 = vmatprep.subr.bf16.mxu1 %v18223_v18 }
0x2940   :  { %17121 = vmatpush3.bf16.msra.mxu1 %v18949_v22 }
0x2941   :  { %17122 = vmatprep.subr.bf16.mxu1 %v18223_v18 }
0x2944   :  { %17124 = vmatpush3.bf16.msra.mxu1 %v18956_v28 }
0x2945   :  { %15805 = vmatprep.subr.mxu1 %v18221_v0 }
0x2947   :  { %15784 = vmatmul.mubr.msk.f32.vlgmr.msra.gmra.mrb[52].mxu1 %vm661_vm5, %v4993_v33  ;;  %v14257_v33 = vld [vmem:[%s20121_s17 + $0x68] sm:$0xff] }
0x2948   :  { %15806 = vmatpush3.msk.msra.mxu1 %vm439_vm3, %v18996_v59  ;;  %15807 = vmatprep.mubr.msk.f32.mxu1 %vm18222_vm0, %v18221_v0 }
0x2949   :  { %17137 = vmatprep.subr.bf16.mxu1 %v18223_v18 }
0x2998   :  { %v4988_v44 = vpop.f32.mrb[58].mxu0 }
0x2999   :  { %v15766_v53 = vpop.f32.mrb[59].mxu0 }
0x2a0a   :  { %v4915_v57 = vpop.f32.mrb[50].mxu1 }
0x2a0b   :  { %v5067_v62 = vmul.f32 %v4915_v57, %v4843_v51  ;;  %v15761_v63 = vpop.f32.mrb[51].mxu1  ;;  %v14256_v51 = vld [vmem:[%s20121_s17 + $0x60] sm:$0xff]  ;;  %v14258_v57 = vld [vmem:[%s20121_s17 + $0x70] sm:$0xff] }
0x2a0c   :  { %v17144_v53 = vpack.c.bf16 %v14257_v33, %v14256_v51  ;;  %v14268_v51 = vld [vmem:[%s20122_s15 + $0x60] sm:$0xff]  ;;  %v14269_v33 = vld [vmem:[%s20122_s15 + $0x68] sm:$0xff] }
0x2a0d   :  { %15803 = vmatmul.mubr.msk.f32.vlgmr.msra.gmra.mrb[60].mxu0 %vm661_vm5, %v5067_v62  ;;  %v14259_v62 = vld [vmem:[%s20121_s17 + $0x78] sm:$0xff] }
0x2a0e   :  { %15811 = vmatpush3.msk.msra.mxu0 %vm439_vm3, %v18996_v59  ;;  %15812 = vmatprep.mubr.msk.f32.mxu0 %vm18222_vm0, %v18221_v0  ;;  %v17147_v63 = vpack.c.bf16 %v14259_v62, %v14258_v57  ;;  %v14270_v57 = vld [vmem:[%s20122_s15 + $0x70] sm:$0xff]  ;;  %v14271_v62 = vld [vmem:[%s20122_s15 + $0x78] sm:$0xff] }
0x2a0f   :  { %17149 = vmatprep.subr.bf16.mxu0 %v18223_v18 }
0x2a1a   :  { %v5063_v1 = vpop.f32.mrb[52].mxu1 }
0x2a1b   :  { %v15785_v5 = vpop.f32.mrb[53].mxu1 }
0x2ae0   :  { %v5137_v60 = vpop.f32.mrb[60].mxu0 }
0x2ae1   :  { %v5141_v56 = vmax.f32 %v5063_v1, %v5137_v60  ;;  %v15804_v6 = vpop.f32.mrb[61].mxu0 }
0x2ae3   :  { %v5142_v10 = vsub.f32 %v5063_v1, %v5141_v56  ;;  %v5145_v14 = vsub.f32 %v5137_v60, %v5141_v56 }
0x2ae5   :  { %v5143_v16 = vmul.f32 1.442695, %v5142_v10  ;;  %v5146_v37 = vmul.f32 1.442695, %v5145_v14 }
0x2ae7   :  { %17712 = vpow2.f32 %v5143_v16 }
0x2ae8   :  { %17714 = vpow2.f32 %v5146_v37  ;;  %v14261_v37 = vld [vmem:[#allocation14 + $0x1] ss:$0 sm:$0xff] }
0x2af1   :  { %v17713_v59 = vpop.eup %17712 }
0x2af2   :  { %v17715_v50 = vpop.eup %17714 }
0x2af3   :  { %v5148_v20 = vadd.f32 %v17715_v50, %v17713_v59 }
0x2af5   :  { %17716 = vrcp.f32 %v5148_v20 }
0x2aff   :  { %v17717_v32 = vpop.eup %17716 }
0x2b00   :  { %v5150_v25 = vmul.f32 %v17717_v32, %v17713_v59  ;;  %v5224_v35 = vmul.f32 %v17717_v32, %v17715_v50 }
0x2b02   :  { %15808 = vmatmul.mubr.msk.f32.vlgmr.msra.gmra.mrb[54].mxu1 %vm435_vm4, %v5150_v25  ;;  %15813 = vmatmul.mubr.msk.f32.vlgmr.msra.gmra.mrb[62].mxu0 %vm435_vm4, %v5224_v35  ;;  %v14265_v25 = vld [vmem:[%s20122_s15 + $0x48] sm:$0xff] }
0x2b03   :  { %17139 = vmatpush3.bf16.msra.mxu1 %v17138_v52  ;;  %15831 = vmatprep.mubr.msk.f32.mxu1 %vm18222_vm0, %v18221_v0 }
0x2b04   :  { %17140 = vmatprep.subr.bf16.mxu1 %v18223_v18  ;;  %15850 = vmatprep.mubr.msk.f32.mxu0 %vm18222_vm0, %v18221_v0 }
0x2b07   :  { %17142 = vmatpush3.bf16.msra.mxu1 %v17141_v7  ;;  %v17153_v7 = vpack.c.bf16 %v14267_v41, %v14266_v40  ;;  %v14272_v41 = vld [vmem:[#allocation19 + $0x1] ss:$0 sm:$0xff] }
0x2b08   :  { %17143 = vmatprep.subr.bf16.mxu1 %v18223_v18 }
0x2b0b   :  { %17145 = vmatpush3.bf16.msra.mxu1 %v17144_v53  ;;  %v17156_v53 = vpack.c.bf16 %v14269_v33, %v14268_v51 }
0x2b0c   :  { %17146 = vmatprep.subr.bf16.mxu1 %v18223_v18 }
0x2b0f   :  { %17148 = vmatpush3.bf16.msra.mxu1 %v17147_v63  ;;  %v17159_v63 = vpack.c.bf16 %v14271_v62, %v14270_v57 }
0x2b10   :  { %17161 = vmatprep.subr.bf16.mxu1 %v18223_v18 }
0x2bd5   :  { %v5220_v1 = vpop.f32.mrb[54].mxu1  ;;  %v5294_v5 = vpop.f32.mrb[62].mxu0 }
0x2bd6   :  { %v5298_v60 = vmul.f32 %v5220_v1, %v19066_v43  ;;  %v5299_v56 = vmul.f32 %v5294_v5, %v4988_v44  ;;  %v15809_v6 = vpop.f32.mrb[55].mxu1  ;;  %v15814_v10 = vpop.f32.mrb[63].mxu0 }
0x2bd7   :  { %v14262_v6 = vld [vmem:[#allocation16 + $0x1] ss:$0 sm:$0xff] }
0x2bd8   :  { %v5300_v14 = vadd.f32 %v5299_v56, %v5298_v60 }
0x2bda   :  { %15832 = vmatmul.mubr.msk.f32.vlgmr.msra.gmra.mrb[56].mxu1 %vm661_vm5, %v5300_v14  ;;  %v14263_v14 = vld [vmem:[#allocation17 + $0x1] ss:$0 sm:$0xff] }
0x2bdb   :  { %15869 = vmatprep.mubr.msk.f32.mxu1 %vm18222_vm0, %v18221_v0 }
0x2cad   :  { %v5379_v16 = vpop.f32.mrb[56].mxu1 }
0x2cae   :  { %v5383_v59 = vadd.f32 %v5379_v16, %v19054_v58  ;;  %v15833_v50 = vpop.f32.mrb[57].mxu1  ;;  %v14264_v58 = vld [vmem:[%s20122_s15 + $0x40] sm:$0xff] }
0x2caf   :  { %v17150_v35 = vpack.c.bf16 %v14265_v25, %v14264_v58  ;;  %v5543_v50 = vld [vmem:[#allocation20 + $0x48] sm:$0xff]  ;;  %v5548_v25 = vld [vmem:[#allocation20 + $0x70] sm:$0xff] }
0x2cb0   :  { %v19133_v20 = vadd.f32 %v14261_v37, %v5383_v59  ;;  %v5542_v59 = vld [vmem:[#allocation20 + $0x40] sm:$0xff] }
0x2cb1   :  { %17151 = vmatpush3.bf16.msra.mxu0 %v17150_v35  ;;  %v5549_v35 = vld [vmem:[#allocation20 + $0x78] sm:$0xff] }
0x2cb2   :  { %v5397_v43 = vsel %vm892_vm6, %v19133_v20, 0.0  ;;  %17152 = vmatprep.subr.bf16.mxu0 %v18223_v18  ;;  %v17171_v40 = vpack.c.bf16 %v5549_v35, %v5548_v25 }
0x2cb3   :  { %5398 = vadd.xlane.f32.xlu1 %v5397_v43  ;;  %v17162_v43 = vpack.c.bf16 %v5543_v50, %v5542_v59 }
0x2cb5   :  { %17154 = vmatpush3.bf16.msra.mxu0 %v17153_v7  ;;  %17163 = vmatpush3.bf16.msra.mxu1 %v17162_v43 }
0x2cb6   :  { %17155 = vmatprep.subr.bf16.mxu0 %v18223_v18  ;;  %17164 = vmatprep.subr.bf16.mxu1 %v18223_v18 }
0x2cb9   :  { %17157 = vmatpush3.bf16.msra.mxu0 %v17156_v53 }
0x2cba   :  { %17158 = vmatprep.subr.bf16.mxu0 %v18223_v18 }
0x2cbd   :  { %17160 = vmatpush3.bf16.msra.mxu0 %v17159_v63 }
0x2cbe   :  { %15872 = vmatprep.subr.mxu0 %v18221_v0 }
0x2d40   :  { %v5399_v44 = vpop.xlane.xlu1 %5398 }
0x2d41   :  { %v5400_v26 = vmul.f32 0.015625, %v5399_v44  ;;  %v5544_v44 = vld [vmem:[#allocation20 + $0x50] sm:$0xff] }
0x2d43   :  { %v5401_v19 = vsub.f32 %v19133_v20, %v5400_v26  ;;  %v5545_v26 = vld [vmem:[#allocation20 + $0x58] sm:$0xff] }
0x2d45   :  { %v5402_v32 = vmul.f32 %v5401_v19, %v5401_v19 }
0x2d47   :  { %v5403_v52 = vsel %vm892_vm6, %v5402_v32, 0.0  ;;  %v17165_v32 = vpack.c.bf16 %v5545_v26, %v5544_v44 }
0x2d48   :  { %5404 = vadd.xlane.f32.xlu1 %v5403_v52  ;;  %v5547_v52 = vld [vmem:[#allocation20 + $0x68] sm:$0xff] }
0x2d49   :  { %17166 = vmatpush3.bf16.msra.mxu1 %v17165_v32 }
0x2d4a   :  { %17167 = vmatprep.subr.bf16.mxu1 %v18223_v18 }
0x2dd5   :  { %v5405_v1 = vpop.xlane.xlu1 %5404 }
0x2dd6   :  { %v5406_v5 = vmul.f32 0.015625, %v5405_v1 }
0x2dd8   :  { %v5407_v60 = vadd.f32 1e-05, %v5406_v5 }
0x2dda   :  { %17718 = vrsqrt.f32 %v5407_v60 }
0x2de4   :  { %v17719_v56 = vpop.eup %17718 }
0x2de5   :  { %v5409_v10 = vmul.f32 %v17719_v56, %v5401_v19  ;;  %v5546_v19 = vld [vmem:[#allocation20 + $0x60] sm:$0xff] }
0x2de6   :  { %v17168_v58 = vpack.c.bf16 %v5547_v52, %v5546_v19 }
0x2de7   :  { %v5416_v16 = vmul.f32 %v14262_v6, %v5409_v10 }
0x2de8   :  { %17169 = vmatpush3.bf16.msra.mxu1 %v17168_v58 }
0x2de9   :  { %v5423_v37 = vadd.f32 %v14263_v14, %v5416_v16  ;;  %17170 = vmatprep.subr.bf16.mxu1 %v18223_v18 }
0x2deb   :  { %15851 = vmatmul.mubr.msk.f32.vlgmr.msra.gmra.mrb[64].mxu0 %vm661_vm5, %v5423_v37 }
0x2dec   :  { %15874 = vmatprep.mubr.msk.f32.mxu0 %vm18222_vm0, %v18221_v0  ;;  %17172 = vmatpush3.bf16.msra.mxu1 %v17171_v40 }
0x2ded   :  { %17185 = vmatprep.subr.bf16.mxu1 %v18223_v18 }
0x2ebe   :  { %v5510_v7 = vpop.f32.mrb[64].mxu0 }
0x2ebf   :  { %v5511_v51 = vadd.f32 %v14272_v41, %v5510_v7  ;;  %v15852_v33 = vpop.f32.mrb[65].mxu0  ;;  %v14274_v41 = vld [vmem:[#allocation22 + $0x1] ss:$0 sm:$0xff] }
0x2ec1   :  { %v5515_v53 = vmul.f32 0.70710677, %v5511_v51  ;;  %v5514_v25 = vmul.f32 0.5, %v5511_v51 }
0x2ec3   :  { %v5516_v57 = vand.u32 2147483647, %v5515_v53  ;;  %vm5536_vm8 = vcmp.ge.f32.partialorder %v5515_v53, 0.0 }
0x2ec5   :  { %v5517_v62 = vmul.f32 0.3275911, %v5516_v57  ;;  %v5530_v1 = vsub.f32 0.0, %v5516_v57 }
0x2ec7   :  { %v5518_v63 = vadd.f32 1.0, %v5517_v62  ;;  %v5531_v60 = vmul.f32 %v5530_v1, %v5516_v57  ;;  %v17776_v57 = vld [vmem:[%s20112_s12] sm:$0xf] }
0x2ec8   :  { %v17777_v62 = vld [vmem:[%s20113_s23] sm:$0xf] }
0x2ec9   :  { %17720 = vrcp.f32 %v5518_v63  ;;  %v5532_v10 = vmul.f32 1.442695, %v5531_v60 }
0x2ecb   :  { %17722 = vpow2.f32 %v5532_v10 }
0x2ed3   :  { %v17721_v5 = vpop.eup %17720 }
0x2ed4   :  { %v5521_v56 = vmul.f32 1.0614054, %v17721_v5 }
0x2ed5   :  { %v17723_v26 = vpop.eup %17722 }
0x2ed6   :  { %v5522_v6 = vadd.f32 -1.4531521, %v5521_v56 }
0x2ed8   :  { %v5523_v14 = vmul.f32 %v17721_v5, %v5522_v6 }
0x2eda   :  { %v5524_v16 = vadd.f32 1.4214138, %v5523_v14 }
0x2edc   :  { %v5525_v37 = vmul.f32 %v17721_v5, %v5524_v16 }
0x2ede   :  { %v5526_v59 = vadd.f32 -0.28449672, %v5525_v37 }
0x2ee0   :  { %v5527_v50 = vmul.f32 %v17721_v5, %v5526_v59 }
0x2ee2   :  { %v5528_v43 = vadd.f32 0.2548296, %v5527_v50 }
0x2ee4   :  { %v5529_v44 = vmul.f32 %v17721_v5, %v5528_v43 }
0x2ee6   :  { %v5534_v32 = vmul.f32 %v17723_v26, %v5529_v44  ;;  %v19210_v44 = vld [vmem:[%s20116_s2] sm:$0xf] }
0x2ee8   :  { %v5535_v19 = vsub.f32 1.0, %v5534_v32 }
0x2eea   :  { %v5537_v52 = vsub.f32 0.0, %v5535_v19 }
0x2eec   :  { %v5538_v58 = vsel %vm5536_vm8, %v5535_v19, %v5537_v52 }
0x2eed   :  { %v5539_v35 = vadd.f32 1.0, %v5538_v58 }
0x2eef   :  { %v5540_v40 = vmul.f32 %v5539_v35, %v5514_v25 }
0x2ef1   :  { %15870 = vmatmul.mubr.msk.f32.vlgmr.msra.gmra.mrb[58].mxu1 %vm661_vm5, %v5540_v40 }
0x2ef2   :  { %17187 = vmatpush3.bf16.msra.mxu1 %v18520_v17  ;;  %15922 = vmatprep.mubr.msk.f32.mxu1 %vm18222_vm0, %v18221_v0 }
0x2ef3   :  { %17188 = vmatprep.subr.bf16.mxu1 %v18223_v18 }
0x2ef6   :  { %17190 = vmatpush3.bf16.msra.mxu1 %v18531_v24 }
0x2ef7   :  { %17191 = vmatprep.subr.bf16.mxu1 %v18223_v18 }
0x2efa   :  { %17193 = vmatpush3.bf16.msra.mxu1 %v18543_v30 }
0x2efb   :  { %17194 = vmatprep.subr.bf16.mxu1 %v18223_v18 }
0x2efe   :  { %17196 = vmatpush3.bf16.msra.mxu1 %v18554_v34 }
0x2eff   :  { %15930 = vmatprep.subr.mxu1 %v18221_v0 }
0x2fc4   :  { %v5627_v7 = vpop.f32.mrb[58].mxu1 }
0x2fc5   :  { %v5628_v51 = vadd.f32 %v14274_v41, %v5627_v7  ;;  %v15871_v33 = vpop.f32.mrb[59].mxu1 }
0x2fc7   :  { %v19170_v53 = vadd.f32 %v5628_v51, %v19133_v20  ;;  %v17778_v20 = vld [vmem:[%s20114_s9] sm:$0xf] }
0x2fc9   :  { %15873 = vmatpush3.msk.msra.mxu0 %vm439_vm3, %v19170_v53 }
0x2fca   :  { %15875 = vmatmul.mubr.msk.f32.vlgmr.msra.gmra.mrb[66].mxu0 %vm435_vm4, %v17776_v57  ;;  %15877 = vmatprep.subr.mxu0 %v18221_v0 }
0x2fcb   :  { %15878 = vmatpush3.msk.msra.mxu0 %vm439_vm3, %v19170_v53  ;;  %15879 = vmatprep.mubr.msk.f32.mxu0 %vm18222_vm0, %v18221_v0 }
0x2fcc   :  { %15882 = vmatprep.subr.mxu0 %v18221_v0 }
0x2fce   :  { %15880 = vmatmul.mubr.msk.f32.vlgmr.msra.gmra.mrb[68].mxu0 %vm435_vm4, %v17777_v62 }
0x2fcf   :  { %15883 = vmatpush3.msk.msra.mxu0 %vm439_vm3, %v19170_v53  ;;  %15884 = vmatprep.mubr.msk.f32.mxu0 %vm18222_vm0, %v18221_v0 }
0x2fd0   :  { %17173 = vmatprep.subr.bf16.mxu0 %v18223_v18 }
0x2fd2   :  { %15885 = vmatmul.mubr.msk.f32.vlgmr.msra.gmra.mrb[70].mxu0 %vm435_vm4, %v17778_v20 }
0x2fd3   :  { %17175 = vmatpush3.bf16.msra.mxu0 %v18511_v13  ;;  %15903 = vmatprep.mubr.msk.f32.mxu0 %vm18222_vm0, %v18221_v0 }
0x2fd4   :  { %17176 = vmatprep.subr.bf16.mxu0 %v18223_v18 }
0x2fd7   :  { %17178 = vmatpush3.bf16.msra.mxu0 %v18526_v21 }
0x2fd8   :  { %17179 = vmatprep.subr.bf16.mxu0 %v18223_v18 }
0x2fdb   :  { %17181 = vmatpush3.bf16.msra.mxu0 %v18539_v27 }
0x2fdc   :  { %17182 = vmatprep.subr.bf16.mxu0 %v18223_v18 }
0x2fdf   :  { %17184 = vmatpush3.bf16.msra.mxu0 %v18547_v31 }
0x2fe0   :  { %15925 = vmatprep.subr.mxu0 %v18221_v0 }
0x309d   :  { %v5701_v63 = vpop.f32.mrb[66].mxu0 }
0x309e   :  { %v15876_v1 = vpop.f32.mrb[67].mxu0  ;;  %15904 = vmatmul.mubr.msk.f32.vlgmr.msra.gmra.mrb[72].mxu0 %vm661_vm5, %v5701_v63 }
0x309f   :  { %15927 = vmatprep.mubr.msk.f32.mxu0 %vm18222_vm0, %v18221_v0 }
0x30a1   :  { %v5771_v5 = vpop.f32.mrb[68].mxu0 }
0x30a2   :  { %v15881_v60 = vpop.f32.mrb[69].mxu0 }
0x30a5   :  { %v5841_v56 = vpop.f32.mrb[70].mxu0 }
0x30a6   :  { %v15886_v6 = vpop.f32.mrb[71].mxu0  ;;  %15923 = vmatmul.mubr.msk.f32.vlgmr.msra.gmra.mrb[60].mxu1 %vm661_vm5, %v5841_v56 }
0x30a7   :  { %15932 = vmatprep.mubr.msk.f32.mxu1 %vm18222_vm0, %v18221_v0 }
0x3171   :  { %v5914_v10 = vpop.f32.mrb[72].mxu0 }
0x3172   :  { %v5915_v14 = vadd.f32 %v5914_v10, %v5771_v5  ;;  %v15905_v16 = vpop.f32.mrb[73].mxu0  ;;  %v17780_v5 = vld [vmem:[%s20112_s12 + $0x4] sm:$0xf] }
0x3179   :  { %v5987_v37 = vpop.f32.mrb[60].mxu1 }
0x317a   :  { %v5991_v59 = vadd.f32 %v5987_v37, %v5915_v14  ;;  %v15924_v50 = vpop.f32.mrb[61].mxu1 }
0x317c   :  { %v5992_v43 = vadd.f32 %v5991_v59, %v18565_v47 }
0x317e   :  { %15926 = vmatpush3.msk.msra.mxu0 %vm439_vm3, %v5992_v43 }
0x317f   :  { %15928 = vmatmul.mubr.msk.f32.vlgmr.msra.gmra.mrb[74].mxu0 %vm435_vm4, %v19210_v44  ;;  %15935 = vmatprep.subr.mxu0 %v18221_v0 }
0x3180   :  { %15937 = vmatprep.mubr.msk.f32.mxu0 %vm18222_vm0, %v18221_v0 }
0x3252   :  { %v6062_v26 = vpop.f32.mrb[74].mxu0 }
0x3253   :  { %v15929_v32 = vpop.f32.mrb[75].mxu0  ;;  %v6066_v19 = vsel %vm892_vm6, %v6062_v26, 0.0 }
0x3254   :  { %6067 = vadd.xlane.f32.xlu0 %v6066_v19 }
0x32e1   :  { %v6068_v52 = vpop.xlane.xlu0 %6067 }
0x32e2   :  { %v6069_v58 = vmul.f32 0.0078125, %v6068_v52 }
0x32e4   :  { %v6070_v47 = vsub.f32 %v5992_v43, %v6069_v58 }
0x32e6   :  { %v6071_v25 = vmul.f32 %v6070_v47, %v6070_v47 }
0x32e8   :  { %15931 = vmatpush3.msk.msra.mxu1 %vm439_vm3, %v6071_v25 }
0x32e9   :  { %15933 = vmatmul.mubr.msk.f32.vlgmr.msra.gmra.mrb[62].mxu1 %vm435_vm4, %v19210_v44  ;;  %15940 = vmatprep.subr.mxu1 %v18221_v0 }
0x32ea   :  { %15942 = vmatprep.mubr.msk.f32.mxu1 %vm18222_vm0, %v18221_v0 }
0x33bc   :  { %v6141_v35 = vpop.f32.mrb[62].mxu1 }
0x33bd   :  { %v15934_v40 = vpop.f32.mrb[63].mxu1  ;;  %v6145_v41 = vsel %vm892_vm6, %v6141_v35, 0.0 }
0x33be   :  { %6146 = vadd.xlane.f32.xlu1 %v6145_v41 }
0x344b   :  { %v6147_v7 = vpop.xlane.xlu1 %6146 }
0x344c   :  { %v6148_v51 = vmul.f32 0.0078125, %v6147_v7 }
0x344e   :  { %v6149_v33 = vadd.f32 1e-05, %v6148_v51 }
0x3450   :  { %17724 = vrsqrt.f32 %v6149_v33 }
0x345a   :  { %v17725_v57 = vpop.eup %17724 }
0x345b   :  { %v6151_v62 = vmul.f32 %v17725_v57, %v6070_v47 }
0x345d   :  { %v6152_v20 = vmul.f32 %v6151_v62, %v18589_v3  ;;  %v17781_v3 = vld [vmem:[%s20113_s23 + $0x4] sm:$0xf] }
0x345f   :  { %v6153_v63 = vadd.f32 %v6152_v20, %v18592_v11  ;;  %v17782_v11 = vld [vmem:[%s20114_s9 + $0x4] sm:$0xf] }
0x3461   :  { %v6154_v1 = vmax.f32 %v6153_v63, 0.0 }
0x3463   :  { %15936 = vmatpush3.msk.msra.mxu0 %vm439_vm3, %v6154_v1  ;;  %15941 = vmatpush3.msk.msra.mxu1 %vm439_vm3, %v6154_v1 }
0x3464   :  { %15938 = vmatmul.mubr.msk.f32.vlgmr.msra.gmra.mrb[76].mxu0 %vm435_vm4, %v17780_v5  ;;  %15945 = vmatprep.subr.mxu0 %v18221_v0 }
0x3465   :  { %15946 = vmatpush3.msk.msra.mxu0 %vm439_vm3, %v6154_v1  ;;  %15947 = vmatprep.mubr.msk.f32.mxu0 %vm18222_vm0, %v18221_v0 }
0x3466   :  { %17197 = vmatprep.subr.bf16.mxu1 %v18223_v18  ;;  %15943 = vmatmul.mubr.msk.f32.vlgmr.msra.gmra.mrb[64].mxu1 %vm435_vm4, %v17781_v3 }
0x3467   :  { %17199 = vmatpush3.bf16.msra.mxu1 %v18511_v13  ;;  %17209 = vmatprep.subr.bf16.mxu0 %v18223_v18 }
0x3468   :  { %15948 = vmatmul.mubr.msk.f32.vlgmr.msra.gmra.mrb[78].mxu0 %vm435_vm4, %v17782_v11  ;;  %17200 = vmatprep.subr.bf16.mxu1 %v18223_v18  ;;  %v17783_v11 = vld [vmem:[%s20112_s12 + $0x8] sm:$0xf] }
0x3469   :  { %17211 = vmatpush3.bf16.msra.mxu0 %v18520_v17  ;;  %15966 = vmatprep.mubr.msk.f32.mxu1 %vm18222_vm0, %v18221_v0 }
0x346a   :  { %17212 = vmatprep.subr.bf16.mxu0 %v18223_v18  ;;  %15985 = vmatprep.mubr.msk.f32.mxu0 %vm18222_vm0, %v18221_v0 }
0x346b   :  { %17202 = vmatpush3.bf16.msra.mxu1 %v18526_v21 }
0x346c   :  { %17203 = vmatprep.subr.bf16.mxu1 %v18223_v18 }
0x346d   :  { %17214 = vmatpush3.bf16.msra.mxu0 %v18531_v24 }
0x346e   :  { %17215 = vmatprep.subr.bf16.mxu0 %v18223_v18 }
0x346f   :  { %17205 = vmatpush3.bf16.msra.mxu1 %v18539_v27 }
0x3470   :  { %17206 = vmatprep.subr.bf16.mxu1 %v18223_v18 }
0x3471   :  { %17217 = vmatpush3.bf16.msra.mxu0 %v18543_v30 }
0x3472   :  { %17218 = vmatprep.subr.bf16.mxu0 %v18223_v18 }
0x3473   :  { %17208 = vmatpush3.bf16.msra.mxu1 %v18547_v31 }
0x3474   :  { %15988 = vmatprep.subr.mxu1 %v18221_v0 }
0x3475   :  { %17220 = vmatpush3.bf16.msra.mxu0 %v18554_v34 }
0x3476   :  { %15993 = vmatprep.subr.mxu0 %v18221_v0 }
0x3537   :  { %v6224_v60 = vpop.f32.mrb[76].mxu0 }
0x3538   :  { %v15939_v56 = vpop.f32.mrb[77].mxu0  ;;  %15967 = vmatmul.mubr.msk.f32.vlgmr.msra.gmra.mrb[66].mxu1 %vm661_vm5, %v6224_v60 }
0x3539   :  { %v6294_v6 = vpop.f32.mrb[64].mxu1  ;;  %15990 = vmatprep.mubr.msk.f32.mxu1 %vm18222_vm0, %v18221_v0 }
0x353a   :  { %v15944_v10 = vpop.f32.mrb[65].mxu1 }
0x353b   :  { %v6364_v14 = vpop.f32.mrb[78].mxu0 }
0x353c   :  { %v15949_v16 = vpop.f32.mrb[79].mxu0  ;;  %15986 = vmatmul.mubr.msk.f32.vlgmr.msra.gmra.mrb[80].mxu0 %vm661_vm5, %v6364_v14 }
0x353d   :  { %15995 = vmatprep.mubr.msk.f32.mxu0 %vm18222_vm0, %v18221_v0 }
0x360b   :  { %v6437_v37 = vpop.f32.mrb[66].mxu1 }
0x360c   :  { %v6438_v59 = vadd.f32 %v6437_v37, %v6294_v6  ;;  %v15968_v50 = vpop.f32.mrb[67].mxu1 }
0x360f   :  { %v6510_v43 = vpop.f32.mrb[80].mxu0 }
0x3610   :  { %v6514_v26 = vadd.f32 %v6510_v43, %v6438_v59  ;;  %v15987_v32 = vpop.f32.mrb[81].mxu0 }
0x3612   :  { %v6515_v19 = vadd.f32 %v6514_v26, %v18635_v38 }
0x3614   :  { %15989 = vmatpush3.msk.msra.mxu1 %vm439_vm3, %v6515_v19 }
0x3615   :  { %15991 = vmatmul.mubr.msk.f32.vlgmr.msra.gmra.mrb[68].mxu1 %vm435_vm4, %v19210_v44  ;;  %15998 = vmatprep.subr.mxu1 %v18221_v0 }
0x3616   :  { %16000 = vmatprep.mubr.msk.f32.mxu1 %vm18222_vm0, %v18221_v0 }
0x36e8   :  { %v6585_v52 = vpop.f32.mrb[68].mxu1 }
0x36e9   :  { %v15992_v58 = vpop.f32.mrb[69].mxu1  ;;  %v6589_v47 = vsel %vm892_vm6, %v6585_v52, 0.0 }
0x36ea   :  { %6590 = vadd.xlane.f32.xlu1 %v6589_v47 }
0x3777   :  { %v6591_v25 = vpop.xlane.xlu1 %6590 }
0x3778   :  { %v6592_v35 = vmul.f32 0.0078125, %v6591_v25 }
0x377a   :  { %v6593_v40 = vsub.f32 %v6515_v19, %v6592_v35 }
0x377c   :  { %v6594_v41 = vmul.f32 %v6593_v40, %v6593_v40 }
0x377e   :  { %15994 = vmatpush3.msk.msra.mxu0 %vm439_vm3, %v6594_v41 }
0x377f   :  { %15996 = vmatmul.mubr.msk.f32.vlgmr.msra.gmra.mrb[82].mxu0 %vm435_vm4, %v19210_v44  ;;  %16003 = vmatprep.subr.mxu0 %v18221_v0 }
0x3780   :  { %16005 = vmatprep.mubr.msk.f32.mxu0 %vm18222_vm0, %v18221_v0 }
0x3852   :  { %v6664_v38 = vpop.f32.mrb[82].mxu0 }
0x3853   :  { %v15997_v7 = vpop.f32.mrb[83].mxu0  ;;  %v6668_v51 = vsel %vm892_vm6, %v6664_v38, 0.0 }
0x3854   :  { %6669 = vadd.xlane.f32.xlu1 %v6668_v51 }
0x38e1   :  { %v6670_v33 = vpop.xlane.xlu1 %6669 }
0x38e2   :  { %v6671_v57 = vmul.f32 0.0078125, %v6670_v33 }
0x38e4   :  { %v6672_v62 = vadd.f32 1e-05, %v6671_v57 }
0x38e6   :  { %17726 = vrsqrt.f32 %v6672_v62 }
0x38f0   :  { %v17727_v20 = vpop.eup %17726 }
0x38f1   :  { %v6674_v63 = vmul.f32 %v17727_v20, %v6593_v40 }
0x38f3   :  { %v6675_v1 = vmul.f32 %v6674_v63, %v18654_v54  ;;  %v17784_v54 = vld [vmem:[%s20113_s23 + $0x8] sm:$0xf] }
0x38f5   :  { %v6676_v5 = vadd.f32 %v6675_v1, %v18657_v61  ;;  %v17785_v61 = vld [vmem:[%s20114_s9 + $0x8] sm:$0xf] }
0x38f7   :  { %v6677_v3 = vmax.f32 %v6676_v5, 0.0 }
0x38f9   :  { %15999 = vmatpush3.msk.msra.mxu1 %vm439_vm3, %v6677_v3  ;;  %16004 = vmatpush3.msk.msra.mxu0 %vm439_vm3, %v6677_v3 }
0x38fa   :  { %16001 = vmatmul.mubr.msk.f32.vlgmr.msra.gmra.mrb[70].mxu1 %vm435_vm4, %v17783_v11  ;;  %16008 = vmatprep.subr.mxu1 %v18221_v0 }
0x38fb   :  { %16009 = vmatpush3.msk.msra.mxu1 %vm439_vm3, %v6677_v3  ;;  %16010 = vmatprep.mubr.msk.f32.mxu1 %vm18222_vm0, %v18221_v0  ;;  %v17786_v3 = vld [vmem:[%s20112_s12 + $0xc] sm:$0xf] }
0x38fc   :  { %17221 = vmatprep.subr.bf16.mxu0 %v18223_v18  ;;  %16006 = vmatmul.mubr.msk.f32.vlgmr.msra.gmra.mrb[84].mxu0 %vm435_vm4, %v17784_v54 }
0x38fd   :  { %17223 = vmatpush3.bf16.msra.mxu0 %v18511_v13  ;;  %17233 = vmatprep.subr.bf16.mxu1 %v18223_v18 }
0x38fe   :  { %16011 = vmatmul.mubr.msk.f32.vlgmr.msra.gmra.mrb[72].mxu1 %vm435_vm4, %v17785_v61  ;;  %17224 = vmatprep.subr.bf16.mxu0 %v18223_v18 }
0x38ff   :  { %17235 = vmatpush3.bf16.msra.mxu1 %v18520_v17  ;;  %16029 = vmatprep.mubr.msk.f32.mxu0 %vm18222_vm0, %v18221_v0 }
0x3900   :  { %17236 = vmatprep.subr.bf16.mxu1 %v18223_v18  ;;  %16048 = vmatprep.mubr.msk.f32.mxu1 %vm18222_vm0, %v18221_v0 }
0x3901   :  { %17226 = vmatpush3.bf16.msra.mxu0 %v18526_v21 }
0x3902   :  { %17227 = vmatprep.subr.bf16.mxu0 %v18223_v18 }
0x3903   :  { %17238 = vmatpush3.bf16.msra.mxu1 %v18531_v24 }
0x3904   :  { %17239 = vmatprep.subr.bf16.mxu1 %v18223_v18 }
0x3905   :  { %17229 = vmatpush3.bf16.msra.mxu0 %v18539_v27 }
0x3906   :  { %17230 = vmatprep.subr.bf16.mxu0 %v18223_v18 }
0x3907   :  { %17241 = vmatpush3.bf16.msra.mxu1 %v18543_v30 }
0x3908   :  { %17242 = vmatprep.subr.bf16.mxu1 %v18223_v18 }
0x3909   :  { %17232 = vmatpush3.bf16.msra.mxu0 %v18547_v31 }
0x390a   :  { %16051 = vmatprep.subr.mxu0 %v18221_v0 }
0x390b   :  { %17244 = vmatpush3.bf16.msra.mxu1 %v18554_v34 }
0x390c   :  { %16056 = vmatprep.subr.mxu1 %v18221_v0 }
0x39cd   :  { %v6747_v60 = vpop.f32.mrb[70].mxu1 }
0x39ce   :  { %v16002_v56 = vpop.f32.mrb[71].mxu1  ;;  %16030 = vmatmul.mubr.msk.f32.vlgmr.msra.gmra.mrb[86].mxu0 %vm661_vm5, %v6747_v60 }
0x39cf   :  { %v6817_v6 = vpop.f32.mrb[84].mxu0  ;;  %16053 = vmatprep.mubr.msk.f32.mxu0 %vm18222_vm0, %v18221_v0 }
0x39d0   :  { %v16007_v10 = vpop.f32.mrb[85].mxu0 }
0x39d1   :  { %v6887_v14 = vpop.f32.mrb[72].mxu1 }
0x39d2   :  { %v16012_v16 = vpop.f32.mrb[73].mxu1  ;;  %16049 = vmatmul.mubr.msk.f32.vlgmr.msra.gmra.mrb[74].mxu1 %vm661_vm5, %v6887_v14 }
0x39d3   :  { %16058 = vmatprep.mubr.msk.f32.mxu1 %vm18222_vm0, %v18221_v0 }
0x3aa1   :  { %v6960_v37 = vpop.f32.mrb[86].mxu0 }
0x3aa2   :  { %v6961_v59 = vadd.f32 %v6960_v37, %v6817_v6  ;;  %v16031_v50 = vpop.f32.mrb[87].mxu0 }
0x3aa5   :  { %v7033_v43 = vpop.f32.mrb[74].mxu1 }
0x3aa6   :  { %v7037_v26 = vadd.f32 %v7033_v43, %v6961_v59  ;;  %v16050_v32 = vpop.f32.mrb[75].mxu1 }
0x3aa8   :  { %v7038_v19 = vadd.f32 %v7037_v26, %v18700_v23 }
0x3aaa   :  { %16052 = vmatpush3.msk.msra.mxu0 %vm439_vm3, %v7038_v19 }
0x3aab   :  { %16054 = vmatmul.mubr.msk.f32.vlgmr.msra.gmra.mrb[88].mxu0 %vm435_vm4, %v19210_v44  ;;  %16061 = vmatprep.subr.mxu0 %v18221_v0 }
0x3aac   :  { %16063 = vmatprep.mubr.msk.f32.mxu0 %vm18222_vm0, %v18221_v0 }
0x3b7e   :  { %v7108_v52 = vpop.f32.mrb[88].mxu0 }
0x3b7f   :  { %v16055_v58 = vpop.f32.mrb[89].mxu0  ;;  %v7112_v47 = vsel %vm892_vm6, %v7108_v52, 0.0 }
0x3b80   :  { %7113 = vadd.xlane.f32.xlu1 %v7112_v47 }
0x3c0d   :  { %v7114_v25 = vpop.xlane.xlu1 %7113 }
0x3c0e   :  { %v7115_v35 = vmul.f32 0.0078125, %v7114_v25 }
0x3c10   :  { %v7116_v40 = vsub.f32 %v7038_v19, %v7115_v35 }
0x3c12   :  { %v7117_v41 = vmul.f32 %v7116_v40, %v7116_v40 }
0x3c14   :  { %16057 = vmatpush3.msk.msra.mxu1 %vm439_vm3, %v7117_v41 }
0x3c15   :  { %16059 = vmatmul.mubr.msk.f32.vlgmr.msra.gmra.mrb[76].mxu1 %vm435_vm4, %v19210_v44  ;;  %16066 = vmatprep.subr.mxu1 %v18221_v0 }
0x3c16   :  { %16068 = vmatprep.mubr.msk.f32.mxu1 %vm18222_vm0, %v18221_v0 }
0x3ce8   :  { %v7187_v23 = vpop.f32.mrb[76].mxu1 }
0x3ce9   :  { %v16060_v38 = vpop.f32.mrb[77].mxu1  ;;  %v7191_v7 = vsel %vm892_vm6, %v7187_v23, 0.0 }
0x3cea   :  { %7192 = vadd.xlane.f32.xlu1 %v7191_v7 }
0x3d77   :  { %v7193_v51 = vpop.xlane.xlu1 %7192 }
0x3d78   :  { %v7194_v33 = vmul.f32 0.0078125, %v7193_v51 }
0x3d7a   :  { %v7195_v57 = vadd.f32 1e-05, %v7194_v33 }
0x3d7c   :  { %17728 = vrsqrt.f32 %v7195_v57 }
0x3d86   :  { %v17729_v62 = vpop.eup %17728 }
0x3d87   :  { %v7197_v20 = vmul.f32 %v17729_v62, %v7116_v40 }
0x3d89   :  { %v7198_v63 = vmul.f32 %v7197_v20, %v18721_v49  ;;  %v17787_v49 = vld [vmem:[%s20113_s23 + $0xc] sm:$0xf]  ;;  %v17789_v20 = vld [vmem:[%s20112_s12 + $0x10] sm:$0xf] }
0x3d8b   :  { %v7199_v1 = vadd.f32 %v7198_v63, %v18724_v55  ;;  %v17788_v55 = vld [vmem:[%s20114_s9 + $0xc] sm:$0xf] }
0x3d8d   :  { %v7200_v5 = vmax.f32 %v7199_v1, 0.0 }
0x3d8f   :  { %16062 = vmatpush3.msk.msra.mxu0 %vm439_vm3, %v7200_v5  ;;  %16067 = vmatpush3.msk.msra.mxu1 %vm439_vm3, %v7200_v5 }
0x3d90   :  { %16064 = vmatmul.mubr.msk.f32.vlgmr.msra.gmra.mrb[90].mxu0 %vm435_vm4, %v17786_v3  ;;  %16071 = vmatprep.subr.mxu0 %v18221_v0 }
0x3d91   :  { %16072 = vmatpush3.msk.msra.mxu0 %vm439_vm3, %v7200_v5  ;;  %16073 = vmatprep.mubr.msk.f32.mxu0 %vm18222_vm0, %v18221_v0 }
0x3d92   :  { %17245 = vmatprep.subr.bf16.mxu1 %v18223_v18  ;;  %16069 = vmatmul.mubr.msk.f32.vlgmr.msra.gmra.mrb[78].mxu1 %vm435_vm4, %v17787_v49 }
0x3d93   :  { %17247 = vmatpush3.bf16.msra.mxu1 %v18511_v13  ;;  %17257 = vmatprep.subr.bf16.mxu0 %v18223_v18 }
0x3d94   :  { %16074 = vmatmul.mubr.msk.f32.vlgmr.msra.gmra.mrb[92].mxu0 %vm435_vm4, %v17788_v55  ;;  %17248 = vmatprep.subr.bf16.mxu1 %v18223_v18 }
0x3d95   :  { %17259 = vmatpush3.bf16.msra.mxu0 %v18520_v17  ;;  %16092 = vmatprep.mubr.msk.f32.mxu1 %vm18222_vm0, %v18221_v0 }
0x3d96   :  { %17260 = vmatprep.subr.bf16.mxu0 %v18223_v18  ;;  %16111 = vmatprep.mubr.msk.f32.mxu0 %vm18222_vm0, %v18221_v0 }
0x3d97   :  { %17250 = vmatpush3.bf16.msra.mxu1 %v18526_v21 }
0x3d98   :  { %17251 = vmatprep.subr.bf16.mxu1 %v18223_v18 }
0x3d99   :  { %17262 = vmatpush3.bf16.msra.mxu0 %v18531_v24 }
0x3d9a   :  { %17263 = vmatprep.subr.bf16.mxu0 %v18223_v18 }
0x3d9b   :  { %17253 = vmatpush3.bf16.msra.mxu1 %v18539_v27 }
0x3d9c   :  { %17254 = vmatprep.subr.bf16.mxu1 %v18223_v18 }
0x3d9d   :  { %17265 = vmatpush3.bf16.msra.mxu0 %v18543_v30 }
0x3d9e   :  { %17266 = vmatprep.subr.bf16.mxu0 %v18223_v18 }
0x3d9f   :  { %17256 = vmatpush3.bf16.msra.mxu1 %v18547_v31 }
0x3da0   :  { %16114 = vmatprep.subr.mxu1 %v18221_v0 }
0x3da1   :  { %17268 = vmatpush3.bf16.msra.mxu0 %v18554_v34 }
0x3da2   :  { %16119 = vmatprep.subr.mxu0 %v18221_v0 }
0x3e63   :  { %v7270_v11 = vpop.f32.mrb[90].mxu0 }
0x3e64   :  { %v16065_v54 = vpop.f32.mrb[91].mxu0  ;;  %16093 = vmatmul.mubr.msk.f32.vlgmr.msra.gmra.mrb[80].mxu1 %vm661_vm5, %v7270_v11 }
0x3e65   :  { %v7340_v61 = vpop.f32.mrb[78].mxu1  ;;  %16116 = vmatprep.mubr.msk.f32.mxu1 %vm18222_vm0, %v18221_v0 }
0x3e66   :  { %v16070_v60 = vpop.f32.mrb[79].mxu1 }
0x3e67   :  { %v7410_v56 = vpop.f32.mrb[92].mxu0 }
0x3e68   :  { %v16075_v6 = vpop.f32.mrb[93].mxu0  ;;  %16112 = vmatmul.mubr.msk.f32.vlgmr.msra.gmra.mrb[94].mxu0 %vm661_vm5, %v7410_v56 }
0x3e69   :  { %16121 = vmatprep.mubr.msk.f32.mxu0 %vm18222_vm0, %v18221_v0 }
0x3f37   :  { %v7483_v10 = vpop.f32.mrb[80].mxu1 }
0x3f38   :  { %v7484_v14 = vadd.f32 %v7483_v10, %v7340_v61  ;;  %v16094_v16 = vpop.f32.mrb[81].mxu1 }
0x3f3b   :  { %v7556_v37 = vpop.f32.mrb[94].mxu0 }
0x3f3c   :  { %v7560_v59 = vadd.f32 %v7556_v37, %v7484_v14  ;;  %v16113_v50 = vpop.f32.mrb[95].mxu0 }
0x3f3e   :  { %v7561_v43 = vadd.f32 %v7560_v59, %v18767_v15 }
0x3f40   :  { %16115 = vmatpush3.msk.msra.mxu1 %vm439_vm3, %v7561_v43 }
0x3f41   :  { %16117 = vmatmul.mubr.msk.f32.vlgmr.msra.gmra.mrb[82].mxu1 %vm435_vm4, %v19210_v44  ;;  %16124 = vmatprep.subr.mxu1 %v18221_v0 }
0x3f42   :  { %16126 = vmatprep.mubr.msk.f32.mxu1 %vm18222_vm0, %v18221_v0 }
0x4014   :  { %v7631_v26 = vpop.f32.mrb[82].mxu1 }
0x4015   :  { %v16118_v32 = vpop.f32.mrb[83].mxu1  ;;  %v7635_v19 = vsel %vm892_vm6, %v7631_v26, 0.0 }
0x4016   :  { %7636 = vadd.xlane.f32.xlu1 %v7635_v19 }
0x40a3   :  { %v7637_v52 = vpop.xlane.xlu1 %7636 }
0x40a4   :  { %v7638_v58 = vmul.f32 0.0078125, %v7637_v52 }
0x40a6   :  { %v7639_v47 = vsub.f32 %v7561_v43, %v7638_v58 }
0x40a8   :  { %v7640_v25 = vmul.f32 %v7639_v47, %v7639_v47 }
0x40aa   :  { %16120 = vmatpush3.msk.msra.mxu0 %vm439_vm3, %v7640_v25 }
0x40ab   :  { %16122 = vmatmul.mubr.msk.f32.vlgmr.msra.gmra.mrb[96].mxu0 %vm435_vm4, %v19210_v44  ;;  %16129 = vmatprep.subr.mxu0 %v18221_v0 }
0x40ac   :  { %16131 = vmatprep.mubr.msk.f32.mxu0 %vm18222_vm0, %v18221_v0 }
0x417e   :  { %v7710_v15 = vpop.f32.mrb[96].mxu0 }
0x417f   :  { %v16123_v35 = vpop.f32.mrb[97].mxu0  ;;  %v7714_v40 = vsel %vm892_vm6, %v7710_v15, 0.0 }
0x4180   :  { %7715 = vadd.xlane.f32.xlu1 %v7714_v40 }
0x420d   :  { %v7716_v41 = vpop.xlane.xlu1 %7715 }
0x420e   :  { %v7717_v23 = vmul.f32 0.0078125, %v7716_v41 }
0x4210   :  { %v7718_v38 = vadd.f32 1e-05, %v7717_v23  ;;  %v17792_v23 = vld [vmem:[%s20112_s12 + $0x14] sm:$0xf] }
0x4212   :  { %17730 = vrsqrt.f32 %v7718_v38 }
0x421c   :  { %v17731_v7 = vpop.eup %17730 }
0x421d   :  { %v7720_v51 = vmul.f32 %v17731_v7, %v7639_v47 }
0x421f   :  { %v7721_v33 = vmul.f32 %v7720_v51, %v18786_v39  ;;  %v17790_v39 = vld [vmem:[%s20113_s23 + $0x10] sm:$0xf] }
0x4221   :  { %v7722_v57 = vadd.f32 %v7721_v33, %v18789_v46  ;;  %v17791_v46 = vld [vmem:[%s20114_s9 + $0x10] sm:$0xf] }
0x4223   :  { %v7723_v62 = vmax.f32 %v7722_v57, 0.0 }
0x4225   :  { %16125 = vmatpush3.msk.msra.mxu1 %vm439_vm3, %v7723_v62  ;;  %16130 = vmatpush3.msk.msra.mxu0 %vm439_vm3, %v7723_v62 }
0x4226   :  { %16127 = vmatmul.mubr.msk.f32.vlgmr.msra.gmra.mrb[84].mxu1 %vm435_vm4, %v17789_v20  ;;  %16134 = vmatprep.subr.mxu1 %v18221_v0 }
0x4227   :  { %16135 = vmatpush3.msk.msra.mxu1 %vm439_vm3, %v7723_v62  ;;  %16136 = vmatprep.mubr.msk.f32.mxu1 %vm18222_vm0, %v18221_v0 }
0x4228   :  { %17269 = vmatprep.subr.bf16.mxu0 %v18223_v18  ;;  %16132 = vmatmul.mubr.msk.f32.vlgmr.msra.gmra.mrb[98].mxu0 %vm435_vm4, %v17790_v39 }
0x4229   :  { %17271 = vmatpush3.bf16.msra.mxu0 %v18511_v13  ;;  %17281 = vmatprep.subr.bf16.mxu1 %v18223_v18 }
0x422a   :  { %16137 = vmatmul.mubr.msk.f32.vlgmr.msra.gmra.mrb[86].mxu1 %vm435_vm4, %v17791_v46  ;;  %17272 = vmatprep.subr.bf16.mxu0 %v18223_v18 }
0x422b   :  { %17283 = vmatpush3.bf16.msra.mxu1 %v18520_v17  ;;  %16155 = vmatprep.mubr.msk.f32.mxu0 %vm18222_vm0, %v18221_v0 }
0x422c   :  { %17284 = vmatprep.subr.bf16.mxu1 %v18223_v18  ;;  %16174 = vmatprep.mubr.msk.f32.mxu1 %vm18222_vm0, %v18221_v0 }
0x422d   :  { %17274 = vmatpush3.bf16.msra.mxu0 %v18526_v21 }
0x422e   :  { %17275 = vmatprep.subr.bf16.mxu0 %v18223_v18 }
0x422f   :  { %17286 = vmatpush3.bf16.msra.mxu1 %v18531_v24 }
0x4230   :  { %17287 = vmatprep.subr.bf16.mxu1 %v18223_v18 }
0x4231   :  { %17277 = vmatpush3.bf16.msra.mxu0 %v18539_v27 }
0x4232   :  { %17278 = vmatprep.subr.bf16.mxu0 %v18223_v18 }
0x4233   :  { %17289 = vmatpush3.bf16.msra.mxu1 %v18543_v30 }
0x4234   :  { %17290 = vmatprep.subr.bf16.mxu1 %v18223_v18 }
0x4235   :  { %17280 = vmatpush3.bf16.msra.mxu0 %v18547_v31 }
0x4236   :  { %16177 = vmatprep.subr.mxu0 %v18221_v0 }
0x4237   :  { %17292 = vmatpush3.bf16.msra.mxu1 %v18554_v34 }
0x4238   :  { %16182 = vmatprep.subr.mxu1 %v18221_v0 }
0x42f9   :  { %v7793_v63 = vpop.f32.mrb[84].mxu1 }
0x42fa   :  { %v16128_v1 = vpop.f32.mrb[85].mxu1  ;;  %16156 = vmatmul.mubr.msk.f32.vlgmr.msra.gmra.mrb[100].mxu0 %vm661_vm5, %v7793_v63 }
0x42fb   :  { %v7863_v5 = vpop.f32.mrb[98].mxu0  ;;  %16179 = vmatprep.mubr.msk.f32.mxu0 %vm18222_vm0, %v18221_v0 }
0x42fc   :  { %v16133_v3 = vpop.f32.mrb[99].mxu0 }
0x42fd   :  { %v7933_v49 = vpop.f32.mrb[86].mxu1 }
0x42fe   :  { %v16138_v55 = vpop.f32.mrb[87].mxu1  ;;  %16175 = vmatmul.mubr.msk.f32.vlgmr.msra.gmra.mrb[88].mxu1 %vm661_vm5, %v7933_v49 }
0x42ff   :  { %16184 = vmatprep.mubr.msk.f32.mxu1 %vm18222_vm0, %v18221_v0 }
0x43cd   :  { %v8006_v11 = vpop.f32.mrb[100].mxu0 }
0x43ce   :  { %v8007_v54 = vadd.f32 %v8006_v11, %v7863_v5  ;;  %v16157_v61 = vpop.f32.mrb[101].mxu0 }
0x43d1   :  { %v8079_v60 = vpop.f32.mrb[88].mxu1 }
0x43d2   :  { %v8083_v56 = vadd.f32 %v8079_v60, %v8007_v54  ;;  %v16176_v6 = vpop.f32.mrb[89].mxu1 }
0x43d4   :  { %v8084_v10 = vadd.f32 %v8083_v56, %v18832_v9 }
0x43d6   :  { %16178 = vmatpush3.msk.msra.mxu0 %vm439_vm3, %v8084_v10 }
0x43d7   :  { %16180 = vmatmul.mubr.msk.f32.vlgmr.msra.gmra.mrb[102].mxu0 %vm435_vm4, %v19210_v44  ;;  %16187 = vmatprep.subr.mxu0 %v18221_v0 }
0x43d8   :  { %16189 = vmatprep.mubr.msk.f32.mxu0 %vm18222_vm0, %v18221_v0 }
0x44aa   :  { %v8154_v14 = vpop.f32.mrb[102].mxu0 }
0x44ab   :  { %v16181_v16 = vpop.f32.mrb[103].mxu0  ;;  %v8158_v37 = vsel %vm892_vm6, %v8154_v14, 0.0 }
0x44ac   :  { %8159 = vadd.xlane.f32.xlu1 %v8158_v37 }
0x4539   :  { %v8160_v59 = vpop.xlane.xlu1 %8159 }
0x453a   :  { %v8161_v50 = vmul.f32 0.0078125, %v8160_v59 }
0x453c   :  { %v8162_v43 = vsub.f32 %v8084_v10, %v8161_v50 }
0x453e   :  { %v8163_v26 = vmul.f32 %v8162_v43, %v8162_v43 }
0x4540   :  { %16183 = vmatpush3.msk.msra.mxu1 %vm439_vm3, %v8163_v26 }
0x4541   :  { %16185 = vmatmul.mubr.msk.f32.vlgmr.msra.gmra.mrb[90].mxu1 %vm435_vm4, %v19210_v44  ;;  %16192 = vmatprep.subr.mxu1 %v18221_v0 }
0x4542   :  { %16194 = vmatprep.mubr.msk.f32.mxu1 %vm18222_vm0, %v18221_v0 }
0x4614   :  { %v8233_v9 = vpop.f32.mrb[90].mxu1 }
0x4615   :  { %v16186_v32 = vpop.f32.mrb[91].mxu1  ;;  %v8237_v19 = vsel %vm892_vm6, %v8233_v9, 0.0 }
0x4616   :  { %8238 = vadd.xlane.f32.xlu0 %v8237_v19 }
0x46a3   :  { %v8239_v52 = vpop.xlane.xlu0 %8238 }
0x46a4   :  { %v8240_v58 = vmul.f32 0.0078125, %v8239_v52 }
0x46a6   :  { %v8241_v47 = vadd.f32 1e-05, %v8240_v58 }
0x46a8   :  { %17732 = vrsqrt.f32 %v8241_v47 }
0x46b2   :  { %v17733_v25 = vpop.eup %17732 }
0x46b3   :  { %v8243_v15 = vmul.f32 %v17733_v25, %v8162_v43  ;;  %v8803_v25 = vld [vmem:[#allocation11 + $0x108] sm:$0xff] }
0x46b5   :  { %v8244_v35 = vmul.f32 %v8243_v15, %v18853_v42  ;;  %v17793_v42 = vld [vmem:[%s20113_s23 + $0x14] sm:$0xf]  ;;  %v8805_v15 = vld [vmem:[#allocation11 + $0x118] sm:$0xff] }
0x46b7   :  { %v8245_v40 = vadd.f32 %v8244_v35, %v18856_v48  ;;  %v17794_v48 = vld [vmem:[%s20114_s9 + $0x14] sm:$0xf] }
0x46b8   :  { %v8802_v35 = vld [vmem:[#allocation11 + $0x100] sm:$0xff] }
0x46b9   :  { %v8246_v41 = vmax.f32 %v8245_v40, 0.0 }
0x46bb   :  { %16188 = vmatpush3.msk.msra.mxu0 %vm439_vm3, %v8246_v41  ;;  %16193 = vmatpush3.msk.msra.mxu1 %vm439_vm3, %v8246_v41 }
0x46bc   :  { %16190 = vmatmul.mubr.msk.f32.vlgmr.msra.gmra.mrb[104].mxu0 %vm435_vm4, %v17792_v23  ;;  %16197 = vmatprep.subr.mxu0 %v18221_v0 }
0x46bd   :  { %16198 = vmatpush3.msk.msra.mxu0 %vm439_vm3, %v8246_v41  ;;  %16199 = vmatprep.mubr.msk.f32.mxu0 %vm18222_vm0, %v18221_v0  ;;  %v8809_v41 = vld [vmem:[#allocation11 + $0x138] sm:$0xff] }
0x46be   :  { %17293 = vmatprep.subr.bf16.mxu1 %v18223_v18  ;;  %16195 = vmatmul.mubr.msk.f32.vlgmr.msra.gmra.mrb[92].mxu1 %vm435_vm4, %v17793_v42  ;;  %v8806_v42 = vld [vmem:[#allocation11 + $0x120] sm:$0xff] }
0x46bf   :  { %17295 = vmatpush3.bf16.msra.mxu1 %v18511_v13  ;;  %17305 = vmatprep.subr.bf16.mxu0 %v18223_v18 }
0x46c0   :  { %16200 = vmatmul.mubr.msk.f32.vlgmr.msra.gmra.mrb[106].mxu0 %vm435_vm4, %v17794_v48  ;;  %17296 = vmatprep.subr.bf16.mxu1 %v18223_v18  ;;  %v8808_v48 = vld [vmem:[#allocation11 + $0x130] sm:$0xff] }
0x46c1   :  { %17307 = vmatpush3.bf16.msra.mxu0 %v18520_v17  ;;  %16218 = vmatprep.mubr.msk.f32.mxu1 %vm18222_vm0, %v18221_v0 }
0x46c2   :  { %17308 = vmatprep.subr.bf16.mxu0 %v18223_v18  ;;  %16237 = vmatprep.mubr.msk.f32.mxu0 %vm18222_vm0, %v18221_v0 }
0x46c3   :  { %17298 = vmatpush3.bf16.msra.mxu1 %v18526_v21 }
0x46c4   :  { %17299 = vmatprep.subr.bf16.mxu1 %v18223_v18 }
0x46c5   :  { %17310 = vmatpush3.bf16.msra.mxu0 %v18531_v24 }
0x46c6   :  { %17311 = vmatprep.subr.bf16.mxu0 %v18223_v18 }
0x46c7   :  { %17301 = vmatpush3.bf16.msra.mxu1 %v18539_v27 }
0x46c8   :  { %17302 = vmatprep.subr.bf16.mxu1 %v18223_v18 }
0x46c9   :  { %17313 = vmatpush3.bf16.msra.mxu0 %v18543_v30 }
0x46ca   :  { %17314 = vmatprep.subr.bf16.mxu0 %v18223_v18 }
0x46cb   :  { %17304 = vmatpush3.bf16.msra.mxu1 %v18547_v31 }
0x46cc   :  { %16240 = vmatprep.subr.mxu1 %v18221_v0 }
0x46cd   :  { %17316 = vmatpush3.bf16.msra.mxu0 %v18554_v34 }
0x46ce   :  { %16245 = vmatprep.subr.mxu0 %v18221_v0 }
0x478f   :  { %v8316_v38 = vpop.f32.mrb[104].mxu0 }
0x4790   :  { %v16191_v7 = vpop.f32.mrb[105].mxu0  ;;  %16219 = vmatmul.mubr.msk.f32.vlgmr.msra.gmra.mrb[94].mxu1 %vm661_vm5, %v8316_v38  ;;  %v17323_v38 = vpack.c.bf16 %v8808_v48, %v8806_v42  ;;  %v14364_v42 = vld [vmem:[%s20121_s17 + $0x98] sm:$0xff] }
0x4791   :  { %v8386_v51 = vpop.f32.mrb[92].mxu1  ;;  %16242 = vmatprep.mubr.msk.f32.mxu1 %vm18222_vm0, %v18221_v0  ;;  %v8811_v7 = vld [vmem:[#allocation11 + $0x148] sm:$0xff] }
0x4792   :  { %v16196_v33 = vpop.f32.mrb[93].mxu1 }
0x4793   :  { %v8456_v57 = vpop.f32.mrb[106].mxu0 }
0x4794   :  { %v16201_v62 = vpop.f32.mrb[107].mxu0  ;;  %16238 = vmatmul.mubr.msk.f32.vlgmr.msra.gmra.mrb[108].mxu0 %vm661_vm5, %v8456_v57  ;;  %v8810_v57 = vld [vmem:[#allocation11 + $0x140] sm:$0xff] }
0x4795   :  { %16247 = vmatprep.mubr.msk.f32.mxu0 %vm18222_vm0, %v18221_v0  ;;  %v8812_v62 = vld [vmem:[#allocation11 + $0x150] sm:$0xff] }
0x4863   :  { %v8529_v20 = vpop.f32.mrb[94].mxu1 }
0x4864   :  { %v8530_v39 = vadd.f32 %v8529_v20, %v8386_v51  ;;  %v16220_v46 = vpop.f32.mrb[95].mxu1  ;;  %v8813_v51 = vld [vmem:[#allocation11 + $0x158] sm:$0xff]  ;;  %v17327_v20 = vpack.c.bf16 %v8812_v62, %v8810_v57 }
0x4865   :  { %v17325_v33 = vpack.c.bf16 %v8813_v51, %v8811_v7  ;;  %v8817_v46 = vld [vmem:[#allocation11 + $0x178] sm:$0xff] }
0x4867   :  { %v8602_v63 = vpop.f32.mrb[108].mxu0 }
0x4868   :  { %v8606_v1 = vadd.f32 %v8602_v63, %v8530_v39  ;;  %v16239_v5 = vpop.f32.mrb[109].mxu0  ;;  %v8815_v39 = vld [vmem:[#allocation11 + $0x168] sm:$0xff]  ;;  %v8814_v63 = vld [vmem:[#allocation11 + $0x160] sm:$0xff] }
0x4869   :  { %v8816_v5 = vld [vmem:[#allocation11 + $0x170] sm:$0xff] }
0x486a   :  { %v8607_v3 = vadd.f32 %v8606_v1, %v18899_v12  ;;  %v17329_v1 = vpack.c.bf16 %v8817_v46, %v8815_v39 }
0x486c   :  { %16241 = vmatpush3.msk.msra.mxu1 %vm439_vm3, %v8607_v3 }
0x486d   :  { %16243 = vmatmul.mubr.msk.f32.vlgmr.msra.gmra.mrb[96].mxu1 %vm435_vm4, %v19210_v44 }
0x486e   :  { %8898 = vmatprep.mubr.f32.mxu1 %v18221_v0 }
0x4940   :  { %v8677_v49 = vpop.f32.mrb[96].mxu1 }
0x4941   :  { %v16244_v55 = vpop.f32.mrb[97].mxu1  ;;  %v8681_v11 = vsel %vm892_vm6, %v8677_v49, 0.0 }
0x4942   :  { %8682 = vadd.xlane.f32.xlu1 %v8681_v11 }
0x49cf   :  { %v8683_v54 = vpop.xlane.xlu1 %8682 }
0x49d0   :  { %v8684_v61 = vmul.f32 0.0078125, %v8683_v54 }
0x49d2   :  { %v8685_v60 = vsub.f32 %v8607_v3, %v8684_v61  ;;  %v17331_v3 = vpack.c.bf16 %v8816_v5, %v8814_v63  ;;  %v14348_v61 = vld [vmem:[#allocation8 + $0x2] ss:$0 sm:$0xff] }
0x49d4   :  { %v8686_v56 = vmul.f32 %v8685_v60, %v8685_v60 }
0x49d6   :  { %16246 = vmatpush3.msk.msra.mxu0 %vm439_vm3, %v8686_v56  ;;  %v14349_v56 = vld [vmem:[#allocation10 + $0x2] ss:$0 sm:$0xff] }
0x49d7   :  { %16248 = vmatmul.mubr.msk.f32.vlgmr.msra.gmra.mrb[110].mxu0 %vm435_vm4, %v19210_v44  ;;  %16250 = vmatprep.subr.mxu0 %v18221_v0 }
0x49d8   :  { %16252 = vmatprep.mubr.msk.f32.mxu0 %vm18222_vm0, %v18221_v0 }
0x4aaa   :  { %v8756_v12 = vpop.f32.mrb[110].mxu0 }
0x4aab   :  { %v16249_v6 = vpop.f32.mrb[111].mxu0  ;;  %v8760_v10 = vsel %vm892_vm6, %v8756_v12, 0.0 }
0x4aac   :  { %8761 = vadd.xlane.f32.xlu0 %v8760_v10  ;;  %v8819_v10 = vld [vmem:[#allocation13 + $0x4] sm:$0x3] }
0x4b39   :  { %v8762_v14 = vpop.xlane.xlu0 %8761 }
0x4b3a   :  { %v8763_v16 = vmul.f32 0.0078125, %v8762_v14  ;;  %v8824_v14 = vrot.slane %v8819_v10, %v18934_v2 }
0x4b3c   :  { %v8764_v37 = vadd.f32 1e-05, %v8763_v16 }
0x4b3e   :  { %17734 = vrsqrt.f32 %v8764_v37 }
0x4b48   :  { %v17735_v59 = vpop.eup %17734 }
0x4b49   :  { %v8766_v50 = vmul.f32 %v17735_v59, %v8685_v60 }
0x4b4b   :  { %v8767_v43 = vmul.f32 %v8766_v50, %v18915_v36  ;;  %v17317_v36 = vpack.c.bf16 %v8805_v15, %v8803_v25  ;;  %v8828_v50 = vrot.slane %v8819_v10, %v18960_v29 }
0x4b4d   :  { %v8768_v44 = vadd.f32 %v8767_v43, %v18918_v45  ;;  %v8804_v45 = vld [vmem:[#allocation11 + $0x110] sm:$0xff]  ;;  %17318 = vmatprep.subr.bf16.mxu1 %v17317_v36 }
0x4b4e   :  { %v17319_v40 = vpack.c.bf16 %v8804_v45, %v8802_v35 }
0x4b4f   :  { %v19511_v26 = vadd.f32 %v8768_v44, %v19170_v53  ;;  %v8807_v53 = vld [vmem:[#allocation11 + $0x128] sm:$0xff] }
0x4b50   :  { %17320 = vmatpush1.bf16.msra.mxu1 %v17319_v40  ;;  %v17321_v23 = vpack.c.bf16 %v8809_v41, %v8807_v53  ;;  %v14361_v40 = vld [vmem:[%s20121_s17 + $0x80] sm:$0xff]  ;;  %v14362_v53 = vld [vmem:[%s20121_s17 + $0x88] sm:$0xff]  ;;  %v14363_v41 = vld [vmem:[%s20121_s17 + $0x90] sm:$0xff] }
0x4b51   :  { %v8774_v9 = vsel %vm892_vm6, %v19511_v26, 0.0  ;;  %v17361_v48 = vpack.c.bf16 %v14364_v42, %v14363_v41  ;;  %v14377_v41 = vld [vmem:[%s20122_s15 + $0xa0] sm:$0xff] }
0x4b52   :  { %8775 = vadd.xlane.f32.xlu1 %v8774_v9  ;;  %17322 = vmatprep.subr.bf16.mxu1 %v17321_v23  ;;  %v17795_v9 = vld [vmem:[%s20120_s11] sm:$0xf]  ;;  %v17358_v23 = vpack.c.bf16 %v14362_v53, %v14361_v40  ;;  %v14376_v40 = vld [vmem:[%s20122_s15 + $0x98] sm:$0xff] }
0x4b54   :  { %17324 = vmatpush1.bf16.msra.mxu1 %v17323_v38 }
0x4b55   :  { %17326 = vmatprep.subr.bf16.mxu1 %v17325_v33 }
0x4b58   :  { %17328 = vmatpush1.bf16.msra.mxu1 %v17327_v20 }
0x4b59   :  { %17330 = vmatprep.subr.bf16.mxu1 %v17329_v1 }
0x4b5c   :  { %17332 = vmatpush1.bf16.msra.mxu1 %v17331_v3 }
0x4b5d   :  { %17345 = vmatprep.subr.bf16.mxu1 %v18223_v18 }
0x4bdf   :  { %v8776_v32 = vpop.xlane.xlu1 %8775 }
0x4be0   :  { %v8777_v19 = vmul.f32 0.015625, %v8776_v32 }
0x4be2   :  { %v8778_v52 = vsub.f32 %v19511_v26, %v8777_v19 }
0x4be4   :  { %v8779_v58 = vmul.f32 %v8778_v52, %v8778_v52 }
0x4be6   :  { %v8780_v47 = vsel %vm892_vm6, %v8779_v58, 0.0 }
0x4be7   :  { %8781 = vadd.xlane.f32.xlu0 %v8780_v47 }
0x4c74   :  { %v8782_v49 = vpop.xlane.xlu0 %8781 }
0x4c75   :  { %v8783_v55 = vmul.f32 0.015625, %v8782_v49  ;;  %v14365_v49 = vld [vmem:[%s20121_s17 + $0xa0] sm:$0xff] }
0x4c77   :  { %v8784_v11 = vadd.f32 1e-05, %v8783_v55  ;;  %v14366_v55 = vld [vmem:[%s20121_s17 + $0xa8] sm:$0xff] }
0x4c79   :  { %17736 = vrsqrt.f32 %v8784_v11  ;;  %v17364_v11 = vpack.c.bf16 %v14366_v55, %v14365_v49  ;;  %v9606_v55 = vld [vmem:[#allocation20 + $0x90] sm:$0xff] }
0x4c83   :  { %v17737_v54 = vpop.eup %17736 }
0x4c84   :  { %v8786_v60 = vmul.f32 %v17737_v54, %v8778_v52  ;;  %v17796_v52 = vld [vmem:[%s18365_s24] sm:$0xf]  ;;  %v14367_v54 = vld [vmem:[%s20121_s17 + $0xb0] sm:$0xff] }
0x4c86   :  { %v8793_v12 = vmul.f32 %v14348_v61, %v8786_v60  ;;  %v14368_v61 = vld [vmem:[%s20121_s17 + $0xb8] sm:$0xff] }
0x4c87   :  { %v17367_v60 = vpack.c.bf16 %v14368_v61, %v14367_v54  ;;  %v9608_v61 = vld [vmem:[#allocation20 + $0xa0] sm:$0xff] }
0x4c88   :  { %v8800_v6 = vadd.f32 %v14349_v56, %v8793_v12 }
0x4c8a   :  { %14350 = vmatmul.mubr.msk.f32.vlgmr.msra.gmra.mrb[98].mxu1 %vm661_vm5, %v8800_v6 }
0x4c8b   :  { %17347 = vmatpush3.bf16.msra.mxu1 %v18936_v4  ;;  %16295 = vmatprep.mubr.msk.f32.mxu1 %vm18222_vm0, %v18221_v0 }
0x4c8c   :  { %17348 = vmatprep.subr.bf16.mxu1 %v18223_v18 }
0x4c8f   :  { %17350 = vmatpush3.bf16.msra.mxu1 %v18943_v8 }
0x4c90   :  { %17351 = vmatprep.subr.bf16.mxu1 %v18223_v18 }
0x4c93   :  { %17353 = vmatpush3.bf16.msra.mxu1 %v18949_v22 }
0x4c94   :  { %17354 = vmatprep.subr.bf16.mxu1 %v18223_v18 }
0x4c97   :  { %17356 = vmatpush3.bf16.msra.mxu1 %v18956_v28 }
0x4c98   :  { %17357 = vmatprep.subr.bf16.mxu1 %v18223_v18 }
0x4d5d   :  { %v8900_v16 = vpop.f32.mrb[98].mxu1 }
0x4d5e   :  { %v8901_v37 = vadd.f32 %v8900_v16, %v8824_v14  ;;  %v8902_v59 = vpop.f32.mrb[99].mxu1 }
0x4d5f   :  { %v19532_v44 = vadd.f32 %v8902_v59, %v8828_v50  ;;  %v14370_v50 = vld [vmem:[#allocation14 + $0x2] ss:$0 sm:$0xff] }
0x4d60   :  { %8907 = vrot.lane.b32.xlu1 %v8901_v37, %s18225_s21  ;;  %v8905_v32 = vmul.f32 0.25, %v8901_v37 }
0x4dd2   :  { %v8908_v43 = vpop.permute.xlu1 %8907 }
0x4dd3   :  { %16251 = vmatpush3.msk.msra.mxu0 %vm439_vm3, %v8908_v43  ;;  %v9055_v19 = vmul.f32 %v8908_v43, %v8905_v32 }
0x4dd4   :  { %16253 = vmatmul.mubr.msk.f32.vlgmr.msra.gmra.mrb[112].mxu0 %vm435_vm4, %v17795_v9  ;;  %16255 = vmatprep.subr.mxu0 %v18221_v0 }
0x4dd5   :  { %16256 = vmatpush3.msk.msra.mxu0 %vm439_vm3, %v19532_v44  ;;  %16257 = vmatprep.mubr.msk.f32.mxu0 %vm18222_vm0, %v18221_v0 }
0x4dd6   :  { %17333 = vmatprep.subr.bf16.mxu0 %v18223_v18 }
0x4dd8   :  { %16258 = vmatmul.mubr.msk.f32.vlgmr.msra.gmra.mrb[114].mxu0 %vm435_vm4, %v17795_v9 }
0x4dd9   :  { %17335 = vmatpush3.bf16.msra.mxu0 %v18936_v4  ;;  %16276 = vmatprep.mubr.msk.f32.mxu0 %vm18222_vm0, %v18221_v0 }
0x4dda   :  { %17336 = vmatprep.subr.bf16.mxu0 %v18223_v18 }
0x4ddd   :  { %17338 = vmatpush3.bf16.msra.mxu0 %v18943_v8 }
0x4dde   :  { %17339 = vmatprep.subr.bf16.mxu0 %v18223_v18 }
0x4de1   :  { %17341 = vmatpush3.bf16.msra.mxu0 %v18949_v22 }
0x4de2   :  { %17342 = vmatprep.subr.bf16.mxu0 %v18223_v18 }
0x4de5   :  { %17344 = vmatpush3.bf16.msra.mxu0 %v18956_v28 }
0x4de6   :  { %16298 = vmatprep.subr.mxu0 %v18221_v0 }
0x4de8   :  { %16277 = vmatmul.mubr.msk.f32.vlgmr.msra.gmra.mrb[116].mxu0 %vm661_vm5, %v9055_v19 }
0x4de9   :  { %16299 = vmatpush3.msk.msra.mxu0 %vm439_vm3, %v17796_v52  ;;  %16300 = vmatprep.mubr.msk.f32.mxu0 %vm18222_vm0, %v18221_v0 }
0x4dea   :  { %16303 = vmatprep.subr.mxu0 %v18221_v0 }
0x4ea7   :  { %v8977_v58 = vpop.f32.mrb[112].mxu0 }
0x4ea8   :  { %v9129_v47 = vmul.f32 %v8977_v58, %v8905_v32  ;;  %v16254_v25 = vpop.f32.mrb[113].mxu0 }
0x4eaa   :  { %16296 = vmatmul.mubr.msk.f32.vlgmr.msra.gmra.mrb[100].mxu1 %vm661_vm5, %v9129_v47 }
0x4eab   :  { %v9050_v15 = vpop.f32.mrb[114].mxu0  ;;  %16324 = vmatprep.mubr.msk.f32.mxu1 %vm18222_vm0, %v18221_v0  ;;  %17359 = vmatpush3.bf16.msra.mxu1 %v17358_v23  ;;  %v14378_v23 = vld [vmem:[%s20122_s15 + $0xa8] sm:$0xff] }
0x4eac   :  { %v16259_v36 = vpop.f32.mrb[115].mxu0  ;;  %17360 = vmatprep.subr.bf16.mxu1 %v18223_v18  ;;  %v17376_v42 = vpack.c.bf16 %v14378_v23, %v14377_v41 }
0x4eaf   :  { %17362 = vmatpush3.bf16.msra.mxu1 %v17361_v48  ;;  %v14379_v48 = vld [vmem:[%s20122_s15 + $0xb0] sm:$0xff] }
0x4eb0   :  { %17363 = vmatprep.subr.bf16.mxu1 %v18223_v18 }
0x4eb3   :  { %17365 = vmatpush3.bf16.msra.mxu1 %v17364_v11  ;;  %v9607_v11 = vld [vmem:[#allocation20 + $0x98] sm:$0xff] }
0x4eb4   :  { %17366 = vmatprep.subr.bf16.mxu1 %v18223_v18  ;;  %v17385_v54 = vpack.c.bf16 %v9607_v11, %v9606_v55 }
0x4eb7   :  { %17368 = vmatpush3.bf16.msra.mxu1 %v17367_v60  ;;  %v9609_v60 = vld [vmem:[#allocation20 + $0xa8] sm:$0xff] }
0x4eb8   :  { %17381 = vmatprep.subr.bf16.mxu1 %v18223_v18 }
0x4ebb   :  { %v9125_v35 = vpop.f32.mrb[116].mxu0 }
0x4ebc   :  { %v16278_v45 = vpop.f32.mrb[117].mxu0 }
0x4ebd   :  { %v14375_v45 = vld [vmem:[%s20122_s15 + $0x90] sm:$0xff] }
0x4ebe   :  { %v17373_v53 = vpack.c.bf16 %v14376_v40, %v14375_v45 }
0x4f7d   :  { %v9199_v38 = vpop.f32.mrb[100].mxu1 }
0x4f7e   :  { %v9203_v7 = vmax.f32 %v9125_v35, %v9199_v38  ;;  %v16297_v51 = vpop.f32.mrb[101].mxu1 }
0x4f80   :  { %v9204_v33 = vsub.f32 %v9125_v35, %v9203_v7  ;;  %v9207_v57 = vsub.f32 %v9199_v38, %v9203_v7  ;;  %v14396_v35 = vld [vmem:[%s20115_s1 + $0x18] sm:$0xf] }
0x4f81   :  { %v14380_v38 = vld [vmem:[%s20122_s15 + $0xb8] sm:$0xff] }
0x4f82   :  { %v9205_v62 = vmul.f32 1.442695, %v9204_v33  ;;  %v9208_v20 = vmul.f32 1.442695, %v9207_v57  ;;  %v17379_v7 = vpack.c.bf16 %v14380_v38, %v14379_v48 }
0x4f84   :  { %17738 = vpow2.f32 %v9205_v62 }
0x4f85   :  { %17740 = vpow2.f32 %v9208_v20  ;;  %v14371_v20 = vld [vmem:[#allocation16 + $0x2] ss:$0 sm:$0xff] }
0x4f8e   :  { %v17739_v39 = vpop.eup %17738 }
0x4f8f   :  { %v17741_v46 = vpop.eup %17740 }
0x4f90   :  { %v9210_v63 = vadd.f32 %v17741_v46, %v17739_v39 }
0x4f92   :  { %17742 = vrcp.f32 %v9210_v63 }
0x4f9c   :  { %v17743_v1 = vpop.eup %17742 }
0x4f9d   :  { %v9212_v5 = vmul.f32 %v17743_v1, %v17739_v39  ;;  %v9286_v3 = vmul.f32 %v17743_v1, %v17741_v46  ;;  %v14372_v46 = vld [vmem:[#allocation17 + $0x2] ss:$0 sm:$0xff] }
0x4f9f   :  { %16301 = vmatmul.mubr.msk.f32.vlgmr.msra.gmra.mrb[118].mxu0 %vm435_vm4, %v9212_v5  ;;  %v9604_v5 = vld [vmem:[#allocation20 + $0x80] sm:$0xff] }
0x4fa0   :  { %16304 = vmatpush3.msk.msra.mxu0 %vm439_vm3, %v17796_v52  ;;  %16305 = vmatprep.mubr.msk.f32.mxu0 %vm18222_vm0, %v18221_v0 }
0x4fa1   :  { %17369 = vmatprep.subr.bf16.mxu0 %v18223_v18 }
0x4fa3   :  { %16306 = vmatmul.mubr.msk.f32.vlgmr.msra.gmra.mrb[120].mxu0 %vm435_vm4, %v9286_v3  ;;  %v9605_v3 = vld [vmem:[#allocation20 + $0x88] sm:$0xff] }
0x4fa4   :  { %16343 = vmatprep.mubr.msk.f32.mxu0 %vm18222_vm0, %v18221_v0  ;;  %v17382_v49 = vpack.c.bf16 %v9605_v3, %v9604_v5  ;;  %v14388_v5 = vld [vmem:[%s20113_s23 + $0x18] sm:$0xf] }
0x5072   :  { %v9282_v56 = vpop.f32.mrb[118].mxu0 }
0x5073   :  { %v16302_v12 = vpop.f32.mrb[119].mxu0  ;;  %v9360_v10 = vmul.f32 %v9282_v56, %v19532_v44  ;;  %v17388_v56 = vpack.c.bf16 %v9609_v60, %v9608_v61 }
0x5074   :  { %v9610_v12 = vld [vmem:[#allocation20 + $0xb0] sm:$0xff] }
0x5076   :  { %v9356_v6 = vpop.f32.mrb[120].mxu0 }
0x5077   :  { %v9361_v14 = vmul.f32 %v9356_v6, %v9050_v15  ;;  %v16307_v16 = vpop.f32.mrb[121].mxu0  ;;  %v14374_v15 = vld [vmem:[%s20122_s15 + $0x88] sm:$0xff]  ;;  %v9611_v6 = vld [vmem:[#allocation20 + $0xb8] sm:$0xff] }
0x5079   :  { %v9362_v37 = vadd.f32 %v9361_v14, %v9360_v10  ;;  %v17391_v10 = vpack.c.bf16 %v9611_v6, %v9610_v12  ;;  %v14381_v14 = vld [vmem:[#allocation19 + $0x2] ss:$0 sm:$0xff] }
0x507b   :  { %16325 = vmatmul.mubr.msk.f32.vlgmr.msra.gmra.mrb[102].mxu1 %vm661_vm5, %v9362_v37 }
0x507c   :  { %16362 = vmatprep.mubr.msk.f32.mxu1 %vm18222_vm0, %v18221_v0  ;;  %17383 = vmatpush3.bf16.msra.mxu1 %v17382_v49 }
0x507d   :  { %17384 = vmatprep.subr.bf16.mxu1 %v18223_v18 }
0x5080   :  { %17386 = vmatpush3.bf16.msra.mxu1 %v17385_v54 }
0x5081   :  { %17387 = vmatprep.subr.bf16.mxu1 %v18223_v18 }
0x5084   :  { %17389 = vmatpush3.bf16.msra.mxu1 %v17388_v56 }
0x5085   :  { %17390 = vmatprep.subr.bf16.mxu1 %v18223_v18 }
0x5088   :  { %17392 = vmatpush3.bf16.msra.mxu1 %v17391_v10 }
0x5089   :  { %17405 = vmatprep.subr.bf16.mxu1 %v18223_v18 }
0x514e   :  { %v9441_v59 = vpop.f32.mrb[102].mxu1 }
0x514f   :  { %v9445_v43 = vadd.f32 %v9441_v59, %v19511_v26  ;;  %v16326_v9 = vpop.f32.mrb[103].mxu1  ;;  %v14373_v26 = vld [vmem:[%s20122_s15 + $0x80] sm:$0xff] }
0x5150   :  { %v17370_v36 = vpack.c.bf16 %v14374_v15, %v14373_v26 }
0x5151   :  { %v19588_v32 = vadd.f32 %v14370_v50, %v9445_v43 }
0x5152   :  { %17371 = vmatpush3.bf16.msra.mxu0 %v17370_v36 }
0x5153   :  { %v9459_v44 = vsel %vm892_vm6, %v19588_v32, 0.0  ;;  %17372 = vmatprep.subr.bf16.mxu0 %v18223_v18 }
0x5154   :  { %9460 = vadd.xlane.f32.xlu0 %v9459_v44 }
0x5156   :  { %17374 = vmatpush3.bf16.msra.mxu0 %v17373_v53 }
0x5157   :  { %17375 = vmatprep.subr.bf16.mxu0 %v18223_v18 }
0x515a   :  { %17377 = vmatpush3.bf16.msra.mxu0 %v17376_v42 }
0x515b   :  { %17378 = vmatprep.subr.bf16.mxu0 %v18223_v18 }
0x515e   :  { %17380 = vmatpush3.bf16.msra.mxu0 %v17379_v7 }
0x515f   :  { %16365 = vmatprep.subr.mxu0 %v18221_v0 }
0x51e1   :  { %v9461_v19 = vpop.xlane.xlu0 %9460 }
0x51e2   :  { %v9462_v52 = vmul.f32 0.015625, %v9461_v19 }
0x51e4   :  { %v9463_v58 = vsub.f32 %v19588_v32, %v9462_v52 }
0x51e6   :  { %v9464_v47 = vmul.f32 %v9463_v58, %v9463_v58 }
0x51e8   :  { %v9465_v25 = vsel %vm892_vm6, %v9464_v47, 0.0 }
0x51e9   :  { %9466 = vadd.xlane.f32.xlu0 %v9465_v25 }
0x51ff   :  { %10073 = vperm.xlu0 %17682, %v14396_v35  }
0x5276   :  { %v9467_v51 = vpop.xlane.xlu0 %9466 }
0x5277   :  { %v9468_v33 = vmul.f32 0.015625, %v9467_v51 }
0x5279   :  { %v9469_v57 = vadd.f32 1e-05, %v9468_v33 }
0x527b   :  { %17744 = vrsqrt.f32 %v9469_v57 }
0x5285   :  { %v17745_v62 = vpop.eup %17744 }
0x5286   :  { %v9471_v39 = vmul.f32 %v17745_v62, %v9463_v58  ;;  %v14383_v62 = vld [vmem:[#allocation22 + $0x2] ss:$0 sm:$0xff] }
0x5288   :  { %v9478_v63 = vmul.f32 %v14371_v20, %v9471_v39 }
0x528a   :  { %v9485_v1 = vadd.f32 %v14372_v46, %v9478_v63 }
0x528c   :  { %16344 = vmatmul.mubr.msk.f32.vlgmr.msra.gmra.mrb[122].mxu0 %vm661_vm5, %v9485_v1  ;;  %v14385_v1 = vld [vmem:[%s20112_s12 + $0x18] sm:$0xf] }
0x528d   :  { %16367 = vmatprep.mubr.msk.f32.mxu0 %vm18222_vm0, %v18221_v0 }
0x535f   :  { %v9572_v16 = vpop.f32.mrb[122].mxu0 }
0x5360   :  { %v9573_v37 = vadd.f32 %v14381_v14, %v9572_v16  ;;  %v16345_v59 = vpop.f32.mrb[123].mxu0  ;;  %v10074_v16 = vpop.permute.xlu0 %10073 }
0x5361   :  { %v19665_v59 = vld [vmem:[%s20116_s2] sm:$0xf] }
0x5362   :  { %v9577_v50 = vmul.f32 0.70710677, %v9573_v37  ;;  %v9576_v51 = vmul.f32 0.5, %v9573_v37 }
0x5364   :  { %v9578_v43 = vand.u32 2147483647, %v9577_v50  ;;  %vm9598_vm9 = vcmp.ge.f32.partialorder %v9577_v50, 0.0 }
0x5366   :  { %v9579_v9 = vmul.f32 0.3275911, %v9578_v43  ;;  %v9592_v19 = vsub.f32 0.0, %v9578_v43 }
0x5368   :  { %v9580_v44 = vadd.f32 1.0, %v9579_v9  ;;  %v9593_v58 = vmul.f32 %v9592_v19, %v9578_v43  ;;  %v14414_v19 = vld [vmem:[%s20115_s1 + $0x1c] sm:$0xf] }
0x536a   :  { %17746 = vrcp.f32 %v9580_v44  ;;  %v9594_v26 = vmul.f32 1.442695, %v9593_v58  ;;  %v14401_v44 = vld [vmem:[%s20117_s19 + $0x18] sm:$0xf] }
0x536c   :  { %17748 = vpow2.f32 %v9594_v26 }
0x5374   :  { %v17747_v52 = vpop.eup %17746 }
0x5375   :  { %v9583_v47 = vmul.f32 1.0614054, %v17747_v52 }
0x5376   :  { %v17749_v23 = vpop.eup %17748 }
0x5377   :  { %v9584_v25 = vadd.f32 -1.4531521, %v9583_v47 }
0x5379   :  { %v9585_v15 = vmul.f32 %v17747_v52, %v9584_v25 }
0x537b   :  { %v9586_v36 = vadd.f32 1.4214138, %v9585_v15 }
0x537d   :  { %v9587_v35 = vmul.f32 %v17747_v52, %v9586_v36 }
0x537f   :  { %v9588_v45 = vadd.f32 -0.28449672, %v9587_v35  ;;  %v14402_v35 = vld [vmem:[%s20118_s7 + $0x18] sm:$0xf] }
0x5381   :  { %v9589_v40 = vmul.f32 %v17747_v52, %v9588_v45 }
0x5383   :  { %v9590_v53 = vadd.f32 0.2548296, %v9589_v40 }
0x5385   :  { %v9591_v41 = vmul.f32 %v17747_v52, %v9590_v53 }
0x5387   :  { %v9596_v42 = vmul.f32 %v17749_v23, %v9591_v41 }
0x5389   :  { %v9597_v48 = vsub.f32 1.0, %v9596_v42 }
0x538b   :  { %v9599_v38 = vsub.f32 0.0, %v9597_v48 }
0x538d   :  { %v9600_v7 = vsel %vm9598_vm9, %v9597_v48, %v9599_v38 }
0x538e   :  { %v9601_v33 = vadd.f32 1.0, %v9600_v7 }
0x5390   :  { %v9602_v57 = vmul.f32 %v9601_v33, %v9576_v51  ;;  %v14403_v33 = vld [vmem:[%s20112_s12 + $0x1c] sm:$0xf] }
0x5392   :  { %16363 = vmatmul.mubr.msk.f32.vlgmr.msra.gmra.mrb[104].mxu1 %vm661_vm5, %v9602_v57  ;;  %v14406_v57 = vld [vmem:[%s20113_s23 + $0x1c] sm:$0xf] }
0x5393   :  { %17407 = vmatpush3.bf16.msra.mxu1 %v18520_v17  ;;  %16415 = vmatprep.mubr.msk.f32.mxu1 %vm18222_vm0, %v18221_v0 }
0x5394   :  { %17408 = vmatprep.subr.bf16.mxu1 %v18223_v18 }
0x5397   :  { %17410 = vmatpush3.bf16.msra.mxu1 %v18531_v24 }
0x5398   :  { %17411 = vmatprep.subr.bf16.mxu1 %v18223_v18 }
0x539b   :  { %17413 = vmatpush3.bf16.msra.mxu1 %v18543_v30 }
0x539c   :  { %17414 = vmatprep.subr.bf16.mxu1 %v18223_v18 }
0x539f   :  { %17416 = vmatpush3.bf16.msra.mxu1 %v18554_v34 }
0x53a0   :  { %16423 = vmatprep.subr.mxu1 %v18221_v0 }
0x5465   :  { %v9689_v20 = vpop.f32.mrb[104].mxu1 }
0x5466   :  { %v9690_v39 = vadd.f32 %v14383_v62, %v9689_v20  ;;  %v16364_v46 = vpop.f32.mrb[105].mxu1  ;;  %v14409_v62 = vld [vmem:[%s20114_s9 + $0x1c] sm:$0xf] }
0x5468   :  { %v19626_v63 = vadd.f32 %v9690_v39, %v19588_v32  ;;  %v14391_v32 = vld [vmem:[%s20114_s9 + $0x18] sm:$0xf] }
0x546a   :  { %16366 = vmatpush3.msk.msra.mxu0 %vm439_vm3, %v19626_v63 }
0x546b   :  { %16368 = vmatmul.mubr.msk.f32.vlgmr.msra.gmra.mrb[124].mxu0 %vm435_vm4, %v14385_v1  ;;  %16370 = vmatprep.subr.mxu0 %v18221_v0 }
0x546c   :  { %16371 = vmatpush3.msk.msra.mxu0 %vm439_vm3, %v19626_v63  ;;  %16372 = vmatprep.mubr.msk.f32.mxu0 %vm18222_vm0, %v18221_v0 }
0x546d   :  { %16375 = vmatprep.subr.mxu0 %v18221_v0 }
0x546f   :  { %16373 = vmatmul.mubr.msk.f32.vlgmr.msra.gmra.mrb[126].mxu0 %vm435_vm4, %v14388_v5 }
0x5470   :  { %16376 = vmatpush3.msk.msra.mxu0 %vm439_vm3, %v19626_v63  ;;  %16377 = vmatprep.mubr.msk.f32.mxu0 %vm18222_vm0, %v18221_v0 }
0x5471   :  { %17393 = vmatprep.subr.bf16.mxu0 %v18223_v18 }
0x5473   :  { %16378 = vmatmul.mubr.msk.f32.vlgmr.msra.gmra.mrb[128].mxu0 %vm435_vm4, %v14391_v32 }
0x5474   :  { %17395 = vmatpush3.bf16.msra.mxu0 %v18511_v13  ;;  %16396 = vmatprep.mubr.msk.f32.mxu0 %vm18222_vm0, %v18221_v0 }
0x5475   :  { %17396 = vmatprep.subr.bf16.mxu0 %v18223_v18 }
0x5478   :  { %17398 = vmatpush3.bf16.msra.mxu0 %v18526_v21 }
0x5479   :  { %17399 = vmatprep.subr.bf16.mxu0 %v18223_v18 }
0x547c   :  { %17401 = vmatpush3.bf16.msra.mxu0 %v18539_v27 }
0x547d   :  { %17402 = vmatprep.subr.bf16.mxu0 %v18223_v18 }
0x5480   :  { %17404 = vmatpush3.bf16.msra.mxu0 %v18547_v31 }
0x5481   :  { %16418 = vmatprep.subr.mxu0 %v18221_v0 }
0x553e   :  { %v9768_v3 = vpop.f32.mrb[124].mxu0 }
0x553f   :  { %v16369_v49 = vpop.f32.mrb[125].mxu0  ;;  %16397 = vmatmul.mubr.msk.f32.vlgmr.msra.gmra.mrb[130].mxu0 %vm661_vm5, %v9768_v3 }
0x5540   :  { %16420 = vmatprep.mubr.msk.f32.mxu0 %vm18222_vm0, %v18221_v0 }
0x5542   :  { %v9843_v55 = vpop.f32.mrb[126].mxu0 }
0x5543   :  { %v16374_v11 = vpop.f32.mrb[127].mxu0 }
0x5546   :  { %v9918_v54 = vpop.f32.mrb[128].mxu0 }
0x5547   :  { %v16379_v61 = vpop.f32.mrb[129].mxu0  ;;  %16416 = vmatmul.mubr.msk.f32.vlgmr.msra.gmra.mrb[106].mxu1 %vm661_vm5, %v9918_v54 }
0x5548   :  { %16425 = vmatprep.mubr.msk.f32.mxu1 %vm18222_vm0, %v18221_v0 }
0x5612   :  { %v9991_v60 = vpop.f32.mrb[130].mxu0 }
0x5613   :  { %v9992_v56 = vadd.f32 %v9991_v60, %v9843_v55  ;;  %v16398_v12 = vpop.f32.mrb[131].mxu0 }
0x561a   :  { %v10064_v6 = vpop.f32.mrb[106].mxu1 }
0x561b   :  { %v10068_v10 = vadd.f32 %v10064_v6, %v9992_v56  ;;  %v16417_v14 = vpop.f32.mrb[107].mxu1 }
0x561c   :  { %v14419_v14 = vld [vmem:[%s20117_s19 + $0x1c] sm:$0xf] }
0x561d   :  { %v10076_v37 = vadd.f32 %v10074_v16, %v10068_v10  ;;  %v14432_v16 = vld [vmem:[%s20115_s1 + $0x20] sm:$0xf] }
0x561f   :  { %16419 = vmatpush3.msk.msra.mxu0 %vm439_vm3, %v10076_v37 }
0x5620   :  { %16421 = vmatmul.mubr.msk.f32.vlgmr.msra.gmra.mrb[132].mxu0 %vm435_vm4, %v19665_v59  ;;  %16428 = vmatprep.subr.mxu0 %v18221_v0 }
0x5621   :  { %16430 = vmatprep.mubr.msk.f32.mxu0 %vm18222_vm0, %v18221_v0 }
0x56f3   :  { %v10146_v50 = vpop.f32.mrb[132].mxu0 }
0x56f4   :  { %v16422_v43 = vpop.f32.mrb[133].mxu0  ;;  %v10150_v9 = vsel %vm892_vm6, %v10146_v50, 0.0 }
0x56f5   :  { %10151 = vadd.xlane.f32.xlu1 %v10150_v9 }
0x5706   :  { %10240 = vperm.xlu1 %17683, %v14401_v44  }
0x570a   :  { %10632 = vperm.xlu1 %17683, %v14414_v19  }
0x5782   :  { %v10152_v52 = vpop.xlane.xlu1 %10151 }
0x5783   :  { %v10153_v58 = vmul.f32 0.0078125, %v10152_v52 }
0x5785   :  { %v10154_v47 = vsub.f32 %v10076_v37, %v10153_v58  ;;  %v14420_v58 = vld [vmem:[%s20118_s7 + $0x1c] sm:$0xf] }
0x5786   :  { %v10241_v42 = vpop.permute.xlu1 %10240 }
0x5787   :  { %v10155_v25 = vmul.f32 %v10154_v47, %v10154_v47 }
0x5789   :  { %16424 = vmatpush3.msk.msra.mxu1 %vm439_vm3, %v10155_v25 }
0x578a   :  { %16426 = vmatmul.mubr.msk.f32.vlgmr.msra.gmra.mrb[108].mxu1 %vm435_vm4, %v19665_v59  ;;  %16433 = vmatprep.subr.mxu1 %v18221_v0  ;;  %v10633_v60 = vpop.permute.xlu1 %10632 }
0x578b   :  { %16435 = vmatprep.mubr.msk.f32.mxu1 %vm18222_vm0, %v18221_v0 }
0x585d   :  { %v10225_v26 = vpop.f32.mrb[108].mxu1 }
0x585e   :  { %v16427_v15 = vpop.f32.mrb[109].mxu1  ;;  %v10229_v36 = vsel %vm892_vm6, %v10225_v26, 0.0 }
0x585f   :  { %10230 = vadd.xlane.f32.xlu0 %v10229_v36 }
0x5875   :  { %10248 = vperm.xlu0 %17682, %v14402_v35  }
0x58ec   :  { %v10231_v45 = vpop.xlane.xlu0 %10230 }
0x58ed   :  { %v10232_v40 = vmul.f32 0.0078125, %v10231_v45 }
0x58ef   :  { %v10233_v53 = vadd.f32 1e-05, %v10232_v40 }
0x58f1   :  { %17750 = vrsqrt.f32 %v10233_v53 }
0x58f4   :  { %v10249_v38 = vpop.permute.xlu0 %10248 }
0x58fb   :  { %v17751_v41 = vpop.eup %17750 }
0x58fc   :  { %v10235_v23 = vmul.f32 %v17751_v41, %v10154_v47 }
0x58fe   :  { %v10243_v48 = vmul.f32 %v10241_v42, %v10235_v23  ;;  %v14421_v23 = vld [vmem:[%s20112_s12 + $0x20] sm:$0xf] }
0x58ff   :  { %v14424_v42 = vld [vmem:[%s20113_s23 + $0x20] sm:$0xf] }
0x5900   :  { %v10251_v7 = vadd.f32 %v10249_v38, %v10243_v48  ;;  %v14427_v48 = vld [vmem:[%s20114_s9 + $0x20] sm:$0xf] }
0x5902   :  { %v10252_v51 = vmax.f32 %v10251_v7, 0.0 }
0x5904   :  { %16429 = vmatpush3.msk.msra.mxu0 %vm439_vm3, %v10252_v51  ;;  %16434 = vmatpush3.msk.msra.mxu1 %vm439_vm3, %v10252_v51 }
0x5905   :  { %16431 = vmatmul.mubr.msk.f32.vlgmr.msra.gmra.mrb[134].mxu0 %vm435_vm4, %v14403_v33  ;;  %16438 = vmatprep.subr.mxu0 %v18221_v0 }
0x5906   :  { %16439 = vmatpush3.msk.msra.mxu0 %vm439_vm3, %v10252_v51  ;;  %16440 = vmatprep.mubr.msk.f32.mxu0 %vm18222_vm0, %v18221_v0 }
0x5907   :  { %17417 = vmatprep.subr.bf16.mxu1 %v18223_v18  ;;  %16436 = vmatmul.mubr.msk.f32.vlgmr.msra.gmra.mrb[110].mxu1 %vm435_vm4, %v14406_v57 }
0x5908   :  { %17419 = vmatpush3.bf16.msra.mxu1 %v18511_v13  ;;  %17429 = vmatprep.subr.bf16.mxu0 %v18223_v18 }
0x5909   :  { %16441 = vmatmul.mubr.msk.f32.vlgmr.msra.gmra.mrb[136].mxu0 %vm435_vm4, %v14409_v62  ;;  %17420 = vmatprep.subr.bf16.mxu1 %v18223_v18 }
0x590a   :  { %17431 = vmatpush3.bf16.msra.mxu0 %v18520_v17  ;;  %16459 = vmatprep.mubr.msk.f32.mxu1 %vm18222_vm0, %v18221_v0 }
0x590b   :  { %17432 = vmatprep.subr.bf16.mxu0 %v18223_v18  ;;  %16478 = vmatprep.mubr.msk.f32.mxu0 %vm18222_vm0, %v18221_v0 }
0x590c   :  { %17422 = vmatpush3.bf16.msra.mxu1 %v18526_v21 }
0x590d   :  { %17423 = vmatprep.subr.bf16.mxu1 %v18223_v18 }
0x590e   :  { %17434 = vmatpush3.bf16.msra.mxu0 %v18531_v24 }
0x590f   :  { %17435 = vmatprep.subr.bf16.mxu0 %v18223_v18 }
0x5910   :  { %17425 = vmatpush3.bf16.msra.mxu1 %v18539_v27 }
0x5911   :  { %17426 = vmatprep.subr.bf16.mxu1 %v18223_v18 }
0x5912   :  { %17437 = vmatpush3.bf16.msra.mxu0 %v18543_v30 }
0x5913   :  { %17438 = vmatprep.subr.bf16.mxu0 %v18223_v18 }
0x5914   :  { %17428 = vmatpush3.bf16.msra.mxu1 %v18547_v31 }
0x5915   :  { %16481 = vmatprep.subr.mxu1 %v18221_v0 }
0x5916   :  { %17440 = vmatpush3.bf16.msra.mxu0 %v18554_v34 }
0x5917   :  { %16486 = vmatprep.subr.mxu0 %v18221_v0 }
0x59d8   :  { %v10327_v20 = vpop.f32.mrb[134].mxu0 }
0x59d9   :  { %v16432_v39 = vpop.f32.mrb[135].mxu0  ;;  %16460 = vmatmul.mubr.msk.f32.vlgmr.msra.gmra.mrb[112].mxu1 %vm661_vm5, %v10327_v20 }
0x59da   :  { %v10402_v46 = vpop.f32.mrb[110].mxu1  ;;  %16483 = vmatprep.mubr.msk.f32.mxu1 %vm18222_vm0, %v18221_v0 }
0x59db   :  { %v16437_v1 = vpop.f32.mrb[111].mxu1 }
0x59dc   :  { %v10477_v5 = vpop.f32.mrb[136].mxu0 }
0x59dd   :  { %v16442_v32 = vpop.f32.mrb[137].mxu0  ;;  %16479 = vmatmul.mubr.msk.f32.vlgmr.msra.gmra.mrb[138].mxu0 %vm661_vm5, %v10477_v5 }
0x59de   :  { %16488 = vmatprep.mubr.msk.f32.mxu0 %vm18222_vm0, %v18221_v0 }
0x5aac   :  { %v10550_v3 = vpop.f32.mrb[112].mxu1 }
0x5aad   :  { %v10551_v49 = vadd.f32 %v10550_v3, %v10402_v46  ;;  %v16461_v55 = vpop.f32.mrb[113].mxu1 }
0x5ab0   :  { %v10623_v11 = vpop.f32.mrb[138].mxu0 }
0x5ab1   :  { %v10627_v54 = vadd.f32 %v10623_v11, %v10551_v49  ;;  %v16480_v61 = vpop.f32.mrb[139].mxu0 }
0x5ab2   :  { %v14437_v61 = vld [vmem:[%s20117_s19 + $0x20] sm:$0xf] }
0x5ab3   :  { %v10635_v56 = vadd.f32 %v10633_v60, %v10627_v54  ;;  %v14450_v60 = vld [vmem:[%s20115_s1 + $0x24] sm:$0xf] }
0x5ab5   :  { %16482 = vmatpush3.msk.msra.mxu1 %vm439_vm3, %v10635_v56 }
0x5ab6   :  { %16484 = vmatmul.mubr.msk.f32.vlgmr.msra.gmra.mrb[114].mxu1 %vm435_vm4, %v19665_v59  ;;  %16491 = vmatprep.subr.mxu1 %v18221_v0 }
0x5ab7   :  { %16493 = vmatprep.mubr.msk.f32.mxu1 %vm18222_vm0, %v18221_v0 }
0x5b89   :  { %v10705_v12 = vpop.f32.mrb[114].mxu1 }
0x5b8a   :  { %v16485_v6 = vpop.f32.mrb[115].mxu1  ;;  %v10709_v10 = vsel %vm892_vm6, %v10705_v12, 0.0 }
0x5b8b   :  { %10710 = vadd.xlane.f32.xlu1 %v10709_v10 }
0x5b9c   :  { %10799 = vperm.xlu1 %17683, %v14419_v14  }
0x5ba0   :  { %11191 = vperm.xlu1 %17683, %v14432_v16  }
0x5c18   :  { %v10711_v37 = vpop.xlane.xlu1 %10710 }
0x5c19   :  { %v10712_v50 = vmul.f32 0.0078125, %v10711_v37 }
0x5c1b   :  { %v10713_v43 = vsub.f32 %v10635_v56, %v10712_v50  ;;  %v14438_v50 = vld [vmem:[%s20118_s7 + $0x20] sm:$0xf] }
0x5c1c   :  { %v10800_v35 = vpop.permute.xlu1 %10799 }
0x5c1d   :  { %v10714_v9 = vmul.f32 %v10713_v43, %v10713_v43 }
0x5c1f   :  { %16487 = vmatpush3.msk.msra.mxu0 %vm439_vm3, %v10714_v9 }
0x5c20   :  { %16489 = vmatmul.mubr.msk.f32.vlgmr.msra.gmra.mrb[140].mxu0 %vm435_vm4, %v19665_v59  ;;  %16496 = vmatprep.subr.mxu0 %v18221_v0  ;;  %v11192_v3 = vpop.permute.xlu1 %11191 }
0x5c21   :  { %16498 = vmatprep.mubr.msk.f32.mxu0 %vm18222_vm0, %v18221_v0 }
0x5cf3   :  { %v10784_v44 = vpop.f32.mrb[140].mxu0 }
0x5cf4   :  { %v16490_v19 = vpop.f32.mrb[141].mxu0  ;;  %v10788_v52 = vsel %vm892_vm6, %v10784_v44, 0.0 }
0x5cf5   :  { %10789 = vadd.xlane.f32.xlu0 %v10788_v52 }
0x5d0b   :  { %10807 = vperm.xlu0 %17682, %v14420_v58  }
0x5d82   :  { %v10790_v47 = vpop.xlane.xlu0 %10789 }
0x5d83   :  { %v10791_v25 = vmul.f32 0.0078125, %v10790_v47 }
0x5d85   :  { %v10792_v26 = vadd.f32 1e-05, %v10791_v25 }
0x5d87   :  { %17752 = vrsqrt.f32 %v10792_v26 }
0x5d8a   :  { %v10808_v40 = vpop.permute.xlu0 %10807 }
0x5d91   :  { %v17753_v15 = vpop.eup %17752 }
0x5d92   :  { %v10794_v36 = vmul.f32 %v17753_v15, %v10713_v43 }
0x5d94   :  { %v10802_v45 = vmul.f32 %v10800_v35, %v10794_v36  ;;  %v14439_v36 = vld [vmem:[%s20112_s12 + $0x24] sm:$0xf] }
0x5d95   :  { %v14442_v35 = vld [vmem:[%s20113_s23 + $0x24] sm:$0xf] }
0x5d96   :  { %v10810_v53 = vadd.f32 %v10808_v40, %v10802_v45  ;;  %v14445_v45 = vld [vmem:[%s20114_s9 + $0x24] sm:$0xf] }
0x5d98   :  { %v10811_v41 = vmax.f32 %v10810_v53, 0.0 }
0x5d9a   :  { %16492 = vmatpush3.msk.msra.mxu1 %vm439_vm3, %v10811_v41  ;;  %16497 = vmatpush3.msk.msra.mxu0 %vm439_vm3, %v10811_v41 }
0x5d9b   :  { %16494 = vmatmul.mubr.msk.f32.vlgmr.msra.gmra.mrb[116].mxu1 %vm435_vm4, %v14421_v23  ;;  %16501 = vmatprep.subr.mxu1 %v18221_v0 }
0x5d9c   :  { %16502 = vmatpush3.msk.msra.mxu1 %vm439_vm3, %v10811_v41  ;;  %16503 = vmatprep.mubr.msk.f32.mxu1 %vm18222_vm0, %v18221_v0 }
0x5d9d   :  { %17441 = vmatprep.subr.bf16.mxu0 %v18223_v18  ;;  %16499 = vmatmul.mubr.msk.f32.vlgmr.msra.gmra.mrb[142].mxu0 %vm435_vm4, %v14424_v42 }
0x5d9e   :  { %17443 = vmatpush3.bf16.msra.mxu0 %v18511_v13  ;;  %17453 = vmatprep.subr.bf16.mxu1 %v18223_v18 }
0x5d9f   :  { %16504 = vmatmul.mubr.msk.f32.vlgmr.msra.gmra.mrb[118].mxu1 %vm435_vm4, %v14427_v48  ;;  %17444 = vmatprep.subr.bf16.mxu0 %v18223_v18 }
0x5da0   :  { %17455 = vmatpush3.bf16.msra.mxu1 %v18520_v17  ;;  %16522 = vmatprep.mubr.msk.f32.mxu0 %vm18222_vm0, %v18221_v0 }
0x5da1   :  { %17456 = vmatprep.subr.bf16.mxu1 %v18223_v18  ;;  %16541 = vmatprep.mubr.msk.f32.mxu1 %vm18222_vm0, %v18221_v0 }
0x5da2   :  { %17446 = vmatpush3.bf16.msra.mxu0 %v18526_v21 }
0x5da3   :  { %17447 = vmatprep.subr.bf16.mxu0 %v18223_v18 }
0x5da4   :  { %17458 = vmatpush3.bf16.msra.mxu1 %v18531_v24 }
0x5da5   :  { %17459 = vmatprep.subr.bf16.mxu1 %v18223_v18 }
0x5da6   :  { %17449 = vmatpush3.bf16.msra.mxu0 %v18539_v27 }
0x5da7   :  { %17450 = vmatprep.subr.bf16.mxu0 %v18223_v18 }
0x5da8   :  { %17461 = vmatpush3.bf16.msra.mxu1 %v18543_v30 }
0x5da9   :  { %17462 = vmatprep.subr.bf16.mxu1 %v18223_v18 }
0x5daa   :  { %17452 = vmatpush3.bf16.msra.mxu0 %v18547_v31 }
0x5dab   :  { %16544 = vmatprep.subr.mxu0 %v18221_v0 }
0x5dac   :  { %17464 = vmatpush3.bf16.msra.mxu1 %v18554_v34 }
0x5dad   :  { %16549 = vmatprep.subr.mxu1 %v18221_v0 }
0x5e6e   :  { %v10886_v38 = vpop.f32.mrb[116].mxu1 }
0x5e6f   :  { %v16495_v7 = vpop.f32.mrb[117].mxu1  ;;  %16523 = vmatmul.mubr.msk.f32.vlgmr.msra.gmra.mrb[144].mxu0 %vm661_vm5, %v10886_v38 }
0x5e70   :  { %v10961_v51 = vpop.f32.mrb[142].mxu0  ;;  %16546 = vmatprep.mubr.msk.f32.mxu0 %vm18222_vm0, %v18221_v0 }
0x5e71   :  { %v16500_v33 = vpop.f32.mrb[143].mxu0 }
0x5e72   :  { %v11036_v57 = vpop.f32.mrb[118].mxu1 }
0x5e73   :  { %v16505_v62 = vpop.f32.mrb[119].mxu1  ;;  %16542 = vmatmul.mubr.msk.f32.vlgmr.msra.gmra.mrb[120].mxu1 %vm661_vm5, %v11036_v57 }
0x5e74   :  { %16551 = vmatprep.mubr.msk.f32.mxu1 %vm18222_vm0, %v18221_v0 }
0x5f42   :  { %v11109_v20 = vpop.f32.mrb[144].mxu0 }
0x5f43   :  { %v11110_v39 = vadd.f32 %v11109_v20, %v10961_v51  ;;  %v16524_v46 = vpop.f32.mrb[145].mxu0 }
0x5f46   :  { %v11182_v1 = vpop.f32.mrb[120].mxu1 }
0x5f47   :  { %v11186_v5 = vadd.f32 %v11182_v1, %v11110_v39  ;;  %v16543_v32 = vpop.f32.mrb[121].mxu1 }
0x5f48   :  { %v14456_v32 = vld [vmem:[%s20118_s7 + $0x24] sm:$0xf] }
0x5f49   :  { %v11194_v49 = vadd.f32 %v11192_v3, %v11186_v5  ;;  %v14468_v3 = vld [vmem:[%s20115_s1 + $0x28] sm:$0xf] }
0x5f4b   :  { %16545 = vmatpush3.msk.msra.mxu0 %vm439_vm3, %v11194_v49 }
0x5f4c   :  { %16547 = vmatmul.mubr.msk.f32.vlgmr.msra.gmra.mrb[146].mxu0 %vm435_vm4, %v19665_v59  ;;  %16554 = vmatprep.subr.mxu0 %v18221_v0 }
0x5f4d   :  { %16556 = vmatprep.mubr.msk.f32.mxu0 %vm18222_vm0, %v18221_v0 }
0x601f   :  { %v11264_v55 = vpop.f32.mrb[146].mxu0 }
0x6020   :  { %v16548_v11 = vpop.f32.mrb[147].mxu0  ;;  %v11268_v54 = vsel %vm892_vm6, %v11264_v55, 0.0 }
0x6021   :  { %11269 = vadd.xlane.f32.xlu1 %v11268_v54 }
0x6032   :  { %11358 = vperm.xlu1 %17683, %v14437_v61  }
0x6036   :  { %11750 = vperm.xlu1 %17683, %v14450_v60  }
0x60ae   :  { %v11270_v56 = vpop.xlane.xlu1 %11269 }
0x60af   :  { %v11271_v12 = vmul.f32 0.0078125, %v11270_v56 }
0x60b1   :  { %v11272_v6 = vsub.f32 %v11194_v49, %v11271_v12  ;;  %v14455_v12 = vld [vmem:[%s20117_s19 + $0x24] sm:$0xf] }
0x60b2   :  { %v11359_v58 = vpop.permute.xlu1 %11358 }
0x60b3   :  { %v11273_v10 = vmul.f32 %v11272_v6, %v11272_v6 }
0x60b5   :  { %16550 = vmatpush3.msk.msra.mxu1 %vm439_vm3, %v11273_v10 }
0x60b6   :  { %16552 = vmatmul.mubr.msk.f32.vlgmr.msra.gmra.mrb[122].mxu1 %vm435_vm4, %v19665_v59  ;;  %16559 = vmatprep.subr.mxu1 %v18221_v0  ;;  %v11751_v20 = vpop.permute.xlu1 %11750 }
0x60b7   :  { %16561 = vmatprep.mubr.msk.f32.mxu1 %vm18222_vm0, %v18221_v0 }
0x6189   :  { %v11343_v14 = vpop.f32.mrb[122].mxu1 }
0x618a   :  { %v16553_v16 = vpop.f32.mrb[123].mxu1  ;;  %v11347_v37 = vsel %vm892_vm6, %v11343_v14, 0.0 }
0x618b   :  { %11348 = vadd.xlane.f32.xlu0 %v11347_v37 }
0x61a1   :  { %11366 = vperm.xlu0 %17682, %v14438_v50  }
0x6218   :  { %v11349_v43 = vpop.xlane.xlu0 %11348 }
0x6219   :  { %v11350_v9 = vmul.f32 0.0078125, %v11349_v43 }
0x621b   :  { %v11351_v44 = vadd.f32 1e-05, %v11350_v9 }
0x621d   :  { %17754 = vrsqrt.f32 %v11351_v44 }
0x6220   :  { %v11367_v25 = vpop.permute.xlu0 %11366 }
0x6227   :  { %v17755_v19 = vpop.eup %17754 }
0x6228   :  { %v11353_v52 = vmul.f32 %v17755_v19, %v11272_v6 }
0x622a   :  { %v11361_v47 = vmul.f32 %v11359_v58, %v11353_v52  ;;  %v14457_v52 = vld [vmem:[%s20112_s12 + $0x28] sm:$0xf] }
0x622b   :  { %v14460_v58 = vld [vmem:[%s20113_s23 + $0x28] sm:$0xf] }
0x622c   :  { %v11369_v26 = vadd.f32 %v11367_v25, %v11361_v47  ;;  %v14463_v47 = vld [vmem:[%s20114_s9 + $0x28] sm:$0xf] }
0x622e   :  { %v11370_v15 = vmax.f32 %v11369_v26, 0.0 }
0x6230   :  { %16555 = vmatpush3.msk.msra.mxu0 %vm439_vm3, %v11370_v15  ;;  %16560 = vmatpush3.msk.msra.mxu1 %vm439_vm3, %v11370_v15 }
0x6231   :  { %16557 = vmatmul.mubr.msk.f32.vlgmr.msra.gmra.mrb[148].mxu0 %vm435_vm4, %v14439_v36  ;;  %16564 = vmatprep.subr.mxu0 %v18221_v0 }
0x6232   :  { %16565 = vmatpush3.msk.msra.mxu0 %vm439_vm3, %v11370_v15  ;;  %16566 = vmatprep.mubr.msk.f32.mxu0 %vm18222_vm0, %v18221_v0 }
0x6233   :  { %17465 = vmatprep.subr.bf16.mxu1 %v18223_v18  ;;  %16562 = vmatmul.mubr.msk.f32.vlgmr.msra.gmra.mrb[124].mxu1 %vm435_vm4, %v14442_v35 }
0x6234   :  { %17467 = vmatpush3.bf16.msra.mxu1 %v18511_v13  ;;  %17477 = vmatprep.subr.bf16.mxu0 %v18223_v18 }
0x6235   :  { %16567 = vmatmul.mubr.msk.f32.vlgmr.msra.gmra.mrb[150].mxu0 %vm435_vm4, %v14445_v45  ;;  %17468 = vmatprep.subr.bf16.mxu1 %v18223_v18 }
0x6236   :  { %17479 = vmatpush3.bf16.msra.mxu0 %v18520_v17  ;;  %16585 = vmatprep.mubr.msk.f32.mxu1 %vm18222_vm0, %v18221_v0 }
0x6237   :  { %17480 = vmatprep.subr.bf16.mxu0 %v18223_v18  ;;  %16604 = vmatprep.mubr.msk.f32.mxu0 %vm18222_vm0, %v18221_v0 }
0x6238   :  { %17470 = vmatpush3.bf16.msra.mxu1 %v18526_v21 }
0x6239   :  { %17471 = vmatprep.subr.bf16.mxu1 %v18223_v18 }
0x623a   :  { %17482 = vmatpush3.bf16.msra.mxu0 %v18531_v24 }
0x623b   :  { %17483 = vmatprep.subr.bf16.mxu0 %v18223_v18 }
0x623c   :  { %17473 = vmatpush3.bf16.msra.mxu1 %v18539_v27 }
0x623d   :  { %17474 = vmatprep.subr.bf16.mxu1 %v18223_v18 }
0x623e   :  { %17485 = vmatpush3.bf16.msra.mxu0 %v18543_v30 }
0x623f   :  { %17486 = vmatprep.subr.bf16.mxu0 %v18223_v18 }
0x6240   :  { %17476 = vmatpush3.bf16.msra.mxu1 %v18547_v31 }
0x6241   :  { %16607 = vmatprep.subr.mxu1 %v18221_v0 }
0x6242   :  { %17488 = vmatpush3.bf16.msra.mxu0 %v18554_v34 }
0x6243   :  { %16612 = vmatprep.subr.mxu0 %v18221_v0 }
0x6304   :  { %v11445_v40 = vpop.f32.mrb[148].mxu0 }
0x6305   :  { %v16558_v53 = vpop.f32.mrb[149].mxu0  ;;  %16586 = vmatmul.mubr.msk.f32.vlgmr.msra.gmra.mrb[126].mxu1 %vm661_vm5, %v11445_v40 }
0x6306   :  { %v11520_v41 = vpop.f32.mrb[124].mxu1  ;;  %16609 = vmatprep.mubr.msk.f32.mxu1 %vm18222_vm0, %v18221_v0 }
0x6307   :  { %v16563_v23 = vpop.f32.mrb[125].mxu1 }
0x6308   :  { %v11595_v42 = vpop.f32.mrb[150].mxu0 }
0x6309   :  { %v16568_v48 = vpop.f32.mrb[151].mxu0  ;;  %16605 = vmatmul.mubr.msk.f32.vlgmr.msra.gmra.mrb[152].mxu0 %vm661_vm5, %v11595_v42 }
0x630a   :  { %16614 = vmatprep.mubr.msk.f32.mxu0 %vm18222_vm0, %v18221_v0 }
0x63d8   :  { %v11668_v38 = vpop.f32.mrb[126].mxu1 }
0x63d9   :  { %v11669_v7 = vadd.f32 %v11668_v38, %v11520_v41  ;;  %v16587_v51 = vpop.f32.mrb[127].mxu1 }
0x63dc   :  { %v11741_v33 = vpop.f32.mrb[152].mxu0 }
0x63dd   :  { %v11745_v57 = vadd.f32 %v11741_v33, %v11669_v7  ;;  %v16606_v62 = vpop.f32.mrb[153].mxu0 }
0x63de   :  { %v14473_v62 = vld [vmem:[%s20117_s19 + $0x28] sm:$0xf] }
0x63df   :  { %v11753_v39 = vadd.f32 %v11751_v20, %v11745_v57  ;;  %v14486_v20 = vld [vmem:[%s20115_s1 + $0x2c] sm:$0xf] }
0x63e1   :  { %16608 = vmatpush3.msk.msra.mxu1 %vm439_vm3, %v11753_v39 }
0x63e2   :  { %16610 = vmatmul.mubr.msk.f32.vlgmr.msra.gmra.mrb[128].mxu1 %vm435_vm4, %v19665_v59  ;;  %16617 = vmatprep.subr.mxu1 %v18221_v0 }
0x63e3   :  { %16619 = vmatprep.mubr.msk.f32.mxu1 %vm18222_vm0, %v18221_v0 }
0x64b5   :  { %v11823_v46 = vpop.f32.mrb[128].mxu1 }
0x64b6   :  { %v16611_v1 = vpop.f32.mrb[129].mxu1  ;;  %v11827_v5 = vsel %vm892_vm6, %v11823_v46, 0.0 }
0x64b7   :  { %11828 = vadd.xlane.f32.xlu1 %v11827_v5 }
0x64c8   :  { %11925 = vperm.xlu1 %17683, %v14456_v32  }
0x64cc   :  { %12309 = vperm.xlu1 %17683, %v14468_v3  }
0x6544   :  { %v11829_v49 = vpop.xlane.xlu1 %11828 }
0x6545   :  { %v11830_v55 = vmul.f32 0.0078125, %v11829_v49 }
0x6547   :  { %v11831_v11 = vsub.f32 %v11753_v39, %v11830_v55  ;;  %v14474_v55 = vld [vmem:[%s20118_s7 + $0x28] sm:$0xf] }
0x6548   :  { %v11926_v9 = vpop.permute.xlu1 %11925 }
0x6549   :  { %v11832_v54 = vmul.f32 %v11831_v11, %v11831_v11 }
0x654b   :  { %16613 = vmatpush3.msk.msra.mxu0 %vm439_vm3, %v11832_v54 }
0x654c   :  { %16615 = vmatmul.mubr.msk.f32.vlgmr.msra.gmra.mrb[154].mxu0 %vm435_vm4, %v19665_v59  ;;  %16622 = vmatprep.subr.mxu0 %v18221_v0  ;;  %v12310_v38 = vpop.permute.xlu1 %12309 }
0x654d   :  { %16624 = vmatprep.mubr.msk.f32.mxu0 %vm18222_vm0, %v18221_v0 }
0x661f   :  { %v11902_v61 = vpop.f32.mrb[154].mxu0 }
0x6620   :  { %v16616_v60 = vpop.f32.mrb[155].mxu0  ;;  %v11906_v56 = vsel %vm892_vm6, %v11902_v61, 0.0 }
0x6621   :  { %11907 = vadd.xlane.f32.xlu0 %v11906_v56 }
0x6637   :  { %11917 = vperm.xlu0 %17682, %v14455_v12  }
0x66ae   :  { %v11908_v6 = vpop.xlane.xlu0 %11907 }
0x66af   :  { %v11909_v10 = vmul.f32 0.0078125, %v11908_v6 }
0x66b1   :  { %v11910_v14 = vadd.f32 1e-05, %v11909_v10 }
0x66b3   :  { %17756 = vrsqrt.f32 %v11910_v14 }
0x66b6   :  { %v11918_v50 = vpop.permute.xlu0 %11917 }
0x66bd   :  { %v17757_v16 = vpop.eup %17756 }
0x66be   :  { %v11912_v37 = vmul.f32 %v17757_v16, %v11831_v11 }
0x66c0   :  { %v11920_v43 = vmul.f32 %v11918_v50, %v11912_v37  ;;  %v14475_v37 = vld [vmem:[%s20112_s12 + $0x2c] sm:$0xf] }
0x66c1   :  { %v14478_v50 = vld [vmem:[%s20113_s23 + $0x2c] sm:$0xf] }
0x66c2   :  { %v11928_v44 = vadd.f32 %v11926_v9, %v11920_v43  ;;  %v14481_v43 = vld [vmem:[%s20114_s9 + $0x2c] sm:$0xf] }
0x66c4   :  { %v11929_v19 = vmax.f32 %v11928_v44, 0.0 }
0x66c6   :  { %16618 = vmatpush3.msk.msra.mxu1 %vm439_vm3, %v11929_v19  ;;  %16623 = vmatpush3.msk.msra.mxu0 %vm439_vm3, %v11929_v19 }
0x66c7   :  { %16620 = vmatmul.mubr.msk.f32.vlgmr.msra.gmra.mrb[130].mxu1 %vm435_vm4, %v14457_v52  ;;  %16627 = vmatprep.subr.mxu1 %v18221_v0 }
0x66c8   :  { %16628 = vmatpush3.msk.msra.mxu1 %vm439_vm3, %v11929_v19  ;;  %16629 = vmatprep.mubr.msk.f32.mxu1 %vm18222_vm0, %v18221_v0 }
0x66c9   :  { %17489 = vmatprep.subr.bf16.mxu0 %v18223_v18  ;;  %16625 = vmatmul.mubr.msk.f32.vlgmr.msra.gmra.mrb[156].mxu0 %vm435_vm4, %v14460_v58 }
0x66ca   :  { %17491 = vmatpush3.bf16.msra.mxu0 %v18511_v13  ;;  %17501 = vmatprep.subr.bf16.mxu1 %v18223_v18 }
0x66cb   :  { %16630 = vmatmul.mubr.msk.f32.vlgmr.msra.gmra.mrb[132].mxu1 %vm435_vm4, %v14463_v47  ;;  %17492 = vmatprep.subr.bf16.mxu0 %v18223_v18 }
0x66cc   :  { %17503 = vmatpush3.bf16.msra.mxu1 %v18520_v17  ;;  %16648 = vmatprep.mubr.msk.f32.mxu0 %vm18222_vm0, %v18221_v0 }
0x66cd   :  { %17504 = vmatprep.subr.bf16.mxu1 %v18223_v18  ;;  %16667 = vmatprep.mubr.msk.f32.mxu1 %vm18222_vm0, %v18221_v0 }
0x66ce   :  { %17494 = vmatpush3.bf16.msra.mxu0 %v18526_v21 }
0x66cf   :  { %17495 = vmatprep.subr.bf16.mxu0 %v18223_v18 }
0x66d0   :  { %17506 = vmatpush3.bf16.msra.mxu1 %v18531_v24 }
0x66d1   :  { %17507 = vmatprep.subr.bf16.mxu1 %v18223_v18 }
0x66d2   :  { %17497 = vmatpush3.bf16.msra.mxu0 %v18539_v27 }
0x66d3   :  { %17498 = vmatprep.subr.bf16.mxu0 %v18223_v18 }
0x66d4   :  { %17509 = vmatpush3.bf16.msra.mxu1 %v18543_v30 }
0x66d5   :  { %17510 = vmatprep.subr.bf16.mxu1 %v18223_v18 }
0x66d6   :  { %17500 = vmatpush3.bf16.msra.mxu0 %v18547_v31 }
0x66d7   :  { %16670 = vmatprep.subr.mxu0 %v18221_v0 }
0x66d8   :  { %17512 = vmatpush3.bf16.msra.mxu1 %v18554_v34 }
0x66d9   :  { %16675 = vmatprep.subr.mxu1 %v18221_v0 }
0x679a   :  { %v12004_v25 = vpop.f32.mrb[130].mxu1 }
0x679b   :  { %v16621_v26 = vpop.f32.mrb[131].mxu1  ;;  %16649 = vmatmul.mubr.msk.f32.vlgmr.msra.gmra.mrb[158].mxu0 %vm661_vm5, %v12004_v25 }
0x679c   :  { %v12079_v15 = vpop.f32.mrb[156].mxu0  ;;  %16672 = vmatprep.mubr.msk.f32.mxu0 %vm18222_vm0, %v18221_v0 }
0x679d   :  { %v16626_v36 = vpop.f32.mrb[157].mxu0 }
0x679e   :  { %v12154_v35 = vpop.f32.mrb[132].mxu1  ;;  %v14492_v36 = vld [vmem:[%s20118_s7 + $0x2c] sm:$0xf] }
0x679f   :  { %v16631_v45 = vpop.f32.mrb[133].mxu1  ;;  %16668 = vmatmul.mubr.msk.f32.vlgmr.msra.gmra.mrb[134].mxu1 %vm661_vm5, %v12154_v35 }
0x67a0   :  { %16677 = vmatprep.mubr.msk.f32.mxu1 %vm18222_vm0, %v18221_v0 }
0x686e   :  { %v12227_v40 = vpop.f32.mrb[158].mxu0 }
0x686f   :  { %v12228_v53 = vadd.f32 %v12227_v40, %v12079_v15  ;;  %v16650_v41 = vpop.f32.mrb[159].mxu0 }
0x6872   :  { %v12300_v23 = vpop.f32.mrb[134].mxu1 }
0x6873   :  { %v12304_v42 = vadd.f32 %v12300_v23, %v12228_v53  ;;  %v16669_v48 = vpop.f32.mrb[135].mxu1 }
0x6874   :  { %v14491_v48 = vld [vmem:[%s20117_s19 + $0x2c] sm:$0xf] }
0x6875   :  { %v12312_v7 = vadd.f32 %v12310_v38, %v12304_v42 }
0x6877   :  { %16671 = vmatpush3.msk.msra.mxu0 %vm439_vm3, %v12312_v7 }
0x6878   :  { %16673 = vmatmul.mubr.msk.f32.vlgmr.msra.gmra.mrb[160].mxu0 %vm435_vm4, %v19665_v59  ;;  %16680 = vmatprep.subr.mxu0 %v18221_v0 }
0x6879   :  { %16682 = vmatprep.mubr.msk.f32.mxu0 %vm18222_vm0, %v18221_v0 }
0x694b   :  { %v12382_v51 = vpop.f32.mrb[160].mxu0 }
0x694c   :  { %v16674_v33 = vpop.f32.mrb[161].mxu0  ;;  %v12386_v57 = vsel %vm892_vm6, %v12382_v51, 0.0 }
0x694d   :  { %12387 = vadd.xlane.f32.xlu0 %v12386_v57 }
0x6963   :  { %12476 = vperm.xlu0 %17682, %v14473_v62  }
0x6967   :  { %12868 = vperm.xlu0 %17682, %v14486_v20  }
0x69da   :  { %v12388_v39 = vpop.xlane.xlu0 %12387 }
0x69db   :  { %v12389_v46 = vmul.f32 0.0078125, %v12388_v39 }
0x69dd   :  { %v12390_v1 = vsub.f32 %v12312_v7, %v12389_v46 }
0x69df   :  { %v12391_v5 = vmul.f32 %v12390_v1, %v12390_v1 }
0x69e1   :  { %16676 = vmatpush3.msk.msra.mxu1 %vm439_vm3, %v12391_v5 }
0x69e2   :  { %16678 = vmatmul.mubr.msk.f32.vlgmr.msra.gmra.mrb[136].mxu1 %vm435_vm4, %v19665_v59  ;;  %16685 = vmatprep.subr.mxu1 %v18221_v0  ;;  %v12477_v12 = vpop.permute.xlu0 %12476 }
0x69e3   :  { %16687 = vmatprep.mubr.msk.f32.mxu1 %vm18222_vm0, %v18221_v0 }
0x69e6   :  { %v12869_v58 = vpop.permute.xlu0 %12868 }
0x6ab5   :  { %v12461_v32 = vpop.f32.mrb[136].mxu1 }
0x6ab6   :  { %v16679_v3 = vpop.f32.mrb[137].mxu1  ;;  %v12465_v49 = vsel %vm892_vm6, %v12461_v32, 0.0 }
0x6ab7   :  { %12466 = vadd.xlane.f32.xlu1 %v12465_v49 }
0x6ac8   :  { %12484 = vperm.xlu1 %17683, %v14474_v55  }
0x6b44   :  { %v12467_v11 = vpop.xlane.xlu1 %12466 }
0x6b45   :  { %v12468_v54 = vmul.f32 0.0078125, %v12467_v11  ;;  %v13081_v11 = vld [vmem:[#allocation11 + $0x188] sm:$0xff] }
0x6b47   :  { %v12469_v61 = vadd.f32 1e-05, %v12468_v54  ;;  %v13083_v54 = vld [vmem:[#allocation11 + $0x198] sm:$0xff] }
0x6b48   :  { %v12485_v10 = vpop.permute.xlu1 %12484 }
0x6b49   :  { %17758 = vrsqrt.f32 %v12469_v61  ;;  %v17537_v61 = vpack.c.bf16 %v13083_v54, %v13081_v11 }
0x6b53   :  { %v17759_v60 = vpop.eup %17758 }
0x6b54   :  { %v12471_v56 = vmul.f32 %v17759_v60, %v12390_v1  ;;  %v13080_v60 = vld [vmem:[#allocation11 + $0x180] sm:$0xff] }
0x6b56   :  { %v12479_v6 = vmul.f32 %v12477_v12, %v12471_v56  ;;  %v13082_v56 = vld [vmem:[#allocation11 + $0x190] sm:$0xff] }
0x6b57   :  { %v17539_v12 = vpack.c.bf16 %v13082_v56, %v13080_v60 }
0x6b58   :  { %v12487_v14 = vadd.f32 %v12485_v10, %v12479_v6  ;;  %v13087_v6 = vld [vmem:[#allocation11 + $0x1b8] sm:$0xff] }
0x6b5a   :  { %v12488_v16 = vmax.f32 %v12487_v14, 0.0  ;;  %v13084_v14 = vld [vmem:[#allocation11 + $0x1a0] sm:$0xff] }
0x6b5c   :  { %16681 = vmatpush3.msk.msra.mxu0 %vm439_vm3, %v12488_v16  ;;  %16686 = vmatpush3.msk.msra.mxu1 %vm439_vm3, %v12488_v16 }
0x6b5d   :  { %16683 = vmatmul.mubr.msk.f32.vlgmr.msra.gmra.mrb[162].mxu0 %vm435_vm4, %v14475_v37  ;;  %16690 = vmatprep.subr.mxu0 %v18221_v0 }
0x6b5e   :  { %16691 = vmatpush3.msk.msra.mxu0 %vm439_vm3, %v12488_v16  ;;  %16692 = vmatprep.mubr.msk.f32.mxu0 %vm18222_vm0, %v18221_v0  ;;  %v13086_v16 = vld [vmem:[#allocation11 + $0x1b0] sm:$0xff] }
0x6b5f   :  { %17513 = vmatprep.subr.bf16.mxu1 %v18223_v18  ;;  %16688 = vmatmul.mubr.msk.f32.vlgmr.msra.gmra.mrb[138].mxu1 %vm435_vm4, %v14478_v50  ;;  %v17543_v37 = vpack.c.bf16 %v13086_v16, %v13084_v14  ;;  %v13089_v50 = vld [vmem:[#allocation11 + $0x1c8] sm:$0xff]  ;;  %v14510_v16 = vld [vmem:[%s20121_s17 + $0xe0] sm:$0xff] }
0x6b60   :  { %17515 = vmatpush3.bf16.msra.mxu1 %v18511_v13  ;;  %17525 = vmatprep.subr.bf16.mxu0 %v18223_v18 }
0x6b61   :  { %16693 = vmatmul.mubr.msk.f32.vlgmr.msra.gmra.mrb[164].mxu0 %vm435_vm4, %v14481_v43  ;;  %17516 = vmatprep.subr.bf16.mxu1 %v18223_v18  ;;  %v13091_v43 = vld [vmem:[#allocation11 + $0x1d8] sm:$0xff] }
0x6b62   :  { %17527 = vmatpush3.bf16.msra.mxu0 %v18520_v17  ;;  %16711 = vmatprep.mubr.msk.f32.mxu1 %vm18222_vm0, %v18221_v0 }
0x6b63   :  { %17528 = vmatprep.subr.bf16.mxu0 %v18223_v18  ;;  %16730 = vmatprep.mubr.msk.f32.mxu0 %vm18222_vm0, %v18221_v0 }
0x6b64   :  { %17518 = vmatpush3.bf16.msra.mxu1 %v18526_v21 }
0x6b65   :  { %17519 = vmatprep.subr.bf16.mxu1 %v18223_v18 }
0x6b66   :  { %17530 = vmatpush3.bf16.msra.mxu0 %v18531_v24 }
0x6b67   :  { %17531 = vmatprep.subr.bf16.mxu0 %v18223_v18 }
0x6b68   :  { %17521 = vmatpush3.bf16.msra.mxu1 %v18539_v27 }
0x6b69   :  { %17522 = vmatprep.subr.bf16.mxu1 %v18223_v18 }
0x6b6a   :  { %17533 = vmatpush3.bf16.msra.mxu0 %v18543_v30 }
0x6b6b   :  { %17534 = vmatprep.subr.bf16.mxu0 %v18223_v18 }
0x6b6c   :  { %17524 = vmatpush3.bf16.msra.mxu1 %v18547_v31 }
0x6b6d   :  { %16733 = vmatprep.subr.mxu1 %v18221_v0 }
0x6b6e   :  { %17536 = vmatpush3.bf16.msra.mxu0 %v18554_v34 }
0x6b6f   :  { %16738 = vmatprep.subr.mxu0 %v18221_v0 }
0x6c30   :  { %v12563_v13 = vpop.f32.mrb[162].mxu0 }
0x6c31   :  { %v16684_v17 = vpop.f32.mrb[163].mxu0  ;;  %16712 = vmatmul.mubr.msk.f32.vlgmr.msra.gmra.mrb[140].mxu1 %vm661_vm5, %v12563_v13  ;;  %v17545_v13 = vpack.c.bf16 %v13091_v43, %v13089_v50  ;;  %v14512_v43 = vld [vmem:[%s20121_s17 + $0xf0] sm:$0xff] }
0x6c32   :  { %v12638_v21 = vpop.f32.mrb[138].mxu1  ;;  %16735 = vmatprep.mubr.msk.f32.mxu1 %vm18222_vm0, %v18221_v0  ;;  %v13088_v17 = vld [vmem:[#allocation11 + $0x1c0] sm:$0xff] }
0x6c33   :  { %v16689_v24 = vpop.f32.mrb[139].mxu1 }
0x6c34   :  { %v12713_v27 = vpop.f32.mrb[164].mxu0 }
0x6c35   :  { %v16694_v30 = vpop.f32.mrb[165].mxu0  ;;  %16731 = vmatmul.mubr.msk.f32.vlgmr.msra.gmra.mrb[166].mxu0 %vm661_vm5, %v12713_v27  ;;  %v13093_v27 = vld [vmem:[#allocation11 + $0x1e8] sm:$0xff] }
0x6c36   :  { %16740 = vmatprep.mubr.msk.f32.mxu0 %vm18222_vm0, %v18221_v0  ;;  %v13095_v30 = vld [vmem:[#allocation11 + $0x1f8] sm:$0xff] }
0x6d04   :  { %v12786_v31 = vpop.f32.mrb[140].mxu1 }
0x6d05   :  { %v12787_v34 = vadd.f32 %v12786_v31, %v12638_v21  ;;  %v16713_v9 = vpop.f32.mrb[141].mxu1  ;;  %v13090_v21 = vld [vmem:[#allocation11 + $0x1d0] sm:$0xff]  ;;  %v13092_v31 = vld [vmem:[#allocation11 + $0x1e0] sm:$0xff] }
0x6d06   :  { %v17547_v24 = vpack.c.bf16 %v13090_v21, %v13088_v17  ;;  %v13094_v9 = vld [vmem:[#allocation11 + $0x1f0] sm:$0xff] }
0x6d08   :  { %v12859_v44 = vpop.f32.mrb[166].mxu0 }
0x6d09   :  { %v12863_v19 = vadd.f32 %v12859_v44, %v12787_v34  ;;  %v16732_v52 = vpop.f32.mrb[167].mxu0  ;;  %v17549_v34 = vpack.c.bf16 %v13095_v30, %v13093_v27  ;;  %v17551_v44 = vpack.c.bf16 %v13094_v9, %v13092_v31 }
0x6d0b   :  { %v12871_v47 = vadd.f32 %v12869_v58, %v12863_v19 }
0x6d0d   :  { %16734 = vmatpush3.msk.msra.mxu1 %vm439_vm3, %v12871_v47 }
0x6d0e   :  { %16736 = vmatmul.mubr.msk.f32.vlgmr.msra.gmra.mrb[142].mxu1 %vm435_vm4, %v19665_v59  ;;  %17538 = vmatprep.subr.bf16.mxu1 %v17537_v61 }
0x6d0f   :  { %13176 = vmatprep.mubr.f32.mxu1 %v18221_v0  ;;  %17540 = vmatpush1.bf16.msra.mxu1 %v17539_v12 }
0x6de1   :  { %v12941_v25 = vpop.f32.mrb[142].mxu1 }
0x6de2   :  { %v16737_v26 = vpop.f32.mrb[143].mxu1  ;;  %v12945_v15 = vsel %vm892_vm6, %v12941_v25, 0.0  ;;  %v14493_v25 = vld [vmem:[#allocation8 + $0x3] ss:$0 sm:$0xff] }
0x6de3   :  { %12946 = vadd.xlane.f32.xlu1 %v12945_v15  ;;  %v14494_v15 = vld [vmem:[#allocation10 + $0x3] ss:$0 sm:$0xff] }
0x6df4   :  { %13043 = vperm.xlu1 %17683, %v14492_v36  }
0x6e70   :  { %v12947_v35 = vpop.xlane.xlu1 %12946 }
0x6e71   :  { %v12948_v45 = vmul.f32 0.0078125, %v12947_v35 }
0x6e73   :  { %v12949_v40 = vsub.f32 %v12871_v47, %v12948_v45  ;;  %v13097_v45 = vld [vmem:[#allocation13 + $0x6] sm:$0x3] }
0x6e74   :  { %v13044_v20 = vpop.permute.xlu1 %13043 }
0x6e75   :  { %v12950_v53 = vmul.f32 %v12949_v40, %v12949_v40 }
0x6e77   :  { %16739 = vmatpush3.msk.msra.mxu0 %vm439_vm3, %v12950_v53 }
0x6e78   :  { %16741 = vmatmul.mubr.msk.f32.vlgmr.msra.gmra.mrb[168].mxu0 %vm435_vm4, %v19665_v59  ;;  %16743 = vmatprep.subr.mxu0 %v18221_v0 }
0x6e79   :  { %16745 = vmatprep.mubr.msk.f32.mxu0 %vm18222_vm0, %v18221_v0 }
0x6f4b   :  { %v13020_v41 = vpop.f32.mrb[168].mxu0 }
0x6f4c   :  { %v16742_v23 = vpop.f32.mrb[169].mxu0  ;;  %v13024_v42 = vsel %vm892_vm6, %v13020_v41, 0.0 }
0x6f4d   :  { %13025 = vadd.xlane.f32.xlu0 %v13024_v42  ;;  %v13106_v42 = vrot.slane %v13097_v45, %v18960_v29 }
0x6f63   :  { %13035 = vperm.xlu0 %17682, %v14491_v48  }
0x6fda   :  { %v13026_v38 = vpop.xlane.xlu0 %13025 }
0x6fdb   :  { %v13027_v7 = vmul.f32 0.0078125, %v13026_v38 }
0x6fdd   :  { %v13028_v51 = vadd.f32 1e-05, %v13027_v7  ;;  %v17798_v7 = vld [vmem:[%s20120_s11] sm:$0xf] }
0x6fdf   :  { %17760 = vrsqrt.f32 %v13028_v51 }
0x6fe2   :  { %v13036_v62 = vpop.permute.xlu0 %13035 }
0x6fe9   :  { %v17761_v33 = vpop.eup %17760 }
0x6fea   :  { %v13030_v57 = vmul.f32 %v17761_v33, %v12949_v40  ;;  %v13102_v40 = vrot.slane %v13097_v45, %v18934_v2 }
0x6fec   :  { %v13038_v59 = vmul.f32 %v13036_v62, %v13030_v57 }
0x6fee   :  { %v13046_v39 = vadd.f32 %v13044_v20, %v13038_v59  ;;  %v14506_v59 = vld [vmem:[%s20121_s17 + $0xc0] sm:$0xff]  ;;  %v14507_v20 = vld [vmem:[%s20121_s17 + $0xc8] sm:$0xff] }
0x6ff0   :  { %v19966_v46 = vadd.f32 %v13046_v39, %v19626_v63  ;;  %v13085_v63 = vld [vmem:[#allocation11 + $0x1a8] sm:$0xff]  ;;  %v14508_v39 = vld [vmem:[%s20121_s17 + $0xd0] sm:$0xff] }
0x6ff1   :  { %v17541_v10 = vpack.c.bf16 %v13087_v6, %v13085_v63 }
0x6ff2   :  { %v13052_v1 = vsel %vm892_vm6, %v19966_v46, 0.0 }
0x6ff3   :  { %13053 = vadd.xlane.f32.xlu1 %v13052_v1  ;;  %17542 = vmatprep.subr.bf16.mxu1 %v17541_v10  ;;  %v17578_v1 = vpack.c.bf16 %v14507_v20, %v14506_v59 }
0x6ff4   :  { %17544 = vmatpush1.bf16.msra.mxu1 %v17543_v37  ;;  %v14511_v37 = vld [vmem:[%s20121_s17 + $0xe8] sm:$0xff] }
0x6ff5   :  { %17546 = vmatprep.subr.bf16.mxu1 %v17545_v13  ;;  %v17584_v50 = vpack.c.bf16 %v14511_v37, %v14510_v16  ;;  %v14513_v13 = vld [vmem:[%s20121_s17 + $0xf8] sm:$0xff]  ;;  %v13976_v16 = vld [vmem:[%s18370_s3 + $0x20] sm:$0xff]  ;;  %v13977_v37 = vld [vmem:[%s18370_s3 + $0x28] sm:$0xff] }
0x6ff6   :  { %v17587_v17 = vpack.c.bf16 %v14513_v13, %v14512_v43  ;;  %v14526_v43 = vld [vmem:[#allocation19 + $0x3] ss:$0 sm:$0xff] }
0x6ff8   :  { %17548 = vmatpush1.bf16.msra.mxu1 %v17547_v24 }
0x6ff9   :  { %17550 = vmatprep.subr.bf16.mxu1 %v17549_v34 }
0x6ffc   :  { %17552 = vmatpush1.bf16.msra.mxu1 %v17551_v44 }
0x6ffd   :  { %17565 = vmatprep.subr.bf16.mxu1 %v18223_v18 }
0x7080   :  { %v13054_v5 = vpop.xlane.xlu1 %13053 }
0x7081   :  { %v13055_v32 = vmul.f32 0.015625, %v13054_v5  ;;  %v14509_v5 = vld [vmem:[%s20121_s17 + $0xd8] sm:$0xff] }
0x7083   :  { %v13056_v3 = vsub.f32 %v19966_v46, %v13055_v32  ;;  %v17581_v32 = vpack.c.bf16 %v14509_v5, %v14508_v39  ;;  %v13882_v39 = vld [vmem:[#allocation20 + $0xc0] sm:$0xff] }
0x7085   :  { %v13057_v49 = vmul.f32 %v13056_v3, %v13056_v3 }
0x7087   :  { %v13058_v55 = vsel %vm892_vm6, %v13057_v49, 0.0 }
0x7088   :  { %13059 = vadd.xlane.f32.xlu0 %v13058_v55 }
0x7115   :  { %v13060_v19 = vpop.xlane.xlu0 %13059 }
0x7116   :  { %v13061_v52 = vmul.f32 0.015625, %v13060_v19  ;;  %v14515_v19 = vld [vmem:[#allocation14 + $0x3] ss:$0 sm:$0xff] }
0x7118   :  { %v13062_v58 = vadd.f32 1e-05, %v13061_v52 }
0x711a   :  { %17762 = vrsqrt.f32 %v13062_v58 }
0x7124   :  { %v17763_v47 = vpop.eup %17762 }
0x7125   :  { %v13064_v26 = vmul.f32 %v17763_v47, %v13056_v3 }
0x7127   :  { %v13071_v36 = vmul.f32 %v14493_v25, %v13064_v26 }
0x7129   :  { %v13078_v35 = vadd.f32 %v14494_v15, %v13071_v36 }
0x712b   :  { %14495 = vmatmul.mubr.msk.f32.vlgmr.msra.gmra.mrb[144].mxu1 %vm661_vm5, %v13078_v35 }
0x712c   :  { %17567 = vmatpush3.bf16.msra.mxu1 %v18936_v4  ;;  %16788 = vmatprep.mubr.msk.f32.mxu1 %vm18222_vm0, %v18221_v0 }
0x712d   :  { %17568 = vmatprep.subr.bf16.mxu1 %v18223_v18 }
0x7130   :  { %17570 = vmatpush3.bf16.msra.mxu1 %v18943_v8 }
0x7131   :  { %17571 = vmatprep.subr.bf16.mxu1 %v18223_v18 }
0x7134   :  { %17573 = vmatpush3.bf16.msra.mxu1 %v18949_v22 }
0x7135   :  { %17574 = vmatprep.subr.bf16.mxu1 %v18223_v18 }
0x7138   :  { %17576 = vmatpush3.bf16.msra.mxu1 %v18956_v28 }
0x7139   :  { %17577 = vmatprep.subr.bf16.mxu1 %v18223_v18 }
0x71fe   :  { %v13178_v53 = vpop.f32.mrb[144].mxu1 }
0x71ff   :  { %v13179_v41 = vadd.f32 %v13178_v53, %v13102_v40  ;;  %v13180_v23 = vpop.f32.mrb[145].mxu1  ;;  %v14519_v40 = vld [vmem:[%s20122_s15 + $0xc8] sm:$0xff] }
0x7200   :  { %v19987_v38 = vadd.f32 %v13180_v23, %v13106_v42  ;;  %v14521_v23 = vld [vmem:[%s20122_s15 + $0xd8] sm:$0xff] }
0x7201   :  { %13185 = vrot.lane.b32.xlu0 %v13179_v41, %s18225_s21  ;;  %v13183_v2 = vmul.f32 0.25, %v13179_v41  ;;  %v14520_v41 = vld [vmem:[%s20122_s15 + $0xd0] sm:$0xff] }
0x7202   :  { %v17593_v42 = vpack.c.bf16 %v14521_v23, %v14520_v41 }
0x7273   :  { %v13186_v48 = vpop.permute.xlu0 %13185 }
0x7274   :  { %16744 = vmatpush3.msk.msra.mxu0 %vm439_vm3, %v13186_v48  ;;  %v13333_v29 = vmul.f32 %v13186_v48, %v13183_v2  ;;  %v14522_v48 = vld [vmem:[%s20122_s15 + $0xe0] sm:$0xff] }
0x7275   :  { %16746 = vmatmul.mubr.msk.f32.vlgmr.msra.gmra.mrb[170].mxu0 %vm435_vm4, %v17798_v7  ;;  %16748 = vmatprep.subr.mxu0 %v18221_v0 }
0x7276   :  { %16749 = vmatpush3.msk.msra.mxu0 %vm439_vm3, %v19987_v38  ;;  %16750 = vmatprep.mubr.msk.f32.mxu0 %vm18222_vm0, %v18221_v0 }
0x7277   :  { %17553 = vmatprep.subr.bf16.mxu0 %v18223_v18 }
0x7279   :  { %16751 = vmatmul.mubr.msk.f32.vlgmr.msra.gmra.mrb[172].mxu0 %vm435_vm4, %v17798_v7 }
0x727a   :  { %17555 = vmatpush3.bf16.msra.mxu0 %v18936_v4  ;;  %16769 = vmatprep.mubr.msk.f32.mxu0 %vm18222_vm0, %v18221_v0  ;;  %v17799_v4 = vld [vmem:[%s18365_s24] sm:$0xf]  ;;  %s18226_s24 = smov [#allocation26]  }
0x727b   :  { %17556 = vmatprep.subr.bf16.mxu0 %v18223_v18  ;;  %s14068_s6 = sshll.u32 %s18226_s24, 4  ;;  %s14069_s6 = int_to_ptr.vmem [resolvable:$true] %s14068_s6 }
0x727c   :  { %p18135_p9 = scmp.lt.s32.totalorder %s14069_s6, %s14069_s6 }
0x727e   :  { %17558 = vmatpush3.bf16.msra.mxu0 %v18943_v8 }
0x727f   :  { %17559 = vmatprep.subr.bf16.mxu0 %v18223_v18 }
0x7282   :  { %17561 = vmatpush3.bf16.msra.mxu0 %v18949_v22 }
0x7283   :  { %17562 = vmatprep.subr.bf16.mxu0 %v18223_v18 }
0x7286   :  { %17564 = vmatpush3.bf16.msra.mxu0 %v18956_v28 }
0x7287   :  { %16791 = vmatprep.subr.mxu0 %v18221_v0 }
0x7289   :  { %16770 = vmatmul.mubr.msk.f32.vlgmr.msra.gmra.mrb[174].mxu0 %vm661_vm5, %v13333_v29  ;;  %v14525_v29 = vld [vmem:[%s20122_s15 + $0xf8] sm:$0xff] }
0x728a   :  { %16792 = vmatpush3.msk.msra.mxu0 %vm439_vm3, %v17799_v4  ;;  %16793 = vmatprep.mubr.msk.f32.mxu0 %vm18222_vm0, %v18221_v0 }
0x728b   :  { %16796 = vmatprep.subr.mxu0 %v18221_v0 }
0x7348   :  { %v13255_v8 = vpop.f32.mrb[170].mxu0 }
0x7349   :  { %v13407_v22 = vmul.f32 %v13255_v8, %v13183_v2  ;;  %v16747_v28 = vpop.f32.mrb[171].mxu0  ;;  %v14524_v2 = vld [vmem:[%s20122_s15 + $0xf0] sm:$0xff] }
0x734b   :  { %16789 = vmatmul.mubr.msk.f32.vlgmr.msra.gmra.mrb[146].mxu1 %vm661_vm5, %v13407_v22 }
0x734c   :  { %v13328_v51 = vpop.f32.mrb[172].mxu0  ;;  %16817 = vmatprep.mubr.msk.f32.mxu1 %vm18222_vm0, %v18221_v0  ;;  %17579 = vmatpush3.bf16.msra.mxu1 %v17578_v1  ;;  %v13883_v1 = vld [vmem:[#allocation20 + $0xc8] sm:$0xff] }
0x734d   :  { %v16752_v33 = vpop.f32.mrb[173].mxu0  ;;  %17580 = vmatprep.subr.bf16.mxu1 %v18223_v18  ;;  %v17602_v5 = vpack.c.bf16 %v13883_v1, %v13882_v39 }
0x734e   :  { %v14516_v33 = vld [vmem:[#allocation16 + $0x3] ss:$0 sm:$0xff] }
0x7350   :  { %17582 = vmatpush3.bf16.msra.mxu1 %v17581_v32  ;;  %v13884_v32 = vld [vmem:[#allocation20 + $0xd0] sm:$0xff] }
0x7351   :  { %17583 = vmatprep.subr.bf16.mxu1 %v18223_v18 }
0x7354   :  { %17585 = vmatpush3.bf16.msra.mxu1 %v17584_v50  ;;  %v17620_v50 = vpack.c.bf16 %v13977_v37, %v13976_v16 }
0x7355   :  { %17586 = vmatprep.subr.bf16.mxu1 %v18223_v18 }
0x7358   :  { %17588 = vmatpush3.bf16.msra.mxu1 %v17587_v17 }
0x7359   :  { %17601 = vmatprep.subr.bf16.mxu1 %v18223_v18 }
0x735c   :  { %v13403_v57 = vpop.f32.mrb[174].mxu0 }
0x735d   :  { %v16771_v62 = vpop.f32.mrb[175].mxu0 }
0x735e   :  { %v14517_v62 = vld [vmem:[#allocation17 + $0x3] ss:$0 sm:$0xff] }
0x741e   :  { %v13477_v3 = vpop.f32.mrb[146].mxu1 }
0x741f   :  { %v13481_v49 = vmax.f32 %v13403_v57, %v13477_v3  ;;  %v16790_v55 = vpop.f32.mrb[147].mxu1 }
0x7420   :  { %v13886_v55 = vld [vmem:[#allocation20 + $0xe0] sm:$0xff] }
0x7421   :  { %v13482_v11 = vsub.f32 %v13403_v57, %v13481_v49  ;;  %v13485_v54 = vsub.f32 %v13477_v3, %v13481_v49  ;;  %v13885_v3 = vld [vmem:[#allocation20 + $0xd8] sm:$0xff] }
0x7422   :  { %v17605_v49 = vpack.c.bf16 %v13885_v3, %v13884_v32 }
0x7423   :  { %v13483_v61 = vmul.f32 1.442695, %v13482_v11  ;;  %v13486_v60 = vmul.f32 1.442695, %v13485_v54  ;;  %v13887_v11 = vld [vmem:[#allocation20 + $0xe8] sm:$0xff]  ;;  %v13888_v54 = vld [vmem:[#allocation20 + $0xf0] sm:$0xff] }
0x7425   :  { %17764 = vpow2.f32 %v13483_v61  ;;  %v13889_v61 = vld [vmem:[#allocation20 + $0xf8] sm:$0xff] }
0x7426   :  { %17766 = vpow2.f32 %v13486_v60  ;;  %v17611_v60 = vpack.c.bf16 %v13889_v61, %v13888_v54 }
0x742f   :  { %v17765_v56 = vpop.eup %17764 }
0x7430   :  { %v17767_v12 = vpop.eup %17766 }
0x7431   :  { %v13488_v63 = vadd.f32 %v17767_v12, %v17765_v56 }
0x7433   :  { %17768 = vrcp.f32 %v13488_v63  ;;  %v13974_v63 = vld [vmem:[%s18370_s3 + $0x10] sm:$0xff] }
0x743d   :  { %v17769_v6 = vpop.eup %17768 }
0x743e   :  { %v13490_v10 = vmul.f32 %v17769_v6, %v17765_v56  ;;  %v13564_v14 = vmul.f32 %v17769_v6, %v17767_v12  ;;  %v13972_v56 = vld [vmem:[%s18370_s3] sm:$0xff]  ;;  %v13973_v12 = vld [vmem:[%s18370_s3 + $0x8] sm:$0xff] }
0x743f   :  { %v17614_v6 = vpack.c.bf16 %v13973_v12, %v13972_v56 }
0x7440   :  { %16794 = vmatmul.mubr.msk.f32.vlgmr.msra.gmra.mrb[176].mxu0 %vm435_vm4, %v13490_v10  ;;  %v13975_v10 = vld [vmem:[%s18370_s3 + $0x18] sm:$0xff] }
0x7441   :  { %16797 = vmatpush3.msk.msra.mxu0 %vm439_vm3, %v17799_v4  ;;  %16798 = vmatprep.mubr.msk.f32.mxu0 %vm18222_vm0, %v18221_v0  ;;  %v17599_v4 = vpack.c.bf16 %v14525_v29, %v14524_v2  ;;  %v13979_v2 = vld [vmem:[%s18370_s3 + $0x38] sm:$0xff] }
0x7442   :  { %17589 = vmatprep.subr.bf16.mxu0 %v18223_v18 }
0x7444   :  { %16799 = vmatmul.mubr.msk.f32.vlgmr.msra.gmra.mrb[178].mxu0 %vm435_vm4, %v13564_v14  ;;  %v17617_v14 = vpack.c.bf16 %v13975_v10, %v13974_v63 }
0x7445   :  { %16836 = vmatprep.mubr.msk.f32.mxu0 %vm18222_vm0, %v18221_v0 }
0x7513   :  { %v13560_v21 = vpop.f32.mrb[176].mxu0 }
0x7514   :  { %v16795_v24 = vpop.f32.mrb[177].mxu0  ;;  %v13638_v30 = vmul.f32 %v13560_v21, %v19987_v38  ;;  %v14523_v38 = vld [vmem:[%s20122_s15 + $0xe8] sm:$0xff] }
0x7515   :  { %v17596_v7 = vpack.c.bf16 %v14523_v38, %v14522_v48 }
0x7517   :  { %v13634_v27 = vpop.f32.mrb[178].mxu0 }
0x7518   :  { %v13639_v31 = vmul.f32 %v13634_v27, %v13328_v51  ;;  %v16800_v34 = vpop.f32.mrb[179].mxu0 }
0x751a   :  { %v13640_v9 = vadd.f32 %v13639_v31, %v13638_v30 }
0x751c   :  { %16818 = vmatmul.mubr.msk.f32.vlgmr.msra.gmra.mrb[148].mxu1 %vm661_vm5, %v13640_v9 }
0x751d   :  { %16855 = vmatprep.mubr.msk.f32.mxu1 %vm18222_vm0, %v18221_v0  ;;  %17603 = vmatpush3.bf16.msra.mxu1 %v17602_v5 }
0x751e   :  { %17604 = vmatprep.subr.bf16.mxu1 %v18223_v18 }
0x7521   :  { %17606 = vmatpush3.bf16.msra.mxu1 %v17605_v49 }
0x7522   :  { %17607 = vmatprep.subr.bf16.mxu1 %v18223_v18 }
0x75ef   :  { %v13719_v44 = vpop.f32.mrb[148].mxu1 }
0x75f0   :  { %v13723_v52 = vadd.f32 %v13719_v44, %v19966_v46  ;;  %v16819_v58 = vpop.f32.mrb[149].mxu1  ;;  %v14518_v46 = vld [vmem:[%s20122_s15 + $0xc0] sm:$0xff] }
0x75f1   :  { %v17590_v53 = vpack.c.bf16 %v14519_v40, %v14518_v46 }
0x75f2   :  { %v20043_v47 = vadd.f32 %v14515_v19, %v13723_v52 }
0x75f3   :  { %17591 = vmatpush3.bf16.msra.mxu0 %v17590_v53 }
0x75f4   :  { %v13737_v25 = vsel %vm892_vm6, %v20043_v47, 0.0  ;;  %17592 = vmatprep.subr.bf16.mxu0 %v18223_v18 }
0x75f5   :  { %13738 = vadd.xlane.f32.xlu1 %v13737_v25 }
0x75f7   :  { %17594 = vmatpush3.bf16.msra.mxu0 %v17593_v42 }
0x75f8   :  { %17595 = vmatprep.subr.bf16.mxu0 %v18223_v18 }
0x75fb   :  { %17597 = vmatpush3.bf16.msra.mxu0 %v17596_v7  ;;  %v13978_v7 = vld [vmem:[%s18370_s3 + $0x30] sm:$0xff]  ;;  %s18130_s3 = scalar_lea.vmem %s14069_s6, 64 }
0x75fc   :  { %17598 = vmatprep.subr.bf16.mxu0 %v18223_v18  ;;  %v17623_v29 = vpack.c.bf16 %v13979_v2, %v13978_v7  ;;  %p18131_p8 = scmp.ne.s32.totalorder %s14069_s6, %s18130_s3  ;;  %p18136_p10 = scmp.lt.s32.totalorder %s18130_s3, %s18130_s3 }
0x75fe   :  { %p18137_p11 = por %p18136_p10, %p18135_p9 }
0x75ff   :  { %17600 = vmatpush3.bf16.msra.mxu0 %v17599_v4  ;;  %v14528_v4 = vld [vmem:[#allocation22 + $0x3] ss:$0 sm:$0xff] }
0x7600   :  { %17613 = vmatprep.subr.bf16.mxu0 %v18223_v18  ;;  %p18138_p12 = pnand %p18137_p11, %p18131_p8 }
0x7682   :  { %v13739_v26 = vpop.xlane.xlu1 %13738 }
0x7683   :  { %v13740_v15 = vmul.f32 0.015625, %v13739_v26 }
0x7685   :  { %v13741_v36 = vsub.f32 %v20043_v47, %v13740_v15 }
0x7687   :  { %v13742_v35 = vmul.f32 %v13741_v36, %v13741_v36 }
0x7689   :  { %v13743_v45 = vsel %vm892_vm6, %v13742_v35, 0.0 }
0x768a   :  { %13744 = vadd.xlane.f32.xlu1 %v13743_v45 }
0x7717   :  { %v13745_v8 = vpop.xlane.xlu1 %13744 }
0x7718   :  { %v13746_v22 = vmul.f32 0.015625, %v13745_v8 }
0x771a   :  { %v13747_v28 = vadd.f32 1e-05, %v13746_v22 }
0x771c   :  { %17770 = vrsqrt.f32 %v13747_v28 }
0x7726   :  { %v17771_v51 = vpop.eup %17770 }
0x7727   :  { %v13749_v57 = vmul.f32 %v17771_v51, %v13741_v36 }
0x7729   :  { %v13756_v59 = vmul.f32 %v14516_v33, %v13749_v57  ;;  %v14530_v33 = vld [vmem:[%s18375_s27] ss:$0 sm:$0xff] }
0x772b   :  { %v13763_v20 = vadd.f32 %v14517_v62, %v13756_v59 }
0x772d   :  { %16837 = vmatmul.mubr.msk.f32.vlgmr.msra.gmra.mrb[180].mxu0 %vm661_vm5, %v13763_v20 }
0x772e   :  { %16874 = vmatprep.mubr.msk.f32.mxu0 %vm18222_vm0, %v18221_v0  ;;  %v17608_v0 = vpack.c.bf16 %v13887_v11, %v13886_v55  ;;  %17615 = vmatpush3.bf16.msra.mxu0 %v17614_v6 }
0x772f   :  { %17616 = vmatprep.subr.bf16.mxu0 %v18223_v18 }
0x7730   :  { %17609 = vmatpush3.bf16.msra.mxu1 %v17608_v0 }
0x7731   :  { %17610 = vmatprep.subr.bf16.mxu1 %v18223_v18 }
0x7732   :  { %17618 = vmatpush3.bf16.msra.mxu0 %v17617_v14 }
0x7733   :  { %17619 = vmatprep.subr.bf16.mxu0 %v18223_v18 }
0x7734   :  { %17612 = vmatpush3.bf16.msra.mxu1 %v17611_v60 }
0x7736   :  { %17621 = vmatpush3.bf16.msra.mxu0 %v17620_v50 }
0x7737   :  { %17622 = vmatprep.subr.bf16.mxu0 %v18223_v18 }
0x773a   :  { %17624 = vmatpush3.bf16.msra.mxu0 %v17623_v29 }
0x7800   :  { %v13850_v13 = vpop.f32.mrb[180].mxu0 }
0x7801   :  { %v13851_v17 = vadd.f32 %v14526_v43, %v13850_v13  ;;  %v16838_v21 = vpop.f32.mrb[181].mxu0 }
0x7803   :  { %v13855_v24 = vmul.f32 0.70710677, %v13851_v17  ;;  %v13854_v42 = vmul.f32 0.5, %v13851_v17 }
0x7805   :  { %v13856_v27 = vand.u32 2147483647, %v13855_v24  ;;  %vm13876_vm10 = vcmp.ge.f32.partialorder %v13855_v24, 0.0 }
0x7807   :  { %v13857_v30 = vmul.f32 0.3275911, %v13856_v27  ;;  %v13870_v34 = vsub.f32 0.0, %v13856_v27 }
0x7809   :  { %v13858_v31 = vadd.f32 1.0, %v13857_v30  ;;  %v13871_v44 = vmul.f32 %v13870_v34, %v13856_v27 }
0x780b   :  { %17772 = vrcp.f32 %v13858_v31  ;;  %v13872_v58 = vmul.f32 1.442695, %v13871_v44 }
0x780d   :  { %17774 = vpow2.f32 %v13872_v58 }
0x7815   :  { %v17773_v9 = vpop.eup %17772 }
0x7816   :  { %v13861_v19 = vmul.f32 1.0614054, %v17773_v9 }
0x7817   :  { %v17775_v46 = vpop.eup %17774 }
0x7818   :  { %v13862_v52 = vadd.f32 -1.4531521, %v13861_v19 }
0x781a   :  { %v13863_v25 = vmul.f32 %v17773_v9, %v13862_v52 }
0x781c   :  { %v13864_v26 = vadd.f32 1.4214138, %v13863_v25 }
0x781e   :  { %v13865_v18 = vmul.f32 %v17773_v9, %v13864_v26 }
0x7820   :  { %v13866_v15 = vadd.f32 -0.28449672, %v13865_v18 }
0x7822   :  { %v13867_v36 = vmul.f32 %v17773_v9, %v13866_v15 }
0x7824   :  { %v13868_v35 = vadd.f32 0.2548296, %v13867_v36 }
0x7826   :  { %v13869_v45 = vmul.f32 %v17773_v9, %v13868_v35 }
0x7828   :  { %v13874_v40 = vmul.f32 %v17775_v46, %v13869_v45 }
0x782a   :  { %v13875_v53 = vsub.f32 1.0, %v13874_v40 }
0x782c   :  { %v13877_v41 = vsub.f32 0.0, %v13875_v53 }
0x782e   :  { %v13878_v23 = vsel %vm13876_vm10, %v13875_v53, %v13877_v41 }
0x782f   :  { %v13879_v48 = vadd.f32 1.0, %v13878_v23 }
0x7831   :  { %v13880_v38 = vmul.f32 %v13879_v48, %v13854_v42 }
0x7833   :  { %16856 = vmatmul.mubr.msk.f32.vlgmr.msra.gmra.mrb[150].mxu1 %vm661_vm5, %v13880_v38 }
0x7906   :  { %v13967_v8 = vpop.f32.mrb[150].mxu1 }
0x7907   :  { %v13968_v22 = vadd.f32 %v14528_v4, %v13967_v8  ;;  %v16857_v28 = vpop.f32.mrb[151].mxu1 }
0x7909   :  { %v13971_v51 = vadd.f32 %v13968_v22, %v20043_v47 }
0x790b   :  { %16875 = vmatmul.mubr.msk.f32.vlgmr.msra.gmra.mrb[182].mxu0 %vm661_vm5, %v13971_v51 }
0x79de   :  { %v14056_v57 = vpop.f32.mrb[182].mxu0 }
0x79df   :  { %v14057_v62 = vadd.f32 %v14530_v33, %v14056_v57  ;;  %v16876_v59 = vpop.f32.mrb[183].mxu0 }
0x79e1   :  { %14061 = vst.msk [vmem:[#allocation26] sm:$0xf] %vm14060_vm11, %v14057_v62 }
0x79e2   :  { %18141 = shalt.err (!%p18138_p12)
}
0x79e3   :  { %s18142_s25 = scalar_lea.hbm %s18380_s20, 64 }
0x79e4   :  { %p18143_p13 = scmp.ne.s32.totalorder %s18380_s20, %s18142_s25  ;;  %p18146_p0 = scmp.lt.u32.totalorder %s18142_s25, %s18380_s20 }
0x79e6   :  { %p18148_p1 = pnand %p18146_p0, %p18143_p13 }
0x79e8   :  { %18151 = shalt.err (!%p18148_p1)
}
0x79e9   :  { %14071 = dma.vmem_to_hbm [thread:$0]  %s14069_s6, 64, %s18380_s20, [#allocation4]  }
0x79ea   :  { %18168 = dma.done.wait [#allocation4], 64  }
0x79eb   :  { %18169 = vsyncadd [#allocation4], 4294967232 }
0x79ec   :  { %14075 = vsyncpa [#allocation3], 1 }
0x79ed   :  { %14076 = vsyncpa [#allocation6], 1 }
0x79ee   :  { %14077 = vsyncpa [#allocation9], 1 }
0x79ef   :  { %14078 = vsyncpa [#allocation12], 1 }
0x79f0   :  { %14079 = vsyncpa [#allocation15], 1 }
0x79f1   :  { %14080 = vsyncpa [#allocation18], 1 }
0x79f2   :  { %14081 = vsyncpa [#allocation21], 1 }
0x79f3   :  { %14082 = vsyncpa [#allocation24], 1 }
0x79f4   :  { %14083 = vsyncpa [#allocation4], 1 }

</bundles_post_ra>
